<compile_context>
chip_gen: v7x
topology: tpu7x:2x2x1
jax: 0.10.0
libtpu: 0.0.40
codegen_flags: <defaults>
</compile_context>

<pallas_src>
import jax
import jax.numpy as jnp
from jax.experimental import pallas as pl
from jax.experimental.pallas import tpu as pltpu


# ----------------------------------------------------------------------------
# Kernel A: conv-as-GEMM (im2col patches @ weights) + bias + ReLU.
# ----------------------------------------------------------------------------
def _gemm_bias_relu_kernel(x_ref, w_ref, b_ref, o_ref):
    acc = jnp.dot(x_ref[...], w_ref[...], preferred_element_type=jnp.float32)
    acc = jnp.maximum(acc + b_ref[...], 0.0)
    o_ref[...] = acc.astype(o_ref.dtype)


def conv_gemm(x, w, b, *, out_dtype=jnp.bfloat16):
    """y = relu(x @ w + b); one grid step, full M/K/N blocks in VMEM."""
    M, K = x.shape
    K2, N = w.shape
    assert K == K2, (K, K2)
    flops = 2 * M * K * N
    bytes_accessed = (M * K * x.dtype.itemsize + K * N * w.dtype.itemsize
                      + N * 4 + M * N * jnp.dtype(out_dtype).itemsize)
    return pl.pallas_call(
        _gemm_bias_relu_kernel,
        out_shape=jax.ShapeDtypeStruct((M, N), out_dtype),
        grid=(1,),
        in_specs=[
            pl.BlockSpec((M, K), lambda i: (0, 0)),   # activations (full block)
            pl.BlockSpec((K, N), lambda i: (0, 0)),   # weight (full block)
            pl.BlockSpec((1, N), lambda i: (0, 0)),   # bias
        ],
        out_specs=pl.BlockSpec((M, N), lambda i: (0, 0)),
        compiler_params=pltpu.CompilerParams(
            dimension_semantics=("arbitrary",)),
        cost_estimate=pl.CostEstimate(
            flops=int(flops), transcendentals=0,
            bytes_accessed=int(bytes_accessed)),
    )(x, w, b)


# ----------------------------------------------------------------------------
# Kernel B: fused fc + mind.
#   zz   = feat @ fc_w + fc_b                     (n_all, 128)  [eyes | news]
#   zs   = sel @ zz     (selects the B*K candidate rows)
#   zb   = sb  @ zz     (replicates each x row K times)
#   h    = relu(zs @ W1b_pad + zb @ W1a_pad + b1)   -- pads zero the wrong half
#   out  = h @ W2_pad + b2                        (n_pairs, 128), col 0 real
# The selection / broadcast (torch.cat + expand_as) is done with 0/1 matmuls:
# pure MXU work, no in-kernel slicing, reshape or gather.
# ----------------------------------------------------------------------------
def _fc_mind_kernel(feat_ref, fcw_ref, fcb_ref, sel_ref, sb_ref,
                    w1b_ref, w1a_ref, b1_ref, w2_ref, b2_ref, o_ref):
    zz = jnp.dot(feat_ref[...], fcw_ref[...],
                 preferred_element_type=jnp.float32) + fcb_ref[...]
    zz = zz.astype(jnp.bfloat16)
    zs = jnp.dot(sel_ref[...], zz, preferred_element_type=jnp.float32)
    zb = jnp.dot(sb_ref[...], zz, preferred_element_type=jnp.float32)
    h = jnp.dot(zs.astype(jnp.bfloat16), w1b_ref[...],
                preferred_element_type=jnp.float32)
    h = h + jnp.dot(zb.astype(jnp.bfloat16), w1a_ref[...],
                    preferred_element_type=jnp.float32)
    h = jnp.maximum(h + b1_ref[...], 0.0).astype(jnp.bfloat16)
    out = jnp.dot(h, w2_ref[...], preferred_element_type=jnp.float32)
    o_ref[...] = (out + b2_ref[...]).astype(o_ref.dtype)


def fc_mind_fused(feat, fc_w, fc_b, sel, sb, w1b, w1a, b1, w2, b2):
    M, Kd = feat.shape                 # (n_all, 3136)
    P = sel.shape[0]                   # n_pairs = B*K
    N = fc_w.shape[1]                  # 128  (2*vocab)
    H = w1b.shape[1]                   # 128
    O = w2.shape[1]                    # 128  (col 0 real)
    flops = (2 * M * Kd * N            # fc
             + 2 * 2 * P * M * N       # sel / sb
             + 2 * 2 * P * N * H       # mind layer 1 (two halves)
             + 2 * P * H * O)          # mind layer 2
    bytes_accessed = (M * Kd * feat.dtype.itemsize
                      + Kd * N * fc_w.dtype.itemsize
                      + 2 * P * M * sel.dtype.itemsize
                      + (N * H * 2 + H * O) * 2
                      + (N + H + O) * 4 + P * O * 4)
    return pl.pallas_call(
        _fc_mind_kernel,
        out_shape=jax.ShapeDtypeStruct((P, O), jnp.float32),
        grid=(1,),
        in_specs=[
            pl.BlockSpec((M, Kd), lambda i: (0, 0)),   # feat
            pl.BlockSpec((Kd, N), lambda i: (0, 0)),   # fc_w
            pl.BlockSpec((1, N), lambda i: (0, 0)),    # fc_b
            pl.BlockSpec((P, M), lambda i: (0, 0)),    # sel
            pl.BlockSpec((P, M), lambda i: (0, 0)),    # sb
            pl.BlockSpec((N, H), lambda i: (0, 0)),    # mind W1b (zero-padded)
            pl.BlockSpec((N, H), lambda i: (0, 0)),    # mind W1a (zero-padded)
            pl.BlockSpec((1, H), lambda i: (0, 0)),    # mind b1
            pl.BlockSpec((H, O), lambda i: (0, 0)),    # mind W2 (lane-padded)
            pl.BlockSpec((1, O), lambda i: (0, 0)),    # mind b2
        ],
        out_specs=pl.BlockSpec((P, O), lambda i: (0, 0)),
        compiler_params=pltpu.CompilerParams(
            dimension_semantics=("arbitrary",)),
        cost_estimate=pl.CostEstimate(
            flops=int(flops), transcendentals=0,
            bytes_accessed=int(bytes_accessed)),
    )(feat, fc_w, fc_b, sel, sb, w1b, w1a, b1, w2, b2)


# ----------------------------------------------------------------------------
# Glue: im2col patch extraction (pure layout plumbing, fused by XLA under jit).
# ----------------------------------------------------------------------------
def im2col(x, ksize=3, stride=2, pad=1):
    # x: (N, H, W, C) NHWC
    N, H, W, C = x.shape
    xp = jnp.pad(x, ((0, 0), (pad, pad), (pad, pad), (0, 0)))
    Ho = (H + 2 * pad - ksize) // stride + 1
    Wo = (W + 2 * pad - ksize) // stride + 1
    patches = []
    for kh in range(ksize):
        for kw in range(ksize):
            patches.append(
                xp[:, kh:kh + stride * Ho:stride, kw:kw + stride * Wo:stride, :])
    patches = jnp.stack(patches, axis=3)               # (N, Ho, Wo, k*k, C)
    return patches.reshape(N * Ho * Wo, ksize * ksize * C), Ho, Wo


# ----------------------------------------------------------------------------
# Forward: eyes/news share kernels via column-concatenated weights.
# ----------------------------------------------------------------------------
@jax.jit
def receiver_forward(x, y, params):
    # x: (B, 1, 28, 28) NCHW;  y: (B, K, 1, 28, 28) NCHW candidates (K == 10)
    B, K = y.shape[0], y.shape[1]
    n_y = B * K

    imgs = jnp.concatenate([y.reshape(-1, 1, 28, 28), x], axis=0)
    imgs = imgs.transpose(0, 2, 3, 1).astype(jnp.bfloat16)    # NHWC, bf16
    n_all = imgs.shape[0]

    # conv1 (1 -> 8 per path, 3x3/s2/p1 + ReLU): 28x28 -> 14x14
    p1, Ho, Wo = im2col(imgs)                                 # (n_all*196, 9)
    h1 = conv_gemm(p1, params['conv1_w'], params['conv1_b'])  # (n_all*196, 16)
    h1 = h1.reshape(n_all, Ho, Wo, 16)
    h1 = jnp.concatenate([h1[:n_y, ..., :8], h1[n_y:, ..., 8:]], axis=0)

    # conv2 (8 -> 64 per path, 3x3/s2/p1 + ReLU): 14x14 -> 7x7 (128-lane out)
    p2, Ho2, Wo2 = im2col(h1)                                 # (n_all*49, 72)
    h2 = conv_gemm(p2, params['conv2_w'], params['conv2_b'])  # (n_all*49, 128)
    h2 = h2.reshape(n_all, Ho2 * Wo2, 128)
    feat = jnp.concatenate([h2[:n_y, :, :64], h2[n_y:, :, 64:]], axis=0)
    feat = feat.reshape(n_all, Ho2 * Wo2 * 64)                # (n_all, 3136)

    # Row selection / broadcast matrices for the fused fc+mind kernel
    # (constant-folded under jit).
    sel = jnp.concatenate([jnp.eye(n_y, dtype=jnp.bfloat16),
                           jnp.zeros((n_y, B), jnp.bfloat16)], axis=1)
    src = jnp.arange(n_y) // K + n_y          # pair i -> x row of example i//K
    sb = (src[:, None] == jnp.arange(n_all)[None, :]).astype(jnp.bfloat16)

    out = fc_mind_fused(feat, params['fc_w'], params['fc_b'], sel, sb,
                        params['mind_w1b_pad'], params['mind_w1a_pad'],
                        params['mind_b1'], params['mind_w2'],
                        params['mind_b2'])                    # (B*K, 128)
    return out[:, 0].reshape(-1, 10)                          # (B, 10)


# ----------------------------------------------------------------------------
# Deterministic synthetic parameters (PyTorch-style U(-1/sqrt(fan_in), ..)),
# packed into the kernel-ready (concatenated / padded, bf16) layout.
# ----------------------------------------------------------------------------
def _affine(key, fan_in, fan_out):
    k1, k2 = jax.random.split(key)
    bound = float(fan_in) ** -0.5
    w = jax.random.uniform(k1, (fan_in, fan_out), jnp.float32, -bound, bound)
    b = jax.random.uniform(k2, (fan_out,), jnp.float32, -bound, bound)
    return w, b


def init_receiver_params(key, vocab=64):
    ks = jax.random.split(key, 8)
    e_c1w, e_c1b = _affine(ks[0], 9 * 1, 8)         # eyes Conv2d(1, 8, 3)
    e_c2w, e_c2b = _affine(ks[1], 9 * 8, 64)        # eyes Conv2d(8, 64, 3)
    e_fcw, e_fcb = _affine(ks[2], 64 * 49, vocab)   # eyes Linear(3136, vocab)
    n_c1w, n_c1b = _affine(ks[3], 9 * 1, 8)         # news Conv2d(1, 8, 3)
    n_c2w, n_c2b = _affine(ks[4], 9 * 8, 64)        # news Conv2d(8, 64, 3)
    n_fcw, n_fcb = _affine(ks[5], 64 * 49, vocab)   # news Linear(3136, vocab)
    m_w1, m_b1 = _affine(ks[6], 2 * vocab, 128)     # mind Linear(128, 128)
    m_w2, m_b2 = _affine(ks[7], 128, 1)             # mind Linear(128, 1)

    bf = jnp.bfloat16
    zeros = jnp.zeros((vocab, 128), jnp.float32)
    return dict(
        # eyes | news weights column-concatenated -> one GEMM serves both paths.
        conv1_w=jnp.concatenate([e_c1w, n_c1w], axis=1).astype(bf),   # (9, 16)
        conv1_b=jnp.concatenate([e_c1b, n_c1b]).reshape(1, -1),       # (1, 16)
        conv2_w=jnp.concatenate([e_c2w, n_c2w], axis=1).astype(bf),   # (72, 128)
        conv2_b=jnp.concatenate([e_c2b, n_c2b]).reshape(1, -1),       # (1, 128)
        fc_w=jnp.concatenate([e_fcw, n_fcw], axis=1).astype(bf),      # (3136, 128)
        fc_b=jnp.concatenate([e_fcb, n_fcb]).reshape(1, -1),          # (1, 128)
        # mind W1 split by the cat([z, zs]) row blocks, each zero-padded to
        # 128 input rows so the column-concatenated fc output feeds it directly:
        #   zz cols 0:64  = eyes(y) = zs -> W1 rows 64:128   (w1b_pad)
        #   zz cols 64:128 = news(x) = z -> W1 rows 0:64     (w1a_pad)
        mind_w1b_pad=jnp.concatenate([m_w1[vocab:], zeros], 0).astype(bf),
        mind_w1a_pad=jnp.concatenate([zeros, m_w1[:vocab]], 0).astype(bf),
        mind_b1=m_b1.reshape(1, -1),                                  # (1, 128)
        # mind W2 zero-padded to 128 output lanes (column 0 is the real head).
        mind_w2=jnp.pad(m_w2, ((0, 0), (0, 127))).astype(bf),         # (128, 128)
        mind_b2=jnp.pad(m_b2, (0, 127)).reshape(1, -1),               # (1, 128)
    )


if __name__ == "__main__":
    key = jax.random.PRNGKey(0)
    kp, kx, ky = jax.random.split(key, 3)
    params = init_receiver_params(kp, vocab=64)   # opts.vocab_size = 64

    B, K = 2, 10   # final .view(-1, 10) fixes 10 candidates per example
    x = jax.random.uniform(kx, (B, 1, 28, 28), jnp.float32)
    y = jax.random.uniform(ky, (B, K, 1, 28, 28), jnp.float32)

    out = jax.block_until_ready(receiver_forward(x, y, params))
    assert out.shape == (B, 10), out.shape
    assert jnp.all(jnp.isfinite(out))
    print("KERNEL_OK")
</pallas_src>

<mosaic_0001>
module attributes {stable_mosaic.version = 11 : i64} {
  func.func @_gemm_bias_relu_kernel(%arg0: i32, %arg1: memref<4312x9xbf16, #tpu.memory_space<vmem>>, %arg2: memref<9x16xbf16, #tpu.memory_space<vmem>>, %arg3: memref<1x16xf32, #tpu.memory_space<vmem>>, %arg4: memref<4312x16xbf16, #tpu.memory_space<vmem>>) attributes {dimension_semantics = [#tpu.dimension_semantics<arbitrary>], iteration_bounds = array<i64: 1>, scalar_prefetch = 0 : i64, scratch_operands = 0 : i64, tpu.core_type = #tpu.core_type<tc>, window_params = [{pipeline_mode = #tpu.pipeline_mode<synchronous>, transform_indices = @transform_0, window_bounds = array<i64: 4312, 9>}, {pipeline_mode = #tpu.pipeline_mode<synchronous>, transform_indices = @transform_1, window_bounds = array<i64: 9, 16>}, {pipeline_mode = #tpu.pipeline_mode<synchronous>, transform_indices = @transform_2, window_bounds = array<i64: 1, 16>}, {pipeline_mode = #tpu.pipeline_mode<synchronous>, transform_indices = @transform_3, window_bounds = array<i64: 4312, 16>}]} {
    %c0 = arith.constant 0 : index
    %c0_0 = arith.constant 0 : index
    %0 = vector.load %arg1[%c0, %c0_0] : memref<4312x9xbf16, #tpu.memory_space<vmem>>, vector<4312x9xbf16>
    %c0_1 = arith.constant 0 : index
    %c0_2 = arith.constant 0 : index
    %1 = vector.load %arg2[%c0_1, %c0_2] : memref<9x16xbf16, #tpu.memory_space<vmem>>, vector<9x16xbf16>
    %cst = arith.constant dense<0.000000e+00> : vector<4312x16xf32>
    %2 = tpu.matmul %0, %1, %cst {dimension_numbers = #tpu.dot_dimension_numbers<[1], [0], [0], [1], [0, 0, 1, 1], [], []>} : vector<4312x9xbf16>, vector<9x16xbf16>, vector<4312x16xf32> -> vector<4312x16xf32>
    %c0_3 = arith.constant 0 : index
    %c0_4 = arith.constant 0 : index
    %3 = vector.load %arg3[%c0_3, %c0_4] : memref<1x16xf32, #tpu.memory_space<vmem>>, vector<1x16xf32>
    %4 = vector.broadcast %3 : vector<1x16xf32> to vector<4312x16xf32>
    %5 = arith.addf %2, %4 : vector<4312x16xf32>
    %cst_5 = arith.constant 0.000000e+00 : f32
    %6 = vector.broadcast %cst_5 : f32 to vector<4312x16xf32>
    %7 = arith.maximumf %5, %6 : vector<4312x16xf32>
    %8 = arith.truncf %7 : vector<4312x16xf32> to vector<4312x16xbf16>
    %c0_6 = arith.constant 0 : index
    %c0_7 = arith.constant 0 : index
    %9 = vector.load %arg4[%c0_6, %c0_7] : memref<4312x16xbf16, #tpu.memory_space<vmem>>, vector<4312x16xbf16>
    tpu.vector_store %arg4[%c0_6, %c0_7], %8 {strides = array<i32>} : memref<4312x16xbf16, #tpu.memory_space<vmem>>, vector<4312x16xbf16>,
    return
  }
  func.func @transform_0(%arg0: i32) -> (i32, i32) {
    %c0_i32 = arith.constant 0 : i32
    %c0_i32_0 = arith.constant 0 : i32
    %c0_i32_1 = arith.constant 0 : i32
    return %c0_i32, %c0_i32_0 : i32, i32
  }
  func.func @transform_1(%arg0: i32) -> (i32, i32) {
    %c0_i32 = arith.constant 0 : i32
    %c0_i32_0 = arith.constant 0 : i32
    %c0_i32_1 = arith.constant 0 : i32
    return %c0_i32, %c0_i32_0 : i32, i32
  }
  func.func @transform_2(%arg0: i32) -> (i32, i32) {
    %c0_i32 = arith.constant 0 : i32
    %c0_i32_0 = arith.constant 0 : i32
    %c0_i32_1 = arith.constant 0 : i32
    return %c0_i32, %c0_i32_0 : i32, i32
  }
  func.func @transform_3(%arg0: i32) -> (i32, i32) {
    %c0_i32 = arith.constant 0 : i32
    %c0_i32_0 = arith.constant 0 : i32
    %c0_i32_1 = arith.constant 0 : i32
    return %c0_i32, %c0_i32_0 : i32, i32
  }
}

module attributes {stable_mosaic.version = 11 : i64} {
  func.func @_gemm_bias_relu_kernel(%arg0: i32, %arg1: memref<1078x72xbf16, #tpu.memory_space<vmem>>, %arg2: memref<72x128xbf16, #tpu.memory_space<vmem>>, %arg3: memref<1x128xf32, #tpu.memory_space<vmem>>, %arg4: memref<1078x128xbf16, #tpu.memory_space<vmem>>) attributes {dimension_semantics = [#tpu.dimension_semantics<arbitrary>], iteration_bounds = array<i64: 1>, scalar_prefetch = 0 : i64, scratch_operands = 0 : i64, tpu.core_type = #tpu.core_type<tc>, window_params = [{pipeline_mode = #tpu.pipeline_mode<synchronous>, transform_indices = @transform_0, window_bounds = array<i64: 1078, 72>}, {pipeline_mode = #tpu.pipeline_mode<synchronous>, transform_indices = @transform_1, window_bounds = array<i64: 72, 128>}, {pipeline_mode = #tpu.pipeline_mode<synchronous>, transform_indices = @transform_2, window_bounds = array<i64: 1, 128>}, {pipeline_mode = #tpu.pipeline_mode<synchronous>, transform_indices = @transform_3, window_bounds = array<i64: 1078, 128>}]} {
    %c0 = arith.constant 0 : index
    %c0_0 = arith.constant 0 : index
    %0 = vector.load %arg1[%c0, %c0_0] : memref<1078x72xbf16, #tpu.memory_space<vmem>>, vector<1078x72xbf16>
    %c0_1 = arith.constant 0 : index
    %c0_2 = arith.constant 0 : index
    %1 = vector.load %arg2[%c0_1, %c0_2] : memref<72x128xbf16, #tpu.memory_space<vmem>>, vector<72x128xbf16>
    %cst = arith.constant dense<0.000000e+00> : vector<1078x128xf32>
    %2 = tpu.matmul %0, %1, %cst {dimension_numbers = #tpu.dot_dimension_numbers<[1], [0], [0], [1], [0, 0, 1, 1], [], []>} : vector<1078x72xbf16>, vector<72x128xbf16>, vector<1078x128xf32> -> vector<1078x128xf32>
    %c0_3 = arith.constant 0 : index
    %c0_4 = arith.constant 0 : index
    %3 = vector.load %arg3[%c0_3, %c0_4] : memref<1x128xf32, #tpu.memory_space<vmem>>, vector<1x128xf32>
    %4 = vector.broadcast %3 : vector<1x128xf32> to vector<1078x128xf32>
    %5 = arith.addf %2, %4 : vector<1078x128xf32>
    %cst_5 = arith.constant 0.000000e+00 : f32
    %6 = vector.broadcast %cst_5 : f32 to vector<1078x128xf32>
    %7 = arith.maximumf %5, %6 : vector<1078x128xf32>
    %8 = arith.truncf %7 : vector<1078x128xf32> to vector<1078x128xbf16>
    %c0_6 = arith.constant 0 : index
    %c0_7 = arith.constant 0 : index
    %9 = vector.load %arg4[%c0_6, %c0_7] : memref<1078x128xbf16, #tpu.memory_space<vmem>>, vector<1078x128xbf16>
    tpu.vector_store %arg4[%c0_6, %c0_7], %8 {strides = array<i32>} : memref<1078x128xbf16, #tpu.memory_space<vmem>>, vector<1078x128xbf16>,
    return
  }
  func.func @transform_0(%arg0: i32) -> (i32, i32) {
    %c0_i32 = arith.constant 0 : i32
    %c0_i32_0 = arith.constant 0 : i32
    %c0_i32_1 = arith.constant 0 : i32
    return %c0_i32, %c0_i32_0 : i32, i32
  }
  func.func @transform_1(%arg0: i32) -> (i32, i32) {
    %c0_i32 = arith.constant 0 : i32
    %c0_i32_0 = arith.constant 0 : i32
    %c0_i32_1 = arith.constant 0 : i32
    return %c0_i32, %c0_i32_0 : i32, i32
  }
  func.func @transform_2(%arg0: i32) -> (i32, i32) {
    %c0_i32 = arith.constant 0 : i32
    %c0_i32_0 = arith.constant 0 : i32
    %c0_i32_1 = arith.constant 0 : i32
    return %c0_i32, %c0_i32_0 : i32, i32
  }
  func.func @transform_3(%arg0: i32) -> (i32, i32) {
    %c0_i32 = arith.constant 0 : i32
    %c0_i32_0 = arith.constant 0 : i32
    %c0_i32_1 = arith.constant 0 : i32
    return %c0_i32, %c0_i32_0 : i32, i32
  }
}

module attributes {stable_mosaic.version = 11 : i64} {
  func.func @_fc_mind_kernel(%arg0: i32, %arg1: memref<22x3136xbf16, #tpu.memory_space<vmem>>, %arg2: memref<3136x128xbf16, #tpu.memory_space<vmem>>, %arg3: memref<1x128xf32, #tpu.memory_space<vmem>>, %arg4: memref<20x22xbf16, #tpu.memory_space<vmem>>, %arg5: memref<20x22xbf16, #tpu.memory_space<vmem>>, %arg6: memref<128x128xbf16, #tpu.memory_space<vmem>>, %arg7: memref<128x128xbf16, #tpu.memory_space<vmem>>, %arg8: memref<1x128xf32, #tpu.memory_space<vmem>>, %arg9: memref<128x128xbf16, #tpu.memory_space<vmem>>, %arg10: memref<1x128xf32, #tpu.memory_space<vmem>>, %arg11: memref<20x128xf32, #tpu.memory_space<vmem>>) attributes {dimension_semantics = [#tpu.dimension_semantics<arbitrary>], iteration_bounds = array<i64: 1>, scalar_prefetch = 0 : i64, scratch_operands = 0 : i64, tpu.core_type = #tpu.core_type<tc>, window_params = [{pipeline_mode = #tpu.pipeline_mode<synchronous>, transform_indices = @transform_0, window_bounds = array<i64: 22, 3136>}, {pipeline_mode = #tpu.pipeline_mode<synchronous>, transform_indices = @transform_1, window_bounds = array<i64: 3136, 128>}, {pipeline_mode = #tpu.pipeline_mode<synchronous>, transform_indices = @transform_2, window_bounds = array<i64: 1, 128>}, {pipeline_mode = #tpu.pipeline_mode<synchronous>, transform_indices = @transform_3, window_bounds = array<i64: 20, 22>}, {pipeline_mode = #tpu.pipeline_mode<synchronous>, transform_indices = @transform_4, window_bounds = array<i64: 20, 22>}, {pipeline_mode = #tpu.pipeline_mode<synchronous>, transform_indices = @transform_5, window_bounds = array<i64: 128, 128>}, {pipeline_mode = #tpu.pipeline_mode<synchronous>, transform_indices = @transform_6, window_bounds = array<i64: 128, 128>}, {pipeline_mode = #tpu.pipeline_mode<synchronous>, transform_indices = @transform_7, window_bounds = array<i64: 1, 128>}, {pipeline_mode = #tpu.pipeline_mode<synchronous>, transform_indices = @transform_8, window_bounds = array<i64: 128, 128>}, {pipeline_mode = #tpu.pipeline_mode<synchronous>, transform_indices = @transform_9, window_bounds = array<i64: 1, 128>}, {pipeline_mode = #tpu.pipeline_mode<synchronous>, transform_indices = @transform_10, window_bounds = array<i64: 20, 128>}]} {
    %c0 = arith.constant 0 : index
    %c0_0 = arith.constant 0 : index
    %0 = vector.load %arg1[%c0, %c0_0] : memref<22x3136xbf16, #tpu.memory_space<vmem>>, vector<22x3136xbf16>
    %c0_1 = arith.constant 0 : index
    %c0_2 = arith.constant 0 : index
    %1 = vector.load %arg2[%c0_1, %c0_2] : memref<3136x128xbf16, #tpu.memory_space<vmem>>, vector<3136x128xbf16>
    %cst = arith.constant dense<0.000000e+00> : vector<22x128xf32>
    %2 = tpu.matmul %0, %1, %cst {dimension_numbers = #tpu.dot_dimension_numbers<[1], [0], [0], [1], [0, 0, 1, 1], [], []>} : vector<22x3136xbf16>, vector<3136x128xbf16>, vector<22x128xf32> -> vector<22x128xf32>
    %c0_3 = arith.constant 0 : index
    %c0_4 = arith.constant 0 : index
    %3 = vector.load %arg3[%c0_3, %c0_4] : memref<1x128xf32, #tpu.memory_space<vmem>>, vector<1x128xf32>
    %4 = vector.broadcast %3 : vector<1x128xf32> to vector<22x128xf32>
    %5 = arith.addf %2, %4 : vector<22x128xf32>
    %6 = arith.truncf %5 : vector<22x128xf32> to vector<22x128xbf16>
    %c0_5 = arith.constant 0 : index
    %c0_6 = arith.constant 0 : index
    %7 = vector.load %arg4[%c0_5, %c0_6] : memref<20x22xbf16, #tpu.memory_space<vmem>>, vector<20x22xbf16>
    %cst_7 = arith.constant dense<0.000000e+00> : vector<20x128xf32>
    %8 = tpu.matmul %7, %6, %cst_7 {dimension_numbers = #tpu.dot_dimension_numbers<[1], [0], [0], [1], [0, 0, 1, 1], [], []>} : vector<20x22xbf16>, vector<22x128xbf16>, vector<20x128xf32> -> vector<20x128xf32>
    %c0_8 = arith.constant 0 : index
    %c0_9 = arith.constant 0 : index
    %9 = vector.load %arg5[%c0_8, %c0_9] : memref<20x22xbf16, #tpu.memory_space<vmem>>, vector<20x22xbf16>
    %cst_10 = arith.constant dense<0.000000e+00> : vector<20x128xf32>
    %10 = tpu.matmul %9, %6, %cst_10 {dimension_numbers = #tpu.dot_dimension_numbers<[1], [0], [0], [1], [0, 0, 1, 1], [], []>} : vector<20x22xbf16>, vector<22x128xbf16>, vector<20x128xf32> -> vector<20x128xf32>
    %11 = arith.truncf %8 : vector<20x128xf32> to vector<20x128xbf16>
    %c0_11 = arith.constant 0 : index
    %c0_12 = arith.constant 0 : index
    %12 = vector.load %arg6[%c0_11, %c0_12] : memref<128x128xbf16, #tpu.memory_space<vmem>>, vector<128x128xbf16>
    %cst_13 = arith.constant dense<0.000000e+00> : vector<20x128xf32>
    %13 = tpu.matmul %11, %12, %cst_13 {dimension_numbers = #tpu.dot_dimension_numbers<[1], [0], [0], [1], [0, 0, 1, 1], [], []>} : vector<20x128xbf16>, vector<128x128xbf16>, vector<20x128xf32> -> vector<20x128xf32>
    %14 = arith.truncf %10 : vector<20x128xf32> to vector<20x128xbf16>
    %c0_14 = arith.constant 0 : index
    %c0_15 = arith.constant 0 : index
    %15 = vector.load %arg7[%c0_14, %c0_15] : memref<128x128xbf16, #tpu.memory_space<vmem>>, vector<128x128xbf16>
    %cst_16 = arith.constant dense<0.000000e+00> : vector<20x128xf32>
    %16 = tpu.matmul %14, %15, %cst_16 {dimension_numbers = #tpu.dot_dimension_numbers<[1], [0], [0], [1], [0, 0, 1, 1], [], []>} : vector<20x128xbf16>, vector<128x128xbf16>, vector<20x128xf32> -> vector<20x128xf32>
    %17 = arith.addf %13, %16 : vector<20x128xf32>
    %c0_17 = arith.constant 0 : index
    %c0_18 = arith.constant 0 : index
    %18 = vector.load %arg8[%c0_17, %c0_18] : memref<1x128xf32, #tpu.memory_space<vmem>>, vector<1x128xf32>
    %19 = vector.broadcast %18 : vector<1x128xf32> to vector<20x128xf32>
    %20 = arith.addf %17, %19 : vector<20x128xf32>
    %cst_19 = arith.constant 0.000000e+00 : f32
    %21 = vector.broadcast %cst_19 : f32 to vector<20x128xf32>
    %22 = arith.maximumf %20, %21 : vector<20x128xf32>
    %23 = arith.truncf %22 : vector<20x128xf32> to vector<20x128xbf16>
    %c0_20 = arith.constant 0 : index
    %c0_21 = arith.constant 0 : index
    %24 = vector.load %arg9[%c0_20, %c0_21] : memref<128x128xbf16, #tpu.memory_space<vmem>>, vector<128x128xbf16>
    %cst_22 = arith.constant dense<0.000000e+00> : vector<20x128xf32>
    %25 = tpu.matmul %23, %24, %cst_22 {dimension_numbers = #tpu.dot_dimension_numbers<[1], [0], [0], [1], [0, 0, 1, 1], [], []>} : vector<20x128xbf16>, vector<128x128xbf16>, vector<20x128xf32> -> vector<20x128xf32>
    %c0_23 = arith.constant 0 : index
    %c0_24 = arith.constant 0 : index
    %26 = vector.load %arg10[%c0_23, %c0_24] : memref<1x128xf32, #tpu.memory_space<vmem>>, vector<1x128xf32>
    %27 = vector.broadcast %26 : vector<1x128xf32> to vector<20x128xf32>
    %28 = arith.addf %25, %27 : vector<20x128xf32>
    %c0_25 = arith.constant 0 : index
    %c0_26 = arith.constant 0 : index
    %29 = vector.load %arg11[%c0_25, %c0_26] : memref<20x128xf32, #tpu.memory_space<vmem>>, vector<20x128xf32>
    tpu.vector_store %arg11[%c0_25, %c0_26], %28 {strides = array<i32>} : memref<20x128xf32, #tpu.memory_space<vmem>>, vector<20x128xf32>,
    return
  }
  func.func @transform_0(%arg0: i32) -> (i32, i32) {
    %c0_i32 = arith.constant 0 : i32
    %c0_i32_0 = arith.constant 0 : i32
    %c0_i32_1 = arith.constant 0 : i32
    return %c0_i32, %c0_i32_0 : i32, i32
  }
  func.func @transform_1(%arg0: i32) -> (i32, i32) {
    %c0_i32 = arith.constant 0 : i32
    %c0_i32_0 = arith.constant 0 : i32
    %c0_i32_1 = arith.constant 0 : i32
    return %c0_i32, %c0_i32_0 : i32, i32
  }
  func.func @transform_2(%arg0: i32) -> (i32, i32) {
    %c0_i32 = arith.constant 0 : i32
    %c0_i32_0 = arith.constant 0 : i32
    %c0_i32_1 = arith.constant 0 : i32
    return %c0_i32, %c0_i32_0 : i32, i32
  }
  func.func @transform_3(%arg0: i32) -> (i32, i32) {
    %c0_i32 = arith.constant 0 : i32
    %c0_i32_0 = arith.constant 0 : i32
    %c0_i32_1 = arith.constant 0 : i32
    return %c0_i32, %c0_i32_0 : i32, i32
  }
  func.func @transform_4(%arg0: i32) -> (i32, i32) {
    %c0_i32 = arith.constant 0 : i32
    %c0_i32_0 = arith.constant 0 : i32
    %c0_i32_1 = arith.constant 0 : i32
    return %c0_i32, %c0_i32_0 : i32, i32
  }
  func.func @transform_5(%arg0: i32) -> (i32, i32) {
    %c0_i32 = arith.constant 0 : i32
    %c0_i32_0 = arith.constant 0 : i32
    %c0_i32_1 = arith.constant 0 : i32
    return %c0_i32, %c0_i32_0 : i32, i32
  }
  func.func @transform_6(%arg0: i32) -> (i32, i32) {
    %c0_i32 = arith.constant 0 : i32
    %c0_i32_0 = arith.constant 0 : i32
    %c0_i32_1 = arith.constant 0 : i32
    return %c0_i32, %c0_i32_0 : i32, i32
  }
  func.func @transform_7(%arg0: i32) -> (i32, i32) {
    %c0_i32 = arith.constant 0 : i32
    %c0_i32_0 = arith.constant 0 : i32
    %c0_i32_1 = arith.constant 0 : i32
    return %c0_i32, %c0_i32_0 : i32, i32
  }
  func.func @transform_8(%arg0: i32) -> (i32, i32) {
    %c0_i32 = arith.constant 0 : i32
    %c0_i32_0 = arith.constant 0 : i32
    %c0_i32_1 = arith.constant 0 : i32
    return %c0_i32, %c0_i32_0 : i32, i32
  }
  func.func @transform_9(%arg0: i32) -> (i32, i32) {
    %c0_i32 = arith.constant 0 : i32
    %c0_i32_0 = arith.constant 0 : i32
    %c0_i32_1 = arith.constant 0 : i32
    return %c0_i32, %c0_i32_0 : i32, i32
  }
  func.func @transform_10(%arg0: i32) -> (i32, i32) {
    %c0_i32 = arith.constant 0 : i32
    %c0_i32_0 = arith.constant 0 : i32
    %c0_i32_1 = arith.constant 0 : i32
    return %c0_i32, %c0_i32_0 : i32, i32
  }
}

</mosaic_0001>

<bundles_post_ra>
// kernel: receiver_forward.3
= control target key start
LH: loop header
LB: loop body
LE: loop exit
PB: predicated region body
PF: predicated region fallthrough
CT: control target
= control target key end

     0   :  { %vm2727_vm0 = vcmask 1043456   ;;  %vm2728_vm1 = vcmask 1044480   ;;  %vm1916_vm2 = vcmask 72704   ;;  %v10878_v1 = vmov 65535   ;;  %s14707_s1 = inlined_call_operand.vmem [shape: bf16[9,16], index: 1, kind: input, shape index: {}]   ;;  %s14708_s0 = inlined_call_operand.vmem [shape: bf16[4312,9], index: 0, kind: input, shape index: {}]   ;;  %s14709_s2 = inlined_call_operand.vmem [shape: f32[1,16], index: 2, kind: input, shape index: {}]   ;;  %s14710_s3 = inlined_call_operand.vmem [shape: bf16[4312,16], index: 3, kind: output, shape index: {}]  }
   0x1   :  { %v10602_v0 = vld [vmem:[%s14707_s1] sm:$0x1f]   ;;  %v2729_v2 = vsel %vm2727_vm0, 4294967295, %v10878_v1  ;;  %v10604_v7 = vld [vmem:[%s14708_s0 + $0x8] sm:$0xff]   ;;  %v10607_v9 = vld [vmem:[%s14708_s0 + $0x10] sm:$0xff]   ;;  %vm7622_vm3 = vcmask 125952  }
   0x2   :  { %v10603_v3 = vld [vmem:[%s14708_s0] sm:$0xff]   ;;  %v2730_v4 = vsel %vm2728_vm1, %v2729_v2, 0  ;;  %v10606_v8 = vld [vmem:[%s14708_s0 + $0x448] sm:$0xff]   ;;  %v10609_v10 = vld [vmem:[%s14708_s0 + $0x450] sm:$0xff]  }
   0x3   :  { %v2732_v5 = vand.u32 %v10602_v0, %v2730_v4  ;;  %10059 = vmatprep.mubr.msk.bf16.mxu0 %vm1916_vm2, %v10603_v3  ;;  %v10605_v6 = vld [vmem:[%s14708_s0 + $0x440] sm:$0xff]   ;;  %v10608_v11 = vld [vmem:[%s14708_s0 + $0x18] sm:$0xff]   ;;  %v10612_v15 = vld [vmem:[%s14708_s0 + $0x28] sm:$0xff]  }
   0x4   :  { %10331 = vmatprep.mubr.msk.bf16.mxu1 %vm1916_vm2, %v10605_v6  ;;  %v10610_v12 = vld [vmem:[%s14708_s0 + $0x458] sm:$0xff]   ;;  %v10611_v13 = vld [vmem:[%s14708_s0 + $0x20] sm:$0xff]   ;;  %v10614_v16 = vld [vmem:[%s14708_s0 + $0x468] sm:$0xff]  }
   0x5   :  { %10057 = vmatprep.subr.bf16.mxu0 %v2732_v5  ;;  %10599 = vmatprep.subr.bf16.mxu1 %v2732_v5  ;;  %v10613_v14 = vld [vmem:[%s14708_s0 + $0x460] sm:$0xff]   ;;  %v10615_v17 = vld [vmem:[%s14708_s0 + $0x30] sm:$0xff]   ;;  %v10616_v19 = vld [vmem:[%s14708_s0 + $0x38] sm:$0xff]  }
   0x6   :  { %10058 = vmatpush3.bf16.msra.mxu0 %v2732_v5  ;;  %10600 = vmatpush3.bf16.msra.mxu1 %v2732_v5  ;;  %v10617_v18 = vld [vmem:[%s14708_s0 + $0x470] sm:$0xff]   ;;  %v10618_v20 = vld [vmem:[%s14708_s0 + $0x478] sm:$0xff]   ;;  %v10619_v21 = vld [vmem:[%s14708_s0 + $0x40] sm:$0xff]  }
   0x7   :  { %v10621_v22 = vld [vmem:[%s14708_s0 + $0x480] sm:$0xff]   ;;  %v10620_v23 = vld [vmem:[%s14708_s0 + $0x48] sm:$0xff]   ;;  %v10623_v25 = vld [vmem:[%s14708_s0 + $0x50] sm:$0xff]  }
   0x8   :  { %v10622_v24 = vld [vmem:[%s14708_s0 + $0x488] sm:$0xff]   ;;  %v10625_v26 = vld [vmem:[%s14708_s0 + $0x490] sm:$0xff]   ;;  %v10624_v27 = vld [vmem:[%s14708_s0 + $0x58] sm:$0xff]  }
   0x9   :  { %10060 = vmatmul.mubr.msk.bf16.vlgmr.msra.gmra.mrb[0].mxu0 %vm1916_vm2, %v10604_v7  ;;  %10332 = vmatmul.mubr.msk.bf16.vlgmr.msra.gmra.mrb[0].mxu1 %vm1916_vm2, %v10606_v8  ;;  %v10626_v28 = vld [vmem:[%s14708_s0 + $0x498] sm:$0xff]   ;;  %v10627_v29 = vld [vmem:[%s14708_s0 + $0x60] sm:$0xff]   ;;  %v10628_v31 = vld [vmem:[%s14708_s0 + $0x68] sm:$0xff]  }
   0xa   :  { %10063 = vmatprep.mubr.msk.bf16.mxu0 %vm1916_vm2, %v10607_v9  ;;  %10335 = vmatprep.mubr.msk.bf16.mxu1 %vm1916_vm2, %v10609_v10  ;;  %v10629_v30 = vld [vmem:[%s14708_s0 + $0x4a0] sm:$0xff]   ;;  %v10630_v32 = vld [vmem:[%s14708_s0 + $0x4a8] sm:$0xff]   ;;  %v10631_v33 = vld [vmem:[%s14708_s0 + $0x70] sm:$0xff]  }
   0xb   :  { %v10633_v34 = vld [vmem:[%s14708_s0 + $0x4b0] sm:$0xff]   ;;  %v10632_v35 = vld [vmem:[%s14708_s0 + $0x78] sm:$0xff]   ;;  %v10635_v37 = vld [vmem:[%s14708_s0 + $0x80] sm:$0xff]  }
   0xc   :  { %v10634_v36 = vld [vmem:[%s14708_s0 + $0x4b8] sm:$0xff]   ;;  %v10637_v38 = vld [vmem:[%s14708_s0 + $0x4c0] sm:$0xff]   ;;  %v10636_v39 = vld [vmem:[%s14708_s0 + $0x88] sm:$0xff]  }
   0xd   :  { %v10638_v40 = vld [vmem:[%s14708_s0 + $0x4c8] sm:$0xff]   ;;  %v10639_v41 = vld [vmem:[%s14708_s0 + $0x90] sm:$0xff]   ;;  %v10640_v43 = vld [vmem:[%s14708_s0 + $0x98] sm:$0xff]  }
   0xe   :  { %v10641_v42 = vld [vmem:[%s14708_s0 + $0x4d0] sm:$0xff]   ;;  %v10642_v44 = vld [vmem:[%s14708_s0 + $0x4d8] sm:$0xff]   ;;  %v10643_v45 = vld [vmem:[%s14708_s0 + $0xa0] sm:$0xff]  }
   0xf   :  { %v10645_v46 = vld [vmem:[%s14708_s0 + $0x4e0] sm:$0xff]   ;;  %v10644_v47 = vld [vmem:[%s14708_s0 + $0xa8] sm:$0xff]   ;;  %v10647_v49 = vld [vmem:[%s14708_s0 + $0xb0] sm:$0xff]  }
  0x10   :  { %v10646_v48 = vld [vmem:[%s14708_s0 + $0x4e8] sm:$0xff]   ;;  %v10649_v50 = vld [vmem:[%s14708_s0 + $0x4f0] sm:$0xff]   ;;  %v10648_v51 = vld [vmem:[%s14708_s0 + $0xb8] sm:$0xff]  }
  0x11   :  { %10064 = vmatmul.mubr.msk.bf16.gmra.mrb[4].mxu0 %vm1916_vm2, %v10608_v11  ;;  %10336 = vmatmul.mubr.msk.bf16.gmra.mrb[4].mxu1 %vm1916_vm2, %v10610_v12  ;;  %v10650_v52 = vld [vmem:[%s14708_s0 + $0x4f8] sm:$0xff]   ;;  %v10651_v53 = vld [vmem:[%s14708_s0 + $0xc0] sm:$0xff]   ;;  %v10652_v55 = vld [vmem:[%s14708_s0 + $0xc8] sm:$0xff]  }
  0x12   :  { %10067 = vmatprep.mubr.msk.bf16.mxu0 %vm1916_vm2, %v10611_v13  ;;  %10339 = vmatprep.mubr.msk.bf16.mxu1 %vm1916_vm2, %v10613_v14  ;;  %v10653_v54 = vld [vmem:[%s14708_s0 + $0x500] sm:$0xff]   ;;  %v10654_v56 = vld [vmem:[%s14708_s0 + $0x508] sm:$0xff]   ;;  %v10655_v57 = vld [vmem:[%s14708_s0 + $0xd0] sm:$0xff]  }
  0x13   :  { %v10657_v58 = vld [vmem:[%s14708_s0 + $0x510] sm:$0xff]   ;;  %v10656_v59 = vld [vmem:[%s14708_s0 + $0xd8] sm:$0xff]   ;;  %v10659_v61 = vld [vmem:[%s14708_s0 + $0xe0] sm:$0xff]  }
  0x14   :  { %v10658_v60 = vld [vmem:[%s14708_s0 + $0x518] sm:$0xff]   ;;  %v10661_v62 = vld [vmem:[%s14708_s0 + $0x520] sm:$0xff]   ;;  %v10660_v63 = vld [vmem:[%s14708_s0 + $0xe8] sm:$0xff]  }
  0x15   :  { %v10662_v0 = vld [vmem:[%s14708_s0 + $0x528] sm:$0xff]   ;;  %v10663_v1 = vld [vmem:[%s14708_s0 + $0xf0] sm:$0xff]   ;;  %v10664_v3 = vld [vmem:[%s14708_s0 + $0xf8] sm:$0xff]  }
  0x16   :  { %v10665_v2 = vld [vmem:[%s14708_s0 + $0x530] sm:$0xff]   ;;  %v10666_v4 = vld [vmem:[%s14708_s0 + $0x538] sm:$0xff]   ;;  %v10667_v5 = vld [vmem:[%s14708_s0 + $0x100] sm:$0xff]  }
  0x17   :  { %v10669_v6 = vld [vmem:[%s14708_s0 + $0x540] sm:$0xff]   ;;  %v10668_v7 = vld [vmem:[%s14708_s0 + $0x108] sm:$0xff]   ;;  %v10671_v9 = vld [vmem:[%s14708_s0 + $0x110] sm:$0xff]  }
  0x18   :  { %v10670_v8 = vld [vmem:[%s14708_s0 + $0x548] sm:$0xff]   ;;  %v10673_v10 = vld [vmem:[%s14708_s0 + $0x550] sm:$0xff]   ;;  %v10672_v11 = vld [vmem:[%s14708_s0 + $0x118] sm:$0xff]  }
  0x19   :  { %10068 = vmatmul.mubr.msk.bf16.gmra.mrb[8].mxu0 %vm1916_vm2, %v10612_v15  ;;  %10340 = vmatmul.mubr.msk.bf16.gmra.mrb[8].mxu1 %vm1916_vm2, %v10614_v16  ;;  %v10674_v12 = vld [vmem:[%s14708_s0 + $0x558] sm:$0xff]   ;;  %v10675_v13 = vld [vmem:[%s14708_s0 + $0x120] sm:$0xff]   ;;  %v10676_v15 = vld [vmem:[%s14708_s0 + $0x128] sm:$0xff]  }
  0x1a   :  { %10071 = vmatprep.mubr.msk.bf16.mxu0 %vm1916_vm2, %v10615_v17  ;;  %10343 = vmatprep.mubr.msk.bf16.mxu1 %vm1916_vm2, %v10617_v18  ;;  %v10677_v14 = vld [vmem:[%s14708_s0 + $0x560] sm:$0xff]   ;;  %v10678_v16 = vld [vmem:[%s14708_s0 + $0x568] sm:$0xff]   ;;  %v10679_v17 = vld [vmem:[%s14708_s0 + $0x130] sm:$0xff]  }
  0x1b   :  { %v10681_v18 = vld [vmem:[%s14708_s0 + $0x570] sm:$0xff]  }
  0x21   :  { %10072 = vmatmul.mubr.msk.bf16.gmra.mrb[12].mxu0 %vm1916_vm2, %v10616_v19  ;;  %10344 = vmatmul.mubr.msk.bf16.gmra.mrb[12].mxu1 %vm1916_vm2, %v10618_v20  ;;  %v10680_v19 = vld [vmem:[%s14708_s0 + $0x138] sm:$0xff]  }
  0x22   :  { %10075 = vmatprep.mubr.msk.bf16.mxu0 %vm1916_vm2, %v10619_v21  ;;  %10347 = vmatprep.mubr.msk.bf16.mxu1 %vm1916_vm2, %v10621_v22  ;;  %v10682_v20 = vld [vmem:[%s14708_s0 + $0x578] sm:$0xff]   ;;  %v10683_v21 = vld [vmem:[%s14708_s0 + $0x140] sm:$0xff]  }
  0x23   :  { %v10685_v22 = vld [vmem:[%s14708_s0 + $0x580] sm:$0xff]  }
  0x29   :  { %10076 = vmatmul.mubr.msk.bf16.gmra.mrb[16].mxu0 %vm1916_vm2, %v10620_v23  ;;  %10348 = vmatmul.mubr.msk.bf16.gmra.mrb[16].mxu1 %vm1916_vm2, %v10622_v24  ;;  %v10684_v23 = vld [vmem:[%s14708_s0 + $0x148] sm:$0xff]  }
  0x2a   :  { %10079 = vmatprep.mubr.msk.bf16.mxu0 %vm1916_vm2, %v10623_v25  ;;  %10351 = vmatprep.mubr.msk.bf16.mxu1 %vm1916_vm2, %v10625_v26  ;;  %v10686_v24 = vld [vmem:[%s14708_s0 + $0x588] sm:$0xff]   ;;  %v10687_v25 = vld [vmem:[%s14708_s0 + $0x150] sm:$0xff]  }
  0x2b   :  { %v10689_v26 = vld [vmem:[%s14708_s0 + $0x590] sm:$0xff]  }
  0x31   :  { %10080 = vmatmul.mubr.msk.bf16.gmra.mrb[20].mxu0 %vm1916_vm2, %v10624_v27  ;;  %10352 = vmatmul.mubr.msk.bf16.gmra.mrb[20].mxu1 %vm1916_vm2, %v10626_v28  ;;  %v10688_v27 = vld [vmem:[%s14708_s0 + $0x158] sm:$0xff]  }
  0x32   :  { %10083 = vmatprep.mubr.msk.bf16.mxu0 %vm1916_vm2, %v10627_v29  ;;  %10355 = vmatprep.mubr.msk.bf16.mxu1 %vm1916_vm2, %v10629_v30  ;;  %v10690_v28 = vld [vmem:[%s14708_s0 + $0x598] sm:$0xff]   ;;  %v10691_v29 = vld [vmem:[%s14708_s0 + $0x160] sm:$0xff]  }
  0x33   :  { %v10693_v30 = vld [vmem:[%s14708_s0 + $0x5a0] sm:$0xff]  }
  0x39   :  { %10084 = vmatmul.mubr.msk.bf16.gmra.mrb[24].mxu0 %vm1916_vm2, %v10628_v31  ;;  %10356 = vmatmul.mubr.msk.bf16.gmra.mrb[24].mxu1 %vm1916_vm2, %v10630_v32  ;;  %v10692_v31 = vld [vmem:[%s14708_s0 + $0x168] sm:$0xff]  }
  0x3a   :  { %10087 = vmatprep.mubr.msk.bf16.mxu0 %vm1916_vm2, %v10631_v33  ;;  %10359 = vmatprep.mubr.msk.bf16.mxu1 %vm1916_vm2, %v10633_v34  ;;  %v10694_v32 = vld [vmem:[%s14708_s0 + $0x5a8] sm:$0xff]   ;;  %v10695_v33 = vld [vmem:[%s14708_s0 + $0x170] sm:$0xff]  }
  0x3b   :  { %v10697_v34 = vld [vmem:[%s14708_s0 + $0x5b0] sm:$0xff]  }
  0x41   :  { %10088 = vmatmul.mubr.msk.bf16.gmra.mrb[28].mxu0 %vm1916_vm2, %v10632_v35  ;;  %10360 = vmatmul.mubr.msk.bf16.gmra.mrb[28].mxu1 %vm1916_vm2, %v10634_v36  ;;  %v10696_v35 = vld [vmem:[%s14708_s0 + $0x178] sm:$0xff]  }
  0x42   :  { %10091 = vmatprep.mubr.msk.bf16.mxu0 %vm1916_vm2, %v10635_v37  ;;  %10363 = vmatprep.mubr.msk.bf16.mxu1 %vm1916_vm2, %v10637_v38  ;;  %v10698_v36 = vld [vmem:[%s14708_s0 + $0x5b8] sm:$0xff]   ;;  %v10699_v37 = vld [vmem:[%s14708_s0 + $0x180] sm:$0xff]  }
  0x43   :  { %v10701_v38 = vld [vmem:[%s14708_s0 + $0x5c0] sm:$0xff]  }
  0x49   :  { %10092 = vmatmul.mubr.msk.bf16.gmra.mrb[32].mxu0 %vm1916_vm2, %v10636_v39  ;;  %10364 = vmatmul.mubr.msk.bf16.gmra.mrb[32].mxu1 %vm1916_vm2, %v10638_v40  ;;  %v10700_v39 = vld [vmem:[%s14708_s0 + $0x188] sm:$0xff]  }
  0x4a   :  { %10095 = vmatprep.mubr.msk.bf16.mxu0 %vm1916_vm2, %v10639_v41  ;;  %10367 = vmatprep.mubr.msk.bf16.mxu1 %vm1916_vm2, %v10641_v42  ;;  %v10702_v40 = vld [vmem:[%s14708_s0 + $0x5c8] sm:$0xff]   ;;  %v10703_v41 = vld [vmem:[%s14708_s0 + $0x190] sm:$0xff]  }
  0x4b   :  { %v10705_v42 = vld [vmem:[%s14708_s0 + $0x5d0] sm:$0xff]  }
  0x51   :  { %10096 = vmatmul.mubr.msk.bf16.gmra.mrb[36].mxu0 %vm1916_vm2, %v10640_v43  ;;  %10368 = vmatmul.mubr.msk.bf16.gmra.mrb[36].mxu1 %vm1916_vm2, %v10642_v44  ;;  %v10704_v43 = vld [vmem:[%s14708_s0 + $0x198] sm:$0xff]  }
  0x52   :  { %10099 = vmatprep.mubr.msk.bf16.mxu0 %vm1916_vm2, %v10643_v45  ;;  %10371 = vmatprep.mubr.msk.bf16.mxu1 %vm1916_vm2, %v10645_v46  ;;  %v10706_v44 = vld [vmem:[%s14708_s0 + $0x5d8] sm:$0xff]   ;;  %v10707_v45 = vld [vmem:[%s14708_s0 + $0x1a0] sm:$0xff]  }
  0x53   :  { %v10709_v46 = vld [vmem:[%s14708_s0 + $0x5e0] sm:$0xff]  }
  0x59   :  { %10100 = vmatmul.mubr.msk.bf16.gmra.mrb[40].mxu0 %vm1916_vm2, %v10644_v47  ;;  %10372 = vmatmul.mubr.msk.bf16.gmra.mrb[40].mxu1 %vm1916_vm2, %v10646_v48  ;;  %v10708_v47 = vld [vmem:[%s14708_s0 + $0x1a8] sm:$0xff]  }
  0x5a   :  { %10103 = vmatprep.mubr.msk.bf16.mxu0 %vm1916_vm2, %v10647_v49  ;;  %10375 = vmatprep.mubr.msk.bf16.mxu1 %vm1916_vm2, %v10649_v50  ;;  %v10710_v48 = vld [vmem:[%s14708_s0 + $0x5e8] sm:$0xff]   ;;  %v10711_v49 = vld [vmem:[%s14708_s0 + $0x1b0] sm:$0xff]  }
  0x5b   :  { %v10713_v50 = vld [vmem:[%s14708_s0 + $0x5f0] sm:$0xff]  }
  0x61   :  { %10104 = vmatmul.mubr.msk.bf16.gmra.mrb[44].mxu0 %vm1916_vm2, %v10648_v51  ;;  %10376 = vmatmul.mubr.msk.bf16.gmra.mrb[44].mxu1 %vm1916_vm2, %v10650_v52  ;;  %v11341_v51 = vld [vmem:[%s14709_s2] ss:$0 sm:$0xff] }
  0x62   :  { %10107 = vmatprep.mubr.msk.bf16.mxu0 %vm1916_vm2, %v10651_v53  ;;  %10379 = vmatprep.mubr.msk.bf16.mxu1 %vm1916_vm2, %v10653_v54  ;;  %v10712_v53 = vld [vmem:[%s14708_s0 + $0x1b8] sm:$0xff]  }
  0x69   :  { %10108 = vmatmul.mubr.msk.bf16.gmra.mrb[48].mxu0 %vm1916_vm2, %v10652_v55  ;;  %10380 = vmatmul.mubr.msk.bf16.gmra.mrb[48].mxu1 %vm1916_vm2, %v10654_v56  ;;  %v10714_v55 = vld [vmem:[%s14708_s0 + $0x5f8] sm:$0xff]  }
  0x6a   :  { %10111 = vmatprep.mubr.msk.bf16.mxu0 %vm1916_vm2, %v10655_v57  ;;  %10383 = vmatprep.mubr.msk.bf16.mxu1 %vm1916_vm2, %v10657_v58 }
  0x71   :  { %10112 = vmatmul.mubr.msk.bf16.gmra.mrb[52].mxu0 %vm1916_vm2, %v10656_v59  ;;  %10384 = vmatmul.mubr.msk.bf16.gmra.mrb[52].mxu1 %vm1916_vm2, %v10658_v60 }
  0x72   :  { %10115 = vmatprep.mubr.msk.bf16.mxu0 %vm1916_vm2, %v10659_v61  ;;  %10387 = vmatprep.mubr.msk.bf16.mxu1 %vm1916_vm2, %v10661_v62 }
  0x79   :  { %10116 = vmatmul.mubr.msk.bf16.gmra.mrb[56].mxu0 %vm1916_vm2, %v10660_v63  ;;  %10388 = vmatmul.mubr.msk.bf16.gmra.mrb[56].mxu1 %vm1916_vm2, %v10662_v0  ;;  %v10715_v0 = vld [vmem:[%s14708_s0 + $0x1c0] sm:$0xff]  }
  0x7a   :  { %10119 = vmatprep.mubr.msk.bf16.mxu0 %vm1916_vm2, %v10663_v1  ;;  %10391 = vmatprep.mubr.msk.bf16.mxu1 %vm1916_vm2, %v10665_v2  ;;  %v10717_v1 = vld [vmem:[%s14708_s0 + $0x600] sm:$0xff]  }
  0x81   :  { %10120 = vmatmul.mubr.msk.bf16.gmra.mrb[60].mxu0 %vm1916_vm2, %v10664_v3  ;;  %10392 = vmatmul.mubr.msk.bf16.gmra.mrb[60].mxu1 %vm1916_vm2, %v10666_v4 }
  0x82   :  { %10123 = vmatprep.mubr.msk.bf16.mxu0 %vm1916_vm2, %v10667_v5  ;;  %10395 = vmatprep.mubr.msk.bf16.mxu1 %vm1916_vm2, %v10669_v6 }
  0x89   :  { %10124 = vmatmul.mubr.msk.bf16.gmra.mrb[64].mxu0 %vm1916_vm2, %v10668_v7  ;;  %10396 = vmatmul.mubr.msk.bf16.gmra.mrb[64].mxu1 %vm1916_vm2, %v10670_v8 }
  0x8a   :  { %10127 = vmatprep.mubr.msk.bf16.mxu0 %vm1916_vm2, %v10671_v9  ;;  %10399 = vmatprep.mubr.msk.bf16.mxu1 %vm1916_vm2, %v10673_v10 }
  0x91   :  { %10128 = vmatmul.mubr.msk.bf16.gmra.mrb[68].mxu0 %vm1916_vm2, %v10672_v11  ;;  %10400 = vmatmul.mubr.msk.bf16.gmra.mrb[68].mxu1 %vm1916_vm2, %v10674_v12 }
  0x92   :  { %10131 = vmatprep.mubr.msk.bf16.mxu0 %vm1916_vm2, %v10675_v13  ;;  %10403 = vmatprep.mubr.msk.bf16.mxu1 %vm1916_vm2, %v10677_v14 }
  0x99   :  { %10132 = vmatmul.mubr.msk.bf16.gmra.mrb[72].mxu0 %vm1916_vm2, %v10676_v15  ;;  %10404 = vmatmul.mubr.msk.bf16.gmra.mrb[72].mxu1 %vm1916_vm2, %v10678_v16 }
  0x9a   :  { %10135 = vmatprep.mubr.msk.bf16.mxu0 %vm1916_vm2, %v10679_v17  ;;  %10407 = vmatprep.mubr.msk.bf16.mxu1 %vm1916_vm2, %v10681_v18 }
  0xa1   :  { %10136 = vmatmul.mubr.msk.bf16.gmra.mrb[76].mxu0 %vm1916_vm2, %v10680_v19  ;;  %10408 = vmatmul.mubr.msk.bf16.gmra.mrb[76].mxu1 %vm1916_vm2, %v10682_v20 }
  0xa2   :  { %10139 = vmatprep.mubr.msk.bf16.mxu0 %vm1916_vm2, %v10683_v21  ;;  %10411 = vmatprep.mubr.msk.bf16.mxu1 %vm1916_vm2, %v10685_v22 }
  0xa9   :  { %10140 = vmatmul.mubr.msk.bf16.gmra.mrb[80].mxu0 %vm1916_vm2, %v10684_v23  ;;  %10412 = vmatmul.mubr.msk.bf16.gmra.mrb[80].mxu1 %vm1916_vm2, %v10686_v24 }
  0xaa   :  { %10143 = vmatprep.mubr.msk.bf16.mxu0 %vm1916_vm2, %v10687_v25  ;;  %10415 = vmatprep.mubr.msk.bf16.mxu1 %vm1916_vm2, %v10689_v26  ;;  %v10716_v25 = vld [vmem:[%s14708_s0 + $0x1c8] sm:$0xff]  }
  0xb1   :  { %10144 = vmatmul.mubr.msk.bf16.gmra.mrb[84].mxu0 %vm1916_vm2, %v10688_v27  ;;  %10416 = vmatmul.mubr.msk.bf16.gmra.mrb[84].mxu1 %vm1916_vm2, %v10690_v28  ;;  %v10718_v27 = vld [vmem:[%s14708_s0 + $0x608] sm:$0xff]  }
  0xb2   :  { %10147 = vmatprep.mubr.msk.bf16.mxu0 %vm1916_vm2, %v10691_v29  ;;  %10419 = vmatprep.mubr.msk.bf16.mxu1 %vm1916_vm2, %v10693_v30 }
  0xb9   :  { %10148 = vmatmul.mubr.msk.bf16.gmra.mrb[88].mxu0 %vm1916_vm2, %v10692_v31  ;;  %10420 = vmatmul.mubr.msk.bf16.gmra.mrb[88].mxu1 %vm1916_vm2, %v10694_v32 }
  0xba   :  { %10151 = vmatprep.mubr.msk.bf16.mxu0 %vm1916_vm2, %v10695_v33  ;;  %10423 = vmatprep.mubr.msk.bf16.mxu1 %vm1916_vm2, %v10697_v34 }
  0xc1   :  { %10152 = vmatmul.mubr.msk.bf16.gmra.mrb[92].mxu0 %vm1916_vm2, %v10696_v35  ;;  %10424 = vmatmul.mubr.msk.bf16.gmra.mrb[92].mxu1 %vm1916_vm2, %v10698_v36  ;;  %v10719_v36 = vld [vmem:[%s14708_s0 + $0x1d0] sm:$0xff]  }
  0xc2   :  { %10155 = vmatprep.mubr.msk.bf16.mxu0 %vm1916_vm2, %v10699_v37  ;;  %10427 = vmatprep.mubr.msk.bf16.mxu1 %vm1916_vm2, %v10701_v38  ;;  %v10721_v37 = vld [vmem:[%s14708_s0 + $0x610] sm:$0xff]  }
  0xc9   :  { %10156 = vmatmul.mubr.msk.bf16.gmra.mrb[96].mxu0 %vm1916_vm2, %v10700_v39  ;;  %10428 = vmatmul.mubr.msk.bf16.gmra.mrb[96].mxu1 %vm1916_vm2, %v10702_v40 }
  0xca   :  { %10159 = vmatprep.mubr.msk.bf16.mxu0 %vm1916_vm2, %v10703_v41  ;;  %10431 = vmatprep.mubr.msk.bf16.mxu1 %vm1916_vm2, %v10705_v42 }
  0xd1   :  { %10160 = vmatmul.mubr.msk.bf16.gmra.mrb[100].mxu0 %vm1916_vm2, %v10704_v43  ;;  %10432 = vmatmul.mubr.msk.bf16.gmra.mrb[100].mxu1 %vm1916_vm2, %v10706_v44 }
  0xd2   :  { %10163 = vmatprep.mubr.msk.bf16.mxu0 %vm1916_vm2, %v10707_v45  ;;  %10435 = vmatprep.mubr.msk.bf16.mxu1 %vm1916_vm2, %v10709_v46 }
  0xd9   :  { %10164 = vmatmul.mubr.msk.bf16.gmra.mrb[104].mxu0 %vm1916_vm2, %v10708_v47  ;;  %10436 = vmatmul.mubr.msk.bf16.gmra.mrb[104].mxu1 %vm1916_vm2, %v10710_v48 }
  0xda   :  { %10167 = vmatprep.mubr.msk.bf16.mxu0 %vm1916_vm2, %v10711_v49  ;;  %10439 = vmatprep.mubr.msk.bf16.mxu1 %vm1916_vm2, %v10713_v50 }
  0xdc   :  { %v10061_v52 = vpop.f32.mrb[0].mxu0  ;;  %v10333_v54 = vpop.f32.mrb[0].mxu1 }
  0xdd   :  { %v2777_v56 = vadd.f32 %v10061_v52, %v11341_v51  ;;  %v2768_v57 = vpop.f32.mrb[1].mxu0  ;;  %v3865_v58 = vadd.f32 %v10333_v54, %v11341_v51  ;;  %v3856_v59 = vpop.f32.mrb[1].mxu1 }
  0xde   :  { %v2769_v60 = vadd.f32 %v11341_v51, %v2768_v57  ;;  %v10062_v61 = vpop.f32.mrb[2].mxu0  ;;  %v3857_v62 = vadd.f32 %v11341_v51, %v3856_v59  ;;  %v10334_v63 = vpop.f32.mrb[2].mxu1 }
  0xdf   :  { %v4928_v2 = vmax.f32 %v2777_v56, 0.0  ;;  %v2780_v3 = vadd.f32 %v10062_v61, %v11341_v51  ;;  %v2771_v4 = vpop.f32.mrb[3].mxu0  ;;  %v5200_v5 = vmax.f32 %v3865_v58, 0.0  ;;  %v3868_v6 = vadd.f32 %v10334_v63, %v11341_v51  ;;  %v3859_v7 = vpop.f32.mrb[3].mxu1 }
  0xe0   :  { %v4926_v8 = vmax.f32 %v2769_v60, 0.0  ;;  %v2772_v9 = vadd.f32 %v11341_v51, %v2771_v4  ;;  %v5198_v10 = vmax.f32 %v3857_v62, 0.0  ;;  %v3860_v11 = vadd.f32 %v11341_v51, %v3859_v7  ;;  %v10720_v62 = vld [vmem:[%s14708_s0 + $0x1d8] sm:$0xff]  }
  0xe1   :  { %v9249_v12 = vpack.c.bf16 %v4928_v2, %v4928_v2  ;;  %v4929_v13 = vmax.f32 %v2780_v3, 0.0  ;;  %10168 = vmatmul.mubr.msk.bf16.gmra.mrb[108].mxu0 %vm1916_vm2, %v10712_v53  ;;  %v9521_v14 = vpack.c.bf16 %v5200_v5, %v5200_v5  ;;  %v5201_v15 = vmax.f32 %v3868_v6, 0.0  ;;  %10440 = vmatmul.mubr.msk.bf16.gmra.mrb[108].mxu1 %vm1916_vm2, %v10714_v55 }
  0xe2   :  { %v9247_v16 = vpack.c.bf16 %v4926_v8, %v4926_v8  ;;  %v4927_v17 = vmax.f32 %v2772_v9, 0.0  ;;  %v9519_v18 = vpack.c.bf16 %v5198_v10, %v5198_v10  ;;  %v5199_v19 = vmax.f32 %v3860_v11, 0.0  ;;  %10171 = vmatprep.mubr.msk.bf16.mxu0 %vm1916_vm2, %v10715_v0  ;;  %10443 = vmatprep.mubr.msk.bf16.mxu1 %vm1916_vm2, %v10717_v1  ;;  %v10722_v0 = vld [vmem:[%s14708_s0 + $0x618] sm:$0xff]   ;;  %v10723_v9 = vld [vmem:[%s14708_s0 + $0x1e0] sm:$0xff]  }
  0xe3   :  { %7625 = vst.msk [vmem:[%s14710_s3 + $0x8] sm:$0xf] %vm7622_vm3, %v9249_v12  ;;  %v9250_v20 = vpack.c.bf16 %v4929_v13, %v4929_v13  ;;  %7897 = vst.msk [vmem:[%s14710_s3 + $0x448] sm:$0xf] %vm7622_vm3, %v9521_v14  ;;  %v9522_v21 = vpack.c.bf16 %v5201_v15, %v5201_v15  ;;  %v10725_v10 = vld [vmem:[%s14708_s0 + $0x620] sm:$0xff]  }
  0xe4   :  { %7623 = vst.msk [vmem:[%s14710_s3] sm:$0xf] %vm7622_vm3, %v9247_v16  ;;  %v9248_v22 = vpack.c.bf16 %v4927_v17, %v4927_v17  ;;  %7895 = vst.msk [vmem:[%s14710_s3 + $0x440] sm:$0xf] %vm7622_vm3, %v9519_v18  ;;  %v10065_v23 = vpop.f32.mrb[4].mxu0  ;;  %v9520_v24 = vpack.c.bf16 %v5199_v19, %v5199_v19  ;;  %v10337_v26 = vpop.f32.mrb[4].mxu1 }
  0xe5   :  { %7626 = vst.msk [vmem:[%s14710_s3 + $0xc] sm:$0xf] %vm7622_vm3, %v9250_v20  ;;  %7898 = vst.msk [vmem:[%s14710_s3 + $0x44c] sm:$0xf] %vm7622_vm3, %v9522_v21  ;;  %v2793_v28 = vadd.f32 %v10065_v23, %v11341_v51  ;;  %v2784_v29 = vpop.f32.mrb[5].mxu0  ;;  %v3881_v30 = vadd.f32 %v10337_v26, %v11341_v51  ;;  %v3872_v31 = vpop.f32.mrb[5].mxu1 }
  0xe6   :  { %7624 = vst.msk [vmem:[%s14710_s3 + $0x4] sm:$0xf] %vm7622_vm3, %v9248_v22  ;;  %7896 = vst.msk [vmem:[%s14710_s3 + $0x444] sm:$0xf] %vm7622_vm3, %v9520_v24  ;;  %v2785_v32 = vadd.f32 %v11341_v51, %v2784_v29  ;;  %v10066_v33 = vpop.f32.mrb[6].mxu0  ;;  %v3873_v34 = vadd.f32 %v11341_v51, %v3872_v31  ;;  %v10338_v35 = vpop.f32.mrb[6].mxu1 }
  0xe7   :  { %v4932_v38 = vmax.f32 %v2793_v28, 0.0  ;;  %v2796_v39 = vadd.f32 %v10066_v33, %v11341_v51  ;;  %v2787_v40 = vpop.f32.mrb[7].mxu0  ;;  %v5204_v41 = vmax.f32 %v3881_v30, 0.0  ;;  %v3884_v42 = vadd.f32 %v10338_v35, %v11341_v51  ;;  %v3875_v43 = vpop.f32.mrb[7].mxu1 }
  0xe8   :  { %v4930_v44 = vmax.f32 %v2785_v32, 0.0  ;;  %v2788_v45 = vadd.f32 %v11341_v51, %v2787_v40  ;;  %v5202_v46 = vmax.f32 %v3873_v34, 0.0  ;;  %v3876_v47 = vadd.f32 %v11341_v51, %v3875_v43  ;;  %v10724_v34 = vld [vmem:[%s14708_s0 + $0x1e8] sm:$0xff]  }
  0xe9   :  { %v9253_v48 = vpack.c.bf16 %v4932_v38, %v4932_v38  ;;  %v4933_v49 = vmax.f32 %v2796_v39, 0.0  ;;  %10172 = vmatmul.mubr.msk.bf16.gmra.mrb[112].mxu0 %vm1916_vm2, %v10716_v25  ;;  %v9525_v50 = vpack.c.bf16 %v5204_v41, %v5204_v41  ;;  %v5205_v52 = vmax.f32 %v3884_v42, 0.0  ;;  %10444 = vmatmul.mubr.msk.bf16.gmra.mrb[112].mxu1 %vm1916_vm2, %v10718_v27 }
  0xea   :  { %v9251_v53 = vpack.c.bf16 %v4930_v44, %v4930_v44  ;;  %v4931_v54 = vmax.f32 %v2788_v45, 0.0  ;;  %v9523_v55 = vpack.c.bf16 %v5202_v46, %v5202_v46  ;;  %v5203_v56 = vmax.f32 %v3876_v47, 0.0  ;;  %10175 = vmatprep.mubr.msk.bf16.mxu0 %vm1916_vm2, %v10719_v36  ;;  %10447 = vmatprep.mubr.msk.bf16.mxu1 %vm1916_vm2, %v10721_v37  ;;  %v10726_v36 = vld [vmem:[%s14708_s0 + $0x628] sm:$0xff]   ;;  %v10727_v45 = vld [vmem:[%s14708_s0 + $0x1f0] sm:$0xff]  }
  0xeb   :  { %7629 = vst.msk [vmem:[%s14710_s3 + $0x18] sm:$0xf] %vm7622_vm3, %v9253_v48  ;;  %v9254_v57 = vpack.c.bf16 %v4933_v49, %v4933_v49  ;;  %7901 = vst.msk [vmem:[%s14710_s3 + $0x458] sm:$0xf] %vm7622_vm3, %v9525_v50  ;;  %v9526_v58 = vpack.c.bf16 %v5205_v52, %v5205_v52  ;;  %v10729_v46 = vld [vmem:[%s14708_s0 + $0x630] sm:$0xff]  }
  0xec   :  { %7627 = vst.msk [vmem:[%s14710_s3 + $0x10] sm:$0xf] %vm7622_vm3, %v9251_v53  ;;  %v9252_v59 = vpack.c.bf16 %v4931_v54, %v4931_v54  ;;  %7899 = vst.msk [vmem:[%s14710_s3 + $0x450] sm:$0xf] %vm7622_vm3, %v9523_v55  ;;  %v10069_v60 = vpop.f32.mrb[8].mxu0  ;;  %v9524_v61 = vpack.c.bf16 %v5203_v56, %v5203_v56  ;;  %v10341_v63 = vpop.f32.mrb[8].mxu1 }
  0xed   :  { %7630 = vst.msk [vmem:[%s14710_s3 + $0x1c] sm:$0xf] %vm7622_vm3, %v9254_v57  ;;  %7902 = vst.msk [vmem:[%s14710_s3 + $0x45c] sm:$0xf] %vm7622_vm3, %v9526_v58  ;;  %v2809_v1 = vadd.f32 %v10069_v60, %v11341_v51  ;;  %v2800_v2 = vpop.f32.mrb[9].mxu0  ;;  %v3897_v3 = vadd.f32 %v10341_v63, %v11341_v51  ;;  %v3888_v4 = vpop.f32.mrb[9].mxu1 }
  0xee   :  { %7628 = vst.msk [vmem:[%s14710_s3 + $0x14] sm:$0xf] %vm7622_vm3, %v9252_v59  ;;  %7900 = vst.msk [vmem:[%s14710_s3 + $0x454] sm:$0xf] %vm7622_vm3, %v9524_v61  ;;  %v2801_v5 = vadd.f32 %v11341_v51, %v2800_v2  ;;  %v10070_v6 = vpop.f32.mrb[10].mxu0  ;;  %v3889_v7 = vadd.f32 %v11341_v51, %v3888_v4  ;;  %v10342_v8 = vpop.f32.mrb[10].mxu1 }
  0xef   :  { %v4936_v11 = vmax.f32 %v2809_v1, 0.0  ;;  %v2812_v12 = vadd.f32 %v10070_v6, %v11341_v51  ;;  %v2803_v13 = vpop.f32.mrb[11].mxu0  ;;  %v5208_v14 = vmax.f32 %v3897_v3, 0.0  ;;  %v3900_v15 = vadd.f32 %v10342_v8, %v11341_v51  ;;  %v3891_v16 = vpop.f32.mrb[11].mxu1 }
  0xf0   :  { %v4934_v17 = vmax.f32 %v2801_v5, 0.0  ;;  %v2804_v18 = vadd.f32 %v11341_v51, %v2803_v13  ;;  %v5206_v19 = vmax.f32 %v3889_v7, 0.0  ;;  %v3892_v20 = vadd.f32 %v11341_v51, %v3891_v16  ;;  %v10728_v7 = vld [vmem:[%s14708_s0 + $0x1f8] sm:$0xff]  }
  0xf1   :  { %v9257_v21 = vpack.c.bf16 %v4936_v11, %v4936_v11  ;;  %v4937_v22 = vmax.f32 %v2812_v12, 0.0  ;;  %10176 = vmatmul.mubr.msk.bf16.gmra.mrb[116].mxu0 %vm1916_vm2, %v10720_v62  ;;  %v9529_v23 = vpack.c.bf16 %v5208_v14, %v5208_v14  ;;  %v5209_v24 = vmax.f32 %v3900_v15, 0.0  ;;  %10448 = vmatmul.mubr.msk.bf16.gmra.mrb[116].mxu1 %vm1916_vm2, %v10722_v0 }
  0xf2   :  { %v9255_v25 = vpack.c.bf16 %v4934_v17, %v4934_v17  ;;  %v4935_v26 = vmax.f32 %v2804_v18, 0.0  ;;  %v9527_v27 = vpack.c.bf16 %v5206_v19, %v5206_v19  ;;  %v5207_v28 = vmax.f32 %v3892_v20, 0.0  ;;  %10179 = vmatprep.mubr.msk.bf16.mxu0 %vm1916_vm2, %v10723_v9  ;;  %10451 = vmatprep.mubr.msk.bf16.mxu1 %vm1916_vm2, %v10725_v10  ;;  %v10730_v9 = vld [vmem:[%s14708_s0 + $0x638] sm:$0xff]   ;;  %v10731_v18 = vld [vmem:[%s14708_s0 + $0x200] sm:$0xff]  }
  0xf3   :  { %7633 = vst.msk [vmem:[%s14710_s3 + $0x28] sm:$0xf] %vm7622_vm3, %v9257_v21  ;;  %v9258_v29 = vpack.c.bf16 %v4937_v22, %v4937_v22  ;;  %7905 = vst.msk [vmem:[%s14710_s3 + $0x468] sm:$0xf] %vm7622_vm3, %v9529_v23  ;;  %v9530_v30 = vpack.c.bf16 %v5209_v24, %v5209_v24  ;;  %v10733_v19 = vld [vmem:[%s14708_s0 + $0x640] sm:$0xff]  }
  0xf4   :  { %7631 = vst.msk [vmem:[%s14710_s3 + $0x20] sm:$0xf] %vm7622_vm3, %v9255_v25  ;;  %v9256_v31 = vpack.c.bf16 %v4935_v26, %v4935_v26  ;;  %7903 = vst.msk [vmem:[%s14710_s3 + $0x460] sm:$0xf] %vm7622_vm3, %v9527_v27  ;;  %v10073_v32 = vpop.f32.mrb[12].mxu0  ;;  %v9528_v33 = vpack.c.bf16 %v5207_v28, %v5207_v28  ;;  %v10345_v35 = vpop.f32.mrb[12].mxu1 }
  0xf5   :  { %7634 = vst.msk [vmem:[%s14710_s3 + $0x2c] sm:$0xf] %vm7622_vm3, %v9258_v29  ;;  %7906 = vst.msk [vmem:[%s14710_s3 + $0x46c] sm:$0xf] %vm7622_vm3, %v9530_v30  ;;  %v2825_v37 = vadd.f32 %v10073_v32, %v11341_v51  ;;  %v2816_v38 = vpop.f32.mrb[13].mxu0  ;;  %v3913_v39 = vadd.f32 %v10345_v35, %v11341_v51  ;;  %v3904_v40 = vpop.f32.mrb[13].mxu1 }
  0xf6   :  { %7632 = vst.msk [vmem:[%s14710_s3 + $0x24] sm:$0xf] %vm7622_vm3, %v9256_v31  ;;  %7904 = vst.msk [vmem:[%s14710_s3 + $0x464] sm:$0xf] %vm7622_vm3, %v9528_v33  ;;  %v2817_v41 = vadd.f32 %v11341_v51, %v2816_v38  ;;  %v10074_v42 = vpop.f32.mrb[14].mxu0  ;;  %v3905_v43 = vadd.f32 %v11341_v51, %v3904_v40  ;;  %v10346_v44 = vpop.f32.mrb[14].mxu1 }
  0xf7   :  { %v4940_v47 = vmax.f32 %v2825_v37, 0.0  ;;  %v2828_v48 = vadd.f32 %v10074_v42, %v11341_v51  ;;  %v2819_v49 = vpop.f32.mrb[15].mxu0  ;;  %v5212_v50 = vmax.f32 %v3913_v39, 0.0  ;;  %v3916_v52 = vadd.f32 %v10346_v44, %v11341_v51  ;;  %v3907_v53 = vpop.f32.mrb[15].mxu1 }
  0xf8   :  { %v4938_v54 = vmax.f32 %v2817_v41, 0.0  ;;  %v2820_v55 = vadd.f32 %v11341_v51, %v2819_v49  ;;  %v5210_v56 = vmax.f32 %v3905_v43, 0.0  ;;  %v3908_v57 = vadd.f32 %v11341_v51, %v3907_v53  ;;  %v10734_v49 = vld [vmem:[%s14708_s0 + $0x648] sm:$0xff]  }
  0xf9   :  { %v9261_v58 = vpack.c.bf16 %v4940_v47, %v4940_v47  ;;  %v4941_v59 = vmax.f32 %v2828_v48, 0.0  ;;  %10180 = vmatmul.mubr.msk.bf16.gmra.mrb[120].mxu0 %vm1916_vm2, %v10724_v34  ;;  %v9533_v60 = vpack.c.bf16 %v5212_v50, %v5212_v50  ;;  %v5213_v61 = vmax.f32 %v3916_v52, 0.0  ;;  %10452 = vmatmul.mubr.msk.bf16.gmra.mrb[120].mxu1 %vm1916_vm2, %v10726_v36 }
  0xfa   :  { %v9259_v62 = vpack.c.bf16 %v4938_v54, %v4938_v54  ;;  %v4939_v63 = vmax.f32 %v2820_v55, 0.0  ;;  %v9531_v0 = vpack.c.bf16 %v5210_v56, %v5210_v56  ;;  %v5211_v1 = vmax.f32 %v3908_v57, 0.0  ;;  %10183 = vmatprep.mubr.msk.bf16.mxu0 %vm1916_vm2, %v10727_v45  ;;  %10455 = vmatprep.mubr.msk.bf16.mxu1 %vm1916_vm2, %v10729_v46  ;;  %v10732_v46 = vld [vmem:[%s14708_s0 + $0x208] sm:$0xff]   ;;  %v10735_v55 = vld [vmem:[%s14708_s0 + $0x210] sm:$0xff]  }
  0xfb   :  { %7637 = vst.msk [vmem:[%s14710_s3 + $0x38] sm:$0xf] %vm7622_vm3, %v9261_v58  ;;  %v9262_v2 = vpack.c.bf16 %v4941_v59, %v4941_v59  ;;  %7909 = vst.msk [vmem:[%s14710_s3 + $0x478] sm:$0xf] %vm7622_vm3, %v9533_v60  ;;  %v9534_v3 = vpack.c.bf16 %v5213_v61, %v5213_v61  ;;  %v10737_v56 = vld [vmem:[%s14708_s0 + $0x650] sm:$0xff]  }
  0xfc   :  { %7635 = vst.msk [vmem:[%s14710_s3 + $0x30] sm:$0xf] %vm7622_vm3, %v9259_v62  ;;  %v9260_v4 = vpack.c.bf16 %v4939_v63, %v4939_v63  ;;  %7907 = vst.msk [vmem:[%s14710_s3 + $0x470] sm:$0xf] %vm7622_vm3, %v9531_v0  ;;  %v10077_v5 = vpop.f32.mrb[16].mxu0  ;;  %v9532_v6 = vpack.c.bf16 %v5211_v1, %v5211_v1  ;;  %v10349_v8 = vpop.f32.mrb[16].mxu1 }
  0xfd   :  { %7638 = vst.msk [vmem:[%s14710_s3 + $0x3c] sm:$0xf] %vm7622_vm3, %v9262_v2  ;;  %7910 = vst.msk [vmem:[%s14710_s3 + $0x47c] sm:$0xf] %vm7622_vm3, %v9534_v3  ;;  %v2841_v10 = vadd.f32 %v10077_v5, %v11341_v51  ;;  %v2832_v11 = vpop.f32.mrb[17].mxu0  ;;  %v3929_v12 = vadd.f32 %v10349_v8, %v11341_v51  ;;  %v3920_v13 = vpop.f32.mrb[17].mxu1 }
  0xfe   :  { %7636 = vst.msk [vmem:[%s14710_s3 + $0x34] sm:$0xf] %vm7622_vm3, %v9260_v4  ;;  %7908 = vst.msk [vmem:[%s14710_s3 + $0x474] sm:$0xf] %vm7622_vm3, %v9532_v6  ;;  %v2833_v14 = vadd.f32 %v11341_v51, %v2832_v11  ;;  %v10078_v15 = vpop.f32.mrb[18].mxu0  ;;  %v3921_v16 = vadd.f32 %v11341_v51, %v3920_v13  ;;  %v10350_v17 = vpop.f32.mrb[18].mxu1 }
  0xff   :  { %v4944_v20 = vmax.f32 %v2841_v10, 0.0  ;;  %v2844_v21 = vadd.f32 %v10078_v15, %v11341_v51  ;;  %v2835_v22 = vpop.f32.mrb[19].mxu0  ;;  %v5216_v23 = vmax.f32 %v3929_v12, 0.0  ;;  %v3932_v24 = vadd.f32 %v10350_v17, %v11341_v51  ;;  %v3923_v25 = vpop.f32.mrb[19].mxu1 }
 0x100   :  { %v4942_v26 = vmax.f32 %v2833_v14, 0.0  ;;  %v2836_v27 = vadd.f32 %v11341_v51, %v2835_v22  ;;  %v5214_v28 = vmax.f32 %v3921_v16, 0.0  ;;  %v3924_v29 = vadd.f32 %v11341_v51, %v3923_v25  ;;  %v10738_v22 = vld [vmem:[%s14708_s0 + $0x658] sm:$0xff]  }
 0x101   :  { %v9265_v30 = vpack.c.bf16 %v4944_v20, %v4944_v20  ;;  %v4945_v31 = vmax.f32 %v2844_v21, 0.0  ;;  %10184 = vmatmul.mubr.msk.bf16.gmra.mrb[124].mxu0 %vm1916_vm2, %v10728_v7  ;;  %v9537_v32 = vpack.c.bf16 %v5216_v23, %v5216_v23  ;;  %v5217_v33 = vmax.f32 %v3932_v24, 0.0  ;;  %10456 = vmatmul.mubr.msk.bf16.gmra.mrb[124].mxu1 %vm1916_vm2, %v10730_v9 }
 0x102   :  { %v9263_v34 = vpack.c.bf16 %v4942_v26, %v4942_v26  ;;  %v4943_v35 = vmax.f32 %v2836_v27, 0.0  ;;  %v9535_v36 = vpack.c.bf16 %v5214_v28, %v5214_v28  ;;  %v5215_v37 = vmax.f32 %v3924_v29, 0.0  ;;  %10187 = vmatprep.mubr.msk.bf16.mxu0 %vm1916_vm2, %v10731_v18  ;;  %10459 = vmatprep.mubr.msk.bf16.mxu1 %vm1916_vm2, %v10733_v19  ;;  %v10736_v19 = vld [vmem:[%s14708_s0 + $0x218] sm:$0xff]   ;;  %v10739_v27 = vld [vmem:[%s14708_s0 + $0x220] sm:$0xff]  }
 0x103   :  { %7641 = vst.msk [vmem:[%s14710_s3 + $0x48] sm:$0xf] %vm7622_vm3, %v9265_v30  ;;  %v9266_v38 = vpack.c.bf16 %v4945_v31, %v4945_v31  ;;  %7913 = vst.msk [vmem:[%s14710_s3 + $0x488] sm:$0xf] %vm7622_vm3, %v9537_v32  ;;  %v9538_v39 = vpack.c.bf16 %v5217_v33, %v5217_v33  ;;  %v10741_v28 = vld [vmem:[%s14708_s0 + $0x660] sm:$0xff]  }
 0x104   :  { %7639 = vst.msk [vmem:[%s14710_s3 + $0x40] sm:$0xf] %vm7622_vm3, %v9263_v34  ;;  %v9264_v40 = vpack.c.bf16 %v4943_v35, %v4943_v35  ;;  %7911 = vst.msk [vmem:[%s14710_s3 + $0x480] sm:$0xf] %vm7622_vm3, %v9535_v36  ;;  %v10081_v41 = vpop.f32.mrb[20].mxu0  ;;  %v9536_v42 = vpack.c.bf16 %v5215_v37, %v5215_v37  ;;  %v10353_v43 = vpop.f32.mrb[20].mxu1 }
 0x105   :  { %7642 = vst.msk [vmem:[%s14710_s3 + $0x4c] sm:$0xf] %vm7622_vm3, %v9266_v38  ;;  %7914 = vst.msk [vmem:[%s14710_s3 + $0x48c] sm:$0xf] %vm7622_vm3, %v9538_v39  ;;  %v2857_v44 = vadd.f32 %v10081_v41, %v11341_v51  ;;  %v2848_v45 = vpop.f32.mrb[21].mxu0  ;;  %v3945_v47 = vadd.f32 %v10353_v43, %v11341_v51  ;;  %v3936_v48 = vpop.f32.mrb[21].mxu1 }
 0x106   :  { %7640 = vst.msk [vmem:[%s14710_s3 + $0x44] sm:$0xf] %vm7622_vm3, %v9264_v40  ;;  %7912 = vst.msk [vmem:[%s14710_s3 + $0x484] sm:$0xf] %vm7622_vm3, %v9536_v42  ;;  %v2849_v50 = vadd.f32 %v11341_v51, %v2848_v45  ;;  %v10082_v52 = vpop.f32.mrb[22].mxu0  ;;  %v3937_v53 = vadd.f32 %v11341_v51, %v3936_v48  ;;  %v10354_v54 = vpop.f32.mrb[22].mxu1 }
 0x107   :  { %v4948_v57 = vmax.f32 %v2857_v44, 0.0  ;;  %v2860_v58 = vadd.f32 %v10082_v52, %v11341_v51  ;;  %v2851_v59 = vpop.f32.mrb[23].mxu0  ;;  %v5220_v60 = vmax.f32 %v3945_v47, 0.0  ;;  %v3948_v61 = vadd.f32 %v10354_v54, %v11341_v51  ;;  %v3939_v62 = vpop.f32.mrb[23].mxu1 }
 0x108   :  { %v4946_v63 = vmax.f32 %v2849_v50, 0.0  ;;  %v2852_v0 = vadd.f32 %v11341_v51, %v2851_v59  ;;  %v5218_v1 = vmax.f32 %v3937_v53, 0.0  ;;  %v3940_v2 = vadd.f32 %v11341_v51, %v3939_v62  ;;  %v10742_v59 = vld [vmem:[%s14708_s0 + $0x668] sm:$0xff]  }
 0x109   :  { %v9269_v3 = vpack.c.bf16 %v4948_v57, %v4948_v57  ;;  %v4949_v4 = vmax.f32 %v2860_v58, 0.0  ;;  %10188 = vmatmul.mubr.msk.bf16.gmra.mrb[128].mxu0 %vm1916_vm2, %v10732_v46  ;;  %v9541_v5 = vpack.c.bf16 %v5220_v60, %v5220_v60  ;;  %v5221_v6 = vmax.f32 %v3948_v61, 0.0  ;;  %10460 = vmatmul.mubr.msk.bf16.gmra.mrb[128].mxu1 %vm1916_vm2, %v10734_v49 }
 0x10a   :  { %v9267_v7 = vpack.c.bf16 %v4946_v63, %v4946_v63  ;;  %v4947_v8 = vmax.f32 %v2852_v0, 0.0  ;;  %v9539_v9 = vpack.c.bf16 %v5218_v1, %v5218_v1  ;;  %v5219_v10 = vmax.f32 %v3940_v2, 0.0  ;;  %10191 = vmatprep.mubr.msk.bf16.mxu0 %vm1916_vm2, %v10735_v55  ;;  %10463 = vmatprep.mubr.msk.bf16.mxu1 %vm1916_vm2, %v10737_v56  ;;  %v10740_v56 = vld [vmem:[%s14708_s0 + $0x228] sm:$0xff]   ;;  %v10743_v0 = vld [vmem:[%s14708_s0 + $0x230] sm:$0xff]  }
 0x10b   :  { %7645 = vst.msk [vmem:[%s14710_s3 + $0x58] sm:$0xf] %vm7622_vm3, %v9269_v3  ;;  %v9270_v11 = vpack.c.bf16 %v4949_v4, %v4949_v4  ;;  %7917 = vst.msk [vmem:[%s14710_s3 + $0x498] sm:$0xf] %vm7622_vm3, %v9541_v5  ;;  %v9542_v12 = vpack.c.bf16 %v5221_v6, %v5221_v6  ;;  %v10745_v1 = vld [vmem:[%s14708_s0 + $0x670] sm:$0xff]  }
 0x10c   :  { %7643 = vst.msk [vmem:[%s14710_s3 + $0x50] sm:$0xf] %vm7622_vm3, %v9267_v7  ;;  %v9268_v13 = vpack.c.bf16 %v4947_v8, %v4947_v8  ;;  %7915 = vst.msk [vmem:[%s14710_s3 + $0x490] sm:$0xf] %vm7622_vm3, %v9539_v9  ;;  %v10085_v14 = vpop.f32.mrb[24].mxu0  ;;  %v9540_v15 = vpack.c.bf16 %v5219_v10, %v5219_v10  ;;  %v10357_v16 = vpop.f32.mrb[24].mxu1 }
 0x10d   :  { %7646 = vst.msk [vmem:[%s14710_s3 + $0x5c] sm:$0xf] %vm7622_vm3, %v9270_v11  ;;  %7918 = vst.msk [vmem:[%s14710_s3 + $0x49c] sm:$0xf] %vm7622_vm3, %v9542_v12  ;;  %v2873_v17 = vadd.f32 %v10085_v14, %v11341_v51  ;;  %v2864_v18 = vpop.f32.mrb[25].mxu0  ;;  %v3961_v20 = vadd.f32 %v10357_v16, %v11341_v51  ;;  %v3952_v21 = vpop.f32.mrb[25].mxu1 }
 0x10e   :  { %7644 = vst.msk [vmem:[%s14710_s3 + $0x54] sm:$0xf] %vm7622_vm3, %v9268_v13  ;;  %7916 = vst.msk [vmem:[%s14710_s3 + $0x494] sm:$0xf] %vm7622_vm3, %v9540_v15  ;;  %v2865_v23 = vadd.f32 %v11341_v51, %v2864_v18  ;;  %v10086_v24 = vpop.f32.mrb[26].mxu0  ;;  %v3953_v25 = vadd.f32 %v11341_v51, %v3952_v21  ;;  %v10358_v26 = vpop.f32.mrb[26].mxu1 }
 0x10f   :  { %v4952_v29 = vmax.f32 %v2873_v17, 0.0  ;;  %v2876_v30 = vadd.f32 %v10086_v24, %v11341_v51  ;;  %v2867_v31 = vpop.f32.mrb[27].mxu0  ;;  %v5224_v32 = vmax.f32 %v3961_v20, 0.0  ;;  %v3964_v33 = vadd.f32 %v10358_v26, %v11341_v51  ;;  %v3955_v34 = vpop.f32.mrb[27].mxu1 }
 0x110   :  { %v4950_v35 = vmax.f32 %v2865_v23, 0.0  ;;  %v2868_v36 = vadd.f32 %v11341_v51, %v2867_v31  ;;  %v5222_v37 = vmax.f32 %v3953_v25, 0.0  ;;  %v3956_v38 = vadd.f32 %v11341_v51, %v3955_v34  ;;  %v10746_v31 = vld [vmem:[%s14708_s0 + $0x678] sm:$0xff]  }
 0x111   :  { %v9273_v39 = vpack.c.bf16 %v4952_v29, %v4952_v29  ;;  %v4953_v40 = vmax.f32 %v2876_v30, 0.0  ;;  %10192 = vmatmul.mubr.msk.bf16.gmra.mrb[132].mxu0 %vm1916_vm2, %v10736_v19  ;;  %v9545_v41 = vpack.c.bf16 %v5224_v32, %v5224_v32  ;;  %v5225_v42 = vmax.f32 %v3964_v33, 0.0  ;;  %10464 = vmatmul.mubr.msk.bf16.gmra.mrb[132].mxu1 %vm1916_vm2, %v10738_v22 }
 0x112   :  { %v9271_v43 = vpack.c.bf16 %v4950_v35, %v4950_v35  ;;  %v4951_v44 = vmax.f32 %v2868_v36, 0.0  ;;  %v9543_v45 = vpack.c.bf16 %v5222_v37, %v5222_v37  ;;  %v5223_v46 = vmax.f32 %v3956_v38, 0.0  ;;  %10195 = vmatprep.mubr.msk.bf16.mxu0 %vm1916_vm2, %v10739_v27  ;;  %10467 = vmatprep.mubr.msk.bf16.mxu1 %vm1916_vm2, %v10741_v28  ;;  %v10744_v28 = vld [vmem:[%s14708_s0 + $0x238] sm:$0xff]   ;;  %v10747_v36 = vld [vmem:[%s14708_s0 + $0x240] sm:$0xff]  }
 0x113   :  { %7649 = vst.msk [vmem:[%s14710_s3 + $0x68] sm:$0xf] %vm7622_vm3, %v9273_v39  ;;  %v9274_v47 = vpack.c.bf16 %v4953_v40, %v4953_v40  ;;  %7921 = vst.msk [vmem:[%s14710_s3 + $0x4a8] sm:$0xf] %vm7622_vm3, %v9545_v41  ;;  %v9546_v48 = vpack.c.bf16 %v5225_v42, %v5225_v42  ;;  %v10749_v37 = vld [vmem:[%s14708_s0 + $0x680] sm:$0xff]  }
 0x114   :  { %7647 = vst.msk [vmem:[%s14710_s3 + $0x60] sm:$0xf] %vm7622_vm3, %v9271_v43  ;;  %v9272_v49 = vpack.c.bf16 %v4951_v44, %v4951_v44  ;;  %7919 = vst.msk [vmem:[%s14710_s3 + $0x4a0] sm:$0xf] %vm7622_vm3, %v9543_v45  ;;  %v10089_v50 = vpop.f32.mrb[28].mxu0  ;;  %v9544_v52 = vpack.c.bf16 %v5223_v46, %v5223_v46  ;;  %v10361_v53 = vpop.f32.mrb[28].mxu1 }
 0x115   :  { %7650 = vst.msk [vmem:[%s14710_s3 + $0x6c] sm:$0xf] %vm7622_vm3, %v9274_v47  ;;  %7922 = vst.msk [vmem:[%s14710_s3 + $0x4ac] sm:$0xf] %vm7622_vm3, %v9546_v48  ;;  %v2889_v54 = vadd.f32 %v10089_v50, %v11341_v51  ;;  %v2880_v55 = vpop.f32.mrb[29].mxu0  ;;  %v3977_v57 = vadd.f32 %v10361_v53, %v11341_v51  ;;  %v3968_v58 = vpop.f32.mrb[29].mxu1 }
 0x116   :  { %7648 = vst.msk [vmem:[%s14710_s3 + $0x64] sm:$0xf] %vm7622_vm3, %v9272_v49  ;;  %7920 = vst.msk [vmem:[%s14710_s3 + $0x4a4] sm:$0xf] %vm7622_vm3, %v9544_v52  ;;  %v2881_v60 = vadd.f32 %v11341_v51, %v2880_v55  ;;  %v10090_v61 = vpop.f32.mrb[30].mxu0  ;;  %v3969_v62 = vadd.f32 %v11341_v51, %v3968_v58  ;;  %v10362_v63 = vpop.f32.mrb[30].mxu1 }
 0x117   :  { %v4956_v2 = vmax.f32 %v2889_v54, 0.0  ;;  %v2892_v3 = vadd.f32 %v10090_v61, %v11341_v51  ;;  %v2883_v4 = vpop.f32.mrb[31].mxu0  ;;  %v5228_v5 = vmax.f32 %v3977_v57, 0.0  ;;  %v3980_v6 = vadd.f32 %v10362_v63, %v11341_v51  ;;  %v3971_v7 = vpop.f32.mrb[31].mxu1 }
 0x118   :  { %v4954_v8 = vmax.f32 %v2881_v60, 0.0  ;;  %v2884_v9 = vadd.f32 %v11341_v51, %v2883_v4  ;;  %v5226_v10 = vmax.f32 %v3969_v62, 0.0  ;;  %v3972_v11 = vadd.f32 %v11341_v51, %v3971_v7  ;;  %v10750_v4 = vld [vmem:[%s14708_s0 + $0x688] sm:$0xff]  }
 0x119   :  { %v9277_v12 = vpack.c.bf16 %v4956_v2, %v4956_v2  ;;  %v4957_v13 = vmax.f32 %v2892_v3, 0.0  ;;  %10196 = vmatmul.mubr.msk.bf16.gmra.mrb[136].mxu0 %vm1916_vm2, %v10740_v56  ;;  %v9549_v14 = vpack.c.bf16 %v5228_v5, %v5228_v5  ;;  %v5229_v15 = vmax.f32 %v3980_v6, 0.0  ;;  %10468 = vmatmul.mubr.msk.bf16.gmra.mrb[136].mxu1 %vm1916_vm2, %v10742_v59  ;;  %v11862_v5 = vld [vmem:[%s14709_s2] ss:$0 sm:$0xff] }
 0x11a   :  { %v9275_v16 = vpack.c.bf16 %v4954_v8, %v4954_v8  ;;  %v4955_v17 = vmax.f32 %v2884_v9, 0.0  ;;  %v9547_v18 = vpack.c.bf16 %v5226_v10, %v5226_v10  ;;  %v5227_v19 = vmax.f32 %v3972_v11, 0.0  ;;  %10199 = vmatprep.mubr.msk.bf16.mxu0 %vm1916_vm2, %v10743_v0  ;;  %10471 = vmatprep.mubr.msk.bf16.mxu1 %vm1916_vm2, %v10745_v1  ;;  %v10748_v1 = vld [vmem:[%s14708_s0 + $0x248] sm:$0xff]   ;;  %v10751_v9 = vld [vmem:[%s14708_s0 + $0x250] sm:$0xff]  }
 0x11b   :  { %7653 = vst.msk [vmem:[%s14710_s3 + $0x78] sm:$0xf] %vm7622_vm3, %v9277_v12  ;;  %v9278_v20 = vpack.c.bf16 %v4957_v13, %v4957_v13  ;;  %7925 = vst.msk [vmem:[%s14710_s3 + $0x4b8] sm:$0xf] %vm7622_vm3, %v9549_v14  ;;  %v9550_v21 = vpack.c.bf16 %v5229_v15, %v5229_v15  ;;  %v10753_v10 = vld [vmem:[%s14708_s0 + $0x690] sm:$0xff]  }
 0x11c   :  { %7651 = vst.msk [vmem:[%s14710_s3 + $0x70] sm:$0xf] %vm7622_vm3, %v9275_v16  ;;  %v9276_v22 = vpack.c.bf16 %v4955_v17, %v4955_v17  ;;  %7923 = vst.msk [vmem:[%s14710_s3 + $0x4b0] sm:$0xf] %vm7622_vm3, %v9547_v18  ;;  %v10093_v23 = vpop.f32.mrb[32].mxu0  ;;  %v9548_v24 = vpack.c.bf16 %v5227_v19, %v5227_v19  ;;  %v10365_v25 = vpop.f32.mrb[32].mxu1 }
 0x11d   :  { %7654 = vst.msk [vmem:[%s14710_s3 + $0x7c] sm:$0xf] %vm7622_vm3, %v9278_v20  ;;  %7926 = vst.msk [vmem:[%s14710_s3 + $0x4bc] sm:$0xf] %vm7622_vm3, %v9550_v21  ;;  %v2905_v26 = vadd.f32 %v10093_v23, %v11341_v51  ;;  %v2896_v27 = vpop.f32.mrb[33].mxu0  ;;  %v3993_v29 = vadd.f32 %v10365_v25, %v11341_v51  ;;  %v3984_v30 = vpop.f32.mrb[33].mxu1 }
 0x11e   :  { %7652 = vst.msk [vmem:[%s14710_s3 + $0x74] sm:$0xf] %vm7622_vm3, %v9276_v22  ;;  %7924 = vst.msk [vmem:[%s14710_s3 + $0x4b4] sm:$0xf] %vm7622_vm3, %v9548_v24  ;;  %v2897_v32 = vadd.f32 %v11341_v51, %v2896_v27  ;;  %v10094_v33 = vpop.f32.mrb[34].mxu0  ;;  %v3985_v34 = vadd.f32 %v11341_v51, %v3984_v30  ;;  %v10366_v35 = vpop.f32.mrb[34].mxu1 }
 0x11f   :  { %v4960_v38 = vmax.f32 %v2905_v26, 0.0  ;;  %v2908_v39 = vadd.f32 %v10094_v33, %v11341_v51  ;;  %v2899_v40 = vpop.f32.mrb[35].mxu0  ;;  %v5232_v41 = vmax.f32 %v3993_v29, 0.0  ;;  %v3996_v42 = vadd.f32 %v10366_v35, %v11341_v51  ;;  %v3987_v43 = vpop.f32.mrb[35].mxu1 }
 0x120   :  { %v4958_v44 = vmax.f32 %v2897_v32, 0.0  ;;  %v2900_v45 = vadd.f32 %v11341_v51, %v2899_v40  ;;  %v5230_v46 = vmax.f32 %v3985_v34, 0.0  ;;  %v3988_v47 = vadd.f32 %v11341_v51, %v3987_v43  ;;  %v10754_v40 = vld [vmem:[%s14708_s0 + $0x698] sm:$0xff]  }
 0x121   :  { %v9281_v48 = vpack.c.bf16 %v4960_v38, %v4960_v38  ;;  %v4961_v49 = vmax.f32 %v2908_v39, 0.0  ;;  %10200 = vmatmul.mubr.msk.bf16.gmra.mrb[140].mxu0 %vm1916_vm2, %v10744_v28  ;;  %v9553_v50 = vpack.c.bf16 %v5232_v41, %v5232_v41  ;;  %v5233_v52 = vmax.f32 %v3996_v42, 0.0  ;;  %10472 = vmatmul.mubr.msk.bf16.gmra.mrb[140].mxu1 %vm1916_vm2, %v10746_v31 }
 0x122   :  { %v9279_v53 = vpack.c.bf16 %v4958_v44, %v4958_v44  ;;  %v4959_v54 = vmax.f32 %v2900_v45, 0.0  ;;  %v9551_v55 = vpack.c.bf16 %v5230_v46, %v5230_v46  ;;  %v5231_v56 = vmax.f32 %v3988_v47, 0.0  ;;  %10203 = vmatprep.mubr.msk.bf16.mxu0 %vm1916_vm2, %v10747_v36  ;;  %10475 = vmatprep.mubr.msk.bf16.mxu1 %vm1916_vm2, %v10749_v37  ;;  %v10752_v37 = vld [vmem:[%s14708_s0 + $0x258] sm:$0xff]   ;;  %v10755_v45 = vld [vmem:[%s14708_s0 + $0x260] sm:$0xff]  }
 0x123   :  { %7657 = vst.msk [vmem:[%s14710_s3 + $0x88] sm:$0xf] %vm7622_vm3, %v9281_v48  ;;  %v9282_v57 = vpack.c.bf16 %v4961_v49, %v4961_v49  ;;  %7929 = vst.msk [vmem:[%s14710_s3 + $0x4c8] sm:$0xf] %vm7622_vm3, %v9553_v50  ;;  %v9554_v58 = vpack.c.bf16 %v5233_v52, %v5233_v52  ;;  %v10757_v46 = vld [vmem:[%s14708_s0 + $0x6a0] sm:$0xff]  }
 0x124   :  { %7655 = vst.msk [vmem:[%s14710_s3 + $0x80] sm:$0xf] %vm7622_vm3, %v9279_v53  ;;  %v9280_v59 = vpack.c.bf16 %v4959_v54, %v4959_v54  ;;  %7927 = vst.msk [vmem:[%s14710_s3 + $0x4c0] sm:$0xf] %vm7622_vm3, %v9551_v55  ;;  %v10097_v60 = vpop.f32.mrb[36].mxu0  ;;  %v9552_v61 = vpack.c.bf16 %v5231_v56, %v5231_v56  ;;  %v10369_v62 = vpop.f32.mrb[36].mxu1 }
 0x125   :  { %7658 = vst.msk [vmem:[%s14710_s3 + $0x8c] sm:$0xf] %vm7622_vm3, %v9282_v57  ;;  %7930 = vst.msk [vmem:[%s14710_s3 + $0x4cc] sm:$0xf] %vm7622_vm3, %v9554_v58  ;;  %v2921_v63 = vadd.f32 %v10097_v60, %v11341_v51  ;;  %v2912_v0 = vpop.f32.mrb[37].mxu0  ;;  %v4009_v2 = vadd.f32 %v10369_v62, %v11341_v51  ;;  %v4000_v3 = vpop.f32.mrb[37].mxu1 }
 0x126   :  { %7656 = vst.msk [vmem:[%s14710_s3 + $0x84] sm:$0xf] %vm7622_vm3, %v9280_v59  ;;  %7928 = vst.msk [vmem:[%s14710_s3 + $0x4c4] sm:$0xf] %vm7622_vm3, %v9552_v61  ;;  %v2913_v51 = vadd.f32 %v11862_v5, %v2912_v0  ;;  %v10098_v6 = vpop.f32.mrb[38].mxu0  ;;  %v4001_v7 = vadd.f32 %v11862_v5, %v4000_v3  ;;  %v10370_v8 = vpop.f32.mrb[38].mxu1 }
 0x127   :  { %v4964_v11 = vmax.f32 %v2921_v63, 0.0  ;;  %v2924_v12 = vadd.f32 %v11862_v5, %v10098_v6  ;;  %v2915_v13 = vpop.f32.mrb[39].mxu0  ;;  %v5236_v14 = vmax.f32 %v4009_v2, 0.0  ;;  %v4012_v15 = vadd.f32 %v11862_v5, %v10370_v8  ;;  %v4003_v16 = vpop.f32.mrb[39].mxu1 }
 0x128   :  { %v4962_v17 = vmax.f32 %v2913_v51, 0.0  ;;  %v2916_v18 = vadd.f32 %v11862_v5, %v2915_v13  ;;  %v5234_v19 = vmax.f32 %v4001_v7, 0.0  ;;  %v4004_v20 = vadd.f32 %v11862_v5, %v4003_v16  ;;  %v10758_v13 = vld [vmem:[%s14708_s0 + $0x6a8] sm:$0xff]  }
 0x129   :  { %v9285_v21 = vpack.c.bf16 %v4964_v11, %v4964_v11  ;;  %v4965_v22 = vmax.f32 %v2924_v12, 0.0  ;;  %10204 = vmatmul.mubr.msk.bf16.gmra.mrb[144].mxu0 %vm1916_vm2, %v10748_v1  ;;  %v9557_v23 = vpack.c.bf16 %v5236_v14, %v5236_v14  ;;  %v5237_v24 = vmax.f32 %v4012_v15, 0.0  ;;  %10476 = vmatmul.mubr.msk.bf16.gmra.mrb[144].mxu1 %vm1916_vm2, %v10750_v4 }
 0x12a   :  { %v9283_v25 = vpack.c.bf16 %v4962_v17, %v4962_v17  ;;  %v4963_v26 = vmax.f32 %v2916_v18, 0.0  ;;  %v9555_v27 = vpack.c.bf16 %v5234_v19, %v5234_v19  ;;  %v5235_v28 = vmax.f32 %v4004_v20, 0.0  ;;  %10207 = vmatprep.mubr.msk.bf16.mxu0 %vm1916_vm2, %v10751_v9  ;;  %10479 = vmatprep.mubr.msk.bf16.mxu1 %vm1916_vm2, %v10753_v10  ;;  %v10756_v10 = vld [vmem:[%s14708_s0 + $0x268] sm:$0xff]   ;;  %v10759_v18 = vld [vmem:[%s14708_s0 + $0x270] sm:$0xff]  }
 0x12b   :  { %7661 = vst.msk [vmem:[%s14710_s3 + $0x98] sm:$0xf] %vm7622_vm3, %v9285_v21  ;;  %v9286_v29 = vpack.c.bf16 %v4965_v22, %v4965_v22  ;;  %7933 = vst.msk [vmem:[%s14710_s3 + $0x4d8] sm:$0xf] %vm7622_vm3, %v9557_v23  ;;  %v9558_v30 = vpack.c.bf16 %v5237_v24, %v5237_v24  ;;  %v10761_v19 = vld [vmem:[%s14708_s0 + $0x6b0] sm:$0xff]  }
 0x12c   :  { %7659 = vst.msk [vmem:[%s14710_s3 + $0x90] sm:$0xf] %vm7622_vm3, %v9283_v25  ;;  %v9284_v31 = vpack.c.bf16 %v4963_v26, %v4963_v26  ;;  %7931 = vst.msk [vmem:[%s14710_s3 + $0x4d0] sm:$0xf] %vm7622_vm3, %v9555_v27  ;;  %v10101_v32 = vpop.f32.mrb[40].mxu0  ;;  %v9556_v33 = vpack.c.bf16 %v5235_v28, %v5235_v28  ;;  %v10373_v34 = vpop.f32.mrb[40].mxu1 }
 0x12d   :  { %7662 = vst.msk [vmem:[%s14710_s3 + $0x9c] sm:$0xf] %vm7622_vm3, %v9286_v29  ;;  %7934 = vst.msk [vmem:[%s14710_s3 + $0x4dc] sm:$0xf] %vm7622_vm3, %v9558_v30  ;;  %v2937_v35 = vadd.f32 %v11862_v5, %v10101_v32  ;;  %v2928_v36 = vpop.f32.mrb[41].mxu0  ;;  %v4025_v38 = vadd.f32 %v11862_v5, %v10373_v34  ;;  %v4016_v39 = vpop.f32.mrb[41].mxu1 }
 0x12e   :  { %7660 = vst.msk [vmem:[%s14710_s3 + $0x94] sm:$0xf] %vm7622_vm3, %v9284_v31  ;;  %7932 = vst.msk [vmem:[%s14710_s3 + $0x4d4] sm:$0xf] %vm7622_vm3, %v9556_v33  ;;  %v2929_v41 = vadd.f32 %v11862_v5, %v2928_v36  ;;  %v10102_v42 = vpop.f32.mrb[42].mxu0  ;;  %v4017_v43 = vadd.f32 %v11862_v5, %v4016_v39  ;;  %v10374_v44 = vpop.f32.mrb[42].mxu1 }
 0x12f   :  { %v4968_v47 = vmax.f32 %v2937_v35, 0.0  ;;  %v2940_v48 = vadd.f32 %v11862_v5, %v10102_v42  ;;  %v2931_v49 = vpop.f32.mrb[43].mxu0  ;;  %v5240_v50 = vmax.f32 %v4025_v38, 0.0  ;;  %v4028_v52 = vadd.f32 %v11862_v5, %v10374_v44  ;;  %v4019_v53 = vpop.f32.mrb[43].mxu1 }
 0x130   :  { %v4966_v54 = vmax.f32 %v2929_v41, 0.0  ;;  %v2932_v55 = vadd.f32 %v11862_v5, %v2931_v49  ;;  %v5238_v56 = vmax.f32 %v4017_v43, 0.0  ;;  %v4020_v57 = vadd.f32 %v11862_v5, %v4019_v53  ;;  %v10762_v49 = vld [vmem:[%s14708_s0 + $0x6b8] sm:$0xff]  }
 0x131   :  { %v9289_v58 = vpack.c.bf16 %v4968_v47, %v4968_v47  ;;  %v4969_v59 = vmax.f32 %v2940_v48, 0.0  ;;  %10208 = vmatmul.mubr.msk.bf16.gmra.mrb[148].mxu0 %vm1916_vm2, %v10752_v37  ;;  %v9561_v60 = vpack.c.bf16 %v5240_v50, %v5240_v50  ;;  %v5241_v61 = vmax.f32 %v4028_v52, 0.0  ;;  %10480 = vmatmul.mubr.msk.bf16.gmra.mrb[148].mxu1 %vm1916_vm2, %v10754_v40 }
 0x132   :  { %v9287_v62 = vpack.c.bf16 %v4966_v54, %v4966_v54  ;;  %v4967_v63 = vmax.f32 %v2932_v55, 0.0  ;;  %v9559_v0 = vpack.c.bf16 %v5238_v56, %v5238_v56  ;;  %v5239_v1 = vmax.f32 %v4020_v57, 0.0  ;;  %10211 = vmatprep.mubr.msk.bf16.mxu0 %vm1916_vm2, %v10755_v45  ;;  %10483 = vmatprep.mubr.msk.bf16.mxu1 %vm1916_vm2, %v10757_v46  ;;  %v10760_v46 = vld [vmem:[%s14708_s0 + $0x278] sm:$0xff]   ;;  %v10763_v55 = vld [vmem:[%s14708_s0 + $0x280] sm:$0xff]  }
 0x133   :  { %7665 = vst.msk [vmem:[%s14710_s3 + $0xa8] sm:$0xf] %vm7622_vm3, %v9289_v58  ;;  %v9290_v2 = vpack.c.bf16 %v4969_v59, %v4969_v59  ;;  %7937 = vst.msk [vmem:[%s14710_s3 + $0x4e8] sm:$0xf] %vm7622_vm3, %v9561_v60  ;;  %v9562_v3 = vpack.c.bf16 %v5241_v61, %v5241_v61  ;;  %v10765_v56 = vld [vmem:[%s14708_s0 + $0x6c0] sm:$0xff]  }
 0x134   :  { %7663 = vst.msk [vmem:[%s14710_s3 + $0xa0] sm:$0xf] %vm7622_vm3, %v9287_v62  ;;  %v9288_v4 = vpack.c.bf16 %v4967_v63, %v4967_v63  ;;  %7935 = vst.msk [vmem:[%s14710_s3 + $0x4e0] sm:$0xf] %vm7622_vm3, %v9559_v0  ;;  %v10105_v51 = vpop.f32.mrb[44].mxu0  ;;  %v9560_v6 = vpack.c.bf16 %v5239_v1, %v5239_v1  ;;  %v10377_v7 = vpop.f32.mrb[44].mxu1 }
 0x135   :  { %7666 = vst.msk [vmem:[%s14710_s3 + $0xac] sm:$0xf] %vm7622_vm3, %v9290_v2  ;;  %7938 = vst.msk [vmem:[%s14710_s3 + $0x4ec] sm:$0xf] %vm7622_vm3, %v9562_v3  ;;  %v2953_v8 = vadd.f32 %v11862_v5, %v10105_v51  ;;  %v2944_v9 = vpop.f32.mrb[45].mxu0  ;;  %v4041_v11 = vadd.f32 %v11862_v5, %v10377_v7  ;;  %v4032_v12 = vpop.f32.mrb[45].mxu1 }
 0x136   :  { %7664 = vst.msk [vmem:[%s14710_s3 + $0xa4] sm:$0xf] %vm7622_vm3, %v9288_v4  ;;  %7936 = vst.msk [vmem:[%s14710_s3 + $0x4e4] sm:$0xf] %vm7622_vm3, %v9560_v6  ;;  %v2945_v14 = vadd.f32 %v11862_v5, %v2944_v9  ;;  %v10106_v15 = vpop.f32.mrb[46].mxu0  ;;  %v4033_v16 = vadd.f32 %v11862_v5, %v4032_v12  ;;  %v10378_v17 = vpop.f32.mrb[46].mxu1 }
 0x137   :  { %v4972_v20 = vmax.f32 %v2953_v8, 0.0  ;;  %v2956_v21 = vadd.f32 %v11862_v5, %v10106_v15  ;;  %v2947_v22 = vpop.f32.mrb[47].mxu0  ;;  %v5244_v23 = vmax.f32 %v4041_v11, 0.0  ;;  %v4044_v24 = vadd.f32 %v11862_v5, %v10378_v17  ;;  %v4035_v25 = vpop.f32.mrb[47].mxu1 }
 0x138   :  { %v4970_v26 = vmax.f32 %v2945_v14, 0.0  ;;  %v2948_v27 = vadd.f32 %v11862_v5, %v2947_v22  ;;  %v5242_v28 = vmax.f32 %v4033_v16, 0.0  ;;  %v4036_v29 = vadd.f32 %v11862_v5, %v4035_v25  ;;  %v10766_v22 = vld [vmem:[%s14708_s0 + $0x6c8] sm:$0xff]  }
 0x139   :  { %v9293_v30 = vpack.c.bf16 %v4972_v20, %v4972_v20  ;;  %v4973_v31 = vmax.f32 %v2956_v21, 0.0  ;;  %10212 = vmatmul.mubr.msk.bf16.gmra.mrb[152].mxu0 %vm1916_vm2, %v10756_v10  ;;  %v9565_v32 = vpack.c.bf16 %v5244_v23, %v5244_v23  ;;  %v5245_v33 = vmax.f32 %v4044_v24, 0.0  ;;  %10484 = vmatmul.mubr.msk.bf16.gmra.mrb[152].mxu1 %vm1916_vm2, %v10758_v13 }
 0x13a   :  { %v9291_v34 = vpack.c.bf16 %v4970_v26, %v4970_v26  ;;  %v4971_v35 = vmax.f32 %v2948_v27, 0.0  ;;  %v9563_v36 = vpack.c.bf16 %v5242_v28, %v5242_v28  ;;  %v5243_v37 = vmax.f32 %v4036_v29, 0.0  ;;  %10215 = vmatprep.mubr.msk.bf16.mxu0 %vm1916_vm2, %v10759_v18  ;;  %10487 = vmatprep.mubr.msk.bf16.mxu1 %vm1916_vm2, %v10761_v19  ;;  %v10764_v19 = vld [vmem:[%s14708_s0 + $0x288] sm:$0xff]   ;;  %v10767_v27 = vld [vmem:[%s14708_s0 + $0x290] sm:$0xff]  }
 0x13b   :  { %7669 = vst.msk [vmem:[%s14710_s3 + $0xb8] sm:$0xf] %vm7622_vm3, %v9293_v30  ;;  %v9294_v38 = vpack.c.bf16 %v4973_v31, %v4973_v31  ;;  %7941 = vst.msk [vmem:[%s14710_s3 + $0x4f8] sm:$0xf] %vm7622_vm3, %v9565_v32  ;;  %v9566_v39 = vpack.c.bf16 %v5245_v33, %v5245_v33  ;;  %v10769_v28 = vld [vmem:[%s14708_s0 + $0x6d0] sm:$0xff]  }
 0x13c   :  { %7667 = vst.msk [vmem:[%s14710_s3 + $0xb0] sm:$0xf] %vm7622_vm3, %v9291_v34  ;;  %v9292_v40 = vpack.c.bf16 %v4971_v35, %v4971_v35  ;;  %7939 = vst.msk [vmem:[%s14710_s3 + $0x4f0] sm:$0xf] %vm7622_vm3, %v9563_v36  ;;  %v10109_v41 = vpop.f32.mrb[48].mxu0  ;;  %v9564_v42 = vpack.c.bf16 %v5243_v37, %v5243_v37  ;;  %v10381_v43 = vpop.f32.mrb[48].mxu1 }
 0x13d   :  { %7670 = vst.msk [vmem:[%s14710_s3 + $0xbc] sm:$0xf] %vm7622_vm3, %v9294_v38  ;;  %7942 = vst.msk [vmem:[%s14710_s3 + $0x4fc] sm:$0xf] %vm7622_vm3, %v9566_v39  ;;  %v2969_v44 = vadd.f32 %v11862_v5, %v10109_v41  ;;  %v2960_v45 = vpop.f32.mrb[49].mxu0  ;;  %v4057_v47 = vadd.f32 %v11862_v5, %v10381_v43  ;;  %v4048_v48 = vpop.f32.mrb[49].mxu1 }
 0x13e   :  { %7668 = vst.msk [vmem:[%s14710_s3 + $0xb4] sm:$0xf] %vm7622_vm3, %v9292_v40  ;;  %7940 = vst.msk [vmem:[%s14710_s3 + $0x4f4] sm:$0xf] %vm7622_vm3, %v9564_v42  ;;  %v2961_v50 = vadd.f32 %v11862_v5, %v2960_v45  ;;  %v10110_v52 = vpop.f32.mrb[50].mxu0  ;;  %v4049_v53 = vadd.f32 %v11862_v5, %v4048_v48  ;;  %v10382_v54 = vpop.f32.mrb[50].mxu1 }
 0x13f   :  { %v4976_v57 = vmax.f32 %v2969_v44, 0.0  ;;  %v2972_v58 = vadd.f32 %v11862_v5, %v10110_v52  ;;  %v2963_v59 = vpop.f32.mrb[51].mxu0  ;;  %v5248_v60 = vmax.f32 %v4057_v47, 0.0  ;;  %v4060_v61 = vadd.f32 %v11862_v5, %v10382_v54  ;;  %v4051_v62 = vpop.f32.mrb[51].mxu1 }
 0x140   :  { %v4974_v63 = vmax.f32 %v2961_v50, 0.0  ;;  %v2964_v0 = vadd.f32 %v11862_v5, %v2963_v59  ;;  %v5246_v1 = vmax.f32 %v4049_v53, 0.0  ;;  %v4052_v2 = vadd.f32 %v11862_v5, %v4051_v62  ;;  %v10770_v59 = vld [vmem:[%s14708_s0 + $0x6d8] sm:$0xff]  }
 0x141   :  { %v9297_v3 = vpack.c.bf16 %v4976_v57, %v4976_v57  ;;  %v4977_v4 = vmax.f32 %v2972_v58, 0.0  ;;  %10216 = vmatmul.mubr.msk.bf16.gmra.mrb[156].mxu0 %vm1916_vm2, %v10760_v46  ;;  %v9569_v51 = vpack.c.bf16 %v5248_v60, %v5248_v60  ;;  %v5249_v6 = vmax.f32 %v4060_v61, 0.0  ;;  %10488 = vmatmul.mubr.msk.bf16.gmra.mrb[156].mxu1 %vm1916_vm2, %v10762_v49 }
 0x142   :  { %v9295_v7 = vpack.c.bf16 %v4974_v63, %v4974_v63  ;;  %v4975_v8 = vmax.f32 %v2964_v0, 0.0  ;;  %v9567_v9 = vpack.c.bf16 %v5246_v1, %v5246_v1  ;;  %v5247_v10 = vmax.f32 %v4052_v2, 0.0  ;;  %10219 = vmatprep.mubr.msk.bf16.mxu0 %vm1916_vm2, %v10763_v55  ;;  %10491 = vmatprep.mubr.msk.bf16.mxu1 %vm1916_vm2, %v10765_v56  ;;  %v10768_v56 = vld [vmem:[%s14708_s0 + $0x298] sm:$0xff]   ;;  %v10771_v0 = vld [vmem:[%s14708_s0 + $0x2a0] sm:$0xff]  }
 0x143   :  { %7673 = vst.msk [vmem:[%s14710_s3 + $0xc8] sm:$0xf] %vm7622_vm3, %v9297_v3  ;;  %v9298_v11 = vpack.c.bf16 %v4977_v4, %v4977_v4  ;;  %7945 = vst.msk [vmem:[%s14710_s3 + $0x508] sm:$0xf] %vm7622_vm3, %v9569_v51  ;;  %v9570_v12 = vpack.c.bf16 %v5249_v6, %v5249_v6  ;;  %v10773_v1 = vld [vmem:[%s14708_s0 + $0x6e0] sm:$0xff]  }
 0x144   :  { %7671 = vst.msk [vmem:[%s14710_s3 + $0xc0] sm:$0xf] %vm7622_vm3, %v9295_v7  ;;  %v9296_v13 = vpack.c.bf16 %v4975_v8, %v4975_v8  ;;  %7943 = vst.msk [vmem:[%s14710_s3 + $0x500] sm:$0xf] %vm7622_vm3, %v9567_v9  ;;  %v10113_v14 = vpop.f32.mrb[52].mxu0  ;;  %v9568_v15 = vpack.c.bf16 %v5247_v10, %v5247_v10  ;;  %v10385_v16 = vpop.f32.mrb[52].mxu1 }
 0x145   :  { %7674 = vst.msk [vmem:[%s14710_s3 + $0xcc] sm:$0xf] %vm7622_vm3, %v9298_v11  ;;  %7946 = vst.msk [vmem:[%s14710_s3 + $0x50c] sm:$0xf] %vm7622_vm3, %v9570_v12  ;;  %v2985_v17 = vadd.f32 %v11862_v5, %v10113_v14  ;;  %v2976_v18 = vpop.f32.mrb[53].mxu0  ;;  %v4073_v20 = vadd.f32 %v11862_v5, %v10385_v16  ;;  %v4064_v21 = vpop.f32.mrb[53].mxu1 }
 0x146   :  { %7672 = vst.msk [vmem:[%s14710_s3 + $0xc4] sm:$0xf] %vm7622_vm3, %v9296_v13  ;;  %7944 = vst.msk [vmem:[%s14710_s3 + $0x504] sm:$0xf] %vm7622_vm3, %v9568_v15  ;;  %v2977_v23 = vadd.f32 %v11862_v5, %v2976_v18  ;;  %v10114_v24 = vpop.f32.mrb[54].mxu0  ;;  %v4065_v25 = vadd.f32 %v11862_v5, %v4064_v21  ;;  %v10386_v26 = vpop.f32.mrb[54].mxu1 }
 0x147   :  { %v4980_v29 = vmax.f32 %v2985_v17, 0.0  ;;  %v2988_v30 = vadd.f32 %v11862_v5, %v10114_v24  ;;  %v2979_v31 = vpop.f32.mrb[55].mxu0  ;;  %v5252_v32 = vmax.f32 %v4073_v20, 0.0  ;;  %v4076_v33 = vadd.f32 %v11862_v5, %v10386_v26  ;;  %v4067_v34 = vpop.f32.mrb[55].mxu1 }
 0x148   :  { %v4978_v35 = vmax.f32 %v2977_v23, 0.0  ;;  %v2980_v36 = vadd.f32 %v11862_v5, %v2979_v31  ;;  %v5250_v37 = vmax.f32 %v4065_v25, 0.0  ;;  %v4068_v38 = vadd.f32 %v11862_v5, %v4067_v34  ;;  %v10774_v31 = vld [vmem:[%s14708_s0 + $0x6e8] sm:$0xff]  }
 0x149   :  { %v9301_v39 = vpack.c.bf16 %v4980_v29, %v4980_v29  ;;  %v4981_v40 = vmax.f32 %v2988_v30, 0.0  ;;  %10220 = vmatmul.mubr.msk.bf16.gmra.mrb[160].mxu0 %vm1916_vm2, %v10764_v19  ;;  %v9573_v41 = vpack.c.bf16 %v5252_v32, %v5252_v32  ;;  %v5253_v42 = vmax.f32 %v4076_v33, 0.0  ;;  %10492 = vmatmul.mubr.msk.bf16.gmra.mrb[160].mxu1 %vm1916_vm2, %v10766_v22 }
 0x14a   :  { %v9299_v43 = vpack.c.bf16 %v4978_v35, %v4978_v35  ;;  %v4979_v44 = vmax.f32 %v2980_v36, 0.0  ;;  %v9571_v45 = vpack.c.bf16 %v5250_v37, %v5250_v37  ;;  %v5251_v46 = vmax.f32 %v4068_v38, 0.0  ;;  %10223 = vmatprep.mubr.msk.bf16.mxu0 %vm1916_vm2, %v10767_v27  ;;  %10495 = vmatprep.mubr.msk.bf16.mxu1 %vm1916_vm2, %v10769_v28  ;;  %v10772_v28 = vld [vmem:[%s14708_s0 + $0x2a8] sm:$0xff]   ;;  %v10775_v36 = vld [vmem:[%s14708_s0 + $0x2b0] sm:$0xff]  }
 0x14b   :  { %7677 = vst.msk [vmem:[%s14710_s3 + $0xd8] sm:$0xf] %vm7622_vm3, %v9301_v39  ;;  %v9302_v47 = vpack.c.bf16 %v4981_v40, %v4981_v40  ;;  %7949 = vst.msk [vmem:[%s14710_s3 + $0x518] sm:$0xf] %vm7622_vm3, %v9573_v41  ;;  %v9574_v48 = vpack.c.bf16 %v5253_v42, %v5253_v42  ;;  %v10777_v37 = vld [vmem:[%s14708_s0 + $0x6f0] sm:$0xff]  }
 0x14c   :  { %7675 = vst.msk [vmem:[%s14710_s3 + $0xd0] sm:$0xf] %vm7622_vm3, %v9299_v43  ;;  %v9300_v49 = vpack.c.bf16 %v4979_v44, %v4979_v44  ;;  %7947 = vst.msk [vmem:[%s14710_s3 + $0x510] sm:$0xf] %vm7622_vm3, %v9571_v45  ;;  %v10117_v50 = vpop.f32.mrb[56].mxu0  ;;  %v9572_v52 = vpack.c.bf16 %v5251_v46, %v5251_v46  ;;  %v10389_v53 = vpop.f32.mrb[56].mxu1 }
 0x14d   :  { %7678 = vst.msk [vmem:[%s14710_s3 + $0xdc] sm:$0xf] %vm7622_vm3, %v9302_v47  ;;  %7950 = vst.msk [vmem:[%s14710_s3 + $0x51c] sm:$0xf] %vm7622_vm3, %v9574_v48  ;;  %v3001_v54 = vadd.f32 %v11862_v5, %v10117_v50  ;;  %v2992_v55 = vpop.f32.mrb[57].mxu0  ;;  %v4089_v57 = vadd.f32 %v11862_v5, %v10389_v53  ;;  %v4080_v58 = vpop.f32.mrb[57].mxu1 }
 0x14e   :  { %7676 = vst.msk [vmem:[%s14710_s3 + $0xd4] sm:$0xf] %vm7622_vm3, %v9300_v49  ;;  %7948 = vst.msk [vmem:[%s14710_s3 + $0x514] sm:$0xf] %vm7622_vm3, %v9572_v52  ;;  %v2993_v60 = vadd.f32 %v11862_v5, %v2992_v55  ;;  %v10118_v61 = vpop.f32.mrb[58].mxu0  ;;  %v4081_v62 = vadd.f32 %v11862_v5, %v4080_v58  ;;  %v10390_v63 = vpop.f32.mrb[58].mxu1 }
 0x14f   :  { %v4984_v2 = vmax.f32 %v3001_v54, 0.0  ;;  %v3004_v3 = vadd.f32 %v11862_v5, %v10118_v61  ;;  %v2995_v4 = vpop.f32.mrb[59].mxu0  ;;  %v5256_v51 = vmax.f32 %v4089_v57, 0.0  ;;  %v4092_v6 = vadd.f32 %v11862_v5, %v10390_v63  ;;  %v4083_v7 = vpop.f32.mrb[59].mxu1 }
 0x150   :  { %v4982_v8 = vmax.f32 %v2993_v60, 0.0  ;;  %v2996_v9 = vadd.f32 %v11862_v5, %v2995_v4  ;;  %v5254_v10 = vmax.f32 %v4081_v62, 0.0  ;;  %v4084_v11 = vadd.f32 %v11862_v5, %v4083_v7  ;;  %v10778_v4 = vld [vmem:[%s14708_s0 + $0x6f8] sm:$0xff]  }
 0x151   :  { %v9305_v12 = vpack.c.bf16 %v4984_v2, %v4984_v2  ;;  %v4985_v13 = vmax.f32 %v3004_v3, 0.0  ;;  %10224 = vmatmul.mubr.msk.bf16.gmra.mrb[164].mxu0 %vm1916_vm2, %v10768_v56  ;;  %v9577_v14 = vpack.c.bf16 %v5256_v51, %v5256_v51  ;;  %v5257_v15 = vmax.f32 %v4092_v6, 0.0  ;;  %10496 = vmatmul.mubr.msk.bf16.gmra.mrb[164].mxu1 %vm1916_vm2, %v10770_v59 }
 0x152   :  { %v9303_v16 = vpack.c.bf16 %v4982_v8, %v4982_v8  ;;  %v4983_v17 = vmax.f32 %v2996_v9, 0.0  ;;  %v9575_v18 = vpack.c.bf16 %v5254_v10, %v5254_v10  ;;  %v5255_v19 = vmax.f32 %v4084_v11, 0.0  ;;  %10227 = vmatprep.mubr.msk.bf16.mxu0 %vm1916_vm2, %v10771_v0  ;;  %10499 = vmatprep.mubr.msk.bf16.mxu1 %vm1916_vm2, %v10773_v1  ;;  %v10776_v1 = vld [vmem:[%s14708_s0 + $0x2b8] sm:$0xff]   ;;  %v10779_v9 = vld [vmem:[%s14708_s0 + $0x2c0] sm:$0xff]  }
 0x153   :  { %7681 = vst.msk [vmem:[%s14710_s3 + $0xe8] sm:$0xf] %vm7622_vm3, %v9305_v12  ;;  %v9306_v20 = vpack.c.bf16 %v4985_v13, %v4985_v13  ;;  %7953 = vst.msk [vmem:[%s14710_s3 + $0x528] sm:$0xf] %vm7622_vm3, %v9577_v14  ;;  %v9578_v21 = vpack.c.bf16 %v5257_v15, %v5257_v15  ;;  %v10781_v10 = vld [vmem:[%s14708_s0 + $0x700] sm:$0xff]  }
 0x154   :  { %7679 = vst.msk [vmem:[%s14710_s3 + $0xe0] sm:$0xf] %vm7622_vm3, %v9303_v16  ;;  %v9304_v22 = vpack.c.bf16 %v4983_v17, %v4983_v17  ;;  %7951 = vst.msk [vmem:[%s14710_s3 + $0x520] sm:$0xf] %vm7622_vm3, %v9575_v18  ;;  %v10121_v23 = vpop.f32.mrb[60].mxu0  ;;  %v9576_v24 = vpack.c.bf16 %v5255_v19, %v5255_v19  ;;  %v10393_v25 = vpop.f32.mrb[60].mxu1 }
 0x155   :  { %7682 = vst.msk [vmem:[%s14710_s3 + $0xec] sm:$0xf] %vm7622_vm3, %v9306_v20  ;;  %7954 = vst.msk [vmem:[%s14710_s3 + $0x52c] sm:$0xf] %vm7622_vm3, %v9578_v21  ;;  %v3017_v26 = vadd.f32 %v11862_v5, %v10121_v23  ;;  %v3008_v27 = vpop.f32.mrb[61].mxu0  ;;  %v4105_v29 = vadd.f32 %v11862_v5, %v10393_v25  ;;  %v4096_v30 = vpop.f32.mrb[61].mxu1 }
 0x156   :  { %7680 = vst.msk [vmem:[%s14710_s3 + $0xe4] sm:$0xf] %vm7622_vm3, %v9304_v22  ;;  %7952 = vst.msk [vmem:[%s14710_s3 + $0x524] sm:$0xf] %vm7622_vm3, %v9576_v24  ;;  %v3009_v32 = vadd.f32 %v11862_v5, %v3008_v27  ;;  %v10122_v33 = vpop.f32.mrb[62].mxu0  ;;  %v4097_v34 = vadd.f32 %v11862_v5, %v4096_v30  ;;  %v10394_v35 = vpop.f32.mrb[62].mxu1 }
 0x157   :  { %v4988_v38 = vmax.f32 %v3017_v26, 0.0  ;;  %v3020_v39 = vadd.f32 %v11862_v5, %v10122_v33  ;;  %v3011_v40 = vpop.f32.mrb[63].mxu0  ;;  %v5260_v41 = vmax.f32 %v4105_v29, 0.0  ;;  %v4108_v42 = vadd.f32 %v11862_v5, %v10394_v35  ;;  %v4099_v43 = vpop.f32.mrb[63].mxu1 }
 0x158   :  { %v4986_v44 = vmax.f32 %v3009_v32, 0.0  ;;  %v3012_v45 = vadd.f32 %v11862_v5, %v3011_v40  ;;  %v5258_v46 = vmax.f32 %v4097_v34, 0.0  ;;  %v4100_v47 = vadd.f32 %v11862_v5, %v4099_v43  ;;  %v10782_v40 = vld [vmem:[%s14708_s0 + $0x708] sm:$0xff]  }
 0x159   :  { %v9309_v48 = vpack.c.bf16 %v4988_v38, %v4988_v38  ;;  %v4989_v49 = vmax.f32 %v3020_v39, 0.0  ;;  %10228 = vmatmul.mubr.msk.bf16.gmra.mrb[168].mxu0 %vm1916_vm2, %v10772_v28  ;;  %v9581_v50 = vpack.c.bf16 %v5260_v41, %v5260_v41  ;;  %v5261_v52 = vmax.f32 %v4108_v42, 0.0  ;;  %10500 = vmatmul.mubr.msk.bf16.gmra.mrb[168].mxu1 %vm1916_vm2, %v10774_v31 }
 0x15a   :  { %v9307_v53 = vpack.c.bf16 %v4986_v44, %v4986_v44  ;;  %v4987_v54 = vmax.f32 %v3012_v45, 0.0  ;;  %v9579_v55 = vpack.c.bf16 %v5258_v46, %v5258_v46  ;;  %v5259_v56 = vmax.f32 %v4100_v47, 0.0  ;;  %10231 = vmatprep.mubr.msk.bf16.mxu0 %vm1916_vm2, %v10775_v36  ;;  %10503 = vmatprep.mubr.msk.bf16.mxu1 %vm1916_vm2, %v10777_v37  ;;  %v10780_v37 = vld [vmem:[%s14708_s0 + $0x2c8] sm:$0xff]   ;;  %v10783_v45 = vld [vmem:[%s14708_s0 + $0x2d0] sm:$0xff]  }
 0x15b   :  { %7685 = vst.msk [vmem:[%s14710_s3 + $0xf8] sm:$0xf] %vm7622_vm3, %v9309_v48  ;;  %v9310_v57 = vpack.c.bf16 %v4989_v49, %v4989_v49  ;;  %7957 = vst.msk [vmem:[%s14710_s3 + $0x538] sm:$0xf] %vm7622_vm3, %v9581_v50  ;;  %v9582_v58 = vpack.c.bf16 %v5261_v52, %v5261_v52  ;;  %v10785_v46 = vld [vmem:[%s14708_s0 + $0x710] sm:$0xff]  }
 0x15c   :  { %7683 = vst.msk [vmem:[%s14710_s3 + $0xf0] sm:$0xf] %vm7622_vm3, %v9307_v53  ;;  %v9308_v59 = vpack.c.bf16 %v4987_v54, %v4987_v54  ;;  %7955 = vst.msk [vmem:[%s14710_s3 + $0x530] sm:$0xf] %vm7622_vm3, %v9579_v55  ;;  %v10125_v60 = vpop.f32.mrb[64].mxu0  ;;  %v9580_v61 = vpack.c.bf16 %v5259_v56, %v5259_v56  ;;  %v10397_v62 = vpop.f32.mrb[64].mxu1 }
 0x15d   :  { %7686 = vst.msk [vmem:[%s14710_s3 + $0xfc] sm:$0xf] %vm7622_vm3, %v9310_v57  ;;  %7958 = vst.msk [vmem:[%s14710_s3 + $0x53c] sm:$0xf] %vm7622_vm3, %v9582_v58  ;;  %v3033_v63 = vadd.f32 %v11862_v5, %v10125_v60  ;;  %v3024_v0 = vpop.f32.mrb[65].mxu0  ;;  %v4121_v2 = vadd.f32 %v11862_v5, %v10397_v62  ;;  %v4112_v3 = vpop.f32.mrb[65].mxu1 }
 0x15e   :  { %7684 = vst.msk [vmem:[%s14710_s3 + $0xf4] sm:$0xf] %vm7622_vm3, %v9308_v59  ;;  %7956 = vst.msk [vmem:[%s14710_s3 + $0x534] sm:$0xf] %vm7622_vm3, %v9580_v61  ;;  %v3025_v51 = vadd.f32 %v11862_v5, %v3024_v0  ;;  %v10126_v6 = vpop.f32.mrb[66].mxu0  ;;  %v4113_v7 = vadd.f32 %v11862_v5, %v4112_v3  ;;  %v10398_v8 = vpop.f32.mrb[66].mxu1 }
 0x15f   :  { %v4992_v11 = vmax.f32 %v3033_v63, 0.0  ;;  %v3036_v12 = vadd.f32 %v11862_v5, %v10126_v6  ;;  %v3027_v13 = vpop.f32.mrb[67].mxu0  ;;  %v5264_v14 = vmax.f32 %v4121_v2, 0.0  ;;  %v4124_v15 = vadd.f32 %v11862_v5, %v10398_v8  ;;  %v4115_v16 = vpop.f32.mrb[67].mxu1 }
 0x160   :  { %v4990_v17 = vmax.f32 %v3025_v51, 0.0  ;;  %v3028_v18 = vadd.f32 %v11862_v5, %v3027_v13  ;;  %v5262_v19 = vmax.f32 %v4113_v7, 0.0  ;;  %v4116_v20 = vadd.f32 %v11862_v5, %v4115_v16  ;;  %v10786_v13 = vld [vmem:[%s14708_s0 + $0x718] sm:$0xff]  }
 0x161   :  { %v9313_v21 = vpack.c.bf16 %v4992_v11, %v4992_v11  ;;  %v4993_v22 = vmax.f32 %v3036_v12, 0.0  ;;  %10232 = vmatmul.mubr.msk.bf16.gmra.mrb[172].mxu0 %vm1916_vm2, %v10776_v1  ;;  %v9585_v23 = vpack.c.bf16 %v5264_v14, %v5264_v14  ;;  %v5265_v24 = vmax.f32 %v4124_v15, 0.0  ;;  %10504 = vmatmul.mubr.msk.bf16.gmra.mrb[172].mxu1 %vm1916_vm2, %v10778_v4 }
 0x162   :  { %v9311_v25 = vpack.c.bf16 %v4990_v17, %v4990_v17  ;;  %v4991_v26 = vmax.f32 %v3028_v18, 0.0  ;;  %v9583_v27 = vpack.c.bf16 %v5262_v19, %v5262_v19  ;;  %v5263_v28 = vmax.f32 %v4116_v20, 0.0  ;;  %10235 = vmatprep.mubr.msk.bf16.mxu0 %vm1916_vm2, %v10779_v9  ;;  %10507 = vmatprep.mubr.msk.bf16.mxu1 %vm1916_vm2, %v10781_v10  ;;  %v10784_v10 = vld [vmem:[%s14708_s0 + $0x2d8] sm:$0xff]   ;;  %v10787_v18 = vld [vmem:[%s14708_s0 + $0x2e0] sm:$0xff]  }
 0x163   :  { %7689 = vst.msk [vmem:[%s14710_s3 + $0x108] sm:$0xf] %vm7622_vm3, %v9313_v21  ;;  %v9314_v29 = vpack.c.bf16 %v4993_v22, %v4993_v22  ;;  %7961 = vst.msk [vmem:[%s14710_s3 + $0x548] sm:$0xf] %vm7622_vm3, %v9585_v23  ;;  %v9586_v30 = vpack.c.bf16 %v5265_v24, %v5265_v24  ;;  %v10789_v19 = vld [vmem:[%s14708_s0 + $0x720] sm:$0xff]  }
 0x164   :  { %7687 = vst.msk [vmem:[%s14710_s3 + $0x100] sm:$0xf] %vm7622_vm3, %v9311_v25  ;;  %v9312_v31 = vpack.c.bf16 %v4991_v26, %v4991_v26  ;;  %7959 = vst.msk [vmem:[%s14710_s3 + $0x540] sm:$0xf] %vm7622_vm3, %v9583_v27  ;;  %v10129_v32 = vpop.f32.mrb[68].mxu0  ;;  %v9584_v33 = vpack.c.bf16 %v5263_v28, %v5263_v28  ;;  %v10401_v34 = vpop.f32.mrb[68].mxu1 }
 0x165   :  { %7690 = vst.msk [vmem:[%s14710_s3 + $0x10c] sm:$0xf] %vm7622_vm3, %v9314_v29  ;;  %7962 = vst.msk [vmem:[%s14710_s3 + $0x54c] sm:$0xf] %vm7622_vm3, %v9586_v30  ;;  %v3049_v35 = vadd.f32 %v11862_v5, %v10129_v32  ;;  %v3040_v36 = vpop.f32.mrb[69].mxu0  ;;  %v4137_v38 = vadd.f32 %v11862_v5, %v10401_v34  ;;  %v4128_v39 = vpop.f32.mrb[69].mxu1 }
 0x166   :  { %7688 = vst.msk [vmem:[%s14710_s3 + $0x104] sm:$0xf] %vm7622_vm3, %v9312_v31  ;;  %7960 = vst.msk [vmem:[%s14710_s3 + $0x544] sm:$0xf] %vm7622_vm3, %v9584_v33  ;;  %v3041_v41 = vadd.f32 %v11862_v5, %v3040_v36  ;;  %v10130_v42 = vpop.f32.mrb[70].mxu0  ;;  %v4129_v43 = vadd.f32 %v11862_v5, %v4128_v39  ;;  %v10402_v44 = vpop.f32.mrb[70].mxu1 }
 0x167   :  { %v4996_v47 = vmax.f32 %v3049_v35, 0.0  ;;  %v3052_v48 = vadd.f32 %v11862_v5, %v10130_v42  ;;  %v3043_v49 = vpop.f32.mrb[71].mxu0  ;;  %v5268_v50 = vmax.f32 %v4137_v38, 0.0  ;;  %v4140_v52 = vadd.f32 %v11862_v5, %v10402_v44  ;;  %v4131_v53 = vpop.f32.mrb[71].mxu1 }
 0x168   :  { %v4994_v54 = vmax.f32 %v3041_v41, 0.0  ;;  %v3044_v55 = vadd.f32 %v11862_v5, %v3043_v49  ;;  %v5266_v56 = vmax.f32 %v4129_v43, 0.0  ;;  %v4132_v57 = vadd.f32 %v11862_v5, %v4131_v53  ;;  %v10790_v49 = vld [vmem:[%s14708_s0 + $0x728] sm:$0xff]  }
 0x169   :  { %v9317_v58 = vpack.c.bf16 %v4996_v47, %v4996_v47  ;;  %v4997_v59 = vmax.f32 %v3052_v48, 0.0  ;;  %10236 = vmatmul.mubr.msk.bf16.gmra.mrb[176].mxu0 %vm1916_vm2, %v10780_v37  ;;  %v9589_v60 = vpack.c.bf16 %v5268_v50, %v5268_v50  ;;  %v5269_v61 = vmax.f32 %v4140_v52, 0.0  ;;  %10508 = vmatmul.mubr.msk.bf16.gmra.mrb[176].mxu1 %vm1916_vm2, %v10782_v40 }
 0x16a   :  { %v9315_v62 = vpack.c.bf16 %v4994_v54, %v4994_v54  ;;  %v4995_v63 = vmax.f32 %v3044_v55, 0.0  ;;  %v9587_v0 = vpack.c.bf16 %v5266_v56, %v5266_v56  ;;  %v5267_v1 = vmax.f32 %v4132_v57, 0.0  ;;  %10239 = vmatprep.mubr.msk.bf16.mxu0 %vm1916_vm2, %v10783_v45  ;;  %10511 = vmatprep.mubr.msk.bf16.mxu1 %vm1916_vm2, %v10785_v46  ;;  %v10788_v46 = vld [vmem:[%s14708_s0 + $0x2e8] sm:$0xff]   ;;  %v10791_v55 = vld [vmem:[%s14708_s0 + $0x2f0] sm:$0xff]  }
 0x16b   :  { %7693 = vst.msk [vmem:[%s14710_s3 + $0x118] sm:$0xf] %vm7622_vm3, %v9317_v58  ;;  %v9318_v2 = vpack.c.bf16 %v4997_v59, %v4997_v59  ;;  %7965 = vst.msk [vmem:[%s14710_s3 + $0x558] sm:$0xf] %vm7622_vm3, %v9589_v60  ;;  %v9590_v3 = vpack.c.bf16 %v5269_v61, %v5269_v61  ;;  %v10793_v56 = vld [vmem:[%s14708_s0 + $0x730] sm:$0xff]  }
 0x16c   :  { %7691 = vst.msk [vmem:[%s14710_s3 + $0x110] sm:$0xf] %vm7622_vm3, %v9315_v62  ;;  %v9316_v4 = vpack.c.bf16 %v4995_v63, %v4995_v63  ;;  %7963 = vst.msk [vmem:[%s14710_s3 + $0x550] sm:$0xf] %vm7622_vm3, %v9587_v0  ;;  %v10133_v51 = vpop.f32.mrb[72].mxu0  ;;  %v9588_v6 = vpack.c.bf16 %v5267_v1, %v5267_v1  ;;  %v10405_v7 = vpop.f32.mrb[72].mxu1 }
 0x16d   :  { %7694 = vst.msk [vmem:[%s14710_s3 + $0x11c] sm:$0xf] %vm7622_vm3, %v9318_v2  ;;  %7966 = vst.msk [vmem:[%s14710_s3 + $0x55c] sm:$0xf] %vm7622_vm3, %v9590_v3  ;;  %v3065_v8 = vadd.f32 %v11862_v5, %v10133_v51  ;;  %v3056_v9 = vpop.f32.mrb[73].mxu0  ;;  %v4153_v11 = vadd.f32 %v11862_v5, %v10405_v7  ;;  %v4144_v12 = vpop.f32.mrb[73].mxu1 }
 0x16e   :  { %7692 = vst.msk [vmem:[%s14710_s3 + $0x114] sm:$0xf] %vm7622_vm3, %v9316_v4  ;;  %7964 = vst.msk [vmem:[%s14710_s3 + $0x554] sm:$0xf] %vm7622_vm3, %v9588_v6  ;;  %v3057_v14 = vadd.f32 %v11862_v5, %v3056_v9  ;;  %v10134_v15 = vpop.f32.mrb[74].mxu0  ;;  %v4145_v16 = vadd.f32 %v11862_v5, %v4144_v12  ;;  %v10406_v17 = vpop.f32.mrb[74].mxu1 }
 0x16f   :  { %v5000_v20 = vmax.f32 %v3065_v8, 0.0  ;;  %v3068_v21 = vadd.f32 %v11862_v5, %v10134_v15  ;;  %v3059_v22 = vpop.f32.mrb[75].mxu0  ;;  %v5272_v23 = vmax.f32 %v4153_v11, 0.0  ;;  %v4156_v24 = vadd.f32 %v11862_v5, %v10406_v17  ;;  %v4147_v25 = vpop.f32.mrb[75].mxu1 }
 0x170   :  { %v4998_v26 = vmax.f32 %v3057_v14, 0.0  ;;  %v3060_v27 = vadd.f32 %v11862_v5, %v3059_v22  ;;  %v5270_v28 = vmax.f32 %v4145_v16, 0.0  ;;  %v4148_v29 = vadd.f32 %v11862_v5, %v4147_v25  ;;  %v12467_v16 = vld [vmem:[%s14709_s2] ss:$0 sm:$0xff]  ;;  %v10794_v22 = vld [vmem:[%s14708_s0 + $0x738] sm:$0xff]  }
 0x171   :  { %v9321_v30 = vpack.c.bf16 %v5000_v20, %v5000_v20  ;;  %v5001_v31 = vmax.f32 %v3068_v21, 0.0  ;;  %10240 = vmatmul.mubr.msk.bf16.gmra.mrb[180].mxu0 %vm1916_vm2, %v10784_v10  ;;  %v9593_v32 = vpack.c.bf16 %v5272_v23, %v5272_v23  ;;  %v5273_v33 = vmax.f32 %v4156_v24, 0.0  ;;  %10512 = vmatmul.mubr.msk.bf16.gmra.mrb[180].mxu1 %vm1916_vm2, %v10786_v13 }
 0x172   :  { %v9319_v34 = vpack.c.bf16 %v4998_v26, %v4998_v26  ;;  %v4999_v35 = vmax.f32 %v3060_v27, 0.0  ;;  %v9591_v36 = vpack.c.bf16 %v5270_v28, %v5270_v28  ;;  %v5271_v37 = vmax.f32 %v4148_v29, 0.0  ;;  %10243 = vmatprep.mubr.msk.bf16.mxu0 %vm1916_vm2, %v10787_v18  ;;  %10515 = vmatprep.mubr.msk.bf16.mxu1 %vm1916_vm2, %v10789_v19  ;;  %v10792_v19 = vld [vmem:[%s14708_s0 + $0x2f8] sm:$0xff]   ;;  %v10795_v27 = vld [vmem:[%s14708_s0 + $0x300] sm:$0xff]  }
 0x173   :  { %7697 = vst.msk [vmem:[%s14710_s3 + $0x128] sm:$0xf] %vm7622_vm3, %v9321_v30  ;;  %v9322_v38 = vpack.c.bf16 %v5001_v31, %v5001_v31  ;;  %7969 = vst.msk [vmem:[%s14710_s3 + $0x568] sm:$0xf] %vm7622_vm3, %v9593_v32  ;;  %v9594_v39 = vpack.c.bf16 %v5273_v33, %v5273_v33  ;;  %v10797_v28 = vld [vmem:[%s14708_s0 + $0x740] sm:$0xff]  }
 0x174   :  { %7695 = vst.msk [vmem:[%s14710_s3 + $0x120] sm:$0xf] %vm7622_vm3, %v9319_v34  ;;  %v9320_v40 = vpack.c.bf16 %v4999_v35, %v4999_v35  ;;  %7967 = vst.msk [vmem:[%s14710_s3 + $0x560] sm:$0xf] %vm7622_vm3, %v9591_v36  ;;  %v10137_v41 = vpop.f32.mrb[76].mxu0  ;;  %v9592_v42 = vpack.c.bf16 %v5271_v37, %v5271_v37  ;;  %v10409_v43 = vpop.f32.mrb[76].mxu1 }
 0x175   :  { %7698 = vst.msk [vmem:[%s14710_s3 + $0x12c] sm:$0xf] %vm7622_vm3, %v9322_v38  ;;  %7970 = vst.msk [vmem:[%s14710_s3 + $0x56c] sm:$0xf] %vm7622_vm3, %v9594_v39  ;;  %v3081_v44 = vadd.f32 %v11862_v5, %v10137_v41  ;;  %v3072_v45 = vpop.f32.mrb[77].mxu0  ;;  %v4169_v47 = vadd.f32 %v11862_v5, %v10409_v43  ;;  %v4160_v48 = vpop.f32.mrb[77].mxu1 }
 0x176   :  { %7696 = vst.msk [vmem:[%s14710_s3 + $0x124] sm:$0xf] %vm7622_vm3, %v9320_v40  ;;  %7968 = vst.msk [vmem:[%s14710_s3 + $0x564] sm:$0xf] %vm7622_vm3, %v9592_v42  ;;  %v3073_v50 = vadd.f32 %v11862_v5, %v3072_v45  ;;  %v10138_v52 = vpop.f32.mrb[78].mxu0  ;;  %v4161_v53 = vadd.f32 %v11862_v5, %v4160_v48  ;;  %v10410_v54 = vpop.f32.mrb[78].mxu1 }
 0x177   :  { %v5004_v57 = vmax.f32 %v3081_v44, 0.0  ;;  %v3084_v58 = vadd.f32 %v11862_v5, %v10138_v52  ;;  %v3075_v59 = vpop.f32.mrb[79].mxu0  ;;  %v5276_v60 = vmax.f32 %v4169_v47, 0.0  ;;  %v4172_v61 = vadd.f32 %v11862_v5, %v10410_v54  ;;  %v4163_v62 = vpop.f32.mrb[79].mxu1 }
 0x178   :  { %v5002_v63 = vmax.f32 %v3073_v50, 0.0  ;;  %v3076_v0 = vadd.f32 %v11862_v5, %v3075_v59  ;;  %v5274_v1 = vmax.f32 %v4161_v53, 0.0  ;;  %v4164_v2 = vadd.f32 %v11862_v5, %v4163_v62  ;;  %v10798_v59 = vld [vmem:[%s14708_s0 + $0x748] sm:$0xff]  }
 0x179   :  { %v9325_v3 = vpack.c.bf16 %v5004_v57, %v5004_v57  ;;  %v5005_v4 = vmax.f32 %v3084_v58, 0.0  ;;  %10244 = vmatmul.mubr.msk.bf16.gmra.mrb[184].mxu0 %vm1916_vm2, %v10788_v46  ;;  %v9597_v51 = vpack.c.bf16 %v5276_v60, %v5276_v60  ;;  %v5277_v6 = vmax.f32 %v4172_v61, 0.0  ;;  %10516 = vmatmul.mubr.msk.bf16.gmra.mrb[184].mxu1 %vm1916_vm2, %v10790_v49 }
 0x17a   :  { %v9323_v7 = vpack.c.bf16 %v5002_v63, %v5002_v63  ;;  %v5003_v8 = vmax.f32 %v3076_v0, 0.0  ;;  %v9595_v9 = vpack.c.bf16 %v5274_v1, %v5274_v1  ;;  %v5275_v10 = vmax.f32 %v4164_v2, 0.0  ;;  %10247 = vmatprep.mubr.msk.bf16.mxu0 %vm1916_vm2, %v10791_v55  ;;  %10519 = vmatprep.mubr.msk.bf16.mxu1 %vm1916_vm2, %v10793_v56  ;;  %v10796_v56 = vld [vmem:[%s14708_s0 + $0x308] sm:$0xff]   ;;  %v10799_v0 = vld [vmem:[%s14708_s0 + $0x310] sm:$0xff]  }
 0x17b   :  { %7701 = vst.msk [vmem:[%s14710_s3 + $0x138] sm:$0xf] %vm7622_vm3, %v9325_v3  ;;  %v9326_v5 = vpack.c.bf16 %v5005_v4, %v5005_v4  ;;  %7973 = vst.msk [vmem:[%s14710_s3 + $0x578] sm:$0xf] %vm7622_vm3, %v9597_v51  ;;  %v9598_v11 = vpack.c.bf16 %v5277_v6, %v5277_v6  ;;  %v10801_v1 = vld [vmem:[%s14708_s0 + $0x750] sm:$0xff]  }
 0x17c   :  { %7699 = vst.msk [vmem:[%s14710_s3 + $0x130] sm:$0xf] %vm7622_vm3, %v9323_v7  ;;  %v9324_v12 = vpack.c.bf16 %v5003_v8, %v5003_v8  ;;  %7971 = vst.msk [vmem:[%s14710_s3 + $0x570] sm:$0xf] %vm7622_vm3, %v9595_v9  ;;  %v10141_v13 = vpop.f32.mrb[80].mxu0  ;;  %v9596_v14 = vpack.c.bf16 %v5275_v10, %v5275_v10  ;;  %v10413_v15 = vpop.f32.mrb[80].mxu1 }
 0x17d   :  { %7702 = vst.msk [vmem:[%s14710_s3 + $0x13c] sm:$0xf] %vm7622_vm3, %v9326_v5  ;;  %7974 = vst.msk [vmem:[%s14710_s3 + $0x57c] sm:$0xf] %vm7622_vm3, %v9598_v11  ;;  %v3097_v17 = vadd.f32 %v12467_v16, %v10141_v13  ;;  %v3088_v18 = vpop.f32.mrb[81].mxu0  ;;  %v4185_v20 = vadd.f32 %v12467_v16, %v10413_v15  ;;  %v4176_v21 = vpop.f32.mrb[81].mxu1 }
 0x17e   :  { %7700 = vst.msk [vmem:[%s14710_s3 + $0x134] sm:$0xf] %vm7622_vm3, %v9324_v12  ;;  %7972 = vst.msk [vmem:[%s14710_s3 + $0x574] sm:$0xf] %vm7622_vm3, %v9596_v14  ;;  %v3089_v23 = vadd.f32 %v12467_v16, %v3088_v18  ;;  %v10142_v24 = vpop.f32.mrb[82].mxu0  ;;  %v4177_v25 = vadd.f32 %v12467_v16, %v4176_v21  ;;  %v10414_v26 = vpop.f32.mrb[82].mxu1 }
 0x17f   :  { %v5008_v29 = vmax.f32 %v3097_v17, 0.0  ;;  %v3100_v30 = vadd.f32 %v12467_v16, %v10142_v24  ;;  %v3091_v31 = vpop.f32.mrb[83].mxu0  ;;  %v5280_v32 = vmax.f32 %v4185_v20, 0.0  ;;  %v4188_v33 = vadd.f32 %v12467_v16, %v10414_v26  ;;  %v4179_v34 = vpop.f32.mrb[83].mxu1 }
 0x180   :  { %v5006_v35 = vmax.f32 %v3089_v23, 0.0  ;;  %v3092_v36 = vadd.f32 %v12467_v16, %v3091_v31  ;;  %v5278_v37 = vmax.f32 %v4177_v25, 0.0  ;;  %v4180_v38 = vadd.f32 %v12467_v16, %v4179_v34  ;;  %v10802_v31 = vld [vmem:[%s14708_s0 + $0x758] sm:$0xff]  }
 0x181   :  { %v9329_v39 = vpack.c.bf16 %v5008_v29, %v5008_v29  ;;  %v5009_v40 = vmax.f32 %v3100_v30, 0.0  ;;  %10248 = vmatmul.mubr.msk.bf16.gmra.mrb[188].mxu0 %vm1916_vm2, %v10792_v19  ;;  %v9601_v41 = vpack.c.bf16 %v5280_v32, %v5280_v32  ;;  %v5281_v42 = vmax.f32 %v4188_v33, 0.0  ;;  %10520 = vmatmul.mubr.msk.bf16.gmra.mrb[188].mxu1 %vm1916_vm2, %v10794_v22 }
 0x182   :  { %v9327_v43 = vpack.c.bf16 %v5006_v35, %v5006_v35  ;;  %v5007_v44 = vmax.f32 %v3092_v36, 0.0  ;;  %v9599_v45 = vpack.c.bf16 %v5278_v37, %v5278_v37  ;;  %v5279_v46 = vmax.f32 %v4180_v38, 0.0  ;;  %10251 = vmatprep.mubr.msk.bf16.mxu0 %vm1916_vm2, %v10795_v27  ;;  %10523 = vmatprep.mubr.msk.bf16.mxu1 %vm1916_vm2, %v10797_v28  ;;  %v10800_v28 = vld [vmem:[%s14708_s0 + $0x318] sm:$0xff]   ;;  %v10803_v36 = vld [vmem:[%s14708_s0 + $0x320] sm:$0xff]  }
 0x183   :  { %7705 = vst.msk [vmem:[%s14710_s3 + $0x148] sm:$0xf] %vm7622_vm3, %v9329_v39  ;;  %v9330_v47 = vpack.c.bf16 %v5009_v40, %v5009_v40  ;;  %7977 = vst.msk [vmem:[%s14710_s3 + $0x588] sm:$0xf] %vm7622_vm3, %v9601_v41  ;;  %v9602_v48 = vpack.c.bf16 %v5281_v42, %v5281_v42  ;;  %v10805_v37 = vld [vmem:[%s14708_s0 + $0x760] sm:$0xff]  }
 0x184   :  { %7703 = vst.msk [vmem:[%s14710_s3 + $0x140] sm:$0xf] %vm7622_vm3, %v9327_v43  ;;  %v9328_v49 = vpack.c.bf16 %v5007_v44, %v5007_v44  ;;  %7975 = vst.msk [vmem:[%s14710_s3 + $0x580] sm:$0xf] %vm7622_vm3, %v9599_v45  ;;  %v10145_v50 = vpop.f32.mrb[84].mxu0  ;;  %v9600_v52 = vpack.c.bf16 %v5279_v46, %v5279_v46  ;;  %v10417_v53 = vpop.f32.mrb[84].mxu1 }
 0x185   :  { %7706 = vst.msk [vmem:[%s14710_s3 + $0x14c] sm:$0xf] %vm7622_vm3, %v9330_v47  ;;  %7978 = vst.msk [vmem:[%s14710_s3 + $0x58c] sm:$0xf] %vm7622_vm3, %v9602_v48  ;;  %v3113_v54 = vadd.f32 %v12467_v16, %v10145_v50  ;;  %v3104_v55 = vpop.f32.mrb[85].mxu0  ;;  %v4201_v57 = vadd.f32 %v12467_v16, %v10417_v53  ;;  %v4192_v58 = vpop.f32.mrb[85].mxu1 }
 0x186   :  { %7704 = vst.msk [vmem:[%s14710_s3 + $0x144] sm:$0xf] %vm7622_vm3, %v9328_v49  ;;  %7976 = vst.msk [vmem:[%s14710_s3 + $0x584] sm:$0xf] %vm7622_vm3, %v9600_v52  ;;  %v3105_v60 = vadd.f32 %v12467_v16, %v3104_v55  ;;  %v10146_v61 = vpop.f32.mrb[86].mxu0  ;;  %v4193_v62 = vadd.f32 %v12467_v16, %v4192_v58  ;;  %v10418_v63 = vpop.f32.mrb[86].mxu1 }
 0x187   :  { %v5012_v2 = vmax.f32 %v3113_v54, 0.0  ;;  %v3116_v3 = vadd.f32 %v12467_v16, %v10146_v61  ;;  %v3107_v4 = vpop.f32.mrb[87].mxu0  ;;  %v5284_v51 = vmax.f32 %v4201_v57, 0.0  ;;  %v4204_v6 = vadd.f32 %v12467_v16, %v10418_v63  ;;  %v4195_v7 = vpop.f32.mrb[87].mxu1 }
 0x188   :  { %v5010_v8 = vmax.f32 %v3105_v60, 0.0  ;;  %v3108_v9 = vadd.f32 %v12467_v16, %v3107_v4  ;;  %v5282_v10 = vmax.f32 %v4193_v62, 0.0  ;;  %v4196_v5 = vadd.f32 %v12467_v16, %v4195_v7  ;;  %v10806_v4 = vld [vmem:[%s14708_s0 + $0x768] sm:$0xff]  }
 0x189   :  { %v9333_v11 = vpack.c.bf16 %v5012_v2, %v5012_v2  ;;  %v5013_v12 = vmax.f32 %v3116_v3, 0.0  ;;  %10252 = vmatmul.mubr.msk.bf16.gmra.mrb[192].mxu0 %vm1916_vm2, %v10796_v56  ;;  %v9605_v13 = vpack.c.bf16 %v5284_v51, %v5284_v51  ;;  %v5285_v14 = vmax.f32 %v4204_v6, 0.0  ;;  %10524 = vmatmul.mubr.msk.bf16.gmra.mrb[192].mxu1 %vm1916_vm2, %v10798_v59 }
 0x18a   :  { %v9331_v15 = vpack.c.bf16 %v5010_v8, %v5010_v8  ;;  %v5011_v17 = vmax.f32 %v3108_v9, 0.0  ;;  %v9603_v18 = vpack.c.bf16 %v5282_v10, %v5282_v10  ;;  %v5283_v19 = vmax.f32 %v4196_v5, 0.0  ;;  %10255 = vmatprep.mubr.msk.bf16.mxu0 %vm1916_vm2, %v10799_v0  ;;  %10527 = vmatprep.mubr.msk.bf16.mxu1 %vm1916_vm2, %v10801_v1  ;;  %v10804_v1 = vld [vmem:[%s14708_s0 + $0x328] sm:$0xff]   ;;  %v10807_v9 = vld [vmem:[%s14708_s0 + $0x330] sm:$0xff]  }
 0x18b   :  { %7709 = vst.msk [vmem:[%s14710_s3 + $0x158] sm:$0xf] %vm7622_vm3, %v9333_v11  ;;  %v9334_v20 = vpack.c.bf16 %v5013_v12, %v5013_v12  ;;  %7981 = vst.msk [vmem:[%s14710_s3 + $0x598] sm:$0xf] %vm7622_vm3, %v9605_v13  ;;  %v9606_v21 = vpack.c.bf16 %v5285_v14, %v5285_v14  ;;  %v10809_v10 = vld [vmem:[%s14708_s0 + $0x770] sm:$0xff]  }
 0x18c   :  { %7707 = vst.msk [vmem:[%s14710_s3 + $0x150] sm:$0xf] %vm7622_vm3, %v9331_v15  ;;  %v9332_v22 = vpack.c.bf16 %v5011_v17, %v5011_v17  ;;  %7979 = vst.msk [vmem:[%s14710_s3 + $0x590] sm:$0xf] %vm7622_vm3, %v9603_v18  ;;  %v10149_v23 = vpop.f32.mrb[88].mxu0  ;;  %v9604_v24 = vpack.c.bf16 %v5283_v19, %v5283_v19  ;;  %v10421_v25 = vpop.f32.mrb[88].mxu1 }
 0x18d   :  { %7710 = vst.msk [vmem:[%s14710_s3 + $0x15c] sm:$0xf] %vm7622_vm3, %v9334_v20  ;;  %7982 = vst.msk [vmem:[%s14710_s3 + $0x59c] sm:$0xf] %vm7622_vm3, %v9606_v21  ;;  %v3129_v26 = vadd.f32 %v12467_v16, %v10149_v23  ;;  %v3120_v27 = vpop.f32.mrb[89].mxu0  ;;  %v4217_v29 = vadd.f32 %v12467_v16, %v10421_v25  ;;  %v4208_v30 = vpop.f32.mrb[89].mxu1 }
 0x18e   :  { %7708 = vst.msk [vmem:[%s14710_s3 + $0x154] sm:$0xf] %vm7622_vm3, %v9332_v22  ;;  %7980 = vst.msk [vmem:[%s14710_s3 + $0x594] sm:$0xf] %vm7622_vm3, %v9604_v24  ;;  %v3121_v32 = vadd.f32 %v12467_v16, %v3120_v27  ;;  %v10150_v33 = vpop.f32.mrb[90].mxu0  ;;  %v4209_v34 = vadd.f32 %v12467_v16, %v4208_v30  ;;  %v10422_v35 = vpop.f32.mrb[90].mxu1 }
 0x18f   :  { %v5016_v38 = vmax.f32 %v3129_v26, 0.0  ;;  %v3132_v39 = vadd.f32 %v12467_v16, %v10150_v33  ;;  %v3123_v40 = vpop.f32.mrb[91].mxu0  ;;  %v5288_v41 = vmax.f32 %v4217_v29, 0.0  ;;  %v4220_v42 = vadd.f32 %v12467_v16, %v10422_v35  ;;  %v4211_v43 = vpop.f32.mrb[91].mxu1 }
 0x190   :  { %v5014_v44 = vmax.f32 %v3121_v32, 0.0  ;;  %v3124_v45 = vadd.f32 %v12467_v16, %v3123_v40  ;;  %v5286_v46 = vmax.f32 %v4209_v34, 0.0  ;;  %v4212_v47 = vadd.f32 %v12467_v16, %v4211_v43  ;;  %v10810_v40 = vld [vmem:[%s14708_s0 + $0x778] sm:$0xff]  }
 0x191   :  { %v9337_v48 = vpack.c.bf16 %v5016_v38, %v5016_v38  ;;  %v5017_v49 = vmax.f32 %v3132_v39, 0.0  ;;  %10256 = vmatmul.mubr.msk.bf16.gmra.mrb[196].mxu0 %vm1916_vm2, %v10800_v28  ;;  %v9609_v50 = vpack.c.bf16 %v5288_v41, %v5288_v41  ;;  %v5289_v52 = vmax.f32 %v4220_v42, 0.0  ;;  %10528 = vmatmul.mubr.msk.bf16.gmra.mrb[196].mxu1 %vm1916_vm2, %v10802_v31 }
 0x192   :  { %v9335_v53 = vpack.c.bf16 %v5014_v44, %v5014_v44  ;;  %v5015_v54 = vmax.f32 %v3124_v45, 0.0  ;;  %v9607_v55 = vpack.c.bf16 %v5286_v46, %v5286_v46  ;;  %v5287_v56 = vmax.f32 %v4212_v47, 0.0  ;;  %10259 = vmatprep.mubr.msk.bf16.mxu0 %vm1916_vm2, %v10803_v36  ;;  %10531 = vmatprep.mubr.msk.bf16.mxu1 %vm1916_vm2, %v10805_v37  ;;  %v10808_v37 = vld [vmem:[%s14708_s0 + $0x338] sm:$0xff]   ;;  %v10811_v45 = vld [vmem:[%s14708_s0 + $0x340] sm:$0xff]  }
 0x193   :  { %7713 = vst.msk [vmem:[%s14710_s3 + $0x168] sm:$0xf] %vm7622_vm3, %v9337_v48  ;;  %v9338_v57 = vpack.c.bf16 %v5017_v49, %v5017_v49  ;;  %7985 = vst.msk [vmem:[%s14710_s3 + $0x5a8] sm:$0xf] %vm7622_vm3, %v9609_v50  ;;  %v9610_v58 = vpack.c.bf16 %v5289_v52, %v5289_v52  ;;  %v10813_v46 = vld [vmem:[%s14708_s0 + $0x780] sm:$0xff]  }
 0x194   :  { %7711 = vst.msk [vmem:[%s14710_s3 + $0x160] sm:$0xf] %vm7622_vm3, %v9335_v53  ;;  %v9336_v59 = vpack.c.bf16 %v5015_v54, %v5015_v54  ;;  %7983 = vst.msk [vmem:[%s14710_s3 + $0x5a0] sm:$0xf] %vm7622_vm3, %v9607_v55  ;;  %v10153_v60 = vpop.f32.mrb[92].mxu0  ;;  %v9608_v61 = vpack.c.bf16 %v5287_v56, %v5287_v56  ;;  %v10425_v62 = vpop.f32.mrb[92].mxu1 }
 0x195   :  { %7714 = vst.msk [vmem:[%s14710_s3 + $0x16c] sm:$0xf] %vm7622_vm3, %v9338_v57  ;;  %7986 = vst.msk [vmem:[%s14710_s3 + $0x5ac] sm:$0xf] %vm7622_vm3, %v9610_v58  ;;  %v3145_v63 = vadd.f32 %v12467_v16, %v10153_v60  ;;  %v3136_v0 = vpop.f32.mrb[93].mxu0  ;;  %v4233_v2 = vadd.f32 %v12467_v16, %v10425_v62  ;;  %v4224_v3 = vpop.f32.mrb[93].mxu1 }
 0x196   :  { %7712 = vst.msk [vmem:[%s14710_s3 + $0x164] sm:$0xf] %vm7622_vm3, %v9336_v59  ;;  %7984 = vst.msk [vmem:[%s14710_s3 + $0x5a4] sm:$0xf] %vm7622_vm3, %v9608_v61  ;;  %v3137_v51 = vadd.f32 %v12467_v16, %v3136_v0  ;;  %v10154_v6 = vpop.f32.mrb[94].mxu0  ;;  %v4225_v7 = vadd.f32 %v12467_v16, %v4224_v3  ;;  %v10426_v8 = vpop.f32.mrb[94].mxu1 }
 0x197   :  { %v5020_v5 = vmax.f32 %v3145_v63, 0.0  ;;  %v3148_v11 = vadd.f32 %v12467_v16, %v10154_v6  ;;  %v3139_v12 = vpop.f32.mrb[95].mxu0  ;;  %v5292_v13 = vmax.f32 %v4233_v2, 0.0  ;;  %v4236_v14 = vadd.f32 %v12467_v16, %v10426_v8  ;;  %v4227_v15 = vpop.f32.mrb[95].mxu1 }
 0x198   :  { %v5018_v17 = vmax.f32 %v3137_v51, 0.0  ;;  %v3140_v18 = vadd.f32 %v12467_v16, %v3139_v12  ;;  %v5290_v19 = vmax.f32 %v4225_v7, 0.0  ;;  %v4228_v20 = vadd.f32 %v12467_v16, %v4227_v15  ;;  %v10814_v12 = vld [vmem:[%s14708_s0 + $0x788] sm:$0xff]  }
 0x199   :  { %v9341_v21 = vpack.c.bf16 %v5020_v5, %v5020_v5  ;;  %v5021_v22 = vmax.f32 %v3148_v11, 0.0  ;;  %10260 = vmatmul.mubr.msk.bf16.gmra.mrb[200].mxu0 %vm1916_vm2, %v10804_v1  ;;  %v9613_v23 = vpack.c.bf16 %v5292_v13, %v5292_v13  ;;  %v5293_v24 = vmax.f32 %v4236_v14, 0.0  ;;  %10532 = vmatmul.mubr.msk.bf16.gmra.mrb[200].mxu1 %vm1916_vm2, %v10806_v4 }
 0x19a   :  { %v9339_v25 = vpack.c.bf16 %v5018_v17, %v5018_v17  ;;  %v5019_v26 = vmax.f32 %v3140_v18, 0.0  ;;  %v9611_v27 = vpack.c.bf16 %v5290_v19, %v5290_v19  ;;  %v5291_v28 = vmax.f32 %v4228_v20, 0.0  ;;  %10263 = vmatprep.mubr.msk.bf16.mxu0 %vm1916_vm2, %v10807_v9  ;;  %10535 = vmatprep.mubr.msk.bf16.mxu1 %vm1916_vm2, %v10809_v10  ;;  %v10812_v10 = vld [vmem:[%s14708_s0 + $0x348] sm:$0xff]   ;;  %v10815_v18 = vld [vmem:[%s14708_s0 + $0x350] sm:$0xff]  }
 0x19b   :  { %7717 = vst.msk [vmem:[%s14710_s3 + $0x178] sm:$0xf] %vm7622_vm3, %v9341_v21  ;;  %v9342_v29 = vpack.c.bf16 %v5021_v22, %v5021_v22  ;;  %7989 = vst.msk [vmem:[%s14710_s3 + $0x5b8] sm:$0xf] %vm7622_vm3, %v9613_v23  ;;  %v9614_v30 = vpack.c.bf16 %v5293_v24, %v5293_v24  ;;  %v10817_v19 = vld [vmem:[%s14708_s0 + $0x790] sm:$0xff]  }
 0x19c   :  { %7715 = vst.msk [vmem:[%s14710_s3 + $0x170] sm:$0xf] %vm7622_vm3, %v9339_v25  ;;  %v9340_v31 = vpack.c.bf16 %v5019_v26, %v5019_v26  ;;  %7987 = vst.msk [vmem:[%s14710_s3 + $0x5b0] sm:$0xf] %vm7622_vm3, %v9611_v27  ;;  %v10157_v32 = vpop.f32.mrb[96].mxu0  ;;  %v9612_v33 = vpack.c.bf16 %v5291_v28, %v5291_v28  ;;  %v10429_v34 = vpop.f32.mrb[96].mxu1 }
 0x19d   :  { %7718 = vst.msk [vmem:[%s14710_s3 + $0x17c] sm:$0xf] %vm7622_vm3, %v9342_v29  ;;  %7990 = vst.msk [vmem:[%s14710_s3 + $0x5bc] sm:$0xf] %vm7622_vm3, %v9614_v30  ;;  %v3161_v35 = vadd.f32 %v12467_v16, %v10157_v32  ;;  %v3152_v36 = vpop.f32.mrb[97].mxu0  ;;  %v4249_v38 = vadd.f32 %v12467_v16, %v10429_v34  ;;  %v4240_v39 = vpop.f32.mrb[97].mxu1 }
 0x19e   :  { %7716 = vst.msk [vmem:[%s14710_s3 + $0x174] sm:$0xf] %vm7622_vm3, %v9340_v31  ;;  %7988 = vst.msk [vmem:[%s14710_s3 + $0x5b4] sm:$0xf] %vm7622_vm3, %v9612_v33  ;;  %v3153_v41 = vadd.f32 %v12467_v16, %v3152_v36  ;;  %v10158_v42 = vpop.f32.mrb[98].mxu0  ;;  %v4241_v43 = vadd.f32 %v12467_v16, %v4240_v39  ;;  %v10430_v44 = vpop.f32.mrb[98].mxu1 }
 0x19f   :  { %v5024_v47 = vmax.f32 %v3161_v35, 0.0  ;;  %v3164_v48 = vadd.f32 %v12467_v16, %v10158_v42  ;;  %v3155_v49 = vpop.f32.mrb[99].mxu0  ;;  %v5296_v50 = vmax.f32 %v4249_v38, 0.0  ;;  %v4252_v52 = vadd.f32 %v12467_v16, %v10430_v44  ;;  %v4243_v53 = vpop.f32.mrb[99].mxu1 }
 0x1a0   :  { %v5022_v54 = vmax.f32 %v3153_v41, 0.0  ;;  %v3156_v55 = vadd.f32 %v12467_v16, %v3155_v49  ;;  %v5294_v56 = vmax.f32 %v4241_v43, 0.0  ;;  %v4244_v57 = vadd.f32 %v12467_v16, %v4243_v53  ;;  %v10818_v49 = vld [vmem:[%s14708_s0 + $0x798] sm:$0xff]  }
 0x1a1   :  { %v9345_v58 = vpack.c.bf16 %v5024_v47, %v5024_v47  ;;  %v5025_v59 = vmax.f32 %v3164_v48, 0.0  ;;  %10264 = vmatmul.mubr.msk.bf16.gmra.mrb[204].mxu0 %vm1916_vm2, %v10808_v37  ;;  %v9617_v60 = vpack.c.bf16 %v5296_v50, %v5296_v50  ;;  %v5297_v61 = vmax.f32 %v4252_v52, 0.0  ;;  %10536 = vmatmul.mubr.msk.bf16.gmra.mrb[204].mxu1 %vm1916_vm2, %v10810_v40 }
 0x1a2   :  { %v9343_v62 = vpack.c.bf16 %v5022_v54, %v5022_v54  ;;  %v5023_v63 = vmax.f32 %v3156_v55, 0.0  ;;  %v9615_v0 = vpack.c.bf16 %v5294_v56, %v5294_v56  ;;  %v5295_v1 = vmax.f32 %v4244_v57, 0.0  ;;  %10267 = vmatprep.mubr.msk.bf16.mxu0 %vm1916_vm2, %v10811_v45  ;;  %10539 = vmatprep.mubr.msk.bf16.mxu1 %vm1916_vm2, %v10813_v46  ;;  %v10816_v46 = vld [vmem:[%s14708_s0 + $0x358] sm:$0xff]   ;;  %v10819_v55 = vld [vmem:[%s14708_s0 + $0x360] sm:$0xff]  }
 0x1a3   :  { %7721 = vst.msk [vmem:[%s14710_s3 + $0x188] sm:$0xf] %vm7622_vm3, %v9345_v58  ;;  %v9346_v2 = vpack.c.bf16 %v5025_v59, %v5025_v59  ;;  %7993 = vst.msk [vmem:[%s14710_s3 + $0x5c8] sm:$0xf] %vm7622_vm3, %v9617_v60  ;;  %v9618_v3 = vpack.c.bf16 %v5297_v61, %v5297_v61  ;;  %v10821_v56 = vld [vmem:[%s14708_s0 + $0x7a0] sm:$0xff]  }
 0x1a4   :  { %7719 = vst.msk [vmem:[%s14710_s3 + $0x180] sm:$0xf] %vm7622_vm3, %v9343_v62  ;;  %v9344_v4 = vpack.c.bf16 %v5023_v63, %v5023_v63  ;;  %7991 = vst.msk [vmem:[%s14710_s3 + $0x5c0] sm:$0xf] %vm7622_vm3, %v9615_v0  ;;  %v10161_v51 = vpop.f32.mrb[100].mxu0  ;;  %v9616_v6 = vpack.c.bf16 %v5295_v1, %v5295_v1  ;;  %v10433_v7 = vpop.f32.mrb[100].mxu1 }
 0x1a5   :  { %7722 = vst.msk [vmem:[%s14710_s3 + $0x18c] sm:$0xf] %vm7622_vm3, %v9346_v2  ;;  %7994 = vst.msk [vmem:[%s14710_s3 + $0x5cc] sm:$0xf] %vm7622_vm3, %v9618_v3  ;;  %v3177_v8 = vadd.f32 %v12467_v16, %v10161_v51  ;;  %v3168_v9 = vpop.f32.mrb[101].mxu0  ;;  %v4265_v5 = vadd.f32 %v12467_v16, %v10433_v7  ;;  %v4256_v11 = vpop.f32.mrb[101].mxu1 }
 0x1a6   :  { %7720 = vst.msk [vmem:[%s14710_s3 + $0x184] sm:$0xf] %vm7622_vm3, %v9344_v4  ;;  %7992 = vst.msk [vmem:[%s14710_s3 + $0x5c4] sm:$0xf] %vm7622_vm3, %v9616_v6  ;;  %v3169_v13 = vadd.f32 %v12467_v16, %v3168_v9  ;;  %v10162_v14 = vpop.f32.mrb[102].mxu0  ;;  %v4257_v15 = vadd.f32 %v12467_v16, %v4256_v11  ;;  %v10434_v17 = vpop.f32.mrb[102].mxu1 }
 0x1a7   :  { %v5028_v20 = vmax.f32 %v3177_v8, 0.0  ;;  %v3180_v21 = vadd.f32 %v12467_v16, %v10162_v14  ;;  %v3171_v22 = vpop.f32.mrb[103].mxu0  ;;  %v5300_v23 = vmax.f32 %v4265_v5, 0.0  ;;  %v4268_v24 = vadd.f32 %v12467_v16, %v10434_v17  ;;  %v4259_v25 = vpop.f32.mrb[103].mxu1 }
 0x1a8   :  { %v5026_v26 = vmax.f32 %v3169_v13, 0.0  ;;  %v3172_v27 = vadd.f32 %v12467_v16, %v3171_v22  ;;  %v5298_v28 = vmax.f32 %v4257_v15, 0.0  ;;  %v4260_v29 = vadd.f32 %v12467_v16, %v4259_v25  ;;  %v10822_v22 = vld [vmem:[%s14708_s0 + $0x7a8] sm:$0xff]  }
 0x1a9   :  { %v9349_v30 = vpack.c.bf16 %v5028_v20, %v5028_v20  ;;  %v5029_v31 = vmax.f32 %v3180_v21, 0.0  ;;  %10268 = vmatmul.mubr.msk.bf16.gmra.mrb[208].mxu0 %vm1916_vm2, %v10812_v10  ;;  %v9621_v32 = vpack.c.bf16 %v5300_v23, %v5300_v23  ;;  %v5301_v33 = vmax.f32 %v4268_v24, 0.0  ;;  %10540 = vmatmul.mubr.msk.bf16.gmra.mrb[208].mxu1 %vm1916_vm2, %v10814_v12 }
 0x1aa   :  { %v9347_v34 = vpack.c.bf16 %v5026_v26, %v5026_v26  ;;  %v5027_v35 = vmax.f32 %v3172_v27, 0.0  ;;  %v9619_v36 = vpack.c.bf16 %v5298_v28, %v5298_v28  ;;  %v5299_v37 = vmax.f32 %v4260_v29, 0.0  ;;  %10271 = vmatprep.mubr.msk.bf16.mxu0 %vm1916_vm2, %v10815_v18  ;;  %10543 = vmatprep.mubr.msk.bf16.mxu1 %vm1916_vm2, %v10817_v19  ;;  %v10820_v19 = vld [vmem:[%s14708_s0 + $0x368] sm:$0xff]   ;;  %v10823_v27 = vld [vmem:[%s14708_s0 + $0x370] sm:$0xff]  }
 0x1ab   :  { %7725 = vst.msk [vmem:[%s14710_s3 + $0x198] sm:$0xf] %vm7622_vm3, %v9349_v30  ;;  %v9350_v38 = vpack.c.bf16 %v5029_v31, %v5029_v31  ;;  %7997 = vst.msk [vmem:[%s14710_s3 + $0x5d8] sm:$0xf] %vm7622_vm3, %v9621_v32  ;;  %v9622_v39 = vpack.c.bf16 %v5301_v33, %v5301_v33  ;;  %v10825_v28 = vld [vmem:[%s14708_s0 + $0x7b0] sm:$0xff]  }
 0x1ac   :  { %7723 = vst.msk [vmem:[%s14710_s3 + $0x190] sm:$0xf] %vm7622_vm3, %v9347_v34  ;;  %v9348_v40 = vpack.c.bf16 %v5027_v35, %v5027_v35  ;;  %7995 = vst.msk [vmem:[%s14710_s3 + $0x5d0] sm:$0xf] %vm7622_vm3, %v9619_v36  ;;  %v10165_v41 = vpop.f32.mrb[104].mxu0  ;;  %v9620_v42 = vpack.c.bf16 %v5299_v37, %v5299_v37  ;;  %v10437_v43 = vpop.f32.mrb[104].mxu1 }
 0x1ad   :  { %7726 = vst.msk [vmem:[%s14710_s3 + $0x19c] sm:$0xf] %vm7622_vm3, %v9350_v38  ;;  %7998 = vst.msk [vmem:[%s14710_s3 + $0x5dc] sm:$0xf] %vm7622_vm3, %v9622_v39  ;;  %v3193_v44 = vadd.f32 %v12467_v16, %v10165_v41  ;;  %v3184_v45 = vpop.f32.mrb[105].mxu0  ;;  %v4281_v47 = vadd.f32 %v12467_v16, %v10437_v43  ;;  %v4272_v48 = vpop.f32.mrb[105].mxu1 }
 0x1ae   :  { %7724 = vst.msk [vmem:[%s14710_s3 + $0x194] sm:$0xf] %vm7622_vm3, %v9348_v40  ;;  %7996 = vst.msk [vmem:[%s14710_s3 + $0x5d4] sm:$0xf] %vm7622_vm3, %v9620_v42  ;;  %v3185_v50 = vadd.f32 %v12467_v16, %v3184_v45  ;;  %v10166_v52 = vpop.f32.mrb[106].mxu0  ;;  %v4273_v53 = vadd.f32 %v12467_v16, %v4272_v48  ;;  %v10438_v54 = vpop.f32.mrb[106].mxu1 }
 0x1af   :  { %v5032_v57 = vmax.f32 %v3193_v44, 0.0  ;;  %v3196_v58 = vadd.f32 %v12467_v16, %v10166_v52  ;;  %v3187_v59 = vpop.f32.mrb[107].mxu0  ;;  %v5304_v60 = vmax.f32 %v4281_v47, 0.0  ;;  %v4284_v61 = vadd.f32 %v12467_v16, %v10438_v54  ;;  %v4275_v62 = vpop.f32.mrb[107].mxu1 }
 0x1b0   :  { %v5030_v63 = vmax.f32 %v3185_v50, 0.0  ;;  %v3188_v0 = vadd.f32 %v12467_v16, %v3187_v59  ;;  %v5302_v1 = vmax.f32 %v4273_v53, 0.0  ;;  %v4276_v2 = vadd.f32 %v12467_v16, %v4275_v62  ;;  %v10826_v59 = vld [vmem:[%s14708_s0 + $0x7b8] sm:$0xff]  }
 0x1b1   :  { %v9353_v3 = vpack.c.bf16 %v5032_v57, %v5032_v57  ;;  %v5033_v4 = vmax.f32 %v3196_v58, 0.0  ;;  %10272 = vmatmul.mubr.msk.bf16.gmra.mrb[212].mxu0 %vm1916_vm2, %v10816_v46  ;;  %v9625_v51 = vpack.c.bf16 %v5304_v60, %v5304_v60  ;;  %v5305_v6 = vmax.f32 %v4284_v61, 0.0  ;;  %10544 = vmatmul.mubr.msk.bf16.gmra.mrb[212].mxu1 %vm1916_vm2, %v10818_v49 }
 0x1b2   :  { %v9351_v7 = vpack.c.bf16 %v5030_v63, %v5030_v63  ;;  %v5031_v8 = vmax.f32 %v3188_v0, 0.0  ;;  %v9623_v9 = vpack.c.bf16 %v5302_v1, %v5302_v1  ;;  %v5303_v10 = vmax.f32 %v4276_v2, 0.0  ;;  %10275 = vmatprep.mubr.msk.bf16.mxu0 %vm1916_vm2, %v10819_v55  ;;  %10547 = vmatprep.mubr.msk.bf16.mxu1 %vm1916_vm2, %v10821_v56  ;;  %v10824_v56 = vld [vmem:[%s14708_s0 + $0x378] sm:$0xff]   ;;  %v10827_v0 = vld [vmem:[%s14708_s0 + $0x380] sm:$0xff]  }
 0x1b3   :  { %7729 = vst.msk [vmem:[%s14710_s3 + $0x1a8] sm:$0xf] %vm7622_vm3, %v9353_v3  ;;  %v9354_v5 = vpack.c.bf16 %v5033_v4, %v5033_v4  ;;  %8001 = vst.msk [vmem:[%s14710_s3 + $0x5e8] sm:$0xf] %vm7622_vm3, %v9625_v51  ;;  %v9626_v11 = vpack.c.bf16 %v5305_v6, %v5305_v6  ;;  %v10829_v1 = vld [vmem:[%s14708_s0 + $0x7c0] sm:$0xff]  }
 0x1b4   :  { %7727 = vst.msk [vmem:[%s14710_s3 + $0x1a0] sm:$0xf] %vm7622_vm3, %v9351_v7  ;;  %v9352_v12 = vpack.c.bf16 %v5031_v8, %v5031_v8  ;;  %7999 = vst.msk [vmem:[%s14710_s3 + $0x5e0] sm:$0xf] %vm7622_vm3, %v9623_v9  ;;  %v10169_v13 = vpop.f32.mrb[108].mxu0  ;;  %v9624_v14 = vpack.c.bf16 %v5303_v10, %v5303_v10  ;;  %v10441_v15 = vpop.f32.mrb[108].mxu1 }
 0x1b5   :  { %7730 = vst.msk [vmem:[%s14710_s3 + $0x1ac] sm:$0xf] %vm7622_vm3, %v9354_v5  ;;  %8002 = vst.msk [vmem:[%s14710_s3 + $0x5ec] sm:$0xf] %vm7622_vm3, %v9626_v11  ;;  %v3209_v17 = vadd.f32 %v12467_v16, %v10169_v13  ;;  %v3200_v18 = vpop.f32.mrb[109].mxu0  ;;  %v4297_v20 = vadd.f32 %v12467_v16, %v10441_v15  ;;  %v4288_v21 = vpop.f32.mrb[109].mxu1 }
 0x1b6   :  { %7728 = vst.msk [vmem:[%s14710_s3 + $0x1a4] sm:$0xf] %vm7622_vm3, %v9352_v12  ;;  %8000 = vst.msk [vmem:[%s14710_s3 + $0x5e4] sm:$0xf] %vm7622_vm3, %v9624_v14  ;;  %v3201_v23 = vadd.f32 %v12467_v16, %v3200_v18  ;;  %v10170_v24 = vpop.f32.mrb[110].mxu0  ;;  %v4289_v25 = vadd.f32 %v12467_v16, %v4288_v21  ;;  %v10442_v26 = vpop.f32.mrb[110].mxu1 }
 0x1b7   :  { %v5036_v29 = vmax.f32 %v3209_v17, 0.0  ;;  %v3212_v30 = vadd.f32 %v12467_v16, %v10170_v24  ;;  %v3203_v31 = vpop.f32.mrb[111].mxu0  ;;  %v5308_v32 = vmax.f32 %v4297_v20, 0.0  ;;  %v4300_v33 = vadd.f32 %v12467_v16, %v10442_v26  ;;  %v4291_v34 = vpop.f32.mrb[111].mxu1 }
 0x1b8   :  { %v5034_v35 = vmax.f32 %v3201_v23, 0.0  ;;  %v3204_v36 = vadd.f32 %v12467_v16, %v3203_v31  ;;  %v5306_v37 = vmax.f32 %v4289_v25, 0.0  ;;  %v4292_v38 = vadd.f32 %v12467_v16, %v4291_v34  ;;  %v10830_v31 = vld [vmem:[%s14708_s0 + $0x7c8] sm:$0xff]  }
 0x1b9   :  { %v9357_v39 = vpack.c.bf16 %v5036_v29, %v5036_v29  ;;  %v5037_v40 = vmax.f32 %v3212_v30, 0.0  ;;  %10276 = vmatmul.mubr.msk.bf16.gmra.mrb[216].mxu0 %vm1916_vm2, %v10820_v19  ;;  %v9629_v41 = vpack.c.bf16 %v5308_v32, %v5308_v32  ;;  %v5309_v42 = vmax.f32 %v4300_v33, 0.0  ;;  %10548 = vmatmul.mubr.msk.bf16.gmra.mrb[216].mxu1 %vm1916_vm2, %v10822_v22 }
 0x1ba   :  { %v9355_v43 = vpack.c.bf16 %v5034_v35, %v5034_v35  ;;  %v5035_v44 = vmax.f32 %v3204_v36, 0.0  ;;  %v9627_v45 = vpack.c.bf16 %v5306_v37, %v5306_v37  ;;  %v5307_v46 = vmax.f32 %v4292_v38, 0.0  ;;  %10279 = vmatprep.mubr.msk.bf16.mxu0 %vm1916_vm2, %v10823_v27  ;;  %10551 = vmatprep.mubr.msk.bf16.mxu1 %vm1916_vm2, %v10825_v28  ;;  %v10828_v28 = vld [vmem:[%s14708_s0 + $0x388] sm:$0xff]   ;;  %v10831_v36 = vld [vmem:[%s14708_s0 + $0x390] sm:$0xff]  }
 0x1bb   :  { %7733 = vst.msk [vmem:[%s14710_s3 + $0x1b8] sm:$0xf] %vm7622_vm3, %v9357_v39  ;;  %v9358_v47 = vpack.c.bf16 %v5037_v40, %v5037_v40  ;;  %8005 = vst.msk [vmem:[%s14710_s3 + $0x5f8] sm:$0xf] %vm7622_vm3, %v9629_v41  ;;  %v9630_v48 = vpack.c.bf16 %v5309_v42, %v5309_v42  ;;  %v10833_v37 = vld [vmem:[%s14708_s0 + $0x7d0] sm:$0xff]  }
 0x1bc   :  { %7731 = vst.msk [vmem:[%s14710_s3 + $0x1b0] sm:$0xf] %vm7622_vm3, %v9355_v43  ;;  %v9356_v49 = vpack.c.bf16 %v5035_v44, %v5035_v44  ;;  %8003 = vst.msk [vmem:[%s14710_s3 + $0x5f0] sm:$0xf] %vm7622_vm3, %v9627_v45  ;;  %v10173_v50 = vpop.f32.mrb[112].mxu0  ;;  %v9628_v52 = vpack.c.bf16 %v5307_v46, %v5307_v46  ;;  %v10445_v53 = vpop.f32.mrb[112].mxu1 }
 0x1bd   :  { %7734 = vst.msk [vmem:[%s14710_s3 + $0x1bc] sm:$0xf] %vm7622_vm3, %v9358_v47  ;;  %8006 = vst.msk [vmem:[%s14710_s3 + $0x5fc] sm:$0xf] %vm7622_vm3, %v9630_v48  ;;  %v3225_v54 = vadd.f32 %v12467_v16, %v10173_v50  ;;  %v3216_v55 = vpop.f32.mrb[113].mxu0  ;;  %v4313_v57 = vadd.f32 %v12467_v16, %v10445_v53  ;;  %v4304_v58 = vpop.f32.mrb[113].mxu1 }
 0x1be   :  { %7732 = vst.msk [vmem:[%s14710_s3 + $0x1b4] sm:$0xf] %vm7622_vm3, %v9356_v49  ;;  %8004 = vst.msk [vmem:[%s14710_s3 + $0x5f4] sm:$0xf] %vm7622_vm3, %v9628_v52  ;;  %v3217_v60 = vadd.f32 %v12467_v16, %v3216_v55  ;;  %v10174_v61 = vpop.f32.mrb[114].mxu0  ;;  %v4305_v62 = vadd.f32 %v12467_v16, %v4304_v58  ;;  %v10446_v63 = vpop.f32.mrb[114].mxu1 }
 0x1bf   :  { %v5040_v2 = vmax.f32 %v3225_v54, 0.0  ;;  %v3228_v3 = vadd.f32 %v12467_v16, %v10174_v61  ;;  %v3219_v4 = vpop.f32.mrb[115].mxu0  ;;  %v5312_v51 = vmax.f32 %v4313_v57, 0.0  ;;  %v4316_v6 = vadd.f32 %v12467_v16, %v10446_v63  ;;  %v4307_v7 = vpop.f32.mrb[115].mxu1 }
 0x1c0   :  { %v5038_v8 = vmax.f32 %v3217_v60, 0.0  ;;  %v3220_v9 = vadd.f32 %v12467_v16, %v3219_v4  ;;  %v5310_v10 = vmax.f32 %v4305_v62, 0.0  ;;  %v4308_v5 = vadd.f32 %v12467_v16, %v4307_v7  ;;  %v10834_v4 = vld [vmem:[%s14708_s0 + $0x7d8] sm:$0xff]  }
 0x1c1   :  { %v9361_v11 = vpack.c.bf16 %v5040_v2, %v5040_v2  ;;  %v5041_v12 = vmax.f32 %v3228_v3, 0.0  ;;  %10280 = vmatmul.mubr.msk.bf16.gmra.mrb[220].mxu0 %vm1916_vm2, %v10824_v56  ;;  %v9633_v13 = vpack.c.bf16 %v5312_v51, %v5312_v51  ;;  %v5313_v14 = vmax.f32 %v4316_v6, 0.0  ;;  %10552 = vmatmul.mubr.msk.bf16.gmra.mrb[220].mxu1 %vm1916_vm2, %v10826_v59 }
 0x1c2   :  { %v9359_v15 = vpack.c.bf16 %v5038_v8, %v5038_v8  ;;  %v5039_v17 = vmax.f32 %v3220_v9, 0.0  ;;  %v9631_v18 = vpack.c.bf16 %v5310_v10, %v5310_v10  ;;  %v5311_v19 = vmax.f32 %v4308_v5, 0.0  ;;  %10283 = vmatprep.mubr.msk.bf16.mxu0 %vm1916_vm2, %v10827_v0  ;;  %10555 = vmatprep.mubr.msk.bf16.mxu1 %vm1916_vm2, %v10829_v1  ;;  %v10832_v1 = vld [vmem:[%s14708_s0 + $0x398] sm:$0xff]   ;;  %v10835_v9 = vld [vmem:[%s14708_s0 + $0x3a0] sm:$0xff]  }
 0x1c3   :  { %7737 = vst.msk [vmem:[%s14710_s3 + $0x1c8] sm:$0xf] %vm7622_vm3, %v9361_v11  ;;  %v9362_v20 = vpack.c.bf16 %v5041_v12, %v5041_v12  ;;  %8009 = vst.msk [vmem:[%s14710_s3 + $0x608] sm:$0xf] %vm7622_vm3, %v9633_v13  ;;  %v9634_v21 = vpack.c.bf16 %v5313_v14, %v5313_v14  ;;  %v10837_v10 = vld [vmem:[%s14708_s0 + $0x7e0] sm:$0xff]  }
 0x1c4   :  { %7735 = vst.msk [vmem:[%s14710_s3 + $0x1c0] sm:$0xf] %vm7622_vm3, %v9359_v15  ;;  %v9360_v22 = vpack.c.bf16 %v5039_v17, %v5039_v17  ;;  %8007 = vst.msk [vmem:[%s14710_s3 + $0x600] sm:$0xf] %vm7622_vm3, %v9631_v18  ;;  %v10177_v23 = vpop.f32.mrb[116].mxu0  ;;  %v9632_v24 = vpack.c.bf16 %v5311_v19, %v5311_v19  ;;  %v10449_v25 = vpop.f32.mrb[116].mxu1 }
 0x1c5   :  { %7738 = vst.msk [vmem:[%s14710_s3 + $0x1cc] sm:$0xf] %vm7622_vm3, %v9362_v20  ;;  %8010 = vst.msk [vmem:[%s14710_s3 + $0x60c] sm:$0xf] %vm7622_vm3, %v9634_v21  ;;  %v3241_v26 = vadd.f32 %v12467_v16, %v10177_v23  ;;  %v3232_v27 = vpop.f32.mrb[117].mxu0  ;;  %v4329_v29 = vadd.f32 %v12467_v16, %v10449_v25  ;;  %v4320_v30 = vpop.f32.mrb[117].mxu1 }
 0x1c6   :  { %7736 = vst.msk [vmem:[%s14710_s3 + $0x1c4] sm:$0xf] %vm7622_vm3, %v9360_v22  ;;  %8008 = vst.msk [vmem:[%s14710_s3 + $0x604] sm:$0xf] %vm7622_vm3, %v9632_v24  ;;  %v3233_v32 = vadd.f32 %v12467_v16, %v3232_v27  ;;  %v10178_v33 = vpop.f32.mrb[118].mxu0  ;;  %v4321_v34 = vadd.f32 %v12467_v16, %v4320_v30  ;;  %v10450_v35 = vpop.f32.mrb[118].mxu1 }
 0x1c7   :  { %v5044_v38 = vmax.f32 %v3241_v26, 0.0  ;;  %v3244_v39 = vadd.f32 %v12467_v16, %v10178_v33  ;;  %v3235_v40 = vpop.f32.mrb[119].mxu0  ;;  %v5316_v41 = vmax.f32 %v4329_v29, 0.0  ;;  %v4332_v42 = vadd.f32 %v12467_v16, %v10450_v35  ;;  %v4323_v43 = vpop.f32.mrb[119].mxu1 }
 0x1c8   :  { %v5042_v44 = vmax.f32 %v3233_v32, 0.0  ;;  %v3236_v45 = vadd.f32 %v12467_v16, %v3235_v40  ;;  %v5314_v46 = vmax.f32 %v4321_v34, 0.0  ;;  %v4324_v47 = vadd.f32 %v12467_v16, %v4323_v43  ;;  %v13088_v34 = vld [vmem:[%s14709_s2] ss:$0 sm:$0xff]  ;;  %v10838_v40 = vld [vmem:[%s14708_s0 + $0x7e8] sm:$0xff]  }
 0x1c9   :  { %v9365_v48 = vpack.c.bf16 %v5044_v38, %v5044_v38  ;;  %v5045_v49 = vmax.f32 %v3244_v39, 0.0  ;;  %10284 = vmatmul.mubr.msk.bf16.gmra.mrb[224].mxu0 %vm1916_vm2, %v10828_v28  ;;  %v9637_v50 = vpack.c.bf16 %v5316_v41, %v5316_v41  ;;  %v5317_v52 = vmax.f32 %v4332_v42, 0.0  ;;  %10556 = vmatmul.mubr.msk.bf16.gmra.mrb[224].mxu1 %vm1916_vm2, %v10830_v31 }
 0x1ca   :  { %v9363_v53 = vpack.c.bf16 %v5042_v44, %v5042_v44  ;;  %v5043_v54 = vmax.f32 %v3236_v45, 0.0  ;;  %v9635_v55 = vpack.c.bf16 %v5314_v46, %v5314_v46  ;;  %v5315_v56 = vmax.f32 %v4324_v47, 0.0  ;;  %10287 = vmatprep.mubr.msk.bf16.mxu0 %vm1916_vm2, %v10831_v36  ;;  %10559 = vmatprep.mubr.msk.bf16.mxu1 %vm1916_vm2, %v10833_v37  ;;  %v10836_v37 = vld [vmem:[%s14708_s0 + $0x3a8] sm:$0xff]   ;;  %v10839_v45 = vld [vmem:[%s14708_s0 + $0x3b0] sm:$0xff]  }
 0x1cb   :  { %7741 = vst.msk [vmem:[%s14710_s3 + $0x1d8] sm:$0xf] %vm7622_vm3, %v9365_v48  ;;  %v9366_v57 = vpack.c.bf16 %v5045_v49, %v5045_v49  ;;  %8013 = vst.msk [vmem:[%s14710_s3 + $0x618] sm:$0xf] %vm7622_vm3, %v9637_v50  ;;  %v9638_v58 = vpack.c.bf16 %v5317_v52, %v5317_v52  ;;  %v10841_v46 = vld [vmem:[%s14708_s0 + $0x7f0] sm:$0xff]  }
 0x1cc   :  { %7739 = vst.msk [vmem:[%s14710_s3 + $0x1d0] sm:$0xf] %vm7622_vm3, %v9363_v53  ;;  %v9364_v59 = vpack.c.bf16 %v5043_v54, %v5043_v54  ;;  %8011 = vst.msk [vmem:[%s14710_s3 + $0x610] sm:$0xf] %vm7622_vm3, %v9635_v55  ;;  %v10181_v60 = vpop.f32.mrb[120].mxu0  ;;  %v9636_v61 = vpack.c.bf16 %v5315_v56, %v5315_v56  ;;  %v10453_v62 = vpop.f32.mrb[120].mxu1 }
 0x1cd   :  { %7742 = vst.msk [vmem:[%s14710_s3 + $0x1dc] sm:$0xf] %vm7622_vm3, %v9366_v57  ;;  %8014 = vst.msk [vmem:[%s14710_s3 + $0x61c] sm:$0xf] %vm7622_vm3, %v9638_v58  ;;  %v3257_v63 = vadd.f32 %v12467_v16, %v10181_v60  ;;  %v3248_v0 = vpop.f32.mrb[121].mxu0  ;;  %v4345_v2 = vadd.f32 %v12467_v16, %v10453_v62  ;;  %v4336_v3 = vpop.f32.mrb[121].mxu1 }
 0x1ce   :  { %7740 = vst.msk [vmem:[%s14710_s3 + $0x1d4] sm:$0xf] %vm7622_vm3, %v9364_v59  ;;  %8012 = vst.msk [vmem:[%s14710_s3 + $0x614] sm:$0xf] %vm7622_vm3, %v9636_v61  ;;  %v3249_v51 = vadd.f32 %v12467_v16, %v3248_v0  ;;  %v10182_v6 = vpop.f32.mrb[122].mxu0  ;;  %v4337_v7 = vadd.f32 %v12467_v16, %v4336_v3  ;;  %v10454_v8 = vpop.f32.mrb[122].mxu1 }
 0x1cf   :  { %v5048_v5 = vmax.f32 %v3257_v63, 0.0  ;;  %v3260_v11 = vadd.f32 %v12467_v16, %v10182_v6  ;;  %v3251_v12 = vpop.f32.mrb[123].mxu0  ;;  %v5320_v13 = vmax.f32 %v4345_v2, 0.0  ;;  %v4348_v14 = vadd.f32 %v12467_v16, %v10454_v8  ;;  %v4339_v15 = vpop.f32.mrb[123].mxu1 }
 0x1d0   :  { %v5046_v17 = vmax.f32 %v3249_v51, 0.0  ;;  %v3252_v18 = vadd.f32 %v12467_v16, %v3251_v12  ;;  %v5318_v19 = vmax.f32 %v4337_v7, 0.0  ;;  %v4340_v20 = vadd.f32 %v12467_v16, %v4339_v15  ;;  %v10842_v12 = vld [vmem:[%s14708_s0 + $0x7f8] sm:$0xff]  }
 0x1d1   :  { %v9369_v21 = vpack.c.bf16 %v5048_v5, %v5048_v5  ;;  %v5049_v22 = vmax.f32 %v3260_v11, 0.0  ;;  %10288 = vmatmul.mubr.msk.bf16.gmra.mrb[228].mxu0 %vm1916_vm2, %v10832_v1  ;;  %v9641_v23 = vpack.c.bf16 %v5320_v13, %v5320_v13  ;;  %v5321_v24 = vmax.f32 %v4348_v14, 0.0  ;;  %10560 = vmatmul.mubr.msk.bf16.gmra.mrb[228].mxu1 %vm1916_vm2, %v10834_v4 }
 0x1d2   :  { %v9367_v25 = vpack.c.bf16 %v5046_v17, %v5046_v17  ;;  %v5047_v26 = vmax.f32 %v3252_v18, 0.0  ;;  %v9639_v27 = vpack.c.bf16 %v5318_v19, %v5318_v19  ;;  %v5319_v28 = vmax.f32 %v4340_v20, 0.0  ;;  %10291 = vmatprep.mubr.msk.bf16.mxu0 %vm1916_vm2, %v10835_v9  ;;  %10563 = vmatprep.mubr.msk.bf16.mxu1 %vm1916_vm2, %v10837_v10  ;;  %v10840_v10 = vld [vmem:[%s14708_s0 + $0x3b8] sm:$0xff]   ;;  %v10843_v18 = vld [vmem:[%s14708_s0 + $0x3c0] sm:$0xff]  }
 0x1d3   :  { %7745 = vst.msk [vmem:[%s14710_s3 + $0x1e8] sm:$0xf] %vm7622_vm3, %v9369_v21  ;;  %v9370_v16 = vpack.c.bf16 %v5049_v22, %v5049_v22  ;;  %8017 = vst.msk [vmem:[%s14710_s3 + $0x628] sm:$0xf] %vm7622_vm3, %v9641_v23  ;;  %v9642_v29 = vpack.c.bf16 %v5321_v24, %v5321_v24  ;;  %v10845_v19 = vld [vmem:[%s14708_s0 + $0x800] sm:$0xff]  }
 0x1d4   :  { %7743 = vst.msk [vmem:[%s14710_s3 + $0x1e0] sm:$0xf] %vm7622_vm3, %v9367_v25  ;;  %v9368_v30 = vpack.c.bf16 %v5047_v26, %v5047_v26  ;;  %8015 = vst.msk [vmem:[%s14710_s3 + $0x620] sm:$0xf] %vm7622_vm3, %v9639_v27  ;;  %v10185_v31 = vpop.f32.mrb[124].mxu0  ;;  %v9640_v32 = vpack.c.bf16 %v5319_v28, %v5319_v28  ;;  %v10457_v33 = vpop.f32.mrb[124].mxu1 }
 0x1d5   :  { %7746 = vst.msk [vmem:[%s14710_s3 + $0x1ec] sm:$0xf] %vm7622_vm3, %v9370_v16  ;;  %8018 = vst.msk [vmem:[%s14710_s3 + $0x62c] sm:$0xf] %vm7622_vm3, %v9642_v29  ;;  %v3273_v35 = vadd.f32 %v13088_v34, %v10185_v31  ;;  %v3264_v36 = vpop.f32.mrb[125].mxu0  ;;  %v4361_v38 = vadd.f32 %v13088_v34, %v10457_v33  ;;  %v4352_v39 = vpop.f32.mrb[125].mxu1 }
 0x1d6   :  { %7744 = vst.msk [vmem:[%s14710_s3 + $0x1e4] sm:$0xf] %vm7622_vm3, %v9368_v30  ;;  %8016 = vst.msk [vmem:[%s14710_s3 + $0x624] sm:$0xf] %vm7622_vm3, %v9640_v32  ;;  %v3265_v41 = vadd.f32 %v13088_v34, %v3264_v36  ;;  %v10186_v42 = vpop.f32.mrb[126].mxu0  ;;  %v4353_v43 = vadd.f32 %v13088_v34, %v4352_v39  ;;  %v10458_v44 = vpop.f32.mrb[126].mxu1 }
 0x1d7   :  { %v5052_v47 = vmax.f32 %v3273_v35, 0.0  ;;  %v3276_v48 = vadd.f32 %v13088_v34, %v10186_v42  ;;  %v3267_v49 = vpop.f32.mrb[127].mxu0  ;;  %v5324_v50 = vmax.f32 %v4361_v38, 0.0  ;;  %v4364_v52 = vadd.f32 %v13088_v34, %v10458_v44  ;;  %v4355_v53 = vpop.f32.mrb[127].mxu1 }
 0x1d8   :  { %v5050_v54 = vmax.f32 %v3265_v41, 0.0  ;;  %v3268_v55 = vadd.f32 %v13088_v34, %v3267_v49  ;;  %v5322_v56 = vmax.f32 %v4353_v43, 0.0  ;;  %v4356_v57 = vadd.f32 %v13088_v34, %v4355_v53  ;;  %v10846_v49 = vld [vmem:[%s14708_s0 + $0x808] sm:$0xff]  }
 0x1d9   :  { %v9373_v58 = vpack.c.bf16 %v5052_v47, %v5052_v47  ;;  %v5053_v59 = vmax.f32 %v3276_v48, 0.0  ;;  %10292 = vmatmul.mubr.msk.bf16.gmra.mrb[232].mxu0 %vm1916_vm2, %v10836_v37  ;;  %v9645_v60 = vpack.c.bf16 %v5324_v50, %v5324_v50  ;;  %v5325_v61 = vmax.f32 %v4364_v52, 0.0  ;;  %10564 = vmatmul.mubr.msk.bf16.gmra.mrb[232].mxu1 %vm1916_vm2, %v10838_v40 }
 0x1da   :  { %v9371_v62 = vpack.c.bf16 %v5050_v54, %v5050_v54  ;;  %v5051_v63 = vmax.f32 %v3268_v55, 0.0  ;;  %v9643_v0 = vpack.c.bf16 %v5322_v56, %v5322_v56  ;;  %v5323_v1 = vmax.f32 %v4356_v57, 0.0  ;;  %10295 = vmatprep.mubr.msk.bf16.mxu0 %vm1916_vm2, %v10839_v45  ;;  %10567 = vmatprep.mubr.msk.bf16.mxu1 %vm1916_vm2, %v10841_v46  ;;  %v10844_v46 = vld [vmem:[%s14708_s0 + $0x3c8] sm:$0xff]   ;;  %v10847_v55 = vld [vmem:[%s14708_s0 + $0x3d0] sm:$0xff]  }
 0x1db   :  { %7749 = vst.msk [vmem:[%s14710_s3 + $0x1f8] sm:$0xf] %vm7622_vm3, %v9373_v58  ;;  %v9374_v2 = vpack.c.bf16 %v5053_v59, %v5053_v59  ;;  %8021 = vst.msk [vmem:[%s14710_s3 + $0x638] sm:$0xf] %vm7622_vm3, %v9645_v60  ;;  %v9646_v3 = vpack.c.bf16 %v5325_v61, %v5325_v61  ;;  %v10849_v56 = vld [vmem:[%s14708_s0 + $0x810] sm:$0xff]  }
 0x1dc   :  { %7747 = vst.msk [vmem:[%s14710_s3 + $0x1f0] sm:$0xf] %vm7622_vm3, %v9371_v62  ;;  %v9372_v4 = vpack.c.bf16 %v5051_v63, %v5051_v63  ;;  %8019 = vst.msk [vmem:[%s14710_s3 + $0x630] sm:$0xf] %vm7622_vm3, %v9643_v0  ;;  %v10189_v51 = vpop.f32.mrb[128].mxu0  ;;  %v9644_v6 = vpack.c.bf16 %v5323_v1, %v5323_v1  ;;  %v10461_v7 = vpop.f32.mrb[128].mxu1 }
 0x1dd   :  { %7750 = vst.msk [vmem:[%s14710_s3 + $0x1fc] sm:$0xf] %vm7622_vm3, %v9374_v2  ;;  %8022 = vst.msk [vmem:[%s14710_s3 + $0x63c] sm:$0xf] %vm7622_vm3, %v9646_v3  ;;  %v3289_v8 = vadd.f32 %v13088_v34, %v10189_v51  ;;  %v3280_v9 = vpop.f32.mrb[129].mxu0  ;;  %v4377_v5 = vadd.f32 %v13088_v34, %v10461_v7  ;;  %v4368_v11 = vpop.f32.mrb[129].mxu1 }
 0x1de   :  { %7748 = vst.msk [vmem:[%s14710_s3 + $0x1f4] sm:$0xf] %vm7622_vm3, %v9372_v4  ;;  %8020 = vst.msk [vmem:[%s14710_s3 + $0x634] sm:$0xf] %vm7622_vm3, %v9644_v6  ;;  %v3281_v13 = vadd.f32 %v13088_v34, %v3280_v9  ;;  %v10190_v14 = vpop.f32.mrb[130].mxu0  ;;  %v4369_v15 = vadd.f32 %v13088_v34, %v4368_v11  ;;  %v10462_v17 = vpop.f32.mrb[130].mxu1 }
 0x1df   :  { %v5056_v20 = vmax.f32 %v3289_v8, 0.0  ;;  %v3292_v21 = vadd.f32 %v13088_v34, %v10190_v14  ;;  %v3283_v22 = vpop.f32.mrb[131].mxu0  ;;  %v5328_v23 = vmax.f32 %v4377_v5, 0.0  ;;  %v4380_v24 = vadd.f32 %v13088_v34, %v10462_v17  ;;  %v4371_v25 = vpop.f32.mrb[131].mxu1 }
 0x1e0   :  { %v5054_v26 = vmax.f32 %v3281_v13, 0.0  ;;  %v3284_v27 = vadd.f32 %v13088_v34, %v3283_v22  ;;  %v5326_v28 = vmax.f32 %v4369_v15, 0.0  ;;  %v4372_v16 = vadd.f32 %v13088_v34, %v4371_v25  ;;  %v10850_v22 = vld [vmem:[%s14708_s0 + $0x818] sm:$0xff]  }
 0x1e1   :  { %v9377_v29 = vpack.c.bf16 %v5056_v20, %v5056_v20  ;;  %v5057_v30 = vmax.f32 %v3292_v21, 0.0  ;;  %10296 = vmatmul.mubr.msk.bf16.gmra.mrb[236].mxu0 %vm1916_vm2, %v10840_v10  ;;  %v9649_v31 = vpack.c.bf16 %v5328_v23, %v5328_v23  ;;  %v5329_v32 = vmax.f32 %v4380_v24, 0.0  ;;  %10568 = vmatmul.mubr.msk.bf16.gmra.mrb[236].mxu1 %vm1916_vm2, %v10842_v12 }
 0x1e2   :  { %v9375_v33 = vpack.c.bf16 %v5054_v26, %v5054_v26  ;;  %v5055_v35 = vmax.f32 %v3284_v27, 0.0  ;;  %v9647_v36 = vpack.c.bf16 %v5326_v28, %v5326_v28  ;;  %v5327_v37 = vmax.f32 %v4372_v16, 0.0  ;;  %10299 = vmatprep.mubr.msk.bf16.mxu0 %vm1916_vm2, %v10843_v18  ;;  %10571 = vmatprep.mubr.msk.bf16.mxu1 %vm1916_vm2, %v10845_v19  ;;  %v10848_v19 = vld [vmem:[%s14708_s0 + $0x3d8] sm:$0xff]   ;;  %v10851_v27 = vld [vmem:[%s14708_s0 + $0x3e0] sm:$0xff]  }
 0x1e3   :  { %7753 = vst.msk [vmem:[%s14710_s3 + $0x208] sm:$0xf] %vm7622_vm3, %v9377_v29  ;;  %v9378_v38 = vpack.c.bf16 %v5057_v30, %v5057_v30  ;;  %8025 = vst.msk [vmem:[%s14710_s3 + $0x648] sm:$0xf] %vm7622_vm3, %v9649_v31  ;;  %v9650_v39 = vpack.c.bf16 %v5329_v32, %v5329_v32  ;;  %v10853_v28 = vld [vmem:[%s14708_s0 + $0x820] sm:$0xff]  }
 0x1e4   :  { %7751 = vst.msk [vmem:[%s14710_s3 + $0x200] sm:$0xf] %vm7622_vm3, %v9375_v33  ;;  %v9376_v40 = vpack.c.bf16 %v5055_v35, %v5055_v35  ;;  %8023 = vst.msk [vmem:[%s14710_s3 + $0x640] sm:$0xf] %vm7622_vm3, %v9647_v36  ;;  %v10193_v41 = vpop.f32.mrb[132].mxu0  ;;  %v9648_v42 = vpack.c.bf16 %v5327_v37, %v5327_v37  ;;  %v10465_v43 = vpop.f32.mrb[132].mxu1 }
 0x1e5   :  { %7754 = vst.msk [vmem:[%s14710_s3 + $0x20c] sm:$0xf] %vm7622_vm3, %v9378_v38  ;;  %8026 = vst.msk [vmem:[%s14710_s3 + $0x64c] sm:$0xf] %vm7622_vm3, %v9650_v39  ;;  %v3305_v44 = vadd.f32 %v13088_v34, %v10193_v41  ;;  %v3296_v45 = vpop.f32.mrb[133].mxu0  ;;  %v4393_v47 = vadd.f32 %v13088_v34, %v10465_v43  ;;  %v4384_v48 = vpop.f32.mrb[133].mxu1 }
 0x1e6   :  { %7752 = vst.msk [vmem:[%s14710_s3 + $0x204] sm:$0xf] %vm7622_vm3, %v9376_v40  ;;  %8024 = vst.msk [vmem:[%s14710_s3 + $0x644] sm:$0xf] %vm7622_vm3, %v9648_v42  ;;  %v3297_v50 = vadd.f32 %v13088_v34, %v3296_v45  ;;  %v10194_v52 = vpop.f32.mrb[134].mxu0  ;;  %v4385_v53 = vadd.f32 %v13088_v34, %v4384_v48  ;;  %v10466_v54 = vpop.f32.mrb[134].mxu1 }
 0x1e7   :  { %v5060_v57 = vmax.f32 %v3305_v44, 0.0  ;;  %v3308_v58 = vadd.f32 %v13088_v34, %v10194_v52  ;;  %v3299_v59 = vpop.f32.mrb[135].mxu0  ;;  %v5332_v60 = vmax.f32 %v4393_v47, 0.0  ;;  %v4396_v61 = vadd.f32 %v13088_v34, %v10466_v54  ;;  %v4387_v62 = vpop.f32.mrb[135].mxu1 }
 0x1e8   :  { %v5058_v63 = vmax.f32 %v3297_v50, 0.0  ;;  %v3300_v0 = vadd.f32 %v13088_v34, %v3299_v59  ;;  %v5330_v1 = vmax.f32 %v4385_v53, 0.0  ;;  %v4388_v2 = vadd.f32 %v13088_v34, %v4387_v62  ;;  %v10854_v59 = vld [vmem:[%s14708_s0 + $0x828] sm:$0xff]  }
 0x1e9   :  { %v9381_v3 = vpack.c.bf16 %v5060_v57, %v5060_v57  ;;  %v5061_v4 = vmax.f32 %v3308_v58, 0.0  ;;  %10300 = vmatmul.mubr.msk.bf16.gmra.mrb[240].mxu0 %vm1916_vm2, %v10844_v46  ;;  %v9653_v51 = vpack.c.bf16 %v5332_v60, %v5332_v60  ;;  %v5333_v6 = vmax.f32 %v4396_v61, 0.0  ;;  %10572 = vmatmul.mubr.msk.bf16.gmra.mrb[240].mxu1 %vm1916_vm2, %v10846_v49 }
 0x1ea   :  { %v9379_v7 = vpack.c.bf16 %v5058_v63, %v5058_v63  ;;  %v5059_v8 = vmax.f32 %v3300_v0, 0.0  ;;  %v9651_v9 = vpack.c.bf16 %v5330_v1, %v5330_v1  ;;  %v5331_v10 = vmax.f32 %v4388_v2, 0.0  ;;  %10303 = vmatprep.mubr.msk.bf16.mxu0 %vm1916_vm2, %v10847_v55  ;;  %10575 = vmatprep.mubr.msk.bf16.mxu1 %vm1916_vm2, %v10849_v56  ;;  %v10852_v56 = vld [vmem:[%s14708_s0 + $0x3e8] sm:$0xff]   ;;  %v10855_v0 = vld [vmem:[%s14708_s0 + $0x3f0] sm:$0xff]  }
 0x1eb   :  { %7757 = vst.msk [vmem:[%s14710_s3 + $0x218] sm:$0xf] %vm7622_vm3, %v9381_v3  ;;  %v9382_v5 = vpack.c.bf16 %v5061_v4, %v5061_v4  ;;  %8029 = vst.msk [vmem:[%s14710_s3 + $0x658] sm:$0xf] %vm7622_vm3, %v9653_v51  ;;  %v9654_v11 = vpack.c.bf16 %v5333_v6, %v5333_v6  ;;  %v10857_v1 = vld [vmem:[%s14708_s0 + $0x830] sm:$0xff]  }
 0x1ec   :  { %7755 = vst.msk [vmem:[%s14710_s3 + $0x210] sm:$0xf] %vm7622_vm3, %v9379_v7  ;;  %v9380_v12 = vpack.c.bf16 %v5059_v8, %v5059_v8  ;;  %8027 = vst.msk [vmem:[%s14710_s3 + $0x650] sm:$0xf] %vm7622_vm3, %v9651_v9  ;;  %v10197_v13 = vpop.f32.mrb[136].mxu0  ;;  %v9652_v14 = vpack.c.bf16 %v5331_v10, %v5331_v10  ;;  %v10469_v15 = vpop.f32.mrb[136].mxu1 }
 0x1ed   :  { %7758 = vst.msk [vmem:[%s14710_s3 + $0x21c] sm:$0xf] %vm7622_vm3, %v9382_v5  ;;  %8030 = vst.msk [vmem:[%s14710_s3 + $0x65c] sm:$0xf] %vm7622_vm3, %v9654_v11  ;;  %v3321_v17 = vadd.f32 %v13088_v34, %v10197_v13  ;;  %v3312_v18 = vpop.f32.mrb[137].mxu0  ;;  %v4409_v20 = vadd.f32 %v13088_v34, %v10469_v15  ;;  %v4400_v21 = vpop.f32.mrb[137].mxu1 }
 0x1ee   :  { %7756 = vst.msk [vmem:[%s14710_s3 + $0x214] sm:$0xf] %vm7622_vm3, %v9380_v12  ;;  %8028 = vst.msk [vmem:[%s14710_s3 + $0x654] sm:$0xf] %vm7622_vm3, %v9652_v14  ;;  %v3313_v23 = vadd.f32 %v13088_v34, %v3312_v18  ;;  %v10198_v24 = vpop.f32.mrb[138].mxu0  ;;  %v4401_v25 = vadd.f32 %v13088_v34, %v4400_v21  ;;  %v10470_v26 = vpop.f32.mrb[138].mxu1 }
 0x1ef   :  { %v5064_v16 = vmax.f32 %v3321_v17, 0.0  ;;  %v3324_v29 = vadd.f32 %v13088_v34, %v10198_v24  ;;  %v3315_v30 = vpop.f32.mrb[139].mxu0  ;;  %v5336_v31 = vmax.f32 %v4409_v20, 0.0  ;;  %v4412_v32 = vadd.f32 %v13088_v34, %v10470_v26  ;;  %v4403_v33 = vpop.f32.mrb[139].mxu1 }
 0x1f0   :  { %v5062_v35 = vmax.f32 %v3313_v23, 0.0  ;;  %v3316_v36 = vadd.f32 %v13088_v34, %v3315_v30  ;;  %v5334_v37 = vmax.f32 %v4401_v25, 0.0  ;;  %v4404_v38 = vadd.f32 %v13088_v34, %v4403_v33  ;;  %v10858_v30 = vld [vmem:[%s14708_s0 + $0x838] sm:$0xff]  }
 0x1f1   :  { %v9385_v39 = vpack.c.bf16 %v5064_v16, %v5064_v16  ;;  %v5065_v40 = vmax.f32 %v3324_v29, 0.0  ;;  %10304 = vmatmul.mubr.msk.bf16.gmra.mrb[244].mxu0 %vm1916_vm2, %v10848_v19  ;;  %v9657_v41 = vpack.c.bf16 %v5336_v31, %v5336_v31  ;;  %v5337_v42 = vmax.f32 %v4412_v32, 0.0  ;;  %10576 = vmatmul.mubr.msk.bf16.gmra.mrb[244].mxu1 %vm1916_vm2, %v10850_v22 }
 0x1f2   :  { %v9383_v43 = vpack.c.bf16 %v5062_v35, %v5062_v35  ;;  %v5063_v44 = vmax.f32 %v3316_v36, 0.0  ;;  %v9655_v45 = vpack.c.bf16 %v5334_v37, %v5334_v37  ;;  %v5335_v46 = vmax.f32 %v4404_v38, 0.0  ;;  %10307 = vmatprep.mubr.msk.bf16.mxu0 %vm1916_vm2, %v10851_v27  ;;  %10579 = vmatprep.mubr.msk.bf16.mxu1 %vm1916_vm2, %v10853_v28  ;;  %v10856_v28 = vld [vmem:[%s14708_s0 + $0x3f8] sm:$0xff]   ;;  %v10859_v36 = vld [vmem:[%s14708_s0 + $0x400] sm:$0xff]  }
 0x1f3   :  { %7761 = vst.msk [vmem:[%s14710_s3 + $0x228] sm:$0xf] %vm7622_vm3, %v9385_v39  ;;  %v9386_v47 = vpack.c.bf16 %v5065_v40, %v5065_v40  ;;  %8033 = vst.msk [vmem:[%s14710_s3 + $0x668] sm:$0xf] %vm7622_vm3, %v9657_v41  ;;  %v9658_v48 = vpack.c.bf16 %v5337_v42, %v5337_v42  ;;  %v10861_v37 = vld [vmem:[%s14708_s0 + $0x840] sm:$0xff]  }
 0x1f4   :  { %7759 = vst.msk [vmem:[%s14710_s3 + $0x220] sm:$0xf] %vm7622_vm3, %v9383_v43  ;;  %v9384_v49 = vpack.c.bf16 %v5063_v44, %v5063_v44  ;;  %8031 = vst.msk [vmem:[%s14710_s3 + $0x660] sm:$0xf] %vm7622_vm3, %v9655_v45  ;;  %v10201_v50 = vpop.f32.mrb[140].mxu0  ;;  %v9656_v52 = vpack.c.bf16 %v5335_v46, %v5335_v46  ;;  %v10473_v53 = vpop.f32.mrb[140].mxu1 }
 0x1f5   :  { %7762 = vst.msk [vmem:[%s14710_s3 + $0x22c] sm:$0xf] %vm7622_vm3, %v9386_v47  ;;  %8034 = vst.msk [vmem:[%s14710_s3 + $0x66c] sm:$0xf] %vm7622_vm3, %v9658_v48  ;;  %v3337_v54 = vadd.f32 %v13088_v34, %v10201_v50  ;;  %v3328_v55 = vpop.f32.mrb[141].mxu0  ;;  %v4425_v57 = vadd.f32 %v13088_v34, %v10473_v53  ;;  %v4416_v58 = vpop.f32.mrb[141].mxu1 }
 0x1f6   :  { %7760 = vst.msk [vmem:[%s14710_s3 + $0x224] sm:$0xf] %vm7622_vm3, %v9384_v49  ;;  %8032 = vst.msk [vmem:[%s14710_s3 + $0x664] sm:$0xf] %vm7622_vm3, %v9656_v52  ;;  %v3329_v60 = vadd.f32 %v13088_v34, %v3328_v55  ;;  %v10202_v61 = vpop.f32.mrb[142].mxu0  ;;  %v4417_v62 = vadd.f32 %v13088_v34, %v4416_v58  ;;  %v10474_v63 = vpop.f32.mrb[142].mxu1 }
 0x1f7   :  { %v5068_v2 = vmax.f32 %v3337_v54, 0.0  ;;  %v3340_v3 = vadd.f32 %v13088_v34, %v10202_v61  ;;  %v3331_v4 = vpop.f32.mrb[143].mxu0  ;;  %v5340_v51 = vmax.f32 %v4425_v57, 0.0  ;;  %v4428_v6 = vadd.f32 %v13088_v34, %v10474_v63  ;;  %v4419_v7 = vpop.f32.mrb[143].mxu1 }
 0x1f8   :  { %v5066_v8 = vmax.f32 %v3329_v60, 0.0  ;;  %v3332_v9 = vadd.f32 %v13088_v34, %v3331_v4  ;;  %v5338_v10 = vmax.f32 %v4417_v62, 0.0  ;;  %v4420_v5 = vadd.f32 %v13088_v34, %v4419_v7  ;;  %v10862_v4 = vld [vmem:[%s14708_s0 + $0x848] sm:$0xff]  }
 0x1f9   :  { %v9389_v11 = vpack.c.bf16 %v5068_v2, %v5068_v2  ;;  %v5069_v12 = vmax.f32 %v3340_v3, 0.0  ;;  %10308 = vmatmul.mubr.msk.bf16.gmra.mrb[248].mxu0 %vm1916_vm2, %v10852_v56  ;;  %v9661_v13 = vpack.c.bf16 %v5340_v51, %v5340_v51  ;;  %v5341_v14 = vmax.f32 %v4428_v6, 0.0  ;;  %10580 = vmatmul.mubr.msk.bf16.gmra.mrb[248].mxu1 %vm1916_vm2, %v10854_v59 }
 0x1fa   :  { %v9387_v15 = vpack.c.bf16 %v5066_v8, %v5066_v8  ;;  %v5067_v17 = vmax.f32 %v3332_v9, 0.0  ;;  %v9659_v18 = vpack.c.bf16 %v5338_v10, %v5338_v10  ;;  %v5339_v19 = vmax.f32 %v4420_v5, 0.0  ;;  %10311 = vmatprep.mubr.msk.bf16.mxu0 %vm1916_vm2, %v10855_v0  ;;  %10583 = vmatprep.mubr.msk.bf16.mxu1 %vm1916_vm2, %v10857_v1  ;;  %v10860_v1 = vld [vmem:[%s14708_s0 + $0x408] sm:$0xff]   ;;  %v10863_v9 = vld [vmem:[%s14708_s0 + $0x410] sm:$0xff]  }
 0x1fb   :  { %7765 = vst.msk [vmem:[%s14710_s3 + $0x238] sm:$0xf] %vm7622_vm3, %v9389_v11  ;;  %v9390_v20 = vpack.c.bf16 %v5069_v12, %v5069_v12  ;;  %8037 = vst.msk [vmem:[%s14710_s3 + $0x678] sm:$0xf] %vm7622_vm3, %v9661_v13  ;;  %v9662_v21 = vpack.c.bf16 %v5341_v14, %v5341_v14  ;;  %v10865_v10 = vld [vmem:[%s14708_s0 + $0x850] sm:$0xff]  }
 0x1fc   :  { %7763 = vst.msk [vmem:[%s14710_s3 + $0x230] sm:$0xf] %vm7622_vm3, %v9387_v15  ;;  %v9388_v22 = vpack.c.bf16 %v5067_v17, %v5067_v17  ;;  %8035 = vst.msk [vmem:[%s14710_s3 + $0x670] sm:$0xf] %vm7622_vm3, %v9659_v18  ;;  %v10205_v23 = vpop.f32.mrb[144].mxu0  ;;  %v9660_v24 = vpack.c.bf16 %v5339_v19, %v5339_v19  ;;  %v10477_v25 = vpop.f32.mrb[144].mxu1 }
 0x1fd   :  { %7766 = vst.msk [vmem:[%s14710_s3 + $0x23c] sm:$0xf] %vm7622_vm3, %v9390_v20  ;;  %8038 = vst.msk [vmem:[%s14710_s3 + $0x67c] sm:$0xf] %vm7622_vm3, %v9662_v21  ;;  %v3353_v26 = vadd.f32 %v13088_v34, %v10205_v23  ;;  %v3344_v27 = vpop.f32.mrb[145].mxu0  ;;  %v4441_v16 = vadd.f32 %v13088_v34, %v10477_v25  ;;  %v4432_v29 = vpop.f32.mrb[145].mxu1 }
 0x1fe   :  { %7764 = vst.msk [vmem:[%s14710_s3 + $0x234] sm:$0xf] %vm7622_vm3, %v9388_v22  ;;  %8036 = vst.msk [vmem:[%s14710_s3 + $0x674] sm:$0xf] %vm7622_vm3, %v9660_v24  ;;  %v3345_v31 = vadd.f32 %v13088_v34, %v3344_v27  ;;  %v10206_v32 = vpop.f32.mrb[146].mxu0  ;;  %v4433_v33 = vadd.f32 %v13088_v34, %v4432_v29  ;;  %v10478_v35 = vpop.f32.mrb[146].mxu1 }
 0x1ff   :  { %v5072_v38 = vmax.f32 %v3353_v26, 0.0  ;;  %v3356_v39 = vadd.f32 %v13088_v34, %v10206_v32  ;;  %v3347_v40 = vpop.f32.mrb[147].mxu0  ;;  %v5344_v41 = vmax.f32 %v4441_v16, 0.0  ;;  %v4444_v42 = vadd.f32 %v13088_v34, %v10478_v35  ;;  %v4435_v43 = vpop.f32.mrb[147].mxu1 }
 0x200   :  { %v5070_v44 = vmax.f32 %v3345_v31, 0.0  ;;  %v3348_v45 = vadd.f32 %v13088_v34, %v3347_v40  ;;  %v5342_v46 = vmax.f32 %v4433_v33, 0.0  ;;  %v4436_v47 = vadd.f32 %v13088_v34, %v4435_v43  ;;  %v10866_v40 = vld [vmem:[%s14708_s0 + $0x858] sm:$0xff]  }
 0x201   :  { %v9393_v48 = vpack.c.bf16 %v5072_v38, %v5072_v38  ;;  %v5073_v49 = vmax.f32 %v3356_v39, 0.0  ;;  %10312 = vmatmul.mubr.msk.bf16.gmra.mrb[252].mxu0 %vm1916_vm2, %v10856_v28  ;;  %v9665_v50 = vpack.c.bf16 %v5344_v41, %v5344_v41  ;;  %v5345_v52 = vmax.f32 %v4444_v42, 0.0  ;;  %10584 = vmatmul.mubr.msk.bf16.gmra.mrb[252].mxu1 %vm1916_vm2, %v10858_v30 }
 0x202   :  { %v9391_v53 = vpack.c.bf16 %v5070_v44, %v5070_v44  ;;  %v5071_v54 = vmax.f32 %v3348_v45, 0.0  ;;  %v9663_v55 = vpack.c.bf16 %v5342_v46, %v5342_v46  ;;  %v5343_v56 = vmax.f32 %v4436_v47, 0.0  ;;  %10315 = vmatprep.mubr.msk.bf16.mxu0 %vm1916_vm2, %v10859_v36  ;;  %10587 = vmatprep.mubr.msk.bf16.mxu1 %vm1916_vm2, %v10861_v37  ;;  %v10864_v37 = vld [vmem:[%s14708_s0 + $0x418] sm:$0xff]   ;;  %v10867_v45 = vld [vmem:[%s14708_s0 + $0x420] sm:$0xff]  }
 0x203   :  { %7769 = vst.msk [vmem:[%s14710_s3 + $0x248] sm:$0xf] %vm7622_vm3, %v9393_v48  ;;  %v9394_v57 = vpack.c.bf16 %v5073_v49, %v5073_v49  ;;  %8041 = vst.msk [vmem:[%s14710_s3 + $0x688] sm:$0xf] %vm7622_vm3, %v9665_v50  ;;  %v9666_v58 = vpack.c.bf16 %v5345_v52, %v5345_v52  ;;  %v10869_v46 = vld [vmem:[%s14708_s0 + $0x860] sm:$0xff]  }
 0x204   :  { %7767 = vst.msk [vmem:[%s14710_s3 + $0x240] sm:$0xf] %vm7622_vm3, %v9391_v53  ;;  %v9392_v59 = vpack.c.bf16 %v5071_v54, %v5071_v54  ;;  %8039 = vst.msk [vmem:[%s14710_s3 + $0x680] sm:$0xf] %vm7622_vm3, %v9663_v55  ;;  %v10209_v60 = vpop.f32.mrb[148].mxu0  ;;  %v9664_v61 = vpack.c.bf16 %v5343_v56, %v5343_v56  ;;  %v10481_v62 = vpop.f32.mrb[148].mxu1 }
 0x205   :  { %7770 = vst.msk [vmem:[%s14710_s3 + $0x24c] sm:$0xf] %vm7622_vm3, %v9394_v57  ;;  %8042 = vst.msk [vmem:[%s14710_s3 + $0x68c] sm:$0xf] %vm7622_vm3, %v9666_v58  ;;  %v3369_v63 = vadd.f32 %v13088_v34, %v10209_v60  ;;  %v3360_v0 = vpop.f32.mrb[149].mxu0  ;;  %v4457_v2 = vadd.f32 %v13088_v34, %v10481_v62  ;;  %v4448_v3 = vpop.f32.mrb[149].mxu1 }
 0x206   :  { %7768 = vst.msk [vmem:[%s14710_s3 + $0x244] sm:$0xf] %vm7622_vm3, %v9392_v59  ;;  %8040 = vst.msk [vmem:[%s14710_s3 + $0x684] sm:$0xf] %vm7622_vm3, %v9664_v61  ;;  %v3361_v51 = vadd.f32 %v13088_v34, %v3360_v0  ;;  %v10210_v6 = vpop.f32.mrb[150].mxu0  ;;  %v4449_v7 = vadd.f32 %v13088_v34, %v4448_v3  ;;  %v10482_v8 = vpop.f32.mrb[150].mxu1 }
 0x207   :  { %v5076_v5 = vmax.f32 %v3369_v63, 0.0  ;;  %v3372_v11 = vadd.f32 %v13088_v34, %v10210_v6  ;;  %v3363_v12 = vpop.f32.mrb[151].mxu0  ;;  %v5348_v13 = vmax.f32 %v4457_v2, 0.0  ;;  %v4460_v14 = vadd.f32 %v13088_v34, %v10482_v8  ;;  %v4451_v15 = vpop.f32.mrb[151].mxu1 }
 0x208   :  { %v5074_v17 = vmax.f32 %v3361_v51, 0.0  ;;  %v3364_v18 = vadd.f32 %v13088_v34, %v3363_v12  ;;  %v5346_v19 = vmax.f32 %v4449_v7, 0.0  ;;  %v4452_v20 = vadd.f32 %v13088_v34, %v4451_v15  ;;  %v10870_v12 = vld [vmem:[%s14708_s0 + $0x868] ss:$0 sps:$4 sm:$0xff]  }
 0x209   :  { %v9397_v21 = vpack.c.bf16 %v5076_v5, %v5076_v5  ;;  %v5077_v22 = vmax.f32 %v3372_v11, 0.0  ;;  %10316 = vmatmul.mubr.msk.bf16.gmra.mrb[0].mxu0 %vm1916_vm2, %v10860_v1  ;;  %v9669_v23 = vpack.c.bf16 %v5348_v13, %v5348_v13  ;;  %v5349_v24 = vmax.f32 %v4460_v14, 0.0  ;;  %10588 = vmatmul.mubr.msk.bf16.gmra.mrb[0].mxu1 %vm1916_vm2, %v10862_v4 }
 0x20a   :  { %v9395_v25 = vpack.c.bf16 %v5074_v17, %v5074_v17  ;;  %v5075_v26 = vmax.f32 %v3364_v18, 0.0  ;;  %v9667_v27 = vpack.c.bf16 %v5346_v19, %v5346_v19  ;;  %v5347_v28 = vmax.f32 %v4452_v20, 0.0  ;;  %10319 = vmatprep.mubr.msk.bf16.mxu0 %vm1916_vm2, %v10863_v9  ;;  %10591 = vmatprep.mubr.msk.bf16.mxu1 %vm1916_vm2, %v10865_v10  ;;  %v10868_v10 = vld [vmem:[%s14708_s0 + $0x428] sm:$0xff]   ;;  %v10871_v18 = vld [vmem:[%s14708_s0 + $0x430] sm:$0xff]  }
 0x20b   :  { %7773 = vst.msk [vmem:[%s14710_s3 + $0x258] sm:$0xf] %vm7622_vm3, %v9397_v21  ;;  %v9398_v16 = vpack.c.bf16 %v5077_v22, %v5077_v22  ;;  %8045 = vst.msk [vmem:[%s14710_s3 + $0x698] sm:$0xf] %vm7622_vm3, %v9669_v23  ;;  %v9670_v29 = vpack.c.bf16 %v5349_v24, %v5349_v24 }
 0x20c   :  { %7771 = vst.msk [vmem:[%s14710_s3 + $0x250] sm:$0xf] %vm7622_vm3, %v9395_v25  ;;  %v9396_v30 = vpack.c.bf16 %v5075_v26, %v5075_v26  ;;  %8043 = vst.msk [vmem:[%s14710_s3 + $0x690] sm:$0xf] %vm7622_vm3, %v9667_v27  ;;  %v10213_v31 = vpop.f32.mrb[152].mxu0  ;;  %v9668_v32 = vpack.c.bf16 %v5347_v28, %v5347_v28  ;;  %v10485_v33 = vpop.f32.mrb[152].mxu1 }
 0x20d   :  { %7774 = vst.msk [vmem:[%s14710_s3 + $0x25c] sm:$0xf] %vm7622_vm3, %v9398_v16  ;;  %8046 = vst.msk [vmem:[%s14710_s3 + $0x69c] sm:$0xf] %vm7622_vm3, %v9670_v29  ;;  %v3385_v35 = vadd.f32 %v13088_v34, %v10213_v31  ;;  %v3376_v36 = vpop.f32.mrb[153].mxu0  ;;  %v4473_v38 = vadd.f32 %v13088_v34, %v10485_v33  ;;  %v4464_v39 = vpop.f32.mrb[153].mxu1 }
 0x20e   :  { %7772 = vst.msk [vmem:[%s14710_s3 + $0x254] sm:$0xf] %vm7622_vm3, %v9396_v30  ;;  %8044 = vst.msk [vmem:[%s14710_s3 + $0x694] sm:$0xf] %vm7622_vm3, %v9668_v32  ;;  %v3377_v41 = vadd.f32 %v13088_v34, %v3376_v36  ;;  %v10214_v42 = vpop.f32.mrb[154].mxu0  ;;  %v4465_v43 = vadd.f32 %v13088_v34, %v4464_v39  ;;  %v10486_v44 = vpop.f32.mrb[154].mxu1 }
 0x20f   :  { %v5080_v47 = vmax.f32 %v3385_v35, 0.0  ;;  %v3388_v48 = vadd.f32 %v13088_v34, %v10214_v42  ;;  %v3379_v49 = vpop.f32.mrb[155].mxu0  ;;  %v5352_v50 = vmax.f32 %v4473_v38, 0.0  ;;  %v4476_v52 = vadd.f32 %v13088_v34, %v10486_v44  ;;  %v4467_v53 = vpop.f32.mrb[155].mxu1 }
 0x210   :  { %v5078_v54 = vmax.f32 %v3377_v41, 0.0  ;;  %v3380_v55 = vadd.f32 %v13088_v34, %v3379_v49  ;;  %v5350_v56 = vmax.f32 %v4465_v43, 0.0  ;;  %v4468_v57 = vadd.f32 %v13088_v34, %v4467_v53 }
 0x211   :  { %v9401_v58 = vpack.c.bf16 %v5080_v47, %v5080_v47  ;;  %v5081_v59 = vmax.f32 %v3388_v48, 0.0  ;;  %10320 = vmatmul.mubr.msk.bf16.gmra.mrb[4].mxu0 %vm1916_vm2, %v10864_v37  ;;  %v9673_v60 = vpack.c.bf16 %v5352_v50, %v5352_v50  ;;  %v5353_v61 = vmax.f32 %v4476_v52, 0.0  ;;  %10592 = vmatmul.mubr.msk.bf16.gmra.mrb[4].mxu1 %vm1916_vm2, %v10866_v40 }
 0x212   :  { %v9399_v62 = vpack.c.bf16 %v5078_v54, %v5078_v54  ;;  %v5079_v63 = vmax.f32 %v3380_v55, 0.0  ;;  %v9671_v0 = vpack.c.bf16 %v5350_v56, %v5350_v56  ;;  %v5351_v1 = vmax.f32 %v4468_v57, 0.0  ;;  %10323 = vmatprep.mubr.msk.bf16.mxu0 %vm1916_vm2, %v10867_v45  ;;  %10595 = vmatprep.mubr.msk.bf16.mxu1 %vm1916_vm2, %v10869_v46  ;;  %v10872_v45 = vld [vmem:[%s14708_s0 + $0x438] sm:$0xff]  }
 0x213   :  { %7777 = vst.msk [vmem:[%s14710_s3 + $0x268] sm:$0xf] %vm7622_vm3, %v9401_v58  ;;  %v9402_v2 = vpack.c.bf16 %v5081_v59, %v5081_v59  ;;  %8049 = vst.msk [vmem:[%s14710_s3 + $0x6a8] sm:$0xf] %vm7622_vm3, %v9673_v60  ;;  %v9674_v3 = vpack.c.bf16 %v5353_v61, %v5353_v61 }
 0x214   :  { %7775 = vst.msk [vmem:[%s14710_s3 + $0x260] sm:$0xf] %vm7622_vm3, %v9399_v62  ;;  %v9400_v4 = vpack.c.bf16 %v5079_v63, %v5079_v63  ;;  %8047 = vst.msk [vmem:[%s14710_s3 + $0x6a0] sm:$0xf] %vm7622_vm3, %v9671_v0  ;;  %v10217_v51 = vpop.f32.mrb[156].mxu0  ;;  %v9672_v6 = vpack.c.bf16 %v5351_v1, %v5351_v1  ;;  %v10489_v7 = vpop.f32.mrb[156].mxu1 }
 0x215   :  { %7778 = vst.msk [vmem:[%s14710_s3 + $0x26c] sm:$0xf] %vm7622_vm3, %v9402_v2  ;;  %8050 = vst.msk [vmem:[%s14710_s3 + $0x6ac] sm:$0xf] %vm7622_vm3, %v9674_v3  ;;  %v3401_v8 = vadd.f32 %v13088_v34, %v10217_v51  ;;  %v3392_v9 = vpop.f32.mrb[157].mxu0  ;;  %v4489_v5 = vadd.f32 %v13088_v34, %v10489_v7  ;;  %v4480_v11 = vpop.f32.mrb[157].mxu1 }
 0x216   :  { %7776 = vst.msk [vmem:[%s14710_s3 + $0x264] sm:$0xf] %vm7622_vm3, %v9400_v4  ;;  %8048 = vst.msk [vmem:[%s14710_s3 + $0x6a4] sm:$0xf] %vm7622_vm3, %v9672_v6  ;;  %v3393_v13 = vadd.f32 %v13088_v34, %v3392_v9  ;;  %v10218_v14 = vpop.f32.mrb[158].mxu0  ;;  %v4481_v15 = vadd.f32 %v13088_v34, %v4480_v11  ;;  %v10490_v17 = vpop.f32.mrb[158].mxu1 }
 0x217   :  { %v5084_v19 = vmax.f32 %v3401_v8, 0.0  ;;  %v3404_v20 = vadd.f32 %v13088_v34, %v10218_v14  ;;  %v3395_v21 = vpop.f32.mrb[159].mxu0  ;;  %v5356_v22 = vmax.f32 %v4489_v5, 0.0  ;;  %v4492_v23 = vadd.f32 %v13088_v34, %v10490_v17  ;;  %v4483_v24 = vpop.f32.mrb[159].mxu1 }
 0x218   :  { %v5082_v25 = vmax.f32 %v3393_v13, 0.0  ;;  %v3396_v26 = vadd.f32 %v13088_v34, %v3395_v21  ;;  %v5354_v27 = vmax.f32 %v4481_v15, 0.0  ;;  %v4484_v28 = vadd.f32 %v13088_v34, %v4483_v24 }
 0x219   :  { %v9405_v16 = vpack.c.bf16 %v5084_v19, %v5084_v19  ;;  %v5085_v29 = vmax.f32 %v3404_v20, 0.0  ;;  %10324 = vmatmul.mubr.msk.bf16.gmra.mrb[8].mxu0 %vm1916_vm2, %v10868_v10  ;;  %v9677_v30 = vpack.c.bf16 %v5356_v22, %v5356_v22  ;;  %v5357_v31 = vmax.f32 %v4492_v23, 0.0  ;;  %10596 = vmatmul.mubr.msk.bf16.gmra.mrb[8].mxu1 %vm1916_vm2, %v10870_v12 }
 0x21a   :  { %v9403_v32 = vpack.c.bf16 %v5082_v25, %v5082_v25  ;;  %v5083_v33 = vmax.f32 %v3396_v26, 0.0  ;;  %v9675_v35 = vpack.c.bf16 %v5354_v27, %v5354_v27  ;;  %v5355_v36 = vmax.f32 %v4484_v28, 0.0  ;;  %10327 = vmatprep.mubr.msk.bf16.mxu0 %vm1916_vm2, %v10871_v18 }
 0x21b   :  { %7781 = vst.msk [vmem:[%s14710_s3 + $0x278] sm:$0xf] %vm7622_vm3, %v9405_v16  ;;  %v9406_v37 = vpack.c.bf16 %v5085_v29, %v5085_v29  ;;  %8053 = vst.msk [vmem:[%s14710_s3 + $0x6b8] sm:$0xf] %vm7622_vm3, %v9677_v30  ;;  %v9678_v38 = vpack.c.bf16 %v5357_v31, %v5357_v31 }
 0x21c   :  { %7779 = vst.msk [vmem:[%s14710_s3 + $0x270] sm:$0xf] %vm7622_vm3, %v9403_v32  ;;  %v9404_v39 = vpack.c.bf16 %v5083_v33, %v5083_v33  ;;  %8051 = vst.msk [vmem:[%s14710_s3 + $0x6b0] sm:$0xf] %vm7622_vm3, %v9675_v35  ;;  %v10221_v40 = vpop.f32.mrb[160].mxu0  ;;  %v9676_v41 = vpack.c.bf16 %v5355_v36, %v5355_v36  ;;  %v10493_v42 = vpop.f32.mrb[160].mxu1 }
 0x21d   :  { %7782 = vst.msk [vmem:[%s14710_s3 + $0x27c] sm:$0xf] %vm7622_vm3, %v9406_v37  ;;  %8054 = vst.msk [vmem:[%s14710_s3 + $0x6bc] sm:$0xf] %vm7622_vm3, %v9678_v38  ;;  %v3417_v43 = vadd.f32 %v13088_v34, %v10221_v40  ;;  %v3408_v44 = vpop.f32.mrb[161].mxu0  ;;  %v4505_v46 = vadd.f32 %v13088_v34, %v10493_v42  ;;  %v4496_v47 = vpop.f32.mrb[161].mxu1 }
 0x21e   :  { %7780 = vst.msk [vmem:[%s14710_s3 + $0x274] sm:$0xf] %vm7622_vm3, %v9404_v39  ;;  %8052 = vst.msk [vmem:[%s14710_s3 + $0x6b4] sm:$0xf] %vm7622_vm3, %v9676_v41  ;;  %v3409_v48 = vadd.f32 %v13088_v34, %v3408_v44  ;;  %v10222_v49 = vpop.f32.mrb[162].mxu0  ;;  %v4497_v50 = vadd.f32 %v13088_v34, %v4496_v47  ;;  %v10494_v52 = vpop.f32.mrb[162].mxu1 }
 0x21f   :  { %v5088_v53 = vmax.f32 %v3417_v43, 0.0  ;;  %v3420_v54 = vadd.f32 %v13088_v34, %v10222_v49  ;;  %v3411_v55 = vpop.f32.mrb[163].mxu0  ;;  %v5360_v56 = vmax.f32 %v4505_v46, 0.0  ;;  %v4508_v57 = vadd.f32 %v13088_v34, %v10494_v52  ;;  %v4499_v58 = vpop.f32.mrb[163].mxu1  ;;  %v13677_v44 = vld [vmem:[%s14709_s2] ss:$0 sm:$0xff] }
 0x220   :  { %v5086_v59 = vmax.f32 %v3409_v48, 0.0  ;;  %v3412_v60 = vadd.f32 %v13088_v34, %v3411_v55  ;;  %v5358_v61 = vmax.f32 %v4497_v50, 0.0  ;;  %v4500_v62 = vadd.f32 %v13088_v34, %v4499_v58 }
 0x221   :  { %v9409_v63 = vpack.c.bf16 %v5088_v53, %v5088_v53  ;;  %v5089_v0 = vmax.f32 %v3420_v54, 0.0  ;;  %10328 = vmatmul.mubr.msk.bf16.gmra.mrb[12].mxu0 %vm1916_vm2, %v10872_v45  ;;  %v9681_v1 = vpack.c.bf16 %v5360_v56, %v5360_v56  ;;  %v5361_v2 = vmax.f32 %v4508_v57, 0.0 }
 0x222   :  { %v9407_v3 = vpack.c.bf16 %v5086_v59, %v5086_v59  ;;  %v5087_v4 = vmax.f32 %v3412_v60, 0.0  ;;  %v9679_v51 = vpack.c.bf16 %v5358_v61, %v5358_v61  ;;  %v5359_v6 = vmax.f32 %v4500_v62, 0.0 }
 0x223   :  { %7785 = vst.msk [vmem:[%s14710_s3 + $0x288] sm:$0xf] %vm7622_vm3, %v9409_v63  ;;  %v9410_v7 = vpack.c.bf16 %v5089_v0, %v5089_v0  ;;  %8057 = vst.msk [vmem:[%s14710_s3 + $0x6c8] sm:$0xf] %vm7622_vm3, %v9681_v1  ;;  %v9682_v8 = vpack.c.bf16 %v5361_v2, %v5361_v2 }
 0x224   :  { %7783 = vst.msk [vmem:[%s14710_s3 + $0x280] sm:$0xf] %vm7622_vm3, %v9407_v3  ;;  %v9408_v9 = vpack.c.bf16 %v5087_v4, %v5087_v4  ;;  %8055 = vst.msk [vmem:[%s14710_s3 + $0x6c0] sm:$0xf] %vm7622_vm3, %v9679_v51  ;;  %v10225_v10 = vpop.f32.mrb[164].mxu0  ;;  %v9680_v5 = vpack.c.bf16 %v5359_v6, %v5359_v6  ;;  %v10497_v11 = vpop.f32.mrb[164].mxu1 }
 0x225   :  { %7786 = vst.msk [vmem:[%s14710_s3 + $0x28c] sm:$0xf] %vm7622_vm3, %v9410_v7  ;;  %8058 = vst.msk [vmem:[%s14710_s3 + $0x6cc] sm:$0xf] %vm7622_vm3, %v9682_v8  ;;  %v3433_v12 = vadd.f32 %v13088_v34, %v10225_v10  ;;  %v3424_v13 = vpop.f32.mrb[165].mxu0  ;;  %v4521_v14 = vadd.f32 %v13088_v34, %v10497_v11  ;;  %v4512_v15 = vpop.f32.mrb[165].mxu1 }
 0x226   :  { %7784 = vst.msk [vmem:[%s14710_s3 + $0x284] sm:$0xf] %vm7622_vm3, %v9408_v9  ;;  %8056 = vst.msk [vmem:[%s14710_s3 + $0x6c4] sm:$0xf] %vm7622_vm3, %v9680_v5  ;;  %v3425_v17 = vadd.f32 %v13088_v34, %v3424_v13  ;;  %v10226_v18 = vpop.f32.mrb[166].mxu0  ;;  %v4513_v19 = vadd.f32 %v13088_v34, %v4512_v15  ;;  %v10498_v20 = vpop.f32.mrb[166].mxu1 }
 0x227   :  { %v5092_v21 = vmax.f32 %v3433_v12, 0.0  ;;  %v3436_v22 = vadd.f32 %v13088_v34, %v10226_v18  ;;  %v3427_v23 = vpop.f32.mrb[167].mxu0  ;;  %v5364_v24 = vmax.f32 %v4521_v14, 0.0  ;;  %v4524_v25 = vadd.f32 %v13088_v34, %v10498_v20  ;;  %v4515_v26 = vpop.f32.mrb[167].mxu1 }
 0x228   :  { %v5090_v27 = vmax.f32 %v3425_v17, 0.0  ;;  %v3428_v28 = vadd.f32 %v13088_v34, %v3427_v23  ;;  %v5362_v16 = vmax.f32 %v4513_v19, 0.0  ;;  %v4516_v29 = vadd.f32 %v13088_v34, %v4515_v26 }
 0x229   :  { %v9413_v30 = vpack.c.bf16 %v5092_v21, %v5092_v21  ;;  %v5093_v31 = vmax.f32 %v3436_v22, 0.0  ;;  %v9685_v32 = vpack.c.bf16 %v5364_v24, %v5364_v24  ;;  %v5365_v33 = vmax.f32 %v4524_v25, 0.0 }
 0x22a   :  { %v9411_v35 = vpack.c.bf16 %v5090_v27, %v5090_v27  ;;  %v5091_v36 = vmax.f32 %v3428_v28, 0.0  ;;  %v9683_v37 = vpack.c.bf16 %v5362_v16, %v5362_v16  ;;  %v5363_v38 = vmax.f32 %v4516_v29, 0.0 }
 0x22b   :  { %7789 = vst.msk [vmem:[%s14710_s3 + $0x298] sm:$0xf] %vm7622_vm3, %v9413_v30  ;;  %v9414_v39 = vpack.c.bf16 %v5093_v31, %v5093_v31  ;;  %8061 = vst.msk [vmem:[%s14710_s3 + $0x6d8] sm:$0xf] %vm7622_vm3, %v9685_v32  ;;  %v9686_v34 = vpack.c.bf16 %v5365_v33, %v5365_v33 }
 0x22c   :  { %7787 = vst.msk [vmem:[%s14710_s3 + $0x290] sm:$0xf] %vm7622_vm3, %v9411_v35  ;;  %v9412_v40 = vpack.c.bf16 %v5091_v36, %v5091_v36  ;;  %8059 = vst.msk [vmem:[%s14710_s3 + $0x6d0] sm:$0xf] %vm7622_vm3, %v9683_v37  ;;  %v10229_v41 = vpop.f32.mrb[168].mxu0  ;;  %v9684_v42 = vpack.c.bf16 %v5363_v38, %v5363_v38  ;;  %v10501_v43 = vpop.f32.mrb[168].mxu1 }
 0x22d   :  { %7790 = vst.msk [vmem:[%s14710_s3 + $0x29c] sm:$0xf] %vm7622_vm3, %v9414_v39  ;;  %8062 = vst.msk [vmem:[%s14710_s3 + $0x6dc] sm:$0xf] %vm7622_vm3, %v9686_v34  ;;  %v3449_v45 = vadd.f32 %v13677_v44, %v10229_v41  ;;  %v3440_v46 = vpop.f32.mrb[169].mxu0  ;;  %v4537_v47 = vadd.f32 %v13677_v44, %v10501_v43  ;;  %v4528_v48 = vpop.f32.mrb[169].mxu1 }
 0x22e   :  { %7788 = vst.msk [vmem:[%s14710_s3 + $0x294] sm:$0xf] %vm7622_vm3, %v9412_v40  ;;  %8060 = vst.msk [vmem:[%s14710_s3 + $0x6d4] sm:$0xf] %vm7622_vm3, %v9684_v42  ;;  %v3441_v49 = vadd.f32 %v13677_v44, %v3440_v46  ;;  %v10230_v50 = vpop.f32.mrb[170].mxu0  ;;  %v4529_v52 = vadd.f32 %v13677_v44, %v4528_v48  ;;  %v10502_v53 = vpop.f32.mrb[170].mxu1 }
 0x22f   :  { %v5096_v54 = vmax.f32 %v3449_v45, 0.0  ;;  %v3452_v55 = vadd.f32 %v13677_v44, %v10230_v50  ;;  %v3443_v56 = vpop.f32.mrb[171].mxu0  ;;  %v5368_v57 = vmax.f32 %v4537_v47, 0.0  ;;  %v4540_v58 = vadd.f32 %v13677_v44, %v10502_v53  ;;  %v4531_v59 = vpop.f32.mrb[171].mxu1 }
 0x230   :  { %v5094_v60 = vmax.f32 %v3441_v49, 0.0  ;;  %v3444_v61 = vadd.f32 %v13677_v44, %v3443_v56  ;;  %v5366_v62 = vmax.f32 %v4529_v52, 0.0  ;;  %v4532_v63 = vadd.f32 %v13677_v44, %v4531_v59 }
 0x231   :  { %v9417_v0 = vpack.c.bf16 %v5096_v54, %v5096_v54  ;;  %v5097_v1 = vmax.f32 %v3452_v55, 0.0  ;;  %v9689_v2 = vpack.c.bf16 %v5368_v57, %v5368_v57  ;;  %v5369_v3 = vmax.f32 %v4540_v58, 0.0 }
 0x232   :  { %v9415_v4 = vpack.c.bf16 %v5094_v60, %v5094_v60  ;;  %v5095_v51 = vmax.f32 %v3444_v61, 0.0  ;;  %v9687_v6 = vpack.c.bf16 %v5366_v62, %v5366_v62  ;;  %v5367_v7 = vmax.f32 %v4532_v63, 0.0 }
 0x233   :  { %7793 = vst.msk [vmem:[%s14710_s3 + $0x2a8] sm:$0xf] %vm7622_vm3, %v9417_v0  ;;  %v9418_v8 = vpack.c.bf16 %v5097_v1, %v5097_v1  ;;  %8065 = vst.msk [vmem:[%s14710_s3 + $0x6e8] sm:$0xf] %vm7622_vm3, %v9689_v2  ;;  %v9690_v9 = vpack.c.bf16 %v5369_v3, %v5369_v3 }
 0x234   :  { %7791 = vst.msk [vmem:[%s14710_s3 + $0x2a0] sm:$0xf] %vm7622_vm3, %v9415_v4  ;;  %v9416_v10 = vpack.c.bf16 %v5095_v51, %v5095_v51  ;;  %8063 = vst.msk [vmem:[%s14710_s3 + $0x6e0] sm:$0xf] %vm7622_vm3, %v9687_v6  ;;  %v10233_v5 = vpop.f32.mrb[172].mxu0  ;;  %v9688_v11 = vpack.c.bf16 %v5367_v7, %v5367_v7  ;;  %v10505_v12 = vpop.f32.mrb[172].mxu1 }
 0x235   :  { %7794 = vst.msk [vmem:[%s14710_s3 + $0x2ac] sm:$0xf] %vm7622_vm3, %v9418_v8  ;;  %8066 = vst.msk [vmem:[%s14710_s3 + $0x6ec] sm:$0xf] %vm7622_vm3, %v9690_v9  ;;  %v3465_v13 = vadd.f32 %v13677_v44, %v10233_v5  ;;  %v3456_v14 = vpop.f32.mrb[173].mxu0  ;;  %v4553_v15 = vadd.f32 %v13677_v44, %v10505_v12  ;;  %v4544_v17 = vpop.f32.mrb[173].mxu1 }
 0x236   :  { %7792 = vst.msk [vmem:[%s14710_s3 + $0x2a4] sm:$0xf] %vm7622_vm3, %v9416_v10  ;;  %8064 = vst.msk [vmem:[%s14710_s3 + $0x6e4] sm:$0xf] %vm7622_vm3, %v9688_v11  ;;  %v3457_v18 = vadd.f32 %v13677_v44, %v3456_v14  ;;  %v10234_v19 = vpop.f32.mrb[174].mxu0  ;;  %v4545_v20 = vadd.f32 %v13677_v44, %v4544_v17  ;;  %v10506_v21 = vpop.f32.mrb[174].mxu1 }
 0x237   :  { %v5100_v22 = vmax.f32 %v3465_v13, 0.0  ;;  %v3468_v23 = vadd.f32 %v13677_v44, %v10234_v19  ;;  %v3459_v24 = vpop.f32.mrb[175].mxu0  ;;  %v5372_v25 = vmax.f32 %v4553_v15, 0.0  ;;  %v4556_v26 = vadd.f32 %v13677_v44, %v10506_v21  ;;  %v4547_v27 = vpop.f32.mrb[175].mxu1 }
 0x238   :  { %v5098_v28 = vmax.f32 %v3457_v18, 0.0  ;;  %v3460_v16 = vadd.f32 %v13677_v44, %v3459_v24  ;;  %v5370_v29 = vmax.f32 %v4545_v20, 0.0  ;;  %v4548_v30 = vadd.f32 %v13677_v44, %v4547_v27 }
 0x239   :  { %v9421_v31 = vpack.c.bf16 %v5100_v22, %v5100_v22  ;;  %v5101_v32 = vmax.f32 %v3468_v23, 0.0  ;;  %v9693_v33 = vpack.c.bf16 %v5372_v25, %v5372_v25  ;;  %v5373_v35 = vmax.f32 %v4556_v26, 0.0 }
 0x23a   :  { %v9419_v36 = vpack.c.bf16 %v5098_v28, %v5098_v28  ;;  %v5099_v37 = vmax.f32 %v3460_v16, 0.0  ;;  %v9691_v38 = vpack.c.bf16 %v5370_v29, %v5370_v29  ;;  %v5371_v39 = vmax.f32 %v4548_v30, 0.0 }
 0x23b   :  { %7797 = vst.msk [vmem:[%s14710_s3 + $0x2b8] sm:$0xf] %vm7622_vm3, %v9421_v31  ;;  %v9422_v34 = vpack.c.bf16 %v5101_v32, %v5101_v32  ;;  %8069 = vst.msk [vmem:[%s14710_s3 + $0x6f8] sm:$0xf] %vm7622_vm3, %v9693_v33  ;;  %v9694_v40 = vpack.c.bf16 %v5373_v35, %v5373_v35 }
 0x23c   :  { %7795 = vst.msk [vmem:[%s14710_s3 + $0x2b0] sm:$0xf] %vm7622_vm3, %v9419_v36  ;;  %v9420_v41 = vpack.c.bf16 %v5099_v37, %v5099_v37  ;;  %8067 = vst.msk [vmem:[%s14710_s3 + $0x6f0] sm:$0xf] %vm7622_vm3, %v9691_v38  ;;  %v10237_v42 = vpop.f32.mrb[176].mxu0  ;;  %v9692_v43 = vpack.c.bf16 %v5371_v39, %v5371_v39  ;;  %v10509_v45 = vpop.f32.mrb[176].mxu1 }
 0x23d   :  { %7798 = vst.msk [vmem:[%s14710_s3 + $0x2bc] sm:$0xf] %vm7622_vm3, %v9422_v34  ;;  %8070 = vst.msk [vmem:[%s14710_s3 + $0x6fc] sm:$0xf] %vm7622_vm3, %v9694_v40  ;;  %v3481_v46 = vadd.f32 %v13677_v44, %v10237_v42  ;;  %v3472_v47 = vpop.f32.mrb[177].mxu0  ;;  %v4569_v48 = vadd.f32 %v13677_v44, %v10509_v45  ;;  %v4560_v49 = vpop.f32.mrb[177].mxu1 }
 0x23e   :  { %7796 = vst.msk [vmem:[%s14710_s3 + $0x2b4] sm:$0xf] %vm7622_vm3, %v9420_v41  ;;  %8068 = vst.msk [vmem:[%s14710_s3 + $0x6f4] sm:$0xf] %vm7622_vm3, %v9692_v43  ;;  %v3473_v50 = vadd.f32 %v13677_v44, %v3472_v47  ;;  %v10238_v52 = vpop.f32.mrb[178].mxu0  ;;  %v4561_v53 = vadd.f32 %v13677_v44, %v4560_v49  ;;  %v10510_v54 = vpop.f32.mrb[178].mxu1 }
 0x23f   :  { %v5104_v55 = vmax.f32 %v3481_v46, 0.0  ;;  %v3484_v56 = vadd.f32 %v13677_v44, %v10238_v52  ;;  %v3475_v57 = vpop.f32.mrb[179].mxu0  ;;  %v5376_v58 = vmax.f32 %v4569_v48, 0.0  ;;  %v4572_v59 = vadd.f32 %v13677_v44, %v10510_v54  ;;  %v4563_v60 = vpop.f32.mrb[179].mxu1 }
 0x240   :  { %v5102_v61 = vmax.f32 %v3473_v50, 0.0  ;;  %v3476_v62 = vadd.f32 %v13677_v44, %v3475_v57  ;;  %v5374_v63 = vmax.f32 %v4561_v53, 0.0  ;;  %v4564_v0 = vadd.f32 %v13677_v44, %v4563_v60 }
 0x241   :  { %v9425_v1 = vpack.c.bf16 %v5104_v55, %v5104_v55  ;;  %v5105_v2 = vmax.f32 %v3484_v56, 0.0  ;;  %v9697_v3 = vpack.c.bf16 %v5376_v58, %v5376_v58  ;;  %v5377_v4 = vmax.f32 %v4572_v59, 0.0 }
 0x242   :  { %v9423_v51 = vpack.c.bf16 %v5102_v61, %v5102_v61  ;;  %v5103_v6 = vmax.f32 %v3476_v62, 0.0  ;;  %v9695_v7 = vpack.c.bf16 %v5374_v63, %v5374_v63  ;;  %v5375_v8 = vmax.f32 %v4564_v0, 0.0 }
 0x243   :  { %7801 = vst.msk [vmem:[%s14710_s3 + $0x2c8] sm:$0xf] %vm7622_vm3, %v9425_v1  ;;  %v9426_v9 = vpack.c.bf16 %v5105_v2, %v5105_v2  ;;  %8073 = vst.msk [vmem:[%s14710_s3 + $0x708] sm:$0xf] %vm7622_vm3, %v9697_v3  ;;  %v9698_v10 = vpack.c.bf16 %v5377_v4, %v5377_v4 }
 0x244   :  { %7799 = vst.msk [vmem:[%s14710_s3 + $0x2c0] sm:$0xf] %vm7622_vm3, %v9423_v51  ;;  %v9424_v5 = vpack.c.bf16 %v5103_v6, %v5103_v6  ;;  %8071 = vst.msk [vmem:[%s14710_s3 + $0x700] sm:$0xf] %vm7622_vm3, %v9695_v7  ;;  %v10241_v11 = vpop.f32.mrb[180].mxu0  ;;  %v9696_v12 = vpack.c.bf16 %v5375_v8, %v5375_v8  ;;  %v10513_v13 = vpop.f32.mrb[180].mxu1 }
 0x245   :  { %7802 = vst.msk [vmem:[%s14710_s3 + $0x2cc] sm:$0xf] %vm7622_vm3, %v9426_v9  ;;  %8074 = vst.msk [vmem:[%s14710_s3 + $0x70c] sm:$0xf] %vm7622_vm3, %v9698_v10  ;;  %v3497_v14 = vadd.f32 %v13677_v44, %v10241_v11  ;;  %v3488_v15 = vpop.f32.mrb[181].mxu0  ;;  %v4585_v17 = vadd.f32 %v13677_v44, %v10513_v13  ;;  %v4576_v18 = vpop.f32.mrb[181].mxu1 }
 0x246   :  { %7800 = vst.msk [vmem:[%s14710_s3 + $0x2c4] sm:$0xf] %vm7622_vm3, %v9424_v5  ;;  %8072 = vst.msk [vmem:[%s14710_s3 + $0x704] sm:$0xf] %vm7622_vm3, %v9696_v12  ;;  %v3489_v19 = vadd.f32 %v13677_v44, %v3488_v15  ;;  %v10242_v20 = vpop.f32.mrb[182].mxu0  ;;  %v4577_v21 = vadd.f32 %v13677_v44, %v4576_v18  ;;  %v10514_v22 = vpop.f32.mrb[182].mxu1 }
 0x247   :  { %v5108_v23 = vmax.f32 %v3497_v14, 0.0  ;;  %v3500_v24 = vadd.f32 %v13677_v44, %v10242_v20  ;;  %v3491_v25 = vpop.f32.mrb[183].mxu0  ;;  %v5380_v26 = vmax.f32 %v4585_v17, 0.0  ;;  %v4588_v27 = vadd.f32 %v13677_v44, %v10514_v22  ;;  %v4579_v28 = vpop.f32.mrb[183].mxu1 }
 0x248   :  { %v5106_v16 = vmax.f32 %v3489_v19, 0.0  ;;  %v3492_v29 = vadd.f32 %v13677_v44, %v3491_v25  ;;  %v5378_v30 = vmax.f32 %v4577_v21, 0.0  ;;  %v4580_v31 = vadd.f32 %v13677_v44, %v4579_v28 }
 0x249   :  { %v9429_v32 = vpack.c.bf16 %v5108_v23, %v5108_v23  ;;  %v5109_v33 = vmax.f32 %v3500_v24, 0.0  ;;  %v9701_v35 = vpack.c.bf16 %v5380_v26, %v5380_v26  ;;  %v5381_v36 = vmax.f32 %v4588_v27, 0.0 }
 0x24a   :  { %v9427_v37 = vpack.c.bf16 %v5106_v16, %v5106_v16  ;;  %v5107_v38 = vmax.f32 %v3492_v29, 0.0  ;;  %v9699_v39 = vpack.c.bf16 %v5378_v30, %v5378_v30  ;;  %v5379_v34 = vmax.f32 %v4580_v31, 0.0 }
 0x24b   :  { %7805 = vst.msk [vmem:[%s14710_s3 + $0x2d8] sm:$0xf] %vm7622_vm3, %v9429_v32  ;;  %v9430_v40 = vpack.c.bf16 %v5109_v33, %v5109_v33  ;;  %8077 = vst.msk [vmem:[%s14710_s3 + $0x718] sm:$0xf] %vm7622_vm3, %v9701_v35  ;;  %v9702_v41 = vpack.c.bf16 %v5381_v36, %v5381_v36 }
 0x24c   :  { %7803 = vst.msk [vmem:[%s14710_s3 + $0x2d0] sm:$0xf] %vm7622_vm3, %v9427_v37  ;;  %v9428_v42 = vpack.c.bf16 %v5107_v38, %v5107_v38  ;;  %8075 = vst.msk [vmem:[%s14710_s3 + $0x710] sm:$0xf] %vm7622_vm3, %v9699_v39  ;;  %v10245_v43 = vpop.f32.mrb[184].mxu0  ;;  %v9700_v45 = vpack.c.bf16 %v5379_v34, %v5379_v34  ;;  %v10517_v46 = vpop.f32.mrb[184].mxu1 }
 0x24d   :  { %7806 = vst.msk [vmem:[%s14710_s3 + $0x2dc] sm:$0xf] %vm7622_vm3, %v9430_v40  ;;  %8078 = vst.msk [vmem:[%s14710_s3 + $0x71c] sm:$0xf] %vm7622_vm3, %v9702_v41  ;;  %v3513_v47 = vadd.f32 %v13677_v44, %v10245_v43  ;;  %v3504_v48 = vpop.f32.mrb[185].mxu0  ;;  %v4601_v49 = vadd.f32 %v13677_v44, %v10517_v46  ;;  %v4592_v50 = vpop.f32.mrb[185].mxu1 }
 0x24e   :  { %7804 = vst.msk [vmem:[%s14710_s3 + $0x2d4] sm:$0xf] %vm7622_vm3, %v9428_v42  ;;  %8076 = vst.msk [vmem:[%s14710_s3 + $0x714] sm:$0xf] %vm7622_vm3, %v9700_v45  ;;  %v3505_v52 = vadd.f32 %v13677_v44, %v3504_v48  ;;  %v10246_v53 = vpop.f32.mrb[186].mxu0  ;;  %v4593_v54 = vadd.f32 %v13677_v44, %v4592_v50  ;;  %v10518_v55 = vpop.f32.mrb[186].mxu1 }
 0x24f   :  { %v5112_v56 = vmax.f32 %v3513_v47, 0.0  ;;  %v3516_v57 = vadd.f32 %v13677_v44, %v10246_v53  ;;  %v3507_v58 = vpop.f32.mrb[187].mxu0  ;;  %v5384_v59 = vmax.f32 %v4601_v49, 0.0  ;;  %v4604_v60 = vadd.f32 %v13677_v44, %v10518_v55  ;;  %v4595_v61 = vpop.f32.mrb[187].mxu1 }
 0x250   :  { %v5110_v62 = vmax.f32 %v3505_v52, 0.0  ;;  %v3508_v63 = vadd.f32 %v13677_v44, %v3507_v58  ;;  %v5382_v0 = vmax.f32 %v4593_v54, 0.0  ;;  %v4596_v1 = vadd.f32 %v13677_v44, %v4595_v61 }
 0x251   :  { %v9433_v2 = vpack.c.bf16 %v5112_v56, %v5112_v56  ;;  %v5113_v3 = vmax.f32 %v3516_v57, 0.0  ;;  %v9705_v4 = vpack.c.bf16 %v5384_v59, %v5384_v59  ;;  %v5385_v51 = vmax.f32 %v4604_v60, 0.0 }
 0x252   :  { %v9431_v6 = vpack.c.bf16 %v5110_v62, %v5110_v62  ;;  %v5111_v7 = vmax.f32 %v3508_v63, 0.0  ;;  %v9703_v8 = vpack.c.bf16 %v5382_v0, %v5382_v0  ;;  %v5383_v9 = vmax.f32 %v4596_v1, 0.0 }
 0x253   :  { %7809 = vst.msk [vmem:[%s14710_s3 + $0x2e8] sm:$0xf] %vm7622_vm3, %v9433_v2  ;;  %v9434_v10 = vpack.c.bf16 %v5113_v3, %v5113_v3  ;;  %8081 = vst.msk [vmem:[%s14710_s3 + $0x728] sm:$0xf] %vm7622_vm3, %v9705_v4  ;;  %v9706_v5 = vpack.c.bf16 %v5385_v51, %v5385_v51 }
 0x254   :  { %7807 = vst.msk [vmem:[%s14710_s3 + $0x2e0] sm:$0xf] %vm7622_vm3, %v9431_v6  ;;  %v9432_v11 = vpack.c.bf16 %v5111_v7, %v5111_v7  ;;  %8079 = vst.msk [vmem:[%s14710_s3 + $0x720] sm:$0xf] %vm7622_vm3, %v9703_v8  ;;  %v10249_v12 = vpop.f32.mrb[188].mxu0  ;;  %v9704_v13 = vpack.c.bf16 %v5383_v9, %v5383_v9  ;;  %v10521_v14 = vpop.f32.mrb[188].mxu1 }
 0x255   :  { %7810 = vst.msk [vmem:[%s14710_s3 + $0x2ec] sm:$0xf] %vm7622_vm3, %v9434_v10  ;;  %8082 = vst.msk [vmem:[%s14710_s3 + $0x72c] sm:$0xf] %vm7622_vm3, %v9706_v5  ;;  %v3529_v15 = vadd.f32 %v13677_v44, %v10249_v12  ;;  %v3520_v17 = vpop.f32.mrb[189].mxu0  ;;  %v4617_v18 = vadd.f32 %v13677_v44, %v10521_v14  ;;  %v4608_v19 = vpop.f32.mrb[189].mxu1 }
 0x256   :  { %7808 = vst.msk [vmem:[%s14710_s3 + $0x2e4] sm:$0xf] %vm7622_vm3, %v9432_v11  ;;  %8080 = vst.msk [vmem:[%s14710_s3 + $0x724] sm:$0xf] %vm7622_vm3, %v9704_v13  ;;  %v3521_v20 = vadd.f32 %v13677_v44, %v3520_v17  ;;  %v10250_v21 = vpop.f32.mrb[190].mxu0  ;;  %v4609_v22 = vadd.f32 %v13677_v44, %v4608_v19  ;;  %v10522_v23 = vpop.f32.mrb[190].mxu1 }
 0x257   :  { %v5116_v24 = vmax.f32 %v3529_v15, 0.0  ;;  %v3532_v25 = vadd.f32 %v13677_v44, %v10250_v21  ;;  %v3523_v26 = vpop.f32.mrb[191].mxu0  ;;  %v5388_v27 = vmax.f32 %v4617_v18, 0.0  ;;  %v4620_v28 = vadd.f32 %v13677_v44, %v10522_v23  ;;  %v4611_v16 = vpop.f32.mrb[191].mxu1 }
 0x258   :  { %v5114_v29 = vmax.f32 %v3521_v20, 0.0  ;;  %v3524_v30 = vadd.f32 %v13677_v44, %v3523_v26  ;;  %v5386_v31 = vmax.f32 %v4609_v22, 0.0  ;;  %v4612_v32 = vadd.f32 %v13677_v44, %v4611_v16 }
 0x259   :  { %v9437_v33 = vpack.c.bf16 %v5116_v24, %v5116_v24  ;;  %v5117_v35 = vmax.f32 %v3532_v25, 0.0  ;;  %v9709_v36 = vpack.c.bf16 %v5388_v27, %v5388_v27  ;;  %v5389_v37 = vmax.f32 %v4620_v28, 0.0 }
 0x25a   :  { %v9435_v38 = vpack.c.bf16 %v5114_v29, %v5114_v29  ;;  %v5115_v39 = vmax.f32 %v3524_v30, 0.0  ;;  %v9707_v34 = vpack.c.bf16 %v5386_v31, %v5386_v31  ;;  %v5387_v40 = vmax.f32 %v4612_v32, 0.0 }
 0x25b   :  { %7813 = vst.msk [vmem:[%s14710_s3 + $0x2f8] sm:$0xf] %vm7622_vm3, %v9437_v33  ;;  %v9438_v41 = vpack.c.bf16 %v5117_v35, %v5117_v35  ;;  %8085 = vst.msk [vmem:[%s14710_s3 + $0x738] sm:$0xf] %vm7622_vm3, %v9709_v36  ;;  %v9710_v42 = vpack.c.bf16 %v5389_v37, %v5389_v37 }
 0x25c   :  { %7811 = vst.msk [vmem:[%s14710_s3 + $0x2f0] sm:$0xf] %vm7622_vm3, %v9435_v38  ;;  %v9436_v43 = vpack.c.bf16 %v5115_v39, %v5115_v39  ;;  %8083 = vst.msk [vmem:[%s14710_s3 + $0x730] sm:$0xf] %vm7622_vm3, %v9707_v34  ;;  %v10253_v45 = vpop.f32.mrb[192].mxu0  ;;  %v9708_v46 = vpack.c.bf16 %v5387_v40, %v5387_v40  ;;  %v10525_v47 = vpop.f32.mrb[192].mxu1 }
 0x25d   :  { %7814 = vst.msk [vmem:[%s14710_s3 + $0x2fc] sm:$0xf] %vm7622_vm3, %v9438_v41  ;;  %8086 = vst.msk [vmem:[%s14710_s3 + $0x73c] sm:$0xf] %vm7622_vm3, %v9710_v42  ;;  %v3545_v48 = vadd.f32 %v13677_v44, %v10253_v45  ;;  %v3536_v49 = vpop.f32.mrb[193].mxu0  ;;  %v4633_v50 = vadd.f32 %v13677_v44, %v10525_v47  ;;  %v4624_v52 = vpop.f32.mrb[193].mxu1 }
 0x25e   :  { %7812 = vst.msk [vmem:[%s14710_s3 + $0x2f4] sm:$0xf] %vm7622_vm3, %v9436_v43  ;;  %8084 = vst.msk [vmem:[%s14710_s3 + $0x734] sm:$0xf] %vm7622_vm3, %v9708_v46  ;;  %v3537_v53 = vadd.f32 %v13677_v44, %v3536_v49  ;;  %v10254_v54 = vpop.f32.mrb[194].mxu0  ;;  %v4625_v55 = vadd.f32 %v13677_v44, %v4624_v52  ;;  %v10526_v56 = vpop.f32.mrb[194].mxu1 }
 0x25f   :  { %v5120_v57 = vmax.f32 %v3545_v48, 0.0  ;;  %v3548_v58 = vadd.f32 %v13677_v44, %v10254_v54  ;;  %v3539_v59 = vpop.f32.mrb[195].mxu0  ;;  %v5392_v60 = vmax.f32 %v4633_v50, 0.0  ;;  %v4636_v61 = vadd.f32 %v13677_v44, %v10526_v56  ;;  %v4627_v62 = vpop.f32.mrb[195].mxu1 }
 0x260   :  { %v5118_v63 = vmax.f32 %v3537_v53, 0.0  ;;  %v3540_v0 = vadd.f32 %v13677_v44, %v3539_v59  ;;  %v5390_v1 = vmax.f32 %v4625_v55, 0.0  ;;  %v4628_v2 = vadd.f32 %v13677_v44, %v4627_v62 }
 0x261   :  { %v9441_v3 = vpack.c.bf16 %v5120_v57, %v5120_v57  ;;  %v5121_v4 = vmax.f32 %v3548_v58, 0.0  ;;  %v9713_v51 = vpack.c.bf16 %v5392_v60, %v5392_v60  ;;  %v5393_v6 = vmax.f32 %v4636_v61, 0.0 }
 0x262   :  { %v9439_v7 = vpack.c.bf16 %v5118_v63, %v5118_v63  ;;  %v5119_v8 = vmax.f32 %v3540_v0, 0.0  ;;  %v9711_v9 = vpack.c.bf16 %v5390_v1, %v5390_v1  ;;  %v5391_v10 = vmax.f32 %v4628_v2, 0.0 }
 0x263   :  { %7817 = vst.msk [vmem:[%s14710_s3 + $0x308] sm:$0xf] %vm7622_vm3, %v9441_v3  ;;  %v9442_v5 = vpack.c.bf16 %v5121_v4, %v5121_v4  ;;  %8089 = vst.msk [vmem:[%s14710_s3 + $0x748] sm:$0xf] %vm7622_vm3, %v9713_v51  ;;  %v9714_v11 = vpack.c.bf16 %v5393_v6, %v5393_v6 }
 0x264   :  { %7815 = vst.msk [vmem:[%s14710_s3 + $0x300] sm:$0xf] %vm7622_vm3, %v9439_v7  ;;  %v9440_v12 = vpack.c.bf16 %v5119_v8, %v5119_v8  ;;  %8087 = vst.msk [vmem:[%s14710_s3 + $0x740] sm:$0xf] %vm7622_vm3, %v9711_v9  ;;  %v10257_v13 = vpop.f32.mrb[196].mxu0  ;;  %v9712_v14 = vpack.c.bf16 %v5391_v10, %v5391_v10  ;;  %v10529_v15 = vpop.f32.mrb[196].mxu1 }
 0x265   :  { %7818 = vst.msk [vmem:[%s14710_s3 + $0x30c] sm:$0xf] %vm7622_vm3, %v9442_v5  ;;  %8090 = vst.msk [vmem:[%s14710_s3 + $0x74c] sm:$0xf] %vm7622_vm3, %v9714_v11  ;;  %v3561_v17 = vadd.f32 %v13677_v44, %v10257_v13  ;;  %v3552_v18 = vpop.f32.mrb[197].mxu0  ;;  %v4649_v19 = vadd.f32 %v13677_v44, %v10529_v15  ;;  %v4640_v20 = vpop.f32.mrb[197].mxu1 }
 0x266   :  { %7816 = vst.msk [vmem:[%s14710_s3 + $0x304] sm:$0xf] %vm7622_vm3, %v9440_v12  ;;  %8088 = vst.msk [vmem:[%s14710_s3 + $0x744] sm:$0xf] %vm7622_vm3, %v9712_v14  ;;  %v3553_v21 = vadd.f32 %v13677_v44, %v3552_v18  ;;  %v10258_v22 = vpop.f32.mrb[198].mxu0  ;;  %v4641_v23 = vadd.f32 %v13677_v44, %v4640_v20  ;;  %v10530_v24 = vpop.f32.mrb[198].mxu1 }
 0x267   :  { %v5124_v25 = vmax.f32 %v3561_v17, 0.0  ;;  %v3564_v26 = vadd.f32 %v13677_v44, %v10258_v22  ;;  %v3555_v27 = vpop.f32.mrb[199].mxu0  ;;  %v5396_v28 = vmax.f32 %v4649_v19, 0.0  ;;  %v4652_v16 = vadd.f32 %v13677_v44, %v10530_v24  ;;  %v4643_v29 = vpop.f32.mrb[199].mxu1 }
 0x268   :  { %v5122_v30 = vmax.f32 %v3553_v21, 0.0  ;;  %v3556_v31 = vadd.f32 %v13677_v44, %v3555_v27  ;;  %v5394_v32 = vmax.f32 %v4641_v23, 0.0  ;;  %v4644_v33 = vadd.f32 %v13677_v44, %v4643_v29 }
 0x269   :  { %v9445_v35 = vpack.c.bf16 %v5124_v25, %v5124_v25  ;;  %v5125_v36 = vmax.f32 %v3564_v26, 0.0  ;;  %v9717_v37 = vpack.c.bf16 %v5396_v28, %v5396_v28  ;;  %v5397_v38 = vmax.f32 %v4652_v16, 0.0 }
 0x26a   :  { %v9443_v39 = vpack.c.bf16 %v5122_v30, %v5122_v30  ;;  %v5123_v34 = vmax.f32 %v3556_v31, 0.0  ;;  %v9715_v40 = vpack.c.bf16 %v5394_v32, %v5394_v32  ;;  %v5395_v41 = vmax.f32 %v4644_v33, 0.0 }
 0x26b   :  { %7821 = vst.msk [vmem:[%s14710_s3 + $0x318] sm:$0xf] %vm7622_vm3, %v9445_v35  ;;  %v9446_v42 = vpack.c.bf16 %v5125_v36, %v5125_v36  ;;  %8093 = vst.msk [vmem:[%s14710_s3 + $0x758] sm:$0xf] %vm7622_vm3, %v9717_v37  ;;  %v9718_v43 = vpack.c.bf16 %v5397_v38, %v5397_v38 }
 0x26c   :  { %7819 = vst.msk [vmem:[%s14710_s3 + $0x310] sm:$0xf] %vm7622_vm3, %v9443_v39  ;;  %v9444_v45 = vpack.c.bf16 %v5123_v34, %v5123_v34  ;;  %8091 = vst.msk [vmem:[%s14710_s3 + $0x750] sm:$0xf] %vm7622_vm3, %v9715_v40  ;;  %v10261_v46 = vpop.f32.mrb[200].mxu0  ;;  %v9716_v47 = vpack.c.bf16 %v5395_v41, %v5395_v41  ;;  %v10533_v48 = vpop.f32.mrb[200].mxu1 }
 0x26d   :  { %7822 = vst.msk [vmem:[%s14710_s3 + $0x31c] sm:$0xf] %vm7622_vm3, %v9446_v42  ;;  %8094 = vst.msk [vmem:[%s14710_s3 + $0x75c] sm:$0xf] %vm7622_vm3, %v9718_v43  ;;  %v3577_v49 = vadd.f32 %v13677_v44, %v10261_v46  ;;  %v3568_v50 = vpop.f32.mrb[201].mxu0  ;;  %v4665_v52 = vadd.f32 %v13677_v44, %v10533_v48  ;;  %v4656_v53 = vpop.f32.mrb[201].mxu1 }
 0x26e   :  { %7820 = vst.msk [vmem:[%s14710_s3 + $0x314] sm:$0xf] %vm7622_vm3, %v9444_v45  ;;  %8092 = vst.msk [vmem:[%s14710_s3 + $0x754] sm:$0xf] %vm7622_vm3, %v9716_v47  ;;  %v3569_v54 = vadd.f32 %v13677_v44, %v3568_v50  ;;  %v10262_v55 = vpop.f32.mrb[202].mxu0  ;;  %v4657_v56 = vadd.f32 %v13677_v44, %v4656_v53  ;;  %v10534_v57 = vpop.f32.mrb[202].mxu1 }
 0x26f   :  { %v5128_v58 = vmax.f32 %v3577_v49, 0.0  ;;  %v3580_v59 = vadd.f32 %v13677_v44, %v10262_v55  ;;  %v3571_v60 = vpop.f32.mrb[203].mxu0  ;;  %v5400_v61 = vmax.f32 %v4665_v52, 0.0  ;;  %v4668_v62 = vadd.f32 %v13677_v44, %v10534_v57  ;;  %v4659_v63 = vpop.f32.mrb[203].mxu1 }
 0x270   :  { %v5126_v0 = vmax.f32 %v3569_v54, 0.0  ;;  %v3572_v1 = vadd.f32 %v13677_v44, %v3571_v60  ;;  %v5398_v2 = vmax.f32 %v4657_v56, 0.0  ;;  %v4660_v3 = vadd.f32 %v13677_v44, %v4659_v63 }
 0x271   :  { %v9449_v4 = vpack.c.bf16 %v5128_v58, %v5128_v58  ;;  %v5129_v51 = vmax.f32 %v3580_v59, 0.0  ;;  %v9721_v6 = vpack.c.bf16 %v5400_v61, %v5400_v61  ;;  %v5401_v7 = vmax.f32 %v4668_v62, 0.0 }
 0x272   :  { %v9447_v8 = vpack.c.bf16 %v5126_v0, %v5126_v0  ;;  %v5127_v9 = vmax.f32 %v3572_v1, 0.0  ;;  %v9719_v10 = vpack.c.bf16 %v5398_v2, %v5398_v2  ;;  %v5399_v5 = vmax.f32 %v4660_v3, 0.0 }
 0x273   :  { %7825 = vst.msk [vmem:[%s14710_s3 + $0x328] sm:$0xf] %vm7622_vm3, %v9449_v4  ;;  %v9450_v11 = vpack.c.bf16 %v5129_v51, %v5129_v51  ;;  %8097 = vst.msk [vmem:[%s14710_s3 + $0x768] sm:$0xf] %vm7622_vm3, %v9721_v6  ;;  %v9722_v12 = vpack.c.bf16 %v5401_v7, %v5401_v7 }
 0x274   :  { %7823 = vst.msk [vmem:[%s14710_s3 + $0x320] sm:$0xf] %vm7622_vm3, %v9447_v8  ;;  %v9448_v13 = vpack.c.bf16 %v5127_v9, %v5127_v9  ;;  %8095 = vst.msk [vmem:[%s14710_s3 + $0x760] sm:$0xf] %vm7622_vm3, %v9719_v10  ;;  %v10265_v14 = vpop.f32.mrb[204].mxu0  ;;  %v9720_v15 = vpack.c.bf16 %v5399_v5, %v5399_v5  ;;  %v10537_v17 = vpop.f32.mrb[204].mxu1 }
 0x275   :  { %7826 = vst.msk [vmem:[%s14710_s3 + $0x32c] sm:$0xf] %vm7622_vm3, %v9450_v11  ;;  %8098 = vst.msk [vmem:[%s14710_s3 + $0x76c] sm:$0xf] %vm7622_vm3, %v9722_v12  ;;  %v3593_v18 = vadd.f32 %v13677_v44, %v10265_v14  ;;  %v3584_v19 = vpop.f32.mrb[205].mxu0  ;;  %v4681_v20 = vadd.f32 %v13677_v44, %v10537_v17  ;;  %v4672_v21 = vpop.f32.mrb[205].mxu1 }
 0x276   :  { %7824 = vst.msk [vmem:[%s14710_s3 + $0x324] sm:$0xf] %vm7622_vm3, %v9448_v13  ;;  %8096 = vst.msk [vmem:[%s14710_s3 + $0x764] sm:$0xf] %vm7622_vm3, %v9720_v15  ;;  %v3585_v22 = vadd.f32 %v13677_v44, %v3584_v19  ;;  %v10266_v23 = vpop.f32.mrb[206].mxu0  ;;  %v4673_v24 = vadd.f32 %v13677_v44, %v4672_v21  ;;  %v10538_v25 = vpop.f32.mrb[206].mxu1 }
 0x277   :  { %v5132_v26 = vmax.f32 %v3593_v18, 0.0  ;;  %v3596_v27 = vadd.f32 %v13677_v44, %v10266_v23  ;;  %v3587_v28 = vpop.f32.mrb[207].mxu0  ;;  %v5404_v16 = vmax.f32 %v4681_v20, 0.0  ;;  %v4684_v29 = vadd.f32 %v13677_v44, %v10538_v25  ;;  %v4675_v30 = vpop.f32.mrb[207].mxu1 }
 0x278   :  { %v5130_v31 = vmax.f32 %v3585_v22, 0.0  ;;  %v3588_v32 = vadd.f32 %v13677_v44, %v3587_v28  ;;  %v5402_v33 = vmax.f32 %v4673_v24, 0.0  ;;  %v4676_v35 = vadd.f32 %v13677_v44, %v4675_v30 }
 0x279   :  { %v9453_v36 = vpack.c.bf16 %v5132_v26, %v5132_v26  ;;  %v5133_v37 = vmax.f32 %v3596_v27, 0.0  ;;  %v9725_v38 = vpack.c.bf16 %v5404_v16, %v5404_v16  ;;  %v5405_v39 = vmax.f32 %v4684_v29, 0.0 }
 0x27a   :  { %v9451_v34 = vpack.c.bf16 %v5130_v31, %v5130_v31  ;;  %v5131_v40 = vmax.f32 %v3588_v32, 0.0  ;;  %v9723_v41 = vpack.c.bf16 %v5402_v33, %v5402_v33  ;;  %v5403_v42 = vmax.f32 %v4676_v35, 0.0 }
 0x27b   :  { %7829 = vst.msk [vmem:[%s14710_s3 + $0x338] sm:$0xf] %vm7622_vm3, %v9453_v36  ;;  %v9454_v43 = vpack.c.bf16 %v5133_v37, %v5133_v37  ;;  %8101 = vst.msk [vmem:[%s14710_s3 + $0x778] sm:$0xf] %vm7622_vm3, %v9725_v38  ;;  %v9726_v45 = vpack.c.bf16 %v5405_v39, %v5405_v39 }
 0x27c   :  { %7827 = vst.msk [vmem:[%s14710_s3 + $0x330] sm:$0xf] %vm7622_vm3, %v9451_v34  ;;  %v9452_v46 = vpack.c.bf16 %v5131_v40, %v5131_v40  ;;  %8099 = vst.msk [vmem:[%s14710_s3 + $0x770] sm:$0xf] %vm7622_vm3, %v9723_v41  ;;  %v10269_v47 = vpop.f32.mrb[208].mxu0  ;;  %v9724_v48 = vpack.c.bf16 %v5403_v42, %v5403_v42  ;;  %v10541_v49 = vpop.f32.mrb[208].mxu1 }
 0x27d   :  { %7830 = vst.msk [vmem:[%s14710_s3 + $0x33c] sm:$0xf] %vm7622_vm3, %v9454_v43  ;;  %8102 = vst.msk [vmem:[%s14710_s3 + $0x77c] sm:$0xf] %vm7622_vm3, %v9726_v45  ;;  %v3609_v50 = vadd.f32 %v13677_v44, %v10269_v47  ;;  %v3600_v52 = vpop.f32.mrb[209].mxu0  ;;  %v4697_v53 = vadd.f32 %v13677_v44, %v10541_v49  ;;  %v4688_v54 = vpop.f32.mrb[209].mxu1 }
 0x27e   :  { %7828 = vst.msk [vmem:[%s14710_s3 + $0x334] sm:$0xf] %vm7622_vm3, %v9452_v46  ;;  %8100 = vst.msk [vmem:[%s14710_s3 + $0x774] sm:$0xf] %vm7622_vm3, %v9724_v48  ;;  %v3601_v55 = vadd.f32 %v13677_v44, %v3600_v52  ;;  %v10270_v56 = vpop.f32.mrb[210].mxu0  ;;  %v4689_v57 = vadd.f32 %v13677_v44, %v4688_v54  ;;  %v10542_v58 = vpop.f32.mrb[210].mxu1 }
 0x27f   :  { %v5136_v59 = vmax.f32 %v3609_v50, 0.0  ;;  %v3612_v60 = vadd.f32 %v13677_v44, %v10270_v56  ;;  %v3603_v61 = vpop.f32.mrb[211].mxu0  ;;  %v5408_v62 = vmax.f32 %v4697_v53, 0.0  ;;  %v4700_v63 = vadd.f32 %v13677_v44, %v10542_v58  ;;  %v4691_v0 = vpop.f32.mrb[211].mxu1 }
 0x280   :  { %v5134_v1 = vmax.f32 %v3601_v55, 0.0  ;;  %v3604_v2 = vadd.f32 %v13677_v44, %v3603_v61  ;;  %v5406_v3 = vmax.f32 %v4689_v57, 0.0  ;;  %v4692_v4 = vadd.f32 %v13677_v44, %v4691_v0 }
 0x281   :  { %v9457_v51 = vpack.c.bf16 %v5136_v59, %v5136_v59  ;;  %v5137_v6 = vmax.f32 %v3612_v60, 0.0  ;;  %v9729_v7 = vpack.c.bf16 %v5408_v62, %v5408_v62  ;;  %v5409_v8 = vmax.f32 %v4700_v63, 0.0 }
 0x282   :  { %v9455_v9 = vpack.c.bf16 %v5134_v1, %v5134_v1  ;;  %v5135_v10 = vmax.f32 %v3604_v2, 0.0  ;;  %v9727_v5 = vpack.c.bf16 %v5406_v3, %v5406_v3  ;;  %v5407_v11 = vmax.f32 %v4692_v4, 0.0 }
 0x283   :  { %7833 = vst.msk [vmem:[%s14710_s3 + $0x348] sm:$0xf] %vm7622_vm3, %v9457_v51  ;;  %v9458_v12 = vpack.c.bf16 %v5137_v6, %v5137_v6  ;;  %8105 = vst.msk [vmem:[%s14710_s3 + $0x788] sm:$0xf] %vm7622_vm3, %v9729_v7  ;;  %v9730_v13 = vpack.c.bf16 %v5409_v8, %v5409_v8 }
 0x284   :  { %7831 = vst.msk [vmem:[%s14710_s3 + $0x340] sm:$0xf] %vm7622_vm3, %v9455_v9  ;;  %v9456_v14 = vpack.c.bf16 %v5135_v10, %v5135_v10  ;;  %8103 = vst.msk [vmem:[%s14710_s3 + $0x780] sm:$0xf] %vm7622_vm3, %v9727_v5  ;;  %v10273_v15 = vpop.f32.mrb[212].mxu0  ;;  %v9728_v17 = vpack.c.bf16 %v5407_v11, %v5407_v11  ;;  %v10545_v18 = vpop.f32.mrb[212].mxu1 }
 0x285   :  { %7834 = vst.msk [vmem:[%s14710_s3 + $0x34c] sm:$0xf] %vm7622_vm3, %v9458_v12  ;;  %8106 = vst.msk [vmem:[%s14710_s3 + $0x78c] sm:$0xf] %vm7622_vm3, %v9730_v13  ;;  %v3625_v19 = vadd.f32 %v13677_v44, %v10273_v15  ;;  %v3616_v20 = vpop.f32.mrb[213].mxu0  ;;  %v4713_v21 = vadd.f32 %v13677_v44, %v10545_v18  ;;  %v4704_v22 = vpop.f32.mrb[213].mxu1 }
 0x286   :  { %7832 = vst.msk [vmem:[%s14710_s3 + $0x344] sm:$0xf] %vm7622_vm3, %v9456_v14  ;;  %8104 = vst.msk [vmem:[%s14710_s3 + $0x784] sm:$0xf] %vm7622_vm3, %v9728_v17  ;;  %v3617_v23 = vadd.f32 %v13677_v44, %v3616_v20  ;;  %v10274_v24 = vpop.f32.mrb[214].mxu0  ;;  %v4705_v25 = vadd.f32 %v13677_v44, %v4704_v22  ;;  %v10546_v26 = vpop.f32.mrb[214].mxu1 }
 0x287   :  { %v5140_v27 = vmax.f32 %v3625_v19, 0.0  ;;  %v3628_v28 = vadd.f32 %v13677_v44, %v10274_v24  ;;  %v3619_v16 = vpop.f32.mrb[215].mxu0  ;;  %v5412_v29 = vmax.f32 %v4713_v21, 0.0  ;;  %v4716_v30 = vadd.f32 %v13677_v44, %v10546_v26  ;;  %v4707_v31 = vpop.f32.mrb[215].mxu1  ;;  %v14202_v19 = vld [vmem:[%s14709_s2] ss:$0 sm:$0xff] }
 0x288   :  { %v5138_v32 = vmax.f32 %v3617_v23, 0.0  ;;  %v3620_v33 = vadd.f32 %v13677_v44, %v3619_v16  ;;  %v5410_v35 = vmax.f32 %v4705_v25, 0.0  ;;  %v4708_v36 = vadd.f32 %v13677_v44, %v4707_v31 }
 0x289   :  { %v9461_v37 = vpack.c.bf16 %v5140_v27, %v5140_v27  ;;  %v5141_v38 = vmax.f32 %v3628_v28, 0.0  ;;  %v9733_v39 = vpack.c.bf16 %v5412_v29, %v5412_v29  ;;  %v5413_v34 = vmax.f32 %v4716_v30, 0.0 }
 0x28a   :  { %v9459_v40 = vpack.c.bf16 %v5138_v32, %v5138_v32  ;;  %v5139_v41 = vmax.f32 %v3620_v33, 0.0  ;;  %v9731_v42 = vpack.c.bf16 %v5410_v35, %v5410_v35  ;;  %v5411_v43 = vmax.f32 %v4708_v36, 0.0 }
 0x28b   :  { %7837 = vst.msk [vmem:[%s14710_s3 + $0x358] sm:$0xf] %vm7622_vm3, %v9461_v37  ;;  %v9462_v45 = vpack.c.bf16 %v5141_v38, %v5141_v38  ;;  %8109 = vst.msk [vmem:[%s14710_s3 + $0x798] sm:$0xf] %vm7622_vm3, %v9733_v39  ;;  %v9734_v46 = vpack.c.bf16 %v5413_v34, %v5413_v34 }
 0x28c   :  { %7835 = vst.msk [vmem:[%s14710_s3 + $0x350] sm:$0xf] %vm7622_vm3, %v9459_v40  ;;  %v9460_v47 = vpack.c.bf16 %v5139_v41, %v5139_v41  ;;  %8107 = vst.msk [vmem:[%s14710_s3 + $0x790] sm:$0xf] %vm7622_vm3, %v9731_v42  ;;  %v10277_v48 = vpop.f32.mrb[216].mxu0  ;;  %v9732_v49 = vpack.c.bf16 %v5411_v43, %v5411_v43  ;;  %v10549_v50 = vpop.f32.mrb[216].mxu1 }
 0x28d   :  { %7838 = vst.msk [vmem:[%s14710_s3 + $0x35c] sm:$0xf] %vm7622_vm3, %v9462_v45  ;;  %8110 = vst.msk [vmem:[%s14710_s3 + $0x79c] sm:$0xf] %vm7622_vm3, %v9734_v46  ;;  %v3641_v52 = vadd.f32 %v13677_v44, %v10277_v48  ;;  %v3632_v53 = vpop.f32.mrb[217].mxu0  ;;  %v4729_v54 = vadd.f32 %v13677_v44, %v10549_v50  ;;  %v4720_v55 = vpop.f32.mrb[217].mxu1 }
 0x28e   :  { %7836 = vst.msk [vmem:[%s14710_s3 + $0x354] sm:$0xf] %vm7622_vm3, %v9460_v47  ;;  %8108 = vst.msk [vmem:[%s14710_s3 + $0x794] sm:$0xf] %vm7622_vm3, %v9732_v49  ;;  %v3633_v56 = vadd.f32 %v13677_v44, %v3632_v53  ;;  %v10278_v57 = vpop.f32.mrb[218].mxu0  ;;  %v4721_v58 = vadd.f32 %v13677_v44, %v4720_v55  ;;  %v10550_v59 = vpop.f32.mrb[218].mxu1 }
 0x28f   :  { %v5144_v60 = vmax.f32 %v3641_v52, 0.0  ;;  %v3644_v61 = vadd.f32 %v13677_v44, %v10278_v57  ;;  %v3635_v62 = vpop.f32.mrb[219].mxu0  ;;  %v5416_v63 = vmax.f32 %v4729_v54, 0.0  ;;  %v4732_v0 = vadd.f32 %v13677_v44, %v10550_v59  ;;  %v4723_v1 = vpop.f32.mrb[219].mxu1 }
 0x290   :  { %v5142_v2 = vmax.f32 %v3633_v56, 0.0  ;;  %v3636_v3 = vadd.f32 %v13677_v44, %v3635_v62  ;;  %v5414_v4 = vmax.f32 %v4721_v58, 0.0  ;;  %v4724_v51 = vadd.f32 %v13677_v44, %v4723_v1 }
 0x291   :  { %v9465_v6 = vpack.c.bf16 %v5144_v60, %v5144_v60  ;;  %v5145_v7 = vmax.f32 %v3644_v61, 0.0  ;;  %v9737_v8 = vpack.c.bf16 %v5416_v63, %v5416_v63  ;;  %v5417_v9 = vmax.f32 %v4732_v0, 0.0 }
 0x292   :  { %v9463_v10 = vpack.c.bf16 %v5142_v2, %v5142_v2  ;;  %v5143_v5 = vmax.f32 %v3636_v3, 0.0  ;;  %v9735_v11 = vpack.c.bf16 %v5414_v4, %v5414_v4  ;;  %v5415_v12 = vmax.f32 %v4724_v51, 0.0 }
 0x293   :  { %7841 = vst.msk [vmem:[%s14710_s3 + $0x368] sm:$0xf] %vm7622_vm3, %v9465_v6  ;;  %v9466_v13 = vpack.c.bf16 %v5145_v7, %v5145_v7  ;;  %8113 = vst.msk [vmem:[%s14710_s3 + $0x7a8] sm:$0xf] %vm7622_vm3, %v9737_v8  ;;  %v9738_v44 = vpack.c.bf16 %v5417_v9, %v5417_v9 }
 0x294   :  { %7839 = vst.msk [vmem:[%s14710_s3 + $0x360] sm:$0xf] %vm7622_vm3, %v9463_v10  ;;  %v9464_v14 = vpack.c.bf16 %v5143_v5, %v5143_v5  ;;  %8111 = vst.msk [vmem:[%s14710_s3 + $0x7a0] sm:$0xf] %vm7622_vm3, %v9735_v11  ;;  %v10281_v15 = vpop.f32.mrb[220].mxu0  ;;  %v9736_v17 = vpack.c.bf16 %v5415_v12, %v5415_v12  ;;  %v10553_v18 = vpop.f32.mrb[220].mxu1 }
 0x295   :  { %7842 = vst.msk [vmem:[%s14710_s3 + $0x36c] sm:$0xf] %vm7622_vm3, %v9466_v13  ;;  %8114 = vst.msk [vmem:[%s14710_s3 + $0x7ac] sm:$0xf] %vm7622_vm3, %v9738_v44  ;;  %v3657_v20 = vadd.f32 %v14202_v19, %v10281_v15  ;;  %v3648_v21 = vpop.f32.mrb[221].mxu0  ;;  %v4745_v22 = vadd.f32 %v14202_v19, %v10553_v18  ;;  %v4736_v23 = vpop.f32.mrb[221].mxu1 }
 0x296   :  { %7840 = vst.msk [vmem:[%s14710_s3 + $0x364] sm:$0xf] %vm7622_vm3, %v9464_v14  ;;  %8112 = vst.msk [vmem:[%s14710_s3 + $0x7a4] sm:$0xf] %vm7622_vm3, %v9736_v17  ;;  %v3649_v24 = vadd.f32 %v14202_v19, %v3648_v21  ;;  %v10282_v25 = vpop.f32.mrb[222].mxu0  ;;  %v4737_v26 = vadd.f32 %v14202_v19, %v4736_v23  ;;  %v10554_v27 = vpop.f32.mrb[222].mxu1 }
 0x297   :  { %v5148_v28 = vmax.f32 %v3657_v20, 0.0  ;;  %v3660_v16 = vadd.f32 %v14202_v19, %v10282_v25  ;;  %v3651_v29 = vpop.f32.mrb[223].mxu0  ;;  %v5420_v30 = vmax.f32 %v4745_v22, 0.0  ;;  %v4748_v31 = vadd.f32 %v14202_v19, %v10554_v27  ;;  %v4739_v32 = vpop.f32.mrb[223].mxu1 }
 0x298   :  { %v5146_v33 = vmax.f32 %v3649_v24, 0.0  ;;  %v3652_v35 = vadd.f32 %v14202_v19, %v3651_v29  ;;  %v5418_v36 = vmax.f32 %v4737_v26, 0.0  ;;  %v4740_v37 = vadd.f32 %v14202_v19, %v4739_v32 }
 0x299   :  { %v9469_v38 = vpack.c.bf16 %v5148_v28, %v5148_v28  ;;  %v5149_v39 = vmax.f32 %v3660_v16, 0.0  ;;  %v9741_v34 = vpack.c.bf16 %v5420_v30, %v5420_v30  ;;  %v5421_v40 = vmax.f32 %v4748_v31, 0.0 }
 0x29a   :  { %v9467_v41 = vpack.c.bf16 %v5146_v33, %v5146_v33  ;;  %v5147_v42 = vmax.f32 %v3652_v35, 0.0  ;;  %v9739_v43 = vpack.c.bf16 %v5418_v36, %v5418_v36  ;;  %v5419_v45 = vmax.f32 %v4740_v37, 0.0 }
 0x29b   :  { %7845 = vst.msk [vmem:[%s14710_s3 + $0x378] sm:$0xf] %vm7622_vm3, %v9469_v38  ;;  %v9470_v46 = vpack.c.bf16 %v5149_v39, %v5149_v39  ;;  %8117 = vst.msk [vmem:[%s14710_s3 + $0x7b8] sm:$0xf] %vm7622_vm3, %v9741_v34  ;;  %v9742_v47 = vpack.c.bf16 %v5421_v40, %v5421_v40 }
 0x29c   :  { %7843 = vst.msk [vmem:[%s14710_s3 + $0x370] sm:$0xf] %vm7622_vm3, %v9467_v41  ;;  %v9468_v48 = vpack.c.bf16 %v5147_v42, %v5147_v42  ;;  %8115 = vst.msk [vmem:[%s14710_s3 + $0x7b0] sm:$0xf] %vm7622_vm3, %v9739_v43  ;;  %v10285_v49 = vpop.f32.mrb[224].mxu0  ;;  %v9740_v50 = vpack.c.bf16 %v5419_v45, %v5419_v45  ;;  %v10557_v52 = vpop.f32.mrb[224].mxu1 }
 0x29d   :  { %7846 = vst.msk [vmem:[%s14710_s3 + $0x37c] sm:$0xf] %vm7622_vm3, %v9470_v46  ;;  %8118 = vst.msk [vmem:[%s14710_s3 + $0x7bc] sm:$0xf] %vm7622_vm3, %v9742_v47  ;;  %v3673_v53 = vadd.f32 %v14202_v19, %v10285_v49  ;;  %v3664_v54 = vpop.f32.mrb[225].mxu0  ;;  %v4761_v55 = vadd.f32 %v14202_v19, %v10557_v52  ;;  %v4752_v56 = vpop.f32.mrb[225].mxu1 }
 0x29e   :  { %7844 = vst.msk [vmem:[%s14710_s3 + $0x374] sm:$0xf] %vm7622_vm3, %v9468_v48  ;;  %8116 = vst.msk [vmem:[%s14710_s3 + $0x7b4] sm:$0xf] %vm7622_vm3, %v9740_v50  ;;  %v3665_v57 = vadd.f32 %v14202_v19, %v3664_v54  ;;  %v10286_v58 = vpop.f32.mrb[226].mxu0  ;;  %v4753_v59 = vadd.f32 %v14202_v19, %v4752_v56  ;;  %v10558_v60 = vpop.f32.mrb[226].mxu1 }
 0x29f   :  { %v5152_v61 = vmax.f32 %v3673_v53, 0.0  ;;  %v3676_v62 = vadd.f32 %v14202_v19, %v10286_v58  ;;  %v3667_v63 = vpop.f32.mrb[227].mxu0  ;;  %v5424_v0 = vmax.f32 %v4761_v55, 0.0  ;;  %v4764_v1 = vadd.f32 %v14202_v19, %v10558_v60  ;;  %v4755_v2 = vpop.f32.mrb[227].mxu1 }
 0x2a0   :  { %v5150_v3 = vmax.f32 %v3665_v57, 0.0  ;;  %v3668_v4 = vadd.f32 %v14202_v19, %v3667_v63  ;;  %v5422_v51 = vmax.f32 %v4753_v59, 0.0  ;;  %v4756_v6 = vadd.f32 %v14202_v19, %v4755_v2 }
 0x2a1   :  { %v9473_v7 = vpack.c.bf16 %v5152_v61, %v5152_v61  ;;  %v5153_v8 = vmax.f32 %v3676_v62, 0.0  ;;  %v9745_v9 = vpack.c.bf16 %v5424_v0, %v5424_v0  ;;  %v5425_v10 = vmax.f32 %v4764_v1, 0.0 }
 0x2a2   :  { %v9471_v5 = vpack.c.bf16 %v5150_v3, %v5150_v3  ;;  %v5151_v11 = vmax.f32 %v3668_v4, 0.0  ;;  %v9743_v12 = vpack.c.bf16 %v5422_v51, %v5422_v51  ;;  %v5423_v13 = vmax.f32 %v4756_v6, 0.0 }
 0x2a3   :  { %7849 = vst.msk [vmem:[%s14710_s3 + $0x388] sm:$0xf] %vm7622_vm3, %v9473_v7  ;;  %v9474_v44 = vpack.c.bf16 %v5153_v8, %v5153_v8  ;;  %8121 = vst.msk [vmem:[%s14710_s3 + $0x7c8] sm:$0xf] %vm7622_vm3, %v9745_v9  ;;  %v9746_v14 = vpack.c.bf16 %v5425_v10, %v5425_v10 }
 0x2a4   :  { %7847 = vst.msk [vmem:[%s14710_s3 + $0x380] sm:$0xf] %vm7622_vm3, %v9471_v5  ;;  %v9472_v15 = vpack.c.bf16 %v5151_v11, %v5151_v11  ;;  %8119 = vst.msk [vmem:[%s14710_s3 + $0x7c0] sm:$0xf] %vm7622_vm3, %v9743_v12  ;;  %v10289_v17 = vpop.f32.mrb[228].mxu0  ;;  %v9744_v18 = vpack.c.bf16 %v5423_v13, %v5423_v13  ;;  %v10561_v20 = vpop.f32.mrb[228].mxu1 }
 0x2a5   :  { %7850 = vst.msk [vmem:[%s14710_s3 + $0x38c] sm:$0xf] %vm7622_vm3, %v9474_v44  ;;  %8122 = vst.msk [vmem:[%s14710_s3 + $0x7cc] sm:$0xf] %vm7622_vm3, %v9746_v14  ;;  %v3689_v21 = vadd.f32 %v14202_v19, %v10289_v17  ;;  %v3680_v22 = vpop.f32.mrb[229].mxu0  ;;  %v4777_v23 = vadd.f32 %v14202_v19, %v10561_v20  ;;  %v4768_v24 = vpop.f32.mrb[229].mxu1 }
 0x2a6   :  { %7848 = vst.msk [vmem:[%s14710_s3 + $0x384] sm:$0xf] %vm7622_vm3, %v9472_v15  ;;  %8120 = vst.msk [vmem:[%s14710_s3 + $0x7c4] sm:$0xf] %vm7622_vm3, %v9744_v18  ;;  %v3681_v25 = vadd.f32 %v14202_v19, %v3680_v22  ;;  %v10290_v26 = vpop.f32.mrb[230].mxu0  ;;  %v4769_v27 = vadd.f32 %v14202_v19, %v4768_v24  ;;  %v10562_v28 = vpop.f32.mrb[230].mxu1 }
 0x2a7   :  { %v5156_v16 = vmax.f32 %v3689_v21, 0.0  ;;  %v3692_v29 = vadd.f32 %v14202_v19, %v10290_v26  ;;  %v3683_v30 = vpop.f32.mrb[231].mxu0  ;;  %v5428_v31 = vmax.f32 %v4777_v23, 0.0  ;;  %v4780_v32 = vadd.f32 %v14202_v19, %v10562_v28  ;;  %v4771_v33 = vpop.f32.mrb[231].mxu1 }
 0x2a8   :  { %v5154_v35 = vmax.f32 %v3681_v25, 0.0  ;;  %v3684_v36 = vadd.f32 %v14202_v19, %v3683_v30  ;;  %v5426_v37 = vmax.f32 %v4769_v27, 0.0  ;;  %v4772_v38 = vadd.f32 %v14202_v19, %v4771_v33 }
 0x2a9   :  { %v9477_v39 = vpack.c.bf16 %v5156_v16, %v5156_v16  ;;  %v5157_v34 = vmax.f32 %v3692_v29, 0.0  ;;  %v9749_v40 = vpack.c.bf16 %v5428_v31, %v5428_v31  ;;  %v5429_v41 = vmax.f32 %v4780_v32, 0.0 }
 0x2aa   :  { %v9475_v42 = vpack.c.bf16 %v5154_v35, %v5154_v35  ;;  %v5155_v43 = vmax.f32 %v3684_v36, 0.0  ;;  %v9747_v45 = vpack.c.bf16 %v5426_v37, %v5426_v37  ;;  %v5427_v46 = vmax.f32 %v4772_v38, 0.0 }
 0x2ab   :  { %7853 = vst.msk [vmem:[%s14710_s3 + $0x398] sm:$0xf] %vm7622_vm3, %v9477_v39  ;;  %v9478_v47 = vpack.c.bf16 %v5157_v34, %v5157_v34  ;;  %8125 = vst.msk [vmem:[%s14710_s3 + $0x7d8] sm:$0xf] %vm7622_vm3, %v9749_v40  ;;  %v9750_v48 = vpack.c.bf16 %v5429_v41, %v5429_v41 }
 0x2ac   :  { %7851 = vst.msk [vmem:[%s14710_s3 + $0x390] sm:$0xf] %vm7622_vm3, %v9475_v42  ;;  %v9476_v49 = vpack.c.bf16 %v5155_v43, %v5155_v43  ;;  %8123 = vst.msk [vmem:[%s14710_s3 + $0x7d0] sm:$0xf] %vm7622_vm3, %v9747_v45  ;;  %v10293_v50 = vpop.f32.mrb[232].mxu0  ;;  %v9748_v52 = vpack.c.bf16 %v5427_v46, %v5427_v46  ;;  %v10565_v53 = vpop.f32.mrb[232].mxu1 }
 0x2ad   :  { %7854 = vst.msk [vmem:[%s14710_s3 + $0x39c] sm:$0xf] %vm7622_vm3, %v9478_v47  ;;  %8126 = vst.msk [vmem:[%s14710_s3 + $0x7dc] sm:$0xf] %vm7622_vm3, %v9750_v48  ;;  %v3705_v54 = vadd.f32 %v14202_v19, %v10293_v50  ;;  %v3696_v55 = vpop.f32.mrb[233].mxu0  ;;  %v4793_v56 = vadd.f32 %v14202_v19, %v10565_v53  ;;  %v4784_v57 = vpop.f32.mrb[233].mxu1 }
 0x2ae   :  { %7852 = vst.msk [vmem:[%s14710_s3 + $0x394] sm:$0xf] %vm7622_vm3, %v9476_v49  ;;  %8124 = vst.msk [vmem:[%s14710_s3 + $0x7d4] sm:$0xf] %vm7622_vm3, %v9748_v52  ;;  %v3697_v58 = vadd.f32 %v14202_v19, %v3696_v55  ;;  %v10294_v59 = vpop.f32.mrb[234].mxu0  ;;  %v4785_v60 = vadd.f32 %v14202_v19, %v4784_v57  ;;  %v10566_v61 = vpop.f32.mrb[234].mxu1 }
 0x2af   :  { %v5160_v62 = vmax.f32 %v3705_v54, 0.0  ;;  %v3708_v63 = vadd.f32 %v14202_v19, %v10294_v59  ;;  %v3699_v0 = vpop.f32.mrb[235].mxu0  ;;  %v5432_v1 = vmax.f32 %v4793_v56, 0.0  ;;  %v4796_v2 = vadd.f32 %v14202_v19, %v10566_v61  ;;  %v4787_v3 = vpop.f32.mrb[235].mxu1 }
 0x2b0   :  { %v5158_v4 = vmax.f32 %v3697_v58, 0.0  ;;  %v3700_v51 = vadd.f32 %v14202_v19, %v3699_v0  ;;  %v5430_v6 = vmax.f32 %v4785_v60, 0.0  ;;  %v4788_v7 = vadd.f32 %v14202_v19, %v4787_v3 }
 0x2b1   :  { %v9481_v8 = vpack.c.bf16 %v5160_v62, %v5160_v62  ;;  %v5161_v9 = vmax.f32 %v3708_v63, 0.0  ;;  %v9753_v10 = vpack.c.bf16 %v5432_v1, %v5432_v1  ;;  %v5433_v5 = vmax.f32 %v4796_v2, 0.0 }
 0x2b2   :  { %v9479_v11 = vpack.c.bf16 %v5158_v4, %v5158_v4  ;;  %v5159_v12 = vmax.f32 %v3700_v51, 0.0  ;;  %v9751_v13 = vpack.c.bf16 %v5430_v6, %v5430_v6  ;;  %v5431_v44 = vmax.f32 %v4788_v7, 0.0 }
 0x2b3   :  { %7857 = vst.msk [vmem:[%s14710_s3 + $0x3a8] sm:$0xf] %vm7622_vm3, %v9481_v8  ;;  %v9482_v14 = vpack.c.bf16 %v5161_v9, %v5161_v9  ;;  %8129 = vst.msk [vmem:[%s14710_s3 + $0x7e8] sm:$0xf] %vm7622_vm3, %v9753_v10  ;;  %v9754_v15 = vpack.c.bf16 %v5433_v5, %v5433_v5 }
 0x2b4   :  { %7855 = vst.msk [vmem:[%s14710_s3 + $0x3a0] sm:$0xf] %vm7622_vm3, %v9479_v11  ;;  %v9480_v17 = vpack.c.bf16 %v5159_v12, %v5159_v12  ;;  %8127 = vst.msk [vmem:[%s14710_s3 + $0x7e0] sm:$0xf] %vm7622_vm3, %v9751_v13  ;;  %v10297_v18 = vpop.f32.mrb[236].mxu0  ;;  %v9752_v20 = vpack.c.bf16 %v5431_v44, %v5431_v44  ;;  %v10569_v21 = vpop.f32.mrb[236].mxu1 }
 0x2b5   :  { %7858 = vst.msk [vmem:[%s14710_s3 + $0x3ac] sm:$0xf] %vm7622_vm3, %v9482_v14  ;;  %8130 = vst.msk [vmem:[%s14710_s3 + $0x7ec] sm:$0xf] %vm7622_vm3, %v9754_v15  ;;  %v3721_v22 = vadd.f32 %v14202_v19, %v10297_v18  ;;  %v3712_v23 = vpop.f32.mrb[237].mxu0  ;;  %v4809_v24 = vadd.f32 %v14202_v19, %v10569_v21  ;;  %v4800_v25 = vpop.f32.mrb[237].mxu1 }
 0x2b6   :  { %7856 = vst.msk [vmem:[%s14710_s3 + $0x3a4] sm:$0xf] %vm7622_vm3, %v9480_v17  ;;  %8128 = vst.msk [vmem:[%s14710_s3 + $0x7e4] sm:$0xf] %vm7622_vm3, %v9752_v20  ;;  %v3713_v26 = vadd.f32 %v14202_v19, %v3712_v23  ;;  %v10298_v27 = vpop.f32.mrb[238].mxu0  ;;  %v4801_v28 = vadd.f32 %v14202_v19, %v4800_v25  ;;  %v10570_v16 = vpop.f32.mrb[238].mxu1 }
 0x2b7   :  { %v5164_v29 = vmax.f32 %v3721_v22, 0.0  ;;  %v3724_v30 = vadd.f32 %v14202_v19, %v10298_v27  ;;  %v3715_v31 = vpop.f32.mrb[239].mxu0  ;;  %v5436_v32 = vmax.f32 %v4809_v24, 0.0  ;;  %v4812_v33 = vadd.f32 %v14202_v19, %v10570_v16  ;;  %v4803_v35 = vpop.f32.mrb[239].mxu1 }
 0x2b8   :  { %v5162_v36 = vmax.f32 %v3713_v26, 0.0  ;;  %v3716_v37 = vadd.f32 %v14202_v19, %v3715_v31  ;;  %v5434_v38 = vmax.f32 %v4801_v28, 0.0  ;;  %v4804_v39 = vadd.f32 %v14202_v19, %v4803_v35 }
 0x2b9   :  { %v9485_v34 = vpack.c.bf16 %v5164_v29, %v5164_v29  ;;  %v5165_v40 = vmax.f32 %v3724_v30, 0.0  ;;  %v9757_v41 = vpack.c.bf16 %v5436_v32, %v5436_v32  ;;  %v5437_v42 = vmax.f32 %v4812_v33, 0.0 }
 0x2ba   :  { %v9483_v43 = vpack.c.bf16 %v5162_v36, %v5162_v36  ;;  %v5163_v45 = vmax.f32 %v3716_v37, 0.0  ;;  %v9755_v46 = vpack.c.bf16 %v5434_v38, %v5434_v38  ;;  %v5435_v47 = vmax.f32 %v4804_v39, 0.0 }
 0x2bb   :  { %7861 = vst.msk [vmem:[%s14710_s3 + $0x3b8] sm:$0xf] %vm7622_vm3, %v9485_v34  ;;  %v9486_v48 = vpack.c.bf16 %v5165_v40, %v5165_v40  ;;  %8133 = vst.msk [vmem:[%s14710_s3 + $0x7f8] sm:$0xf] %vm7622_vm3, %v9757_v41  ;;  %v9758_v49 = vpack.c.bf16 %v5437_v42, %v5437_v42 }
 0x2bc   :  { %7859 = vst.msk [vmem:[%s14710_s3 + $0x3b0] sm:$0xf] %vm7622_vm3, %v9483_v43  ;;  %v9484_v50 = vpack.c.bf16 %v5163_v45, %v5163_v45  ;;  %8131 = vst.msk [vmem:[%s14710_s3 + $0x7f0] sm:$0xf] %vm7622_vm3, %v9755_v46  ;;  %v10301_v52 = vpop.f32.mrb[240].mxu0  ;;  %v9756_v53 = vpack.c.bf16 %v5435_v47, %v5435_v47  ;;  %v10573_v54 = vpop.f32.mrb[240].mxu1 }
 0x2bd   :  { %7862 = vst.msk [vmem:[%s14710_s3 + $0x3bc] sm:$0xf] %vm7622_vm3, %v9486_v48  ;;  %8134 = vst.msk [vmem:[%s14710_s3 + $0x7fc] sm:$0xf] %vm7622_vm3, %v9758_v49  ;;  %v3737_v55 = vadd.f32 %v14202_v19, %v10301_v52  ;;  %v3728_v56 = vpop.f32.mrb[241].mxu0  ;;  %v4825_v57 = vadd.f32 %v14202_v19, %v10573_v54  ;;  %v4816_v58 = vpop.f32.mrb[241].mxu1 }
 0x2be   :  { %7860 = vst.msk [vmem:[%s14710_s3 + $0x3b4] sm:$0xf] %vm7622_vm3, %v9484_v50  ;;  %8132 = vst.msk [vmem:[%s14710_s3 + $0x7f4] sm:$0xf] %vm7622_vm3, %v9756_v53  ;;  %v3729_v59 = vadd.f32 %v14202_v19, %v3728_v56  ;;  %v10302_v60 = vpop.f32.mrb[242].mxu0  ;;  %v4817_v61 = vadd.f32 %v14202_v19, %v4816_v58  ;;  %v10574_v62 = vpop.f32.mrb[242].mxu1 }
 0x2bf   :  { %v5168_v63 = vmax.f32 %v3737_v55, 0.0  ;;  %v3740_v0 = vadd.f32 %v14202_v19, %v10302_v60  ;;  %v3731_v1 = vpop.f32.mrb[243].mxu0  ;;  %v5440_v2 = vmax.f32 %v4825_v57, 0.0  ;;  %v4828_v3 = vadd.f32 %v14202_v19, %v10574_v62  ;;  %v4819_v4 = vpop.f32.mrb[243].mxu1 }
 0x2c0   :  { %v5166_v51 = vmax.f32 %v3729_v59, 0.0  ;;  %v3732_v6 = vadd.f32 %v14202_v19, %v3731_v1  ;;  %v5438_v7 = vmax.f32 %v4817_v61, 0.0  ;;  %v4820_v8 = vadd.f32 %v14202_v19, %v4819_v4 }
 0x2c1   :  { %v9489_v9 = vpack.c.bf16 %v5168_v63, %v5168_v63  ;;  %v5169_v10 = vmax.f32 %v3740_v0, 0.0  ;;  %v9761_v5 = vpack.c.bf16 %v5440_v2, %v5440_v2  ;;  %v5441_v11 = vmax.f32 %v4828_v3, 0.0 }
 0x2c2   :  { %v9487_v12 = vpack.c.bf16 %v5166_v51, %v5166_v51  ;;  %v5167_v13 = vmax.f32 %v3732_v6, 0.0  ;;  %v9759_v44 = vpack.c.bf16 %v5438_v7, %v5438_v7  ;;  %v5439_v14 = vmax.f32 %v4820_v8, 0.0 }
 0x2c3   :  { %7865 = vst.msk [vmem:[%s14710_s3 + $0x3c8] sm:$0xf] %vm7622_vm3, %v9489_v9  ;;  %v9490_v15 = vpack.c.bf16 %v5169_v10, %v5169_v10  ;;  %8137 = vst.msk [vmem:[%s14710_s3 + $0x808] sm:$0xf] %vm7622_vm3, %v9761_v5  ;;  %v9762_v17 = vpack.c.bf16 %v5441_v11, %v5441_v11 }
 0x2c4   :  { %7863 = vst.msk [vmem:[%s14710_s3 + $0x3c0] sm:$0xf] %vm7622_vm3, %v9487_v12  ;;  %v9488_v18 = vpack.c.bf16 %v5167_v13, %v5167_v13  ;;  %8135 = vst.msk [vmem:[%s14710_s3 + $0x800] sm:$0xf] %vm7622_vm3, %v9759_v44  ;;  %v10305_v20 = vpop.f32.mrb[244].mxu0  ;;  %v9760_v21 = vpack.c.bf16 %v5439_v14, %v5439_v14  ;;  %v10577_v22 = vpop.f32.mrb[244].mxu1 }
 0x2c5   :  { %7866 = vst.msk [vmem:[%s14710_s3 + $0x3cc] sm:$0xf] %vm7622_vm3, %v9490_v15  ;;  %8138 = vst.msk [vmem:[%s14710_s3 + $0x80c] sm:$0xf] %vm7622_vm3, %v9762_v17  ;;  %v3753_v23 = vadd.f32 %v14202_v19, %v10305_v20  ;;  %v3744_v24 = vpop.f32.mrb[245].mxu0  ;;  %v4841_v25 = vadd.f32 %v14202_v19, %v10577_v22  ;;  %v4832_v26 = vpop.f32.mrb[245].mxu1 }
 0x2c6   :  { %7864 = vst.msk [vmem:[%s14710_s3 + $0x3c4] sm:$0xf] %vm7622_vm3, %v9488_v18  ;;  %8136 = vst.msk [vmem:[%s14710_s3 + $0x804] sm:$0xf] %vm7622_vm3, %v9760_v21  ;;  %v3745_v27 = vadd.f32 %v14202_v19, %v3744_v24  ;;  %v10306_v28 = vpop.f32.mrb[246].mxu0  ;;  %v4833_v16 = vadd.f32 %v14202_v19, %v4832_v26  ;;  %v10578_v29 = vpop.f32.mrb[246].mxu1 }
 0x2c7   :  { %v5172_v30 = vmax.f32 %v3753_v23, 0.0  ;;  %v3756_v31 = vadd.f32 %v14202_v19, %v10306_v28  ;;  %v3747_v32 = vpop.f32.mrb[247].mxu0  ;;  %v5444_v33 = vmax.f32 %v4841_v25, 0.0  ;;  %v4844_v35 = vadd.f32 %v14202_v19, %v10578_v29  ;;  %v4835_v36 = vpop.f32.mrb[247].mxu1 }
 0x2c8   :  { %v5170_v37 = vmax.f32 %v3745_v27, 0.0  ;;  %v3748_v38 = vadd.f32 %v14202_v19, %v3747_v32  ;;  %v5442_v39 = vmax.f32 %v4833_v16, 0.0  ;;  %v4836_v34 = vadd.f32 %v14202_v19, %v4835_v36 }
 0x2c9   :  { %v9493_v40 = vpack.c.bf16 %v5172_v30, %v5172_v30  ;;  %v5173_v41 = vmax.f32 %v3756_v31, 0.0  ;;  %v9765_v42 = vpack.c.bf16 %v5444_v33, %v5444_v33  ;;  %v5445_v43 = vmax.f32 %v4844_v35, 0.0 }
 0x2ca   :  { %v9491_v45 = vpack.c.bf16 %v5170_v37, %v5170_v37  ;;  %v5171_v46 = vmax.f32 %v3748_v38, 0.0  ;;  %v9763_v47 = vpack.c.bf16 %v5442_v39, %v5442_v39  ;;  %v5443_v48 = vmax.f32 %v4836_v34, 0.0 }
 0x2cb   :  { %7869 = vst.msk [vmem:[%s14710_s3 + $0x3d8] sm:$0xf] %vm7622_vm3, %v9493_v40  ;;  %v9494_v49 = vpack.c.bf16 %v5173_v41, %v5173_v41  ;;  %8141 = vst.msk [vmem:[%s14710_s3 + $0x818] sm:$0xf] %vm7622_vm3, %v9765_v42  ;;  %v9766_v50 = vpack.c.bf16 %v5445_v43, %v5445_v43 }
 0x2cc   :  { %7867 = vst.msk [vmem:[%s14710_s3 + $0x3d0] sm:$0xf] %vm7622_vm3, %v9491_v45  ;;  %v9492_v52 = vpack.c.bf16 %v5171_v46, %v5171_v46  ;;  %8139 = vst.msk [vmem:[%s14710_s3 + $0x810] sm:$0xf] %vm7622_vm3, %v9763_v47  ;;  %v10309_v53 = vpop.f32.mrb[248].mxu0  ;;  %v9764_v54 = vpack.c.bf16 %v5443_v48, %v5443_v48  ;;  %v10581_v55 = vpop.f32.mrb[248].mxu1 }
 0x2cd   :  { %7870 = vst.msk [vmem:[%s14710_s3 + $0x3dc] sm:$0xf] %vm7622_vm3, %v9494_v49  ;;  %8142 = vst.msk [vmem:[%s14710_s3 + $0x81c] sm:$0xf] %vm7622_vm3, %v9766_v50  ;;  %v3769_v56 = vadd.f32 %v14202_v19, %v10309_v53  ;;  %v3760_v57 = vpop.f32.mrb[249].mxu0  ;;  %v4857_v58 = vadd.f32 %v14202_v19, %v10581_v55  ;;  %v4848_v59 = vpop.f32.mrb[249].mxu1 }
 0x2ce   :  { %7868 = vst.msk [vmem:[%s14710_s3 + $0x3d4] sm:$0xf] %vm7622_vm3, %v9492_v52  ;;  %8140 = vst.msk [vmem:[%s14710_s3 + $0x814] sm:$0xf] %vm7622_vm3, %v9764_v54  ;;  %v3761_v60 = vadd.f32 %v14202_v19, %v3760_v57  ;;  %v10310_v61 = vpop.f32.mrb[250].mxu0  ;;  %v4849_v62 = vadd.f32 %v14202_v19, %v4848_v59  ;;  %v10582_v63 = vpop.f32.mrb[250].mxu1 }
 0x2cf   :  { %v5176_v0 = vmax.f32 %v3769_v56, 0.0  ;;  %v3772_v1 = vadd.f32 %v14202_v19, %v10310_v61  ;;  %v3763_v2 = vpop.f32.mrb[251].mxu0  ;;  %v5448_v3 = vmax.f32 %v4857_v58, 0.0  ;;  %v4860_v4 = vadd.f32 %v14202_v19, %v10582_v63  ;;  %v4851_v51 = vpop.f32.mrb[251].mxu1 }
 0x2d0   :  { %v5174_v6 = vmax.f32 %v3761_v60, 0.0  ;;  %v3764_v7 = vadd.f32 %v14202_v19, %v3763_v2  ;;  %v5446_v8 = vmax.f32 %v4849_v62, 0.0  ;;  %v4852_v9 = vadd.f32 %v14202_v19, %v4851_v51 }
 0x2d1   :  { %v9497_v10 = vpack.c.bf16 %v5176_v0, %v5176_v0  ;;  %v5177_v5 = vmax.f32 %v3772_v1, 0.0  ;;  %v9769_v11 = vpack.c.bf16 %v5448_v3, %v5448_v3  ;;  %v5449_v12 = vmax.f32 %v4860_v4, 0.0 }
 0x2d2   :  { %v9495_v13 = vpack.c.bf16 %v5174_v6, %v5174_v6  ;;  %v5175_v44 = vmax.f32 %v3764_v7, 0.0  ;;  %v9767_v14 = vpack.c.bf16 %v5446_v8, %v5446_v8  ;;  %v5447_v15 = vmax.f32 %v4852_v9, 0.0 }
 0x2d3   :  { %7873 = vst.msk [vmem:[%s14710_s3 + $0x3e8] sm:$0xf] %vm7622_vm3, %v9497_v10  ;;  %v9498_v17 = vpack.c.bf16 %v5177_v5, %v5177_v5  ;;  %8145 = vst.msk [vmem:[%s14710_s3 + $0x828] sm:$0xf] %vm7622_vm3, %v9769_v11  ;;  %v9770_v18 = vpack.c.bf16 %v5449_v12, %v5449_v12 }
 0x2d4   :  { %7871 = vst.msk [vmem:[%s14710_s3 + $0x3e0] sm:$0xf] %vm7622_vm3, %v9495_v13  ;;  %v9496_v20 = vpack.c.bf16 %v5175_v44, %v5175_v44  ;;  %8143 = vst.msk [vmem:[%s14710_s3 + $0x820] sm:$0xf] %vm7622_vm3, %v9767_v14  ;;  %v10313_v21 = vpop.f32.mrb[252].mxu0  ;;  %v9768_v22 = vpack.c.bf16 %v5447_v15, %v5447_v15  ;;  %v10585_v23 = vpop.f32.mrb[252].mxu1 }
 0x2d5   :  { %7874 = vst.msk [vmem:[%s14710_s3 + $0x3ec] sm:$0xf] %vm7622_vm3, %v9498_v17  ;;  %8146 = vst.msk [vmem:[%s14710_s3 + $0x82c] sm:$0xf] %vm7622_vm3, %v9770_v18  ;;  %v3785_v24 = vadd.f32 %v14202_v19, %v10313_v21  ;;  %v3776_v25 = vpop.f32.mrb[253].mxu0  ;;  %v4873_v26 = vadd.f32 %v14202_v19, %v10585_v23  ;;  %v4864_v27 = vpop.f32.mrb[253].mxu1 }
 0x2d6   :  { %7872 = vst.msk [vmem:[%s14710_s3 + $0x3e4] sm:$0xf] %vm7622_vm3, %v9496_v20  ;;  %8144 = vst.msk [vmem:[%s14710_s3 + $0x824] sm:$0xf] %vm7622_vm3, %v9768_v22  ;;  %v3777_v28 = vadd.f32 %v14202_v19, %v3776_v25  ;;  %v10314_v16 = vpop.f32.mrb[254].mxu0  ;;  %v4865_v29 = vadd.f32 %v14202_v19, %v4864_v27  ;;  %v10586_v30 = vpop.f32.mrb[254].mxu1 }
 0x2d7   :  { %v5180_v31 = vmax.f32 %v3785_v24, 0.0  ;;  %v3788_v32 = vadd.f32 %v14202_v19, %v10314_v16  ;;  %v3779_v33 = vpop.f32.mrb[255].mxu0  ;;  %v5452_v35 = vmax.f32 %v4873_v26, 0.0  ;;  %v4876_v36 = vadd.f32 %v14202_v19, %v10586_v30  ;;  %v4867_v37 = vpop.f32.mrb[255].mxu1 }
 0x2d8   :  { %v5178_v38 = vmax.f32 %v3777_v28, 0.0  ;;  %v3780_v39 = vadd.f32 %v14202_v19, %v3779_v33  ;;  %v5450_v34 = vmax.f32 %v4865_v29, 0.0  ;;  %v4868_v40 = vadd.f32 %v14202_v19, %v4867_v37 }
 0x2d9   :  { %v9501_v41 = vpack.c.bf16 %v5180_v31, %v5180_v31  ;;  %v5181_v42 = vmax.f32 %v3788_v32, 0.0  ;;  %v9773_v43 = vpack.c.bf16 %v5452_v35, %v5452_v35  ;;  %v5453_v45 = vmax.f32 %v4876_v36, 0.0 }
 0x2da   :  { %v9499_v46 = vpack.c.bf16 %v5178_v38, %v5178_v38  ;;  %v5179_v47 = vmax.f32 %v3780_v39, 0.0  ;;  %v9771_v48 = vpack.c.bf16 %v5450_v34, %v5450_v34  ;;  %v5451_v49 = vmax.f32 %v4868_v40, 0.0 }
 0x2db   :  { %7877 = vst.msk [vmem:[%s14710_s3 + $0x3f8] sm:$0xf] %vm7622_vm3, %v9501_v41  ;;  %v9502_v50 = vpack.c.bf16 %v5181_v42, %v5181_v42  ;;  %8149 = vst.msk [vmem:[%s14710_s3 + $0x838] sm:$0xf] %vm7622_vm3, %v9773_v43  ;;  %v9774_v52 = vpack.c.bf16 %v5453_v45, %v5453_v45 }
 0x2dc   :  { %7875 = vst.msk [vmem:[%s14710_s3 + $0x3f0] sm:$0xf] %vm7622_vm3, %v9499_v46  ;;  %v9500_v53 = vpack.c.bf16 %v5179_v47, %v5179_v47  ;;  %8147 = vst.msk [vmem:[%s14710_s3 + $0x830] sm:$0xf] %vm7622_vm3, %v9771_v48  ;;  %v10317_v54 = vpop.f32.mrb[0].mxu0  ;;  %v9772_v55 = vpack.c.bf16 %v5451_v49, %v5451_v49  ;;  %v10589_v56 = vpop.f32.mrb[0].mxu1 }
 0x2dd   :  { %7878 = vst.msk [vmem:[%s14710_s3 + $0x3fc] sm:$0xf] %vm7622_vm3, %v9502_v50  ;;  %8150 = vst.msk [vmem:[%s14710_s3 + $0x83c] sm:$0xf] %vm7622_vm3, %v9774_v52  ;;  %v3801_v57 = vadd.f32 %v14202_v19, %v10317_v54  ;;  %v3792_v58 = vpop.f32.mrb[1].mxu0  ;;  %v4889_v59 = vadd.f32 %v14202_v19, %v10589_v56  ;;  %v4880_v60 = vpop.f32.mrb[1].mxu1 }
 0x2de   :  { %7876 = vst.msk [vmem:[%s14710_s3 + $0x3f4] sm:$0xf] %vm7622_vm3, %v9500_v53  ;;  %8148 = vst.msk [vmem:[%s14710_s3 + $0x834] sm:$0xf] %vm7622_vm3, %v9772_v55  ;;  %v3793_v61 = vadd.f32 %v14202_v19, %v3792_v58  ;;  %v10318_v62 = vpop.f32.mrb[2].mxu0  ;;  %v4881_v63 = vadd.f32 %v14202_v19, %v4880_v60  ;;  %v10590_v0 = vpop.f32.mrb[2].mxu1 }
 0x2df   :  { %v5184_v1 = vmax.f32 %v3801_v57, 0.0  ;;  %v3804_v2 = vadd.f32 %v14202_v19, %v10318_v62  ;;  %v3795_v3 = vpop.f32.mrb[3].mxu0  ;;  %v5456_v4 = vmax.f32 %v4889_v59, 0.0  ;;  %v4892_v51 = vadd.f32 %v14202_v19, %v10590_v0  ;;  %v4883_v6 = vpop.f32.mrb[3].mxu1 }
 0x2e0   :  { %v5182_v7 = vmax.f32 %v3793_v61, 0.0  ;;  %v3796_v8 = vadd.f32 %v14202_v19, %v3795_v3  ;;  %v5454_v9 = vmax.f32 %v4881_v63, 0.0  ;;  %v4884_v10 = vadd.f32 %v14202_v19, %v4883_v6 }
 0x2e1   :  { %v9505_v5 = vpack.c.bf16 %v5184_v1, %v5184_v1  ;;  %v5185_v11 = vmax.f32 %v3804_v2, 0.0  ;;  %v9777_v12 = vpack.c.bf16 %v5456_v4, %v5456_v4  ;;  %v5457_v13 = vmax.f32 %v4892_v51, 0.0 }
 0x2e2   :  { %v9503_v44 = vpack.c.bf16 %v5182_v7, %v5182_v7  ;;  %v5183_v14 = vmax.f32 %v3796_v8, 0.0  ;;  %v9775_v15 = vpack.c.bf16 %v5454_v9, %v5454_v9  ;;  %v5455_v17 = vmax.f32 %v4884_v10, 0.0 }
 0x2e3   :  { %7881 = vst.msk [vmem:[%s14710_s3 + $0x408] sm:$0xf] %vm7622_vm3, %v9505_v5  ;;  %v9506_v18 = vpack.c.bf16 %v5185_v11, %v5185_v11  ;;  %8153 = vst.msk [vmem:[%s14710_s3 + $0x848] sm:$0xf] %vm7622_vm3, %v9777_v12  ;;  %v9778_v20 = vpack.c.bf16 %v5457_v13, %v5457_v13 }
 0x2e4   :  { %7879 = vst.msk [vmem:[%s14710_s3 + $0x400] sm:$0xf] %vm7622_vm3, %v9503_v44  ;;  %v9504_v21 = vpack.c.bf16 %v5183_v14, %v5183_v14  ;;  %8151 = vst.msk [vmem:[%s14710_s3 + $0x840] sm:$0xf] %vm7622_vm3, %v9775_v15  ;;  %v10321_v22 = vpop.f32.mrb[4].mxu0  ;;  %v9776_v23 = vpack.c.bf16 %v5455_v17, %v5455_v17  ;;  %v10593_v24 = vpop.f32.mrb[4].mxu1 }
 0x2e5   :  { %7882 = vst.msk [vmem:[%s14710_s3 + $0x40c] sm:$0xf] %vm7622_vm3, %v9506_v18  ;;  %8154 = vst.msk [vmem:[%s14710_s3 + $0x84c] sm:$0xf] %vm7622_vm3, %v9778_v20  ;;  %v3817_v25 = vadd.f32 %v14202_v19, %v10321_v22  ;;  %v3808_v26 = vpop.f32.mrb[5].mxu0  ;;  %v4905_v27 = vadd.f32 %v14202_v19, %v10593_v24  ;;  %v4896_v28 = vpop.f32.mrb[5].mxu1 }
 0x2e6   :  { %7880 = vst.msk [vmem:[%s14710_s3 + $0x404] sm:$0xf] %vm7622_vm3, %v9504_v21  ;;  %8152 = vst.msk [vmem:[%s14710_s3 + $0x844] sm:$0xf] %vm7622_vm3, %v9776_v23  ;;  %v3809_v16 = vadd.f32 %v14202_v19, %v3808_v26  ;;  %v10322_v29 = vpop.f32.mrb[6].mxu0  ;;  %v4897_v30 = vadd.f32 %v14202_v19, %v4896_v28  ;;  %v10594_v31 = vpop.f32.mrb[6].mxu1 }
 0x2e7   :  { %v5188_v32 = vmax.f32 %v3817_v25, 0.0  ;;  %v3820_v33 = vadd.f32 %v14202_v19, %v10322_v29  ;;  %v3811_v35 = vpop.f32.mrb[7].mxu0  ;;  %v5460_v36 = vmax.f32 %v4905_v27, 0.0  ;;  %v4908_v37 = vadd.f32 %v14202_v19, %v10594_v31  ;;  %v4899_v38 = vpop.f32.mrb[7].mxu1 }
 0x2e8   :  { %v5186_v39 = vmax.f32 %v3809_v16, 0.0  ;;  %v3812_v34 = vadd.f32 %v14202_v19, %v3811_v35  ;;  %v5458_v40 = vmax.f32 %v4897_v30, 0.0  ;;  %v4900_v41 = vadd.f32 %v14202_v19, %v4899_v38 }
 0x2e9   :  { %v9509_v42 = vpack.c.bf16 %v5188_v32, %v5188_v32  ;;  %v5189_v43 = vmax.f32 %v3820_v33, 0.0  ;;  %v9781_v45 = vpack.c.bf16 %v5460_v36, %v5460_v36  ;;  %v5461_v46 = vmax.f32 %v4908_v37, 0.0 }
 0x2ea   :  { %v9507_v47 = vpack.c.bf16 %v5186_v39, %v5186_v39  ;;  %v5187_v48 = vmax.f32 %v3812_v34, 0.0  ;;  %v9779_v49 = vpack.c.bf16 %v5458_v40, %v5458_v40  ;;  %v5459_v50 = vmax.f32 %v4900_v41, 0.0 }
 0x2eb   :  { %7885 = vst.msk [vmem:[%s14710_s3 + $0x418] sm:$0xf] %vm7622_vm3, %v9509_v42  ;;  %v9510_v52 = vpack.c.bf16 %v5189_v43, %v5189_v43  ;;  %8157 = vst.msk [vmem:[%s14710_s3 + $0x858] sm:$0xf] %vm7622_vm3, %v9781_v45  ;;  %v9782_v53 = vpack.c.bf16 %v5461_v46, %v5461_v46 }
 0x2ec   :  { %7883 = vst.msk [vmem:[%s14710_s3 + $0x410] sm:$0xf] %vm7622_vm3, %v9507_v47  ;;  %v9508_v54 = vpack.c.bf16 %v5187_v48, %v5187_v48  ;;  %8155 = vst.msk [vmem:[%s14710_s3 + $0x850] sm:$0xf] %vm7622_vm3, %v9779_v49  ;;  %v10325_v55 = vpop.f32.mrb[8].mxu0  ;;  %v9780_v56 = vpack.c.bf16 %v5459_v50, %v5459_v50  ;;  %v10597_v57 = vpop.f32.mrb[8].mxu1 }
 0x2ed   :  { %7886 = vst.msk [vmem:[%s14710_s3 + $0x41c] sm:$0xf] %vm7622_vm3, %v9510_v52  ;;  %8158 = vst.msk [vmem:[%s14710_s3 + $0x85c] sm:$0xf] %vm7622_vm3, %v9782_v53  ;;  %v3833_v58 = vadd.f32 %v14202_v19, %v10325_v55  ;;  %v3824_v59 = vpop.f32.mrb[9].mxu0  ;;  %v4921_v60 = vadd.f32 %v14202_v19, %v10597_v57  ;;  %v4912_v61 = vpop.f32.mrb[9].mxu1 }
 0x2ee   :  { %7884 = vst.msk [vmem:[%s14710_s3 + $0x414] sm:$0xf] %vm7622_vm3, %v9508_v54  ;;  %8156 = vst.msk [vmem:[%s14710_s3 + $0x854] sm:$0xf] %vm7622_vm3, %v9780_v56  ;;  %v3825_v62 = vadd.f32 %v14202_v19, %v3824_v59  ;;  %v10326_v63 = vpop.f32.mrb[10].mxu0  ;;  %v4913_v0 = vadd.f32 %v14202_v19, %v4912_v61  ;;  %v10598_v1 = vpop.f32.mrb[10].mxu1 }
 0x2ef   :  { %v5192_v2 = vmax.f32 %v3833_v58, 0.0  ;;  %v3836_v3 = vadd.f32 %v14202_v19, %v10326_v63  ;;  %v3827_v4 = vpop.f32.mrb[11].mxu0  ;;  %v5464_v51 = vmax.f32 %v4921_v60, 0.0  ;;  %v4915_v6 = vpop.f32.mrb[11].mxu1 }
 0x2f0   :  { %v5190_v7 = vmax.f32 %v3825_v62, 0.0  ;;  %v3828_v8 = vadd.f32 %v14202_v19, %v3827_v4  ;;  %v5462_v9 = vmax.f32 %v4913_v0, 0.0  ;;  %v4916_v10 = vadd.f32 %v14202_v19, %v4915_v6 }
 0x2f1   :  { %v9513_v5 = vpack.c.bf16 %v5192_v2, %v5192_v2  ;;  %v5193_v11 = vmax.f32 %v3836_v3, 0.0  ;;  %v9785_v12 = vpack.c.bf16 %v5464_v51, %v5464_v51 }
 0x2f2   :  { %v9511_v13 = vpack.c.bf16 %v5190_v7, %v5190_v7  ;;  %v5191_v44 = vmax.f32 %v3828_v8, 0.0  ;;  %v9783_v14 = vpack.c.bf16 %v5462_v9, %v5462_v9  ;;  %v5463_v15 = vmax.f32 %v4916_v10, 0.0 }
 0x2f3   :  { %7889 = vst.msk [vmem:[%s14710_s3 + $0x428] sm:$0xf] %vm7622_vm3, %v9513_v5  ;;  %v9514_v17 = vpack.c.bf16 %v5193_v11, %v5193_v11  ;;  %8161 = vst.msk [vmem:[%s14710_s3 + $0x868] sm:$0xf] %vm7622_vm3, %v9785_v12 }
 0x2f4   :  { %7887 = vst.msk [vmem:[%s14710_s3 + $0x420] sm:$0xf] %vm7622_vm3, %v9511_v13  ;;  %v9512_v18 = vpack.c.bf16 %v5191_v44, %v5191_v44  ;;  %8159 = vst.msk [vmem:[%s14710_s3 + $0x860] sm:$0xf] %vm7622_vm3, %v9783_v14  ;;  %v10329_v20 = vpop.f32.mrb[12].mxu0  ;;  %v9784_v21 = vpack.c.bf16 %v5463_v15, %v5463_v15 }
 0x2f5   :  { %7890 = vst.msk [vmem:[%s14710_s3 + $0x42c] sm:$0xf] %vm7622_vm3, %v9514_v17  ;;  %v3849_v22 = vadd.f32 %v14202_v19, %v10329_v20  ;;  %v3840_v23 = vpop.f32.mrb[13].mxu0 }
 0x2f6   :  { %7888 = vst.msk [vmem:[%s14710_s3 + $0x424] sm:$0xf] %vm7622_vm3, %v9512_v18  ;;  %8160 = vst.msk [vmem:[%s14710_s3 + $0x864] sm:$0xf] %vm7622_vm3, %v9784_v21  ;;  %v3841_v24 = vadd.f32 %v14202_v19, %v3840_v23  ;;  %v10330_v25 = vpop.f32.mrb[14].mxu0 }
 0x2f7   :  { %v5196_v26 = vmax.f32 %v3849_v22, 0.0  ;;  %v3852_v27 = vadd.f32 %v14202_v19, %v10330_v25  ;;  %v3843_v28 = vpop.f32.mrb[15].mxu0 }
 0x2f8   :  { %v5194_v16 = vmax.f32 %v3841_v24, 0.0  ;;  %v3844_v29 = vadd.f32 %v14202_v19, %v3843_v28 }
 0x2f9   :  { %v9517_v30 = vpack.c.bf16 %v5196_v26, %v5196_v26  ;;  %v5197_v31 = vmax.f32 %v3852_v27, 0.0 }
 0x2fa   :  { %v9515_v32 = vpack.c.bf16 %v5194_v16, %v5194_v16  ;;  %v5195_v33 = vmax.f32 %v3844_v29, 0.0 }
 0x2fb   :  { %7893 = vst.msk [vmem:[%s14710_s3 + $0x438] sm:$0xf] %vm7622_vm3, %v9517_v30  ;;  %v9518_v35 = vpack.c.bf16 %v5197_v31, %v5197_v31 }
 0x2fc   :  { %7891 = vst.msk [vmem:[%s14710_s3 + $0x430] sm:$0xf] %vm7622_vm3, %v9515_v32  ;;  %v9516_v36 = vpack.c.bf16 %v5195_v33, %v5195_v33 }
 0x2fd   :  { %7894 = vst.msk [vmem:[%s14710_s3 + $0x43c] sm:$0xf] %vm7622_vm3, %v9518_v35 }
 0x2fe   :  { %7892 = vst.msk [vmem:[%s14710_s3 + $0x434] sm:$0xf] %vm7622_vm3, %v9516_v36 }

// kernel: receiver_forward.4
= control target key start
LH: loop header
LB: loop body
LE: loop exit
PB: predicated region body
PF: predicated region fallthrough
CT: control target
= control target key end

     0   :  { %vm531_vm0 = vcmask 588800   ;;  %vm736_vm1 = vcmask 1043456   ;;  %s3896_s1 = inlined_call_operand.vmem [shape: bf16[72,128], index: 1, kind: input, shape index: {}]   ;;  %s3897_s0 = inlined_call_operand.vmem [shape: bf16[1078,72], index: 0, kind: input, shape index: {}]   ;;  %s3898_s2 = inlined_call_operand.vmem [shape: f32[1,128], index: 2, kind: input, shape index: {}]   ;;  %s3899_s3 = inlined_call_operand.vmem [shape: bf16[1078,128], index: 3, kind: output, shape index: {}]  }
   0x1   :  { %v3175_v0 = vld [vmem:[%s3896_s1] sm:$0xff]   ;;  %v3176_v1 = vld [vmem:[%s3896_s1 + $0x8] sm:$0xff]   ;;  %v3177_v2 = vld [vmem:[%s3896_s1 + $0x10] sm:$0xff]  }
   0x2   :  { %3017 = vmatprep.subr.bf16.mxu0 %v3175_v0  ;;  %3163 = vmatprep.subr.bf16.mxu1 %v3175_v0  ;;  %v3180_v3 = vld [vmem:[%s3897_s0] sm:$0xff]   ;;  %v3181_v4 = vld [vmem:[%s3897_s0 + $0x110] sm:$0xff]   ;;  %v3178_v5 = vld [vmem:[%s3896_s1 + $0x18] sm:$0xff]  }
   0x3   :  { %3018 = vmatpush3.bf16.msra.mxu0 %v3175_v0  ;;  %3168 = vmatpush3.bf16.msra.mxu1 %v3175_v0  ;;  %v3179_v6 = vld [vmem:[%s3896_s1 + $0x20] ss:$0 sps:$4 sm:$0xff]   ;;  %v3182_v8 = vld [vmem:[%s3897_s0 + $0x8] sm:$0xff]   ;;  %v3183_v9 = vld [vmem:[%s3897_s0 + $0x118] sm:$0xff]  }
   0x4   :  { %3019 = vmatprep.subr.bf16.mxu0 %v3176_v1  ;;  %3164 = vmatprep.subr.bf16.mxu1 %v3176_v1  ;;  %v738_v7 = vsel %vm736_vm1, %v3179_v6, 0  ;;  %v3184_v10 = vld [vmem:[%s3897_s0 + $0x10] sm:$0xff]   ;;  %v3185_v11 = vld [vmem:[%s3897_s0 + $0x120] sm:$0xff]   ;;  %v3186_v12 = vld [vmem:[%s3897_s0 + $0x18] sm:$0xff]  }
   0x5   :  { %3027 = vmatprep.mubr.msk.bf16.mxu0 %vm531_vm0, %v3180_v3  ;;  %3095 = vmatprep.mubr.msk.bf16.mxu1 %vm531_vm0, %v3181_v4  ;;  %v3187_v13 = vld [vmem:[%s3897_s0 + $0x128] sm:$0xff]   ;;  %v3188_v14 = vld [vmem:[%s3897_s0 + $0x20] sm:$0xff]   ;;  %v3189_v15 = vld [vmem:[%s3897_s0 + $0x130] sm:$0xff]  }
   0x6   :  { %v3190_v16 = vld [vmem:[%s3897_s0 + $0x28] sm:$0xff]   ;;  %v3191_v17 = vld [vmem:[%s3897_s0 + $0x138] sm:$0xff]   ;;  %v3192_v18 = vld [vmem:[%s3897_s0 + $0x30] sm:$0xff]  }
   0x7   :  { %3020 = vmatpush3.bf16.msra.mxu0 %v3176_v1  ;;  %3169 = vmatpush3.bf16.msra.mxu1 %v3176_v1  ;;  %v3193_v19 = vld [vmem:[%s3897_s0 + $0x140] sm:$0xff]   ;;  %v3194_v20 = vld [vmem:[%s3897_s0 + $0x38] sm:$0xff]   ;;  %v3195_v21 = vld [vmem:[%s3897_s0 + $0x148] sm:$0xff]  }
   0x8   :  { %3021 = vmatprep.subr.bf16.mxu0 %v3177_v2  ;;  %3165 = vmatprep.subr.bf16.mxu1 %v3177_v2  ;;  %v3196_v22 = vld [vmem:[%s3897_s0 + $0x40] sm:$0xff]   ;;  %v3197_v23 = vld [vmem:[%s3897_s0 + $0x150] sm:$0xff]   ;;  %v3198_v24 = vld [vmem:[%s3897_s0 + $0x48] sm:$0xff]  }
   0x9   :  { %v3199_v25 = vld [vmem:[%s3897_s0 + $0x158] sm:$0xff]   ;;  %v3200_v26 = vld [vmem:[%s3897_s0 + $0x50] sm:$0xff]   ;;  %v3201_v27 = vld [vmem:[%s3897_s0 + $0x160] sm:$0xff]  }
   0xa   :  { %v3202_v28 = vld [vmem:[%s3897_s0 + $0x58] sm:$0xff]   ;;  %v3203_v29 = vld [vmem:[%s3897_s0 + $0x168] sm:$0xff]   ;;  %v3204_v30 = vld [vmem:[%s3897_s0 + $0x60] sm:$0xff]  }
   0xb   :  { %3022 = vmatpush3.bf16.msra.mxu0 %v3177_v2  ;;  %3170 = vmatpush3.bf16.msra.mxu1 %v3177_v2  ;;  %v3205_v31 = vld [vmem:[%s3897_s0 + $0x170] sm:$0xff]   ;;  %v3206_v32 = vld [vmem:[%s3897_s0 + $0x68] sm:$0xff]   ;;  %v3207_v33 = vld [vmem:[%s3897_s0 + $0x178] sm:$0xff]  }
   0xc   :  { %3023 = vmatprep.subr.bf16.mxu0 %v3178_v5  ;;  %3166 = vmatprep.subr.bf16.mxu1 %v3178_v5  ;;  %v3208_v34 = vld [vmem:[%s3897_s0 + $0x70] sm:$0xff]   ;;  %v3209_v35 = vld [vmem:[%s3897_s0 + $0x180] sm:$0xff]   ;;  %v3210_v36 = vld [vmem:[%s3897_s0 + $0x78] sm:$0xff]  }
   0xd   :  { %v3211_v37 = vld [vmem:[%s3897_s0 + $0x188] sm:$0xff]   ;;  %v3212_v38 = vld [vmem:[%s3897_s0 + $0x80] sm:$0xff]   ;;  %v3213_v39 = vld [vmem:[%s3897_s0 + $0x190] sm:$0xff]  }
   0xe   :  { %v3214_v40 = vld [vmem:[%s3897_s0 + $0x88] sm:$0xff]   ;;  %v3215_v41 = vld [vmem:[%s3897_s0 + $0x198] sm:$0xff]   ;;  %v3216_v42 = vld [vmem:[%s3897_s0 + $0x90] sm:$0xff]  }
   0xf   :  { %3024 = vmatpush3.bf16.msra.mxu0 %v3178_v5  ;;  %3171 = vmatpush3.bf16.msra.mxu1 %v3178_v5  ;;  %v3217_v43 = vld [vmem:[%s3897_s0 + $0x1a0] sm:$0xff]   ;;  %v3218_v44 = vld [vmem:[%s3897_s0 + $0x98] sm:$0xff]   ;;  %v3219_v45 = vld [vmem:[%s3897_s0 + $0x1a8] sm:$0xff]  }
  0x10   :  { %3173 = vmatprep.subr.msk.bf16.mxu0 %vm736_vm1, %v3179_v6  ;;  %3174 = vmatprep.subr.msk.bf16.mxu1 %vm736_vm1, %v3179_v6  ;;  %v3220_v46 = vld [vmem:[%s3897_s0 + $0xa0] sm:$0xff]   ;;  %v3221_v47 = vld [vmem:[%s3897_s0 + $0x1b0] sm:$0xff]   ;;  %v3222_v48 = vld [vmem:[%s3897_s0 + $0xa8] sm:$0xff]  }
  0x11   :  { %v3223_v49 = vld [vmem:[%s3897_s0 + $0x1b8] sm:$0xff]   ;;  %v3224_v50 = vld [vmem:[%s3897_s0 + $0xb0] sm:$0xff]   ;;  %v3225_v51 = vld [vmem:[%s3897_s0 + $0x1c0] sm:$0xff]  }
  0x12   :  { %v3226_v52 = vld [vmem:[%s3897_s0 + $0xb8] sm:$0xff]   ;;  %v3227_v53 = vld [vmem:[%s3897_s0 + $0x1c8] sm:$0xff]   ;;  %v3228_v54 = vld [vmem:[%s3897_s0 + $0xc0] sm:$0xff]  }
  0x13   :  { %3026 = vmatpush3.bf16.msra.mxu0 %v738_v7  ;;  %3172 = vmatpush3.bf16.msra.mxu1 %v738_v7  ;;  %v3229_v55 = vld [vmem:[%s3897_s0 + $0x1d0] sm:$0xff]   ;;  %v3230_v56 = vld [vmem:[%s3897_s0 + $0xc8] sm:$0xff]   ;;  %v3231_v57 = vld [vmem:[%s3897_s0 + $0x1d8] sm:$0xff]  }
  0x14   :  { %v3232_v58 = vld [vmem:[%s3897_s0 + $0xd0] sm:$0xff]   ;;  %v3233_v59 = vld [vmem:[%s3897_s0 + $0x1e0] sm:$0xff]   ;;  %v3234_v60 = vld [vmem:[%s3897_s0 + $0xd8] sm:$0xff]  }
  0x15   :  { %v3235_v61 = vld [vmem:[%s3897_s0 + $0x1e8] sm:$0xff]   ;;  %v3236_v62 = vld [vmem:[%s3897_s0 + $0xe0] sm:$0xff]   ;;  %v3237_v63 = vld [vmem:[%s3897_s0 + $0x1f0] sm:$0xff]  }
  0x16   :  { %3028 = vmatmul.mubr.msk.bf16.vlgmr.msra.gmra.mrb[0].mxu0 %vm531_vm0, %v3182_v8  ;;  %3096 = vmatmul.mubr.msk.bf16.vlgmr.msra.gmra.mrb[0].mxu1 %vm531_vm0, %v3183_v9  ;;  %v3238_v0 = vld [vmem:[%s3897_s0 + $0xe8] sm:$0xff]   ;;  %v3239_v1 = vld [vmem:[%s3897_s0 + $0x1f8] sm:$0xff]   ;;  %v3240_v2 = vld [vmem:[%s3897_s0 + $0xf0] sm:$0xff]  }
  0x17   :  { %3031 = vmatprep.mubr.msk.bf16.mxu0 %vm531_vm0, %v3184_v10  ;;  %3099 = vmatprep.mubr.msk.bf16.mxu1 %vm531_vm0, %v3185_v11  ;;  %v3241_v3 = vld [vmem:[%s3897_s0 + $0x200] sm:$0xff]   ;;  %v3242_v4 = vld [vmem:[%s3897_s0 + $0xf8] sm:$0xff]   ;;  %v3243_v5 = vld [vmem:[%s3897_s0 + $0x208] sm:$0xff]  }
  0x18   :  { %v3244_v6 = vld [vmem:[%s3897_s0 + $0x100] sm:$0xff]   ;;  %v3245_v7 = vld [vmem:[%s3897_s0 + $0x210] sm:$0xff]   ;;  %v3246_v8 = vld [vmem:[%s3897_s0 + $0x108] sm:$0xff]  }
  0x19   :  { %v3247_v9 = vld [vmem:[%s3897_s0 + $0x218] ss:$0 sps:$4 sm:$0x77]   ;;  %v3559_v10 = vld [vmem:[%s3898_s2] ss:$0 sm:$0xff] }
  0x1e   :  { %3032 = vmatmul.mubr.msk.bf16.gmra.mrb[4].mxu0 %vm531_vm0, %v3186_v12  ;;  %3100 = vmatmul.mubr.msk.bf16.gmra.mrb[4].mxu1 %vm531_vm0, %v3187_v13 }
  0x1f   :  { %3035 = vmatprep.mubr.msk.bf16.mxu0 %vm531_vm0, %v3188_v14  ;;  %3103 = vmatprep.mubr.msk.bf16.mxu1 %vm531_vm0, %v3189_v15 }
  0x26   :  { %3036 = vmatmul.mubr.msk.bf16.gmra.mrb[8].mxu0 %vm531_vm0, %v3190_v16  ;;  %3104 = vmatmul.mubr.msk.bf16.gmra.mrb[8].mxu1 %vm531_vm0, %v3191_v17 }
  0x27   :  { %3039 = vmatprep.mubr.msk.bf16.mxu0 %vm531_vm0, %v3192_v18  ;;  %3107 = vmatprep.mubr.msk.bf16.mxu1 %vm531_vm0, %v3193_v19 }
  0x2e   :  { %3040 = vmatmul.mubr.msk.bf16.gmra.mrb[12].mxu0 %vm531_vm0, %v3194_v20  ;;  %3108 = vmatmul.mubr.msk.bf16.gmra.mrb[12].mxu1 %vm531_vm0, %v3195_v21 }
  0x2f   :  { %3043 = vmatprep.mubr.msk.bf16.mxu0 %vm531_vm0, %v3196_v22  ;;  %3111 = vmatprep.mubr.msk.bf16.mxu1 %vm531_vm0, %v3197_v23 }
  0x36   :  { %3044 = vmatmul.mubr.msk.bf16.gmra.mrb[16].mxu0 %vm531_vm0, %v3198_v24  ;;  %3112 = vmatmul.mubr.msk.bf16.gmra.mrb[16].mxu1 %vm531_vm0, %v3199_v25 }
  0x37   :  { %3047 = vmatprep.mubr.msk.bf16.mxu0 %vm531_vm0, %v3200_v26  ;;  %3115 = vmatprep.mubr.msk.bf16.mxu1 %vm531_vm0, %v3201_v27 }
  0x3e   :  { %3048 = vmatmul.mubr.msk.bf16.gmra.mrb[20].mxu0 %vm531_vm0, %v3202_v28  ;;  %3116 = vmatmul.mubr.msk.bf16.gmra.mrb[20].mxu1 %vm531_vm0, %v3203_v29 }
  0x3f   :  { %3051 = vmatprep.mubr.msk.bf16.mxu0 %vm531_vm0, %v3204_v30  ;;  %3119 = vmatprep.mubr.msk.bf16.mxu1 %vm531_vm0, %v3205_v31 }
  0x46   :  { %3052 = vmatmul.mubr.msk.bf16.gmra.mrb[24].mxu0 %vm531_vm0, %v3206_v32  ;;  %3120 = vmatmul.mubr.msk.bf16.gmra.mrb[24].mxu1 %vm531_vm0, %v3207_v33 }
  0x47   :  { %3055 = vmatprep.mubr.msk.bf16.mxu0 %vm531_vm0, %v3208_v34  ;;  %3123 = vmatprep.mubr.msk.bf16.mxu1 %vm531_vm0, %v3209_v35 }
  0x4e   :  { %3056 = vmatmul.mubr.msk.bf16.gmra.mrb[28].mxu0 %vm531_vm0, %v3210_v36  ;;  %3124 = vmatmul.mubr.msk.bf16.gmra.mrb[28].mxu1 %vm531_vm0, %v3211_v37 }
  0x4f   :  { %3059 = vmatprep.mubr.msk.bf16.mxu0 %vm531_vm0, %v3212_v38  ;;  %3127 = vmatprep.mubr.msk.bf16.mxu1 %vm531_vm0, %v3213_v39 }
  0x56   :  { %3060 = vmatmul.mubr.msk.bf16.gmra.mrb[32].mxu0 %vm531_vm0, %v3214_v40  ;;  %3128 = vmatmul.mubr.msk.bf16.gmra.mrb[32].mxu1 %vm531_vm0, %v3215_v41 }
  0x57   :  { %3063 = vmatprep.mubr.msk.bf16.mxu0 %vm531_vm0, %v3216_v42  ;;  %3131 = vmatprep.mubr.msk.bf16.mxu1 %vm531_vm0, %v3217_v43 }
  0x5e   :  { %3064 = vmatmul.mubr.msk.bf16.gmra.mrb[36].mxu0 %vm531_vm0, %v3218_v44  ;;  %3132 = vmatmul.mubr.msk.bf16.gmra.mrb[36].mxu1 %vm531_vm0, %v3219_v45 }
  0x5f   :  { %3067 = vmatprep.mubr.msk.bf16.mxu0 %vm531_vm0, %v3220_v46  ;;  %3135 = vmatprep.mubr.msk.bf16.mxu1 %vm531_vm0, %v3221_v47 }
  0x66   :  { %3068 = vmatmul.mubr.msk.bf16.gmra.mrb[40].mxu0 %vm531_vm0, %v3222_v48  ;;  %3136 = vmatmul.mubr.msk.bf16.gmra.mrb[40].mxu1 %vm531_vm0, %v3223_v49 }
  0x67   :  { %3071 = vmatprep.mubr.msk.bf16.mxu0 %vm531_vm0, %v3224_v50  ;;  %3139 = vmatprep.mubr.msk.bf16.mxu1 %vm531_vm0, %v3225_v51 }
  0x6e   :  { %3072 = vmatmul.mubr.msk.bf16.gmra.mrb[44].mxu0 %vm531_vm0, %v3226_v52  ;;  %3140 = vmatmul.mubr.msk.bf16.gmra.mrb[44].mxu1 %vm531_vm0, %v3227_v53 }
  0x6f   :  { %3075 = vmatprep.mubr.msk.bf16.mxu0 %vm531_vm0, %v3228_v54  ;;  %3143 = vmatprep.mubr.msk.bf16.mxu1 %vm531_vm0, %v3229_v55 }
  0x76   :  { %3076 = vmatmul.mubr.msk.bf16.gmra.mrb[48].mxu0 %vm531_vm0, %v3230_v56  ;;  %3144 = vmatmul.mubr.msk.bf16.gmra.mrb[48].mxu1 %vm531_vm0, %v3231_v57 }
  0x77   :  { %3079 = vmatprep.mubr.msk.bf16.mxu0 %vm531_vm0, %v3232_v58  ;;  %3147 = vmatprep.mubr.msk.bf16.mxu1 %vm531_vm0, %v3233_v59 }
  0x7e   :  { %3080 = vmatmul.mubr.msk.bf16.gmra.mrb[52].mxu0 %vm531_vm0, %v3234_v60  ;;  %3148 = vmatmul.mubr.msk.bf16.gmra.mrb[52].mxu1 %vm531_vm0, %v3235_v61 }
  0x7f   :  { %3083 = vmatprep.mubr.msk.bf16.mxu0 %vm531_vm0, %v3236_v62  ;;  %3151 = vmatprep.mubr.msk.bf16.mxu1 %vm531_vm0, %v3237_v63 }
  0x86   :  { %3084 = vmatmul.mubr.msk.bf16.gmra.mrb[56].mxu0 %vm531_vm0, %v3238_v0  ;;  %3152 = vmatmul.mubr.msk.bf16.gmra.mrb[56].mxu1 %vm531_vm0, %v3239_v1 }
  0x87   :  { %3087 = vmatprep.mubr.msk.bf16.mxu0 %vm531_vm0, %v3240_v2  ;;  %3155 = vmatprep.mubr.msk.bf16.mxu1 %vm531_vm0, %v3241_v3 }
  0x8e   :  { %3088 = vmatmul.mubr.msk.bf16.gmra.mrb[60].mxu0 %vm531_vm0, %v3242_v4  ;;  %3156 = vmatmul.mubr.msk.bf16.gmra.mrb[60].mxu1 %vm531_vm0, %v3243_v5 }
  0x8f   :  { %3091 = vmatprep.mubr.msk.bf16.mxu0 %vm531_vm0, %v3244_v6  ;;  %3159 = vmatprep.mubr.msk.bf16.mxu1 %vm531_vm0, %v3245_v7 }
  0x96   :  { %3092 = vmatmul.mubr.msk.bf16.gmra.mrb[64].mxu0 %vm531_vm0, %v3246_v8  ;;  %3160 = vmatmul.mubr.msk.bf16.gmra.mrb[64].mxu1 %vm531_vm0, %v3247_v9 }
  0xe9   :  { %v3029_v11 = vpop.f32.mrb[0].mxu0  ;;  %v3097_v12 = vpop.f32.mrb[0].mxu1 }
  0xea   :  { %v783_v13 = vadd.f32 %v3029_v11, %v3559_v10  ;;  %v1055_v14 = vadd.f32 %v3097_v12, %v3559_v10  ;;  %v774_v15 = vpop.f32.mrb[1].mxu0  ;;  %v1046_v16 = vpop.f32.mrb[1].mxu1 }
  0xeb   :  { %v775_v17 = vadd.f32 %v3559_v10, %v774_v15  ;;  %v1047_v18 = vadd.f32 %v3559_v10, %v1046_v16  ;;  %v3030_v19 = vpop.f32.mrb[2].mxu0  ;;  %v3098_v20 = vpop.f32.mrb[2].mxu1 }
  0xec   :  { %v786_v21 = vadd.f32 %v3030_v19, %v3559_v10  ;;  %v1058_v22 = vadd.f32 %v3098_v20, %v3559_v10  ;;  %v777_v23 = vpop.f32.mrb[3].mxu0  ;;  %v1049_v24 = vpop.f32.mrb[3].mxu1  ;;  %v1318_v27 = vmax.f32 %v783_v13, 0.0  ;;  %v1386_v28 = vmax.f32 %v1055_v14, 0.0 }
  0xed   :  { %v778_v25 = vadd.f32 %v3559_v10, %v777_v23  ;;  %v1050_v26 = vadd.f32 %v3559_v10, %v1049_v24  ;;  %v1316_v31 = vmax.f32 %v775_v17, 0.0  ;;  %v1384_v32 = vmax.f32 %v1047_v18, 0.0 }
  0xee   :  { %v1319_v29 = vmax.f32 %v786_v21, 0.0  ;;  %v1387_v30 = vmax.f32 %v1058_v22, 0.0 }
  0xef   :  { %v1317_v33 = vmax.f32 %v778_v25, 0.0  ;;  %v1385_v34 = vmax.f32 %v1050_v26, 0.0 }
  0xf0   :  { %v2551_v35 = vpack.c.bf16 %v1319_v29, %v1318_v27  ;;  %v2721_v36 = vpack.c.bf16 %v1387_v30, %v1386_v28 }
  0xf1   :  { %v2546_v37 = vpack.c.bf16 %v1317_v33, %v1316_v31  ;;  %v2716_v38 = vpack.c.bf16 %v1385_v34, %v1384_v32  ;;  %v3033_v39 = vpop.f32.mrb[4].mxu0  ;;  %v3101_v40 = vpop.f32.mrb[4].mxu1 }
  0xf2   :  { %2878 = vst [vmem:[%s3899_s3 + $0x8] sm:$0xff] %v2551_v35   ;;  %2912 = vst [vmem:[%s3899_s3 + $0x118] sm:$0xff] %v2721_v36   ;;  %v799_v41 = vadd.f32 %v3033_v39, %v3559_v10  ;;  %v1071_v42 = vadd.f32 %v3101_v40, %v3559_v10  ;;  %v790_v43 = vpop.f32.mrb[5].mxu0  ;;  %v1062_v44 = vpop.f32.mrb[5].mxu1 }
  0xf3   :  { %2547 = vst [vmem:[%s3899_s3] sm:$0xff] %v2546_v37   ;;  %2911 = vst [vmem:[%s3899_s3 + $0x110] sm:$0xff] %v2716_v38   ;;  %v791_v45 = vadd.f32 %v3559_v10, %v790_v43  ;;  %v1063_v46 = vadd.f32 %v3559_v10, %v1062_v44  ;;  %v3034_v47 = vpop.f32.mrb[6].mxu0  ;;  %v3102_v48 = vpop.f32.mrb[6].mxu1 }
  0xf4   :  { %v802_v49 = vadd.f32 %v3034_v47, %v3559_v10  ;;  %v1074_v50 = vadd.f32 %v3102_v48, %v3559_v10  ;;  %v793_v51 = vpop.f32.mrb[7].mxu0  ;;  %v1065_v52 = vpop.f32.mrb[7].mxu1  ;;  %v1322_v55 = vmax.f32 %v799_v41, 0.0  ;;  %v1390_v56 = vmax.f32 %v1071_v42, 0.0 }
  0xf5   :  { %v794_v53 = vadd.f32 %v3559_v10, %v793_v51  ;;  %v1066_v54 = vadd.f32 %v3559_v10, %v1065_v52  ;;  %v1320_v59 = vmax.f32 %v791_v45, 0.0  ;;  %v1388_v60 = vmax.f32 %v1063_v46, 0.0 }
  0xf6   :  { %v1323_v57 = vmax.f32 %v802_v49, 0.0  ;;  %v1391_v58 = vmax.f32 %v1074_v50, 0.0 }
  0xf7   :  { %v1321_v61 = vmax.f32 %v794_v53, 0.0  ;;  %v1389_v62 = vmax.f32 %v1066_v54, 0.0 }
  0xf8   :  { %v2561_v63 = vpack.c.bf16 %v1323_v57, %v1322_v55  ;;  %v2731_v0 = vpack.c.bf16 %v1391_v58, %v1390_v56 }
  0xf9   :  { %v2556_v1 = vpack.c.bf16 %v1321_v61, %v1320_v59  ;;  %v2726_v2 = vpack.c.bf16 %v1389_v62, %v1388_v60  ;;  %v3037_v3 = vpop.f32.mrb[8].mxu0  ;;  %v3105_v4 = vpop.f32.mrb[8].mxu1 }
  0xfa   :  { %2880 = vst [vmem:[%s3899_s3 + $0x18] sm:$0xff] %v2561_v63   ;;  %2914 = vst [vmem:[%s3899_s3 + $0x128] sm:$0xff] %v2731_v0   ;;  %v815_v5 = vadd.f32 %v3037_v3, %v3559_v10  ;;  %v1087_v6 = vadd.f32 %v3105_v4, %v3559_v10  ;;  %v806_v7 = vpop.f32.mrb[9].mxu0  ;;  %v1078_v8 = vpop.f32.mrb[9].mxu1 }
  0xfb   :  { %2879 = vst [vmem:[%s3899_s3 + $0x10] sm:$0xff] %v2556_v1   ;;  %2913 = vst [vmem:[%s3899_s3 + $0x120] sm:$0xff] %v2726_v2   ;;  %v807_v9 = vadd.f32 %v3559_v10, %v806_v7  ;;  %v1079_v11 = vadd.f32 %v3559_v10, %v1078_v8  ;;  %v3038_v12 = vpop.f32.mrb[10].mxu0  ;;  %v3106_v13 = vpop.f32.mrb[10].mxu1 }
  0xfc   :  { %v818_v14 = vadd.f32 %v3038_v12, %v3559_v10  ;;  %v1090_v15 = vadd.f32 %v3106_v13, %v3559_v10  ;;  %v809_v16 = vpop.f32.mrb[11].mxu0  ;;  %v1081_v17 = vpop.f32.mrb[11].mxu1  ;;  %v1326_v20 = vmax.f32 %v815_v5, 0.0  ;;  %v1394_v21 = vmax.f32 %v1087_v6, 0.0 }
  0xfd   :  { %v810_v18 = vadd.f32 %v3559_v10, %v809_v16  ;;  %v1082_v19 = vadd.f32 %v3559_v10, %v1081_v17  ;;  %v1324_v24 = vmax.f32 %v807_v9, 0.0  ;;  %v1392_v25 = vmax.f32 %v1079_v11, 0.0 }
  0xfe   :  { %v1327_v22 = vmax.f32 %v818_v14, 0.0  ;;  %v1395_v23 = vmax.f32 %v1090_v15, 0.0 }
  0xff   :  { %v1325_v26 = vmax.f32 %v810_v18, 0.0  ;;  %v1393_v27 = vmax.f32 %v1082_v19, 0.0 }
 0x100   :  { %v2571_v28 = vpack.c.bf16 %v1327_v22, %v1326_v20  ;;  %v2741_v29 = vpack.c.bf16 %v1395_v23, %v1394_v21 }
 0x101   :  { %v2566_v30 = vpack.c.bf16 %v1325_v26, %v1324_v24  ;;  %v2736_v31 = vpack.c.bf16 %v1393_v27, %v1392_v25  ;;  %v3041_v32 = vpop.f32.mrb[12].mxu0  ;;  %v3109_v33 = vpop.f32.mrb[12].mxu1 }
 0x102   :  { %2882 = vst [vmem:[%s3899_s3 + $0x28] sm:$0xff] %v2571_v28   ;;  %2916 = vst [vmem:[%s3899_s3 + $0x138] sm:$0xff] %v2741_v29   ;;  %v831_v34 = vadd.f32 %v3041_v32, %v3559_v10  ;;  %v1103_v35 = vadd.f32 %v3109_v33, %v3559_v10  ;;  %v822_v36 = vpop.f32.mrb[13].mxu0  ;;  %v1094_v37 = vpop.f32.mrb[13].mxu1 }
 0x103   :  { %2881 = vst [vmem:[%s3899_s3 + $0x20] sm:$0xff] %v2566_v30   ;;  %2915 = vst [vmem:[%s3899_s3 + $0x130] sm:$0xff] %v2736_v31   ;;  %v823_v38 = vadd.f32 %v3559_v10, %v822_v36  ;;  %v1095_v39 = vadd.f32 %v3559_v10, %v1094_v37  ;;  %v3042_v40 = vpop.f32.mrb[14].mxu0  ;;  %v3110_v41 = vpop.f32.mrb[14].mxu1 }
 0x104   :  { %v834_v42 = vadd.f32 %v3042_v40, %v3559_v10  ;;  %v1106_v43 = vadd.f32 %v3110_v41, %v3559_v10  ;;  %v825_v44 = vpop.f32.mrb[15].mxu0  ;;  %v1097_v45 = vpop.f32.mrb[15].mxu1  ;;  %v1330_v48 = vmax.f32 %v831_v34, 0.0  ;;  %v1398_v49 = vmax.f32 %v1103_v35, 0.0 }
 0x105   :  { %v826_v46 = vadd.f32 %v3559_v10, %v825_v44  ;;  %v1098_v47 = vadd.f32 %v3559_v10, %v1097_v45  ;;  %v1328_v52 = vmax.f32 %v823_v38, 0.0  ;;  %v1396_v53 = vmax.f32 %v1095_v39, 0.0 }
 0x106   :  { %v1331_v50 = vmax.f32 %v834_v42, 0.0  ;;  %v1399_v51 = vmax.f32 %v1106_v43, 0.0 }
 0x107   :  { %v1329_v54 = vmax.f32 %v826_v46, 0.0  ;;  %v1397_v55 = vmax.f32 %v1098_v47, 0.0 }
 0x108   :  { %v2581_v56 = vpack.c.bf16 %v1331_v50, %v1330_v48  ;;  %v2751_v57 = vpack.c.bf16 %v1399_v51, %v1398_v49 }
 0x109   :  { %v2576_v58 = vpack.c.bf16 %v1329_v54, %v1328_v52  ;;  %v2746_v59 = vpack.c.bf16 %v1397_v55, %v1396_v53  ;;  %v3045_v60 = vpop.f32.mrb[16].mxu0  ;;  %v3113_v61 = vpop.f32.mrb[16].mxu1 }
 0x10a   :  { %2884 = vst [vmem:[%s3899_s3 + $0x38] sm:$0xff] %v2581_v56   ;;  %2918 = vst [vmem:[%s3899_s3 + $0x148] sm:$0xff] %v2751_v57   ;;  %v847_v62 = vadd.f32 %v3045_v60, %v3559_v10  ;;  %v1119_v63 = vadd.f32 %v3113_v61, %v3559_v10  ;;  %v838_v0 = vpop.f32.mrb[17].mxu0  ;;  %v1110_v1 = vpop.f32.mrb[17].mxu1 }
 0x10b   :  { %2883 = vst [vmem:[%s3899_s3 + $0x30] sm:$0xff] %v2576_v58   ;;  %2917 = vst [vmem:[%s3899_s3 + $0x140] sm:$0xff] %v2746_v59   ;;  %v839_v2 = vadd.f32 %v3559_v10, %v838_v0  ;;  %v1111_v3 = vadd.f32 %v3559_v10, %v1110_v1  ;;  %v3046_v4 = vpop.f32.mrb[18].mxu0  ;;  %v3114_v5 = vpop.f32.mrb[18].mxu1 }
 0x10c   :  { %v850_v6 = vadd.f32 %v3046_v4, %v3559_v10  ;;  %v1122_v7 = vadd.f32 %v3114_v5, %v3559_v10  ;;  %v841_v8 = vpop.f32.mrb[19].mxu0  ;;  %v1113_v9 = vpop.f32.mrb[19].mxu1  ;;  %v1334_v13 = vmax.f32 %v847_v62, 0.0  ;;  %v1402_v14 = vmax.f32 %v1119_v63, 0.0 }
 0x10d   :  { %v842_v11 = vadd.f32 %v3559_v10, %v841_v8  ;;  %v1114_v12 = vadd.f32 %v3559_v10, %v1113_v9  ;;  %v1332_v17 = vmax.f32 %v839_v2, 0.0  ;;  %v1400_v18 = vmax.f32 %v1111_v3, 0.0 }
 0x10e   :  { %v1335_v15 = vmax.f32 %v850_v6, 0.0  ;;  %v1403_v16 = vmax.f32 %v1122_v7, 0.0 }
 0x10f   :  { %v1333_v19 = vmax.f32 %v842_v11, 0.0  ;;  %v1401_v20 = vmax.f32 %v1114_v12, 0.0 }
 0x110   :  { %v2591_v21 = vpack.c.bf16 %v1335_v15, %v1334_v13  ;;  %v2761_v22 = vpack.c.bf16 %v1403_v16, %v1402_v14 }
 0x111   :  { %v2586_v23 = vpack.c.bf16 %v1333_v19, %v1332_v17  ;;  %v2756_v24 = vpack.c.bf16 %v1401_v20, %v1400_v18  ;;  %v3049_v25 = vpop.f32.mrb[20].mxu0  ;;  %v3117_v26 = vpop.f32.mrb[20].mxu1 }
 0x112   :  { %2886 = vst [vmem:[%s3899_s3 + $0x48] sm:$0xff] %v2591_v21   ;;  %2920 = vst [vmem:[%s3899_s3 + $0x158] sm:$0xff] %v2761_v22   ;;  %v863_v27 = vadd.f32 %v3049_v25, %v3559_v10  ;;  %v1135_v28 = vadd.f32 %v3117_v26, %v3559_v10  ;;  %v854_v29 = vpop.f32.mrb[21].mxu0  ;;  %v1126_v30 = vpop.f32.mrb[21].mxu1 }
 0x113   :  { %2885 = vst [vmem:[%s3899_s3 + $0x40] sm:$0xff] %v2586_v23   ;;  %2919 = vst [vmem:[%s3899_s3 + $0x150] sm:$0xff] %v2756_v24   ;;  %v855_v31 = vadd.f32 %v3559_v10, %v854_v29  ;;  %v1127_v32 = vadd.f32 %v3559_v10, %v1126_v30  ;;  %v3050_v33 = vpop.f32.mrb[22].mxu0  ;;  %v3118_v34 = vpop.f32.mrb[22].mxu1 }
 0x114   :  { %v866_v35 = vadd.f32 %v3050_v33, %v3559_v10  ;;  %v1138_v36 = vadd.f32 %v3118_v34, %v3559_v10  ;;  %v857_v37 = vpop.f32.mrb[23].mxu0  ;;  %v1129_v38 = vpop.f32.mrb[23].mxu1  ;;  %v1338_v41 = vmax.f32 %v863_v27, 0.0  ;;  %v1406_v42 = vmax.f32 %v1135_v28, 0.0 }
 0x115   :  { %v858_v39 = vadd.f32 %v3559_v10, %v857_v37  ;;  %v1130_v40 = vadd.f32 %v3559_v10, %v1129_v38  ;;  %v1336_v45 = vmax.f32 %v855_v31, 0.0  ;;  %v1404_v46 = vmax.f32 %v1127_v32, 0.0 }
 0x116   :  { %v1339_v43 = vmax.f32 %v866_v35, 0.0  ;;  %v1407_v44 = vmax.f32 %v1138_v36, 0.0 }
 0x117   :  { %v1337_v47 = vmax.f32 %v858_v39, 0.0  ;;  %v1405_v48 = vmax.f32 %v1130_v40, 0.0 }
 0x118   :  { %v2601_v49 = vpack.c.bf16 %v1339_v43, %v1338_v41  ;;  %v2771_v50 = vpack.c.bf16 %v1407_v44, %v1406_v42 }
 0x119   :  { %v2596_v51 = vpack.c.bf16 %v1337_v47, %v1336_v45  ;;  %v2766_v52 = vpack.c.bf16 %v1405_v48, %v1404_v46  ;;  %v3053_v53 = vpop.f32.mrb[24].mxu0  ;;  %v3121_v54 = vpop.f32.mrb[24].mxu1 }
 0x11a   :  { %2888 = vst [vmem:[%s3899_s3 + $0x58] sm:$0xff] %v2601_v49   ;;  %2922 = vst [vmem:[%s3899_s3 + $0x168] sm:$0xff] %v2771_v50   ;;  %v879_v55 = vadd.f32 %v3053_v53, %v3559_v10  ;;  %v1151_v56 = vadd.f32 %v3121_v54, %v3559_v10  ;;  %v870_v57 = vpop.f32.mrb[25].mxu0  ;;  %v1142_v58 = vpop.f32.mrb[25].mxu1 }
 0x11b   :  { %2887 = vst [vmem:[%s3899_s3 + $0x50] sm:$0xff] %v2596_v51   ;;  %2921 = vst [vmem:[%s3899_s3 + $0x160] sm:$0xff] %v2766_v52   ;;  %v871_v59 = vadd.f32 %v3559_v10, %v870_v57  ;;  %v1143_v60 = vadd.f32 %v3559_v10, %v1142_v58  ;;  %v3054_v61 = vpop.f32.mrb[26].mxu0  ;;  %v3122_v62 = vpop.f32.mrb[26].mxu1 }
 0x11c   :  { %v882_v63 = vadd.f32 %v3054_v61, %v3559_v10  ;;  %v1154_v0 = vadd.f32 %v3122_v62, %v3559_v10  ;;  %v873_v1 = vpop.f32.mrb[27].mxu0  ;;  %v1145_v2 = vpop.f32.mrb[27].mxu1  ;;  %v1342_v5 = vmax.f32 %v879_v55, 0.0  ;;  %v1410_v6 = vmax.f32 %v1151_v56, 0.0 }
 0x11d   :  { %v874_v3 = vadd.f32 %v3559_v10, %v873_v1  ;;  %v1146_v4 = vadd.f32 %v3559_v10, %v1145_v2  ;;  %v1340_v9 = vmax.f32 %v871_v59, 0.0  ;;  %v1408_v11 = vmax.f32 %v1143_v60, 0.0 }
 0x11e   :  { %v1343_v7 = vmax.f32 %v882_v63, 0.0  ;;  %v1411_v8 = vmax.f32 %v1154_v0, 0.0 }
 0x11f   :  { %v1341_v12 = vmax.f32 %v874_v3, 0.0  ;;  %v1409_v13 = vmax.f32 %v1146_v4, 0.0 }
 0x120   :  { %v2611_v14 = vpack.c.bf16 %v1343_v7, %v1342_v5  ;;  %v2781_v15 = vpack.c.bf16 %v1411_v8, %v1410_v6 }
 0x121   :  { %v2606_v16 = vpack.c.bf16 %v1341_v12, %v1340_v9  ;;  %v2776_v17 = vpack.c.bf16 %v1409_v13, %v1408_v11  ;;  %v3057_v18 = vpop.f32.mrb[28].mxu0  ;;  %v3125_v19 = vpop.f32.mrb[28].mxu1 }
 0x122   :  { %2890 = vst [vmem:[%s3899_s3 + $0x68] sm:$0xff] %v2611_v14   ;;  %2924 = vst [vmem:[%s3899_s3 + $0x178] sm:$0xff] %v2781_v15   ;;  %v895_v20 = vadd.f32 %v3057_v18, %v3559_v10  ;;  %v1167_v21 = vadd.f32 %v3125_v19, %v3559_v10  ;;  %v886_v22 = vpop.f32.mrb[29].mxu0  ;;  %v1158_v23 = vpop.f32.mrb[29].mxu1 }
 0x123   :  { %2889 = vst [vmem:[%s3899_s3 + $0x60] sm:$0xff] %v2606_v16   ;;  %2923 = vst [vmem:[%s3899_s3 + $0x170] sm:$0xff] %v2776_v17   ;;  %v887_v24 = vadd.f32 %v3559_v10, %v886_v22  ;;  %v1159_v25 = vadd.f32 %v3559_v10, %v1158_v23  ;;  %v3058_v26 = vpop.f32.mrb[30].mxu0  ;;  %v3126_v27 = vpop.f32.mrb[30].mxu1 }
 0x124   :  { %v898_v28 = vadd.f32 %v3058_v26, %v3559_v10  ;;  %v1170_v29 = vadd.f32 %v3126_v27, %v3559_v10  ;;  %v889_v30 = vpop.f32.mrb[31].mxu0  ;;  %v1161_v31 = vpop.f32.mrb[31].mxu1  ;;  %v1346_v34 = vmax.f32 %v895_v20, 0.0  ;;  %v1414_v35 = vmax.f32 %v1167_v21, 0.0 }
 0x125   :  { %v890_v32 = vadd.f32 %v3559_v10, %v889_v30  ;;  %v1162_v33 = vadd.f32 %v3559_v10, %v1161_v31  ;;  %v1344_v38 = vmax.f32 %v887_v24, 0.0  ;;  %v1412_v39 = vmax.f32 %v1159_v25, 0.0 }
 0x126   :  { %v1347_v36 = vmax.f32 %v898_v28, 0.0  ;;  %v1415_v37 = vmax.f32 %v1170_v29, 0.0 }
 0x127   :  { %v1345_v40 = vmax.f32 %v890_v32, 0.0  ;;  %v1413_v41 = vmax.f32 %v1162_v33, 0.0 }
 0x128   :  { %v2621_v42 = vpack.c.bf16 %v1347_v36, %v1346_v34  ;;  %v2791_v43 = vpack.c.bf16 %v1415_v37, %v1414_v35 }
 0x129   :  { %v2616_v44 = vpack.c.bf16 %v1345_v40, %v1344_v38  ;;  %v2786_v45 = vpack.c.bf16 %v1413_v41, %v1412_v39  ;;  %v3061_v46 = vpop.f32.mrb[32].mxu0  ;;  %v3129_v47 = vpop.f32.mrb[32].mxu1 }
 0x12a   :  { %2892 = vst [vmem:[%s3899_s3 + $0x78] sm:$0xff] %v2621_v42   ;;  %2926 = vst [vmem:[%s3899_s3 + $0x188] sm:$0xff] %v2791_v43   ;;  %v911_v48 = vadd.f32 %v3061_v46, %v3559_v10  ;;  %v1183_v49 = vadd.f32 %v3129_v47, %v3559_v10  ;;  %v902_v50 = vpop.f32.mrb[33].mxu0  ;;  %v1174_v51 = vpop.f32.mrb[33].mxu1 }
 0x12b   :  { %2891 = vst [vmem:[%s3899_s3 + $0x70] sm:$0xff] %v2616_v44   ;;  %2925 = vst [vmem:[%s3899_s3 + $0x180] sm:$0xff] %v2786_v45   ;;  %v903_v52 = vadd.f32 %v3559_v10, %v902_v50  ;;  %v1175_v53 = vadd.f32 %v3559_v10, %v1174_v51  ;;  %v3062_v54 = vpop.f32.mrb[34].mxu0  ;;  %v3130_v55 = vpop.f32.mrb[34].mxu1 }
 0x12c   :  { %v914_v56 = vadd.f32 %v3062_v54, %v3559_v10  ;;  %v1186_v57 = vadd.f32 %v3130_v55, %v3559_v10  ;;  %v905_v58 = vpop.f32.mrb[35].mxu0  ;;  %v1177_v59 = vpop.f32.mrb[35].mxu1  ;;  %v1350_v62 = vmax.f32 %v911_v48, 0.0  ;;  %v1418_v63 = vmax.f32 %v1183_v49, 0.0 }
 0x12d   :  { %v906_v60 = vadd.f32 %v3559_v10, %v905_v58  ;;  %v1178_v61 = vadd.f32 %v3559_v10, %v1177_v59  ;;  %v1348_v2 = vmax.f32 %v903_v52, 0.0  ;;  %v1416_v3 = vmax.f32 %v1175_v53, 0.0 }
 0x12e   :  { %v1351_v0 = vmax.f32 %v914_v56, 0.0  ;;  %v1419_v1 = vmax.f32 %v1186_v57, 0.0 }
 0x12f   :  { %v1349_v4 = vmax.f32 %v906_v60, 0.0  ;;  %v1417_v5 = vmax.f32 %v1178_v61, 0.0 }
 0x130   :  { %v2631_v6 = vpack.c.bf16 %v1351_v0, %v1350_v62  ;;  %v2801_v7 = vpack.c.bf16 %v1419_v1, %v1418_v63 }
 0x131   :  { %v2626_v8 = vpack.c.bf16 %v1349_v4, %v1348_v2  ;;  %v2796_v9 = vpack.c.bf16 %v1417_v5, %v1416_v3  ;;  %v3065_v11 = vpop.f32.mrb[36].mxu0  ;;  %v3133_v12 = vpop.f32.mrb[36].mxu1 }
 0x132   :  { %2894 = vst [vmem:[%s3899_s3 + $0x88] sm:$0xff] %v2631_v6   ;;  %2928 = vst [vmem:[%s3899_s3 + $0x198] sm:$0xff] %v2801_v7   ;;  %v927_v13 = vadd.f32 %v3065_v11, %v3559_v10  ;;  %v1199_v14 = vadd.f32 %v3133_v12, %v3559_v10  ;;  %v918_v15 = vpop.f32.mrb[37].mxu0  ;;  %v1190_v16 = vpop.f32.mrb[37].mxu1 }
 0x133   :  { %2893 = vst [vmem:[%s3899_s3 + $0x80] sm:$0xff] %v2626_v8   ;;  %2927 = vst [vmem:[%s3899_s3 + $0x190] sm:$0xff] %v2796_v9   ;;  %v919_v17 = vadd.f32 %v3559_v10, %v918_v15  ;;  %v1191_v18 = vadd.f32 %v3559_v10, %v1190_v16  ;;  %v3066_v19 = vpop.f32.mrb[38].mxu0  ;;  %v3134_v20 = vpop.f32.mrb[38].mxu1 }
 0x134   :  { %v930_v21 = vadd.f32 %v3066_v19, %v3559_v10  ;;  %v1202_v22 = vadd.f32 %v3134_v20, %v3559_v10  ;;  %v921_v23 = vpop.f32.mrb[39].mxu0  ;;  %v1193_v24 = vpop.f32.mrb[39].mxu1  ;;  %v1354_v27 = vmax.f32 %v927_v13, 0.0  ;;  %v1422_v28 = vmax.f32 %v1199_v14, 0.0 }
 0x135   :  { %v922_v25 = vadd.f32 %v3559_v10, %v921_v23  ;;  %v1194_v26 = vadd.f32 %v3559_v10, %v1193_v24  ;;  %v1352_v31 = vmax.f32 %v919_v17, 0.0  ;;  %v1420_v32 = vmax.f32 %v1191_v18, 0.0 }
 0x136   :  { %v1355_v29 = vmax.f32 %v930_v21, 0.0  ;;  %v1423_v30 = vmax.f32 %v1202_v22, 0.0 }
 0x137   :  { %v1353_v33 = vmax.f32 %v922_v25, 0.0  ;;  %v1421_v34 = vmax.f32 %v1194_v26, 0.0 }
 0x138   :  { %v2641_v35 = vpack.c.bf16 %v1355_v29, %v1354_v27  ;;  %v2811_v36 = vpack.c.bf16 %v1423_v30, %v1422_v28 }
 0x139   :  { %v2636_v37 = vpack.c.bf16 %v1353_v33, %v1352_v31  ;;  %v2806_v38 = vpack.c.bf16 %v1421_v34, %v1420_v32  ;;  %v3069_v39 = vpop.f32.mrb[40].mxu0  ;;  %v3137_v40 = vpop.f32.mrb[40].mxu1 }
 0x13a   :  { %2896 = vst [vmem:[%s3899_s3 + $0x98] sm:$0xff] %v2641_v35   ;;  %2930 = vst [vmem:[%s3899_s3 + $0x1a8] sm:$0xff] %v2811_v36   ;;  %v943_v41 = vadd.f32 %v3069_v39, %v3559_v10  ;;  %v1215_v42 = vadd.f32 %v3137_v40, %v3559_v10  ;;  %v934_v43 = vpop.f32.mrb[41].mxu0  ;;  %v1206_v44 = vpop.f32.mrb[41].mxu1 }
 0x13b   :  { %2895 = vst [vmem:[%s3899_s3 + $0x90] sm:$0xff] %v2636_v37   ;;  %2929 = vst [vmem:[%s3899_s3 + $0x1a0] sm:$0xff] %v2806_v38   ;;  %v935_v45 = vadd.f32 %v3559_v10, %v934_v43  ;;  %v1207_v46 = vadd.f32 %v3559_v10, %v1206_v44  ;;  %v3070_v47 = vpop.f32.mrb[42].mxu0  ;;  %v3138_v48 = vpop.f32.mrb[42].mxu1 }
 0x13c   :  { %v946_v49 = vadd.f32 %v3070_v47, %v3559_v10  ;;  %v1218_v50 = vadd.f32 %v3138_v48, %v3559_v10  ;;  %v937_v51 = vpop.f32.mrb[43].mxu0  ;;  %v1209_v52 = vpop.f32.mrb[43].mxu1  ;;  %v1358_v55 = vmax.f32 %v943_v41, 0.0  ;;  %v1426_v56 = vmax.f32 %v1215_v42, 0.0 }
 0x13d   :  { %v938_v53 = vadd.f32 %v3559_v10, %v937_v51  ;;  %v1210_v54 = vadd.f32 %v3559_v10, %v1209_v52  ;;  %v1356_v59 = vmax.f32 %v935_v45, 0.0  ;;  %v1424_v60 = vmax.f32 %v1207_v46, 0.0 }
 0x13e   :  { %v1359_v57 = vmax.f32 %v946_v49, 0.0  ;;  %v1427_v58 = vmax.f32 %v1218_v50, 0.0 }
 0x13f   :  { %v1357_v61 = vmax.f32 %v938_v53, 0.0  ;;  %v1425_v62 = vmax.f32 %v1210_v54, 0.0 }
 0x140   :  { %v2651_v63 = vpack.c.bf16 %v1359_v57, %v1358_v55  ;;  %v2821_v0 = vpack.c.bf16 %v1427_v58, %v1426_v56 }
 0x141   :  { %v2646_v1 = vpack.c.bf16 %v1357_v61, %v1356_v59  ;;  %v2816_v2 = vpack.c.bf16 %v1425_v62, %v1424_v60  ;;  %v3073_v3 = vpop.f32.mrb[44].mxu0  ;;  %v3141_v4 = vpop.f32.mrb[44].mxu1 }
 0x142   :  { %2898 = vst [vmem:[%s3899_s3 + $0xa8] sm:$0xff] %v2651_v63   ;;  %2932 = vst [vmem:[%s3899_s3 + $0x1b8] sm:$0xff] %v2821_v0   ;;  %v959_v5 = vadd.f32 %v3073_v3, %v3559_v10  ;;  %v1231_v6 = vadd.f32 %v3141_v4, %v3559_v10  ;;  %v950_v7 = vpop.f32.mrb[45].mxu0  ;;  %v1222_v8 = vpop.f32.mrb[45].mxu1 }
 0x143   :  { %2897 = vst [vmem:[%s3899_s3 + $0xa0] sm:$0xff] %v2646_v1   ;;  %2931 = vst [vmem:[%s3899_s3 + $0x1b0] sm:$0xff] %v2816_v2   ;;  %v951_v9 = vadd.f32 %v3559_v10, %v950_v7  ;;  %v1223_v11 = vadd.f32 %v3559_v10, %v1222_v8  ;;  %v3074_v12 = vpop.f32.mrb[46].mxu0  ;;  %v3142_v13 = vpop.f32.mrb[46].mxu1 }
 0x144   :  { %v962_v14 = vadd.f32 %v3074_v12, %v3559_v10  ;;  %v1234_v15 = vadd.f32 %v3142_v13, %v3559_v10  ;;  %v953_v16 = vpop.f32.mrb[47].mxu0  ;;  %v1225_v17 = vpop.f32.mrb[47].mxu1  ;;  %v1362_v20 = vmax.f32 %v959_v5, 0.0  ;;  %v1430_v21 = vmax.f32 %v1231_v6, 0.0 }
 0x145   :  { %v954_v18 = vadd.f32 %v3559_v10, %v953_v16  ;;  %v1226_v19 = vadd.f32 %v3559_v10, %v1225_v17  ;;  %v1360_v24 = vmax.f32 %v951_v9, 0.0  ;;  %v1428_v25 = vmax.f32 %v1223_v11, 0.0 }
 0x146   :  { %v1363_v22 = vmax.f32 %v962_v14, 0.0  ;;  %v1431_v23 = vmax.f32 %v1234_v15, 0.0 }
 0x147   :  { %v1361_v26 = vmax.f32 %v954_v18, 0.0  ;;  %v1429_v27 = vmax.f32 %v1226_v19, 0.0 }
 0x148   :  { %v2661_v28 = vpack.c.bf16 %v1363_v22, %v1362_v20  ;;  %v2831_v29 = vpack.c.bf16 %v1431_v23, %v1430_v21 }
 0x149   :  { %v2656_v30 = vpack.c.bf16 %v1361_v26, %v1360_v24  ;;  %v2826_v31 = vpack.c.bf16 %v1429_v27, %v1428_v25  ;;  %v3077_v32 = vpop.f32.mrb[48].mxu0  ;;  %v3145_v33 = vpop.f32.mrb[48].mxu1 }
 0x14a   :  { %2900 = vst [vmem:[%s3899_s3 + $0xb8] sm:$0xff] %v2661_v28   ;;  %2934 = vst [vmem:[%s3899_s3 + $0x1c8] sm:$0xff] %v2831_v29   ;;  %v975_v34 = vadd.f32 %v3077_v32, %v3559_v10  ;;  %v1247_v35 = vadd.f32 %v3145_v33, %v3559_v10  ;;  %v966_v36 = vpop.f32.mrb[49].mxu0  ;;  %v1238_v37 = vpop.f32.mrb[49].mxu1 }
 0x14b   :  { %2899 = vst [vmem:[%s3899_s3 + $0xb0] sm:$0xff] %v2656_v30   ;;  %2933 = vst [vmem:[%s3899_s3 + $0x1c0] sm:$0xff] %v2826_v31   ;;  %v967_v38 = vadd.f32 %v3559_v10, %v966_v36  ;;  %v1239_v39 = vadd.f32 %v3559_v10, %v1238_v37  ;;  %v3078_v40 = vpop.f32.mrb[50].mxu0  ;;  %v3146_v41 = vpop.f32.mrb[50].mxu1 }
 0x14c   :  { %v978_v42 = vadd.f32 %v3078_v40, %v3559_v10  ;;  %v1250_v43 = vadd.f32 %v3146_v41, %v3559_v10  ;;  %v969_v44 = vpop.f32.mrb[51].mxu0  ;;  %v1241_v45 = vpop.f32.mrb[51].mxu1  ;;  %v1366_v48 = vmax.f32 %v975_v34, 0.0  ;;  %v1434_v49 = vmax.f32 %v1247_v35, 0.0 }
 0x14d   :  { %v970_v46 = vadd.f32 %v3559_v10, %v969_v44  ;;  %v1242_v47 = vadd.f32 %v3559_v10, %v1241_v45  ;;  %v1364_v52 = vmax.f32 %v967_v38, 0.0  ;;  %v1432_v53 = vmax.f32 %v1239_v39, 0.0 }
 0x14e   :  { %v1367_v50 = vmax.f32 %v978_v42, 0.0  ;;  %v1435_v51 = vmax.f32 %v1250_v43, 0.0 }
 0x14f   :  { %v1365_v54 = vmax.f32 %v970_v46, 0.0  ;;  %v1433_v55 = vmax.f32 %v1242_v47, 0.0 }
 0x150   :  { %v2671_v56 = vpack.c.bf16 %v1367_v50, %v1366_v48  ;;  %v2841_v57 = vpack.c.bf16 %v1435_v51, %v1434_v49 }
 0x151   :  { %v2666_v58 = vpack.c.bf16 %v1365_v54, %v1364_v52  ;;  %v2836_v59 = vpack.c.bf16 %v1433_v55, %v1432_v53  ;;  %v3081_v60 = vpop.f32.mrb[52].mxu0  ;;  %v3149_v61 = vpop.f32.mrb[52].mxu1 }
 0x152   :  { %2902 = vst [vmem:[%s3899_s3 + $0xc8] sm:$0xff] %v2671_v56   ;;  %2936 = vst [vmem:[%s3899_s3 + $0x1d8] sm:$0xff] %v2841_v57   ;;  %v991_v62 = vadd.f32 %v3081_v60, %v3559_v10  ;;  %v1263_v63 = vadd.f32 %v3149_v61, %v3559_v10  ;;  %v982_v0 = vpop.f32.mrb[53].mxu0  ;;  %v1254_v1 = vpop.f32.mrb[53].mxu1 }
 0x153   :  { %2901 = vst [vmem:[%s3899_s3 + $0xc0] sm:$0xff] %v2666_v58   ;;  %2935 = vst [vmem:[%s3899_s3 + $0x1d0] sm:$0xff] %v2836_v59   ;;  %v983_v2 = vadd.f32 %v3559_v10, %v982_v0  ;;  %v1255_v3 = vadd.f32 %v3559_v10, %v1254_v1  ;;  %v3082_v4 = vpop.f32.mrb[54].mxu0  ;;  %v3150_v5 = vpop.f32.mrb[54].mxu1 }
 0x154   :  { %v994_v6 = vadd.f32 %v3082_v4, %v3559_v10  ;;  %v1266_v7 = vadd.f32 %v3150_v5, %v3559_v10  ;;  %v985_v8 = vpop.f32.mrb[55].mxu0  ;;  %v1257_v9 = vpop.f32.mrb[55].mxu1  ;;  %v1370_v13 = vmax.f32 %v991_v62, 0.0  ;;  %v1438_v14 = vmax.f32 %v1263_v63, 0.0 }
 0x155   :  { %v986_v11 = vadd.f32 %v3559_v10, %v985_v8  ;;  %v1258_v12 = vadd.f32 %v3559_v10, %v1257_v9  ;;  %v1368_v17 = vmax.f32 %v983_v2, 0.0  ;;  %v1436_v18 = vmax.f32 %v1255_v3, 0.0 }
 0x156   :  { %v1371_v15 = vmax.f32 %v994_v6, 0.0  ;;  %v1439_v16 = vmax.f32 %v1266_v7, 0.0 }
 0x157   :  { %v1369_v19 = vmax.f32 %v986_v11, 0.0  ;;  %v1437_v20 = vmax.f32 %v1258_v12, 0.0 }
 0x158   :  { %v2681_v21 = vpack.c.bf16 %v1371_v15, %v1370_v13  ;;  %v2851_v22 = vpack.c.bf16 %v1439_v16, %v1438_v14 }
 0x159   :  { %v2676_v23 = vpack.c.bf16 %v1369_v19, %v1368_v17  ;;  %v2846_v24 = vpack.c.bf16 %v1437_v20, %v1436_v18  ;;  %v3085_v25 = vpop.f32.mrb[56].mxu0  ;;  %v3153_v26 = vpop.f32.mrb[56].mxu1 }
 0x15a   :  { %2904 = vst [vmem:[%s3899_s3 + $0xd8] sm:$0xff] %v2681_v21   ;;  %2938 = vst [vmem:[%s3899_s3 + $0x1e8] sm:$0xff] %v2851_v22   ;;  %v1007_v27 = vadd.f32 %v3085_v25, %v3559_v10  ;;  %v1279_v28 = vadd.f32 %v3153_v26, %v3559_v10  ;;  %v998_v29 = vpop.f32.mrb[57].mxu0  ;;  %v1270_v30 = vpop.f32.mrb[57].mxu1 }
 0x15b   :  { %2903 = vst [vmem:[%s3899_s3 + $0xd0] sm:$0xff] %v2676_v23   ;;  %2937 = vst [vmem:[%s3899_s3 + $0x1e0] sm:$0xff] %v2846_v24   ;;  %v999_v31 = vadd.f32 %v3559_v10, %v998_v29  ;;  %v1271_v32 = vadd.f32 %v3559_v10, %v1270_v30  ;;  %v3086_v33 = vpop.f32.mrb[58].mxu0  ;;  %v3154_v34 = vpop.f32.mrb[58].mxu1 }
 0x15c   :  { %v1010_v35 = vadd.f32 %v3086_v33, %v3559_v10  ;;  %v1282_v36 = vadd.f32 %v3154_v34, %v3559_v10  ;;  %v1001_v37 = vpop.f32.mrb[59].mxu0  ;;  %v1273_v38 = vpop.f32.mrb[59].mxu1  ;;  %v1374_v41 = vmax.f32 %v1007_v27, 0.0  ;;  %v1442_v42 = vmax.f32 %v1279_v28, 0.0 }
 0x15d   :  { %v1002_v39 = vadd.f32 %v3559_v10, %v1001_v37  ;;  %v1274_v40 = vadd.f32 %v3559_v10, %v1273_v38  ;;  %v1372_v45 = vmax.f32 %v999_v31, 0.0  ;;  %v1440_v46 = vmax.f32 %v1271_v32, 0.0 }
 0x15e   :  { %v1375_v43 = vmax.f32 %v1010_v35, 0.0  ;;  %v1443_v44 = vmax.f32 %v1282_v36, 0.0 }
 0x15f   :  { %v1373_v47 = vmax.f32 %v1002_v39, 0.0  ;;  %v1441_v48 = vmax.f32 %v1274_v40, 0.0 }
 0x160   :  { %v2691_v49 = vpack.c.bf16 %v1375_v43, %v1374_v41  ;;  %v2861_v50 = vpack.c.bf16 %v1443_v44, %v1442_v42 }
 0x161   :  { %v2686_v51 = vpack.c.bf16 %v1373_v47, %v1372_v45  ;;  %v2856_v52 = vpack.c.bf16 %v1441_v48, %v1440_v46  ;;  %v3089_v53 = vpop.f32.mrb[60].mxu0  ;;  %v3157_v54 = vpop.f32.mrb[60].mxu1 }
 0x162   :  { %2906 = vst [vmem:[%s3899_s3 + $0xe8] sm:$0xff] %v2691_v49   ;;  %2940 = vst [vmem:[%s3899_s3 + $0x1f8] sm:$0xff] %v2861_v50   ;;  %v1023_v55 = vadd.f32 %v3089_v53, %v3559_v10  ;;  %v1295_v56 = vadd.f32 %v3157_v54, %v3559_v10  ;;  %v1014_v57 = vpop.f32.mrb[61].mxu0  ;;  %v1286_v58 = vpop.f32.mrb[61].mxu1 }
 0x163   :  { %2905 = vst [vmem:[%s3899_s3 + $0xe0] sm:$0xff] %v2686_v51   ;;  %2939 = vst [vmem:[%s3899_s3 + $0x1f0] sm:$0xff] %v2856_v52   ;;  %v1015_v59 = vadd.f32 %v3559_v10, %v1014_v57  ;;  %v1287_v60 = vadd.f32 %v3559_v10, %v1286_v58  ;;  %v3090_v61 = vpop.f32.mrb[62].mxu0  ;;  %v3158_v62 = vpop.f32.mrb[62].mxu1 }
 0x164   :  { %v1026_v63 = vadd.f32 %v3090_v61, %v3559_v10  ;;  %v1298_v0 = vadd.f32 %v3158_v62, %v3559_v10  ;;  %v1017_v1 = vpop.f32.mrb[63].mxu0  ;;  %v1289_v2 = vpop.f32.mrb[63].mxu1  ;;  %v1378_v5 = vmax.f32 %v1023_v55, 0.0  ;;  %v1446_v6 = vmax.f32 %v1295_v56, 0.0 }
 0x165   :  { %v1018_v3 = vadd.f32 %v3559_v10, %v1017_v1  ;;  %v1290_v4 = vadd.f32 %v3559_v10, %v1289_v2  ;;  %v1376_v9 = vmax.f32 %v1015_v59, 0.0  ;;  %v1444_v11 = vmax.f32 %v1287_v60, 0.0  ;;  %v3248_v10 = vld [vmem:[%s3898_s2] ss:$0 sm:$0xff] }
 0x166   :  { %v1379_v7 = vmax.f32 %v1026_v63, 0.0  ;;  %v1447_v8 = vmax.f32 %v1298_v0, 0.0 }
 0x167   :  { %v1377_v12 = vmax.f32 %v1018_v3, 0.0  ;;  %v1445_v13 = vmax.f32 %v1290_v4, 0.0 }
 0x168   :  { %v2701_v14 = vpack.c.bf16 %v1379_v7, %v1378_v5  ;;  %v2871_v15 = vpack.c.bf16 %v1447_v8, %v1446_v6 }
 0x169   :  { %v2696_v16 = vpack.c.bf16 %v1377_v12, %v1376_v9  ;;  %v2866_v17 = vpack.c.bf16 %v1445_v13, %v1444_v11  ;;  %v3093_v18 = vpop.f32.mrb[64].mxu0  ;;  %v3161_v19 = vpop.f32.mrb[64].mxu1 }
 0x16a   :  { %2908 = vst [vmem:[%s3899_s3 + $0xf8] sm:$0xff] %v2701_v14   ;;  %2942 = vst [vmem:[%s3899_s3 + $0x208] sm:$0xff] %v2871_v15   ;;  %v1039_v20 = vadd.f32 %v3248_v10, %v3093_v18  ;;  %v1311_v21 = vadd.f32 %v3248_v10, %v3161_v19  ;;  %v1030_v22 = vpop.f32.mrb[65].mxu0  ;;  %v1302_v23 = vpop.f32.mrb[65].mxu1 }
 0x16b   :  { %2907 = vst [vmem:[%s3899_s3 + $0xf0] sm:$0xff] %v2696_v16   ;;  %2941 = vst [vmem:[%s3899_s3 + $0x200] sm:$0xff] %v2866_v17   ;;  %v1031_v24 = vadd.f32 %v3248_v10, %v1030_v22  ;;  %v1303_v25 = vadd.f32 %v3248_v10, %v1302_v23  ;;  %v3094_v26 = vpop.f32.mrb[66].mxu0  ;;  %v3162_v27 = vpop.f32.mrb[66].mxu1 }
 0x16c   :  { %v1450_v28 = vmax.f32 %v1311_v21, 0.0  ;;  %v1042_v29 = vadd.f32 %v3248_v10, %v3094_v26  ;;  %v1033_v30 = vpop.f32.mrb[67].mxu0  ;;  %v1305_v31 = vpop.f32.mrb[67].mxu1  ;;  %v1382_v34 = vmax.f32 %v1039_v20, 0.0 }
 0x16d   :  { %v1034_v32 = vadd.f32 %v3248_v10, %v1033_v30  ;;  %v1306_v33 = vadd.f32 %v3248_v10, %v1305_v31  ;;  %v1380_v37 = vmax.f32 %v1031_v24, 0.0  ;;  %v1448_v38 = vmax.f32 %v1303_v25, 0.0 }
 0x16e   :  { %v2542_v35 = vpack.c.bf16 %v1450_v28, %v1450_v28  ;;  %v1383_v36 = vmax.f32 %v1042_v29, 0.0 }
 0x16f   :  { %v1381_v39 = vmax.f32 %v1034_v32, 0.0  ;;  %v1449_v40 = vmax.f32 %v1306_v33, 0.0 }
 0x170   :  { %2126 = vst [vmem:[%s3899_s3 + $0x218] sm:$0x7] %v2542_v35  ;;  %v2711_v41 = vpack.c.bf16 %v1383_v36, %v1382_v34 }
 0x171   :  { %v2706_v42 = vpack.c.bf16 %v1381_v39, %v1380_v37  ;;  %v2876_v43 = vpack.c.bf16 %v1449_v40, %v1448_v38 }
 0x172   :  { %2910 = vst [vmem:[%s3899_s3 + $0x108] sm:$0xff] %v2711_v41  }
 0x173   :  { %2909 = vst [vmem:[%s3899_s3 + $0x100] sm:$0xff] %v2706_v42   ;;  %2943 = vst [vmem:[%s3899_s3 + $0x210] sm:$0xff] %v2876_v43  }

// kernel: squeeze.1
= control target key start
LH: loop header
LB: loop body
LE: loop exit
PB: predicated region body
PF: predicated region fallthrough
CT: control target
= control target key end

     0   :  { %s85_s0 = inlined_call_operand.vmem [shape: f32[20], index: 0, kind: input, shape index: {}]   ;;  %s86_s1 = inlined_call_operand.hbm [shape: f32[2,10], index: 1, kind: output, shape index: {}]  }
   0x1   :  { %v5_v0 = vld [vmem:[%s85_s0] sm:$0x1] }
   0x2   :  { %2 = vsyncpa [#allocation1], 0  ;;  %6 = vst [vmem:[#allocation3] sm:$0x1] %v5_v0  ;;  %vm8_vm0 = vcmask 80896   ;;  %s58_s0 = smov 118  }
   0x3   :  { %s59_s8 = smov [#allocation0]  }
   0x4   :  { %s26_s9 = sshll.u32 %s59_s8, 4  ;;  %s27_s9 = int_to_ptr.vmem [resolvable:$true] %s26_s9 }
   0x5   :  { %s34_s10 = scalar_lea.vmem %s27_s9, 32  ;;  %p39_p1 = scmp.lt.s32.totalorder %s27_s9, %s27_s9 }
   0x6   :  { %p35_p0 = scmp.ne.s32.totalorder %s27_s9, %s34_s10  ;;  %p40_p2 = scmp.lt.s32.totalorder %s34_s10, %s34_s10 }
   0x8   :  { %p41_p3 = por %p40_p2, %p39_p1 }
   0x9   :  { %v10_v1 = vld [vmem:[#allocation3] sm:$0x1]  }
   0xa   :  { %v7_v2 = vld [vmem:[#allocation3] sm:$0x1]   ;;  %11 = vrot.lane.b32.xlu0 %v10_v1, %s58_s0  ;;  %p42_p4 = pnand %p41_p3, %p35_p0 }
   0xb   :  { %9 = vst.msk [vmem:[#allocation2] sm:$0x1] %vm8_vm0, %v7_v2  }
  0x7c   :  { %v12_v3 = vpop.permute.xlu0 %11  }
  0x7d   :  { %15 = vst.msk [vmem:[#allocation2 + $0x1] sm:$0x1] %vm8_vm0, %v12_v3  }
  0x84   :  { %v19_v4 = vld [vmem:[#allocation2] sm:$0x3] }
  0x85   :  { %21 = vst [vmem:[#allocation0] sm:$0x3] %v19_v4 }
  0x86   :  { %45 = shalt.err (!%p42_p4)
}
  0x87   :  { %s46_s13 = scalar_lea.hbm %s86_s1, 32 }
  0x88   :  { %p47_p5 = scmp.ne.s32.totalorder %s86_s1, %s46_s13  ;;  %p50_p6 = scmp.lt.u32.totalorder %s46_s13, %s86_s1 }
  0x8a   :  { %p52_p7 = pnand %p50_p6, %p47_p5 }
  0x8c   :  { %55 = shalt.err (!%p52_p7)
}
  0x8d   :  { %29 = dma.vmem_to_hbm [thread:$0]  %s27_s9, 32, %s86_s1, [#allocation1]  }
  0x8e   :  { %56 = dma.done.wait [#allocation1], 32  }
  0x8f   :  { %57 = vsyncadd [#allocation1], 4294967264 }
  0x90   :  { %31 = vsyncpa [#allocation1], 1 }

// kernel: receiver_forward.5
= control target key start
LH: loop header
LB: loop body
LE: loop exit
PB: predicated region body
PF: predicated region fallthrough
CT: control target
= control target key end

     0   :  { %vm1862_vm0 = vcmask 523264   ;;  %vm2506_vm1 = vcmask 179200   ;;  %vm2513_vm2 = vcmask 1042432   ;;  %s4901_s1 = inlined_call_operand.vmem [shape: bf16[3136,128], index: 1, kind: input, shape index: {}]   ;;  %s4902_s0 = inlined_call_operand.vmem [shape: bf16[22,3136], index: 0, kind: input, shape index: {}]   ;;  %s4903_s2 = inlined_call_operand.vmem [shape: f32[1,128], index: 2, kind: input, shape index: {}]   ;;  %s4904_s3 = inlined_call_operand.vmem [shape: bf16[20,22], index: 3, kind: input, shape index: {}]   ;;  %s4905_s4 = inlined_call_operand.vmem [shape: bf16[20,22], index: 4, kind: input, shape index: {}]   ;;  %s4906_s5 = inlined_call_operand.vmem [shape: bf16[128,128], index: 5, kind: input, shape index: {}]   ;;  %s4907_s6 = inlined_call_operand.vmem [shape: bf16[128,128], index: 6, kind: input, shape index: {}]   ;;  %s4908_s8 = inlined_call_operand.vmem [shape: bf16[128,128], index: 8, kind: input, shape index: {}]   ;;  %s4909_s7 = inlined_call_operand.vmem [shape: f32[1,128], index: 7, kind: input, shape index: {}]   ;;  %s4910_s9 = inlined_call_operand.vmem [shape: f32[1,128], index: 9, kind: input, shape index: {}]   ;;  %s4911_s10 = inlined_call_operand.vmem [shape: f32[20,128], index: 10, kind: output, shape index: {}]  }
   0x1   :  { %v3752_v0 = vld [vmem:[%s4901_s1 + $0x40] sm:$0xff]   ;;  %v3756_v4 = vld [vmem:[%s4901_s1 + $0x48] sm:$0xff]   ;;  %v3760_v8 = vld [vmem:[%s4901_s1 + $0x50] sm:$0xff]  }
   0x2   :  { %v3753_v1 = vld [vmem:[%s4901_s1] sm:$0xff]   ;;  %3282 = vmatprep.subr.bf16.mxu0 %v3752_v0  ;;  %v3757_v5 = vld [vmem:[%s4901_s1 + $0x8] sm:$0xff]   ;;  %v3761_v9 = vld [vmem:[%s4901_s1 + $0x10] sm:$0xff]  }
   0x3   :  { %v3754_v2 = vld [vmem:[%s4901_s1 + $0xc0] sm:$0xff]   ;;  %3283 = vmatpush3.bf16.msra.mxu0 %v3753_v1  ;;  %v3758_v6 = vld [vmem:[%s4901_s1 + $0xc8] sm:$0xff]   ;;  %v3762_v10 = vld [vmem:[%s4901_s1 + $0xd0] sm:$0xff]  }
   0x4   :  { %v3755_v3 = vld [vmem:[%s4901_s1 + $0x80] sm:$0xff]   ;;  %3310 = vmatprep.subr.bf16.mxu1 %v3754_v2  ;;  %3284 = vmatprep.subr.bf16.mxu0 %v3756_v4  ;;  %v3759_v7 = vld [vmem:[%s4901_s1 + $0x88] sm:$0xff]   ;;  %v3763_v11 = vld [vmem:[%s4901_s1 + $0x90] sm:$0xff]  }
   0x5   :  { %3311 = vmatpush3.bf16.msra.mxu1 %v3755_v3  ;;  %v3764_v12 = vld [vmem:[%s4901_s1 + $0x58] sm:$0xff]   ;;  %v3768_v16 = vld [vmem:[%s4901_s1 + $0x60] sm:$0xff]   ;;  %v3772_v20 = vld [vmem:[%s4901_s1 + $0x68] sm:$0xff]  }
   0x6   :  { %3312 = vmatprep.subr.bf16.mxu1 %v3758_v6  ;;  %v3765_v13 = vld [vmem:[%s4901_s1 + $0x18] sm:$0xff]   ;;  %v3769_v17 = vld [vmem:[%s4901_s1 + $0x20] sm:$0xff]   ;;  %v3773_v21 = vld [vmem:[%s4901_s1 + $0x28] sm:$0xff]  }
   0x7   :  { %3285 = vmatpush3.bf16.msra.mxu0 %v3757_v5  ;;  %v3766_v14 = vld [vmem:[%s4901_s1 + $0xd8] sm:$0xff]   ;;  %v3770_v18 = vld [vmem:[%s4901_s1 + $0xe0] sm:$0xff]   ;;  %v3774_v22 = vld [vmem:[%s4901_s1 + $0xe8] sm:$0xff]  }
   0x8   :  { %3286 = vmatprep.subr.bf16.mxu0 %v3760_v8  ;;  %v3767_v15 = vld [vmem:[%s4901_s1 + $0x98] sm:$0xff]   ;;  %v3771_v19 = vld [vmem:[%s4901_s1 + $0xa0] sm:$0xff]   ;;  %v3775_v23 = vld [vmem:[%s4901_s1 + $0xa8] sm:$0xff]  }
   0x9   :  { %3313 = vmatpush3.bf16.msra.mxu1 %v3759_v7  ;;  %v3776_v24 = vld [vmem:[%s4901_s1 + $0x70] sm:$0xff]   ;;  %v3780_v28 = vld [vmem:[%s4901_s1 + $0x78] sm:$0xff]   ;;  %v3783_v31 = vld [vmem:[%s4902_s0] ss:$100 sps:$4 sm:$0xff]  }
   0xa   :  { %3314 = vmatprep.subr.bf16.mxu1 %v3762_v10  ;;  %v3777_v25 = vld [vmem:[%s4901_s1 + $0x30] sm:$0xff]   ;;  %v3781_v29 = vld [vmem:[%s4901_s1 + $0x38] sm:$0xff]   ;;  %v3785_v32 = vld [vmem:[%s4902_s0 + $0x4] ss:$100 sps:$4 sm:$0xff]  }
   0xb   :  { %3287 = vmatpush3.bf16.msra.mxu0 %v3761_v9  ;;  %v3778_v26 = vld [vmem:[%s4901_s1 + $0xf0] sm:$0xff]   ;;  %v3782_v30 = vld [vmem:[%s4901_s1 + $0xf8] sm:$0xff]   ;;  %1901 = vmatprep.mubr.bf16.mxu0 %v3785_v32  ;;  %v3787_v34 = vld [vmem:[%s4901_s1 + $0x140] sm:$0xff]  }
   0xc   :  { %3288 = vmatprep.subr.bf16.mxu0 %v3764_v12  ;;  %v3779_v27 = vld [vmem:[%s4901_s1 + $0xb0] sm:$0xff]   ;;  %v3786_v33 = vld [vmem:[%s4901_s1 + $0xb8] sm:$0xff]   ;;  %v3788_v35 = vld [vmem:[%s4902_s0 + $0x8] ss:$100 sps:$4 sm:$0xff]  }
   0xd   :  { %3315 = vmatpush3.bf16.msra.mxu1 %v3763_v11  ;;  %v3790_v36 = vld [vmem:[%s4902_s0 + $0xc] ss:$100 sps:$4 sm:$0xff]   ;;  %v3791_v37 = vld [vmem:[%s4901_s1 + $0x100] sm:$0xff]   ;;  %v3802_v48 = vld [vmem:[%s4901_s1 + $0x158] sm:$0xff]  }
   0xe   :  { %3316 = vmatprep.subr.bf16.mxu1 %v3766_v14  ;;  %1949 = vmatprep.mubr.bf16.mxu1 %v3790_v36  ;;  %v3792_v38 = vld [vmem:[%s4901_s1 + $0x1c0] sm:$0xff]   ;;  %v3794_v40 = vld [vmem:[%s4901_s1 + $0x148] sm:$0xff]   ;;  %v3798_v44 = vld [vmem:[%s4901_s1 + $0x150] sm:$0xff]  }
   0xf   :  { %3289 = vmatpush3.bf16.msra.mxu0 %v3765_v13  ;;  %v3793_v39 = vld [vmem:[%s4901_s1 + $0x180] sm:$0xff]   ;;  %v3795_v41 = vld [vmem:[%s4901_s1 + $0x108] sm:$0xff]   ;;  %v3799_v45 = vld [vmem:[%s4901_s1 + $0x110] sm:$0xff]  }
  0x10   :  { %3290 = vmatprep.subr.bf16.mxu0 %v3768_v16  ;;  %v3796_v42 = vld [vmem:[%s4901_s1 + $0x1c8] sm:$0xff]   ;;  %v3800_v46 = vld [vmem:[%s4901_s1 + $0x1d0] sm:$0xff]   ;;  %v3803_v49 = vld [vmem:[%s4901_s1 + $0x118] sm:$0xff]  }
  0x11   :  { %3317 = vmatpush3.bf16.msra.mxu1 %v3767_v15  ;;  %v3797_v43 = vld [vmem:[%s4901_s1 + $0x188] sm:$0xff]   ;;  %v3801_v47 = vld [vmem:[%s4901_s1 + $0x190] sm:$0xff]   ;;  %v3804_v50 = vld [vmem:[%s4901_s1 + $0x1d8] sm:$0xff]  }
  0x12   :  { %3318 = vmatprep.subr.bf16.mxu1 %v3770_v18  ;;  %v3805_v51 = vld [vmem:[%s4901_s1 + $0x198] sm:$0xff]   ;;  %v3806_v52 = vld [vmem:[%s4901_s1 + $0x160] sm:$0xff]   ;;  %v3810_v56 = vld [vmem:[%s4901_s1 + $0x168] sm:$0xff]  }
  0x13   :  { %3291 = vmatpush3.bf16.msra.mxu0 %v3769_v17  ;;  %v3807_v53 = vld [vmem:[%s4901_s1 + $0x120] sm:$0xff]   ;;  %v62_v57 = vld [vmem:[%s4902_s0 + $0xc8] sm:$0x77]  ;;  %v3816_v63 = vld [vmem:[%s4901_s1 + $0x170] sm:$0xff]  }
  0x14   :  { %3292 = vmatprep.subr.bf16.mxu0 %v3772_v20  ;;  %v3808_v54 = vld [vmem:[%s4901_s1 + $0x1e0] sm:$0xff]   ;;  %v3026_v58 = vcombine.high %v62_v57, %v62_v57  ;;  %v3812_v59 = vld [vmem:[%s4901_s1 + $0x128] sm:$0xff]   ;;  %v3025_v60 = vcombine.low %v62_v57, %v62_v57  ;;  %v63_v0 = vld [vmem:[%s4902_s0 + $0xd0] sm:$0x77] }
  0x15   :  { %3319 = vmatpush3.bf16.msra.mxu1 %v3771_v19  ;;  %v3809_v55 = vld [vmem:[%s4901_s1 + $0x1a0] sm:$0xff]   ;;  %v3814_v61 = vld [vmem:[%s4901_s1 + $0x1e8] sm:$0xff]   ;;  %v3028_v1 = vcombine.high %v63_v0, %v63_v0  ;;  %v3818_v2 = vld [vmem:[%s4901_s1 + $0x130] sm:$0xff]   ;;  %v3027_v3 = vcombine.low %v63_v0, %v63_v0 }
  0x16   :  { %3320 = vmatprep.subr.bf16.mxu1 %v3774_v22  ;;  %v3815_v62 = vld [vmem:[%s4901_s1 + $0x1a8] sm:$0xff]   ;;  %v3820_v4 = vld [vmem:[%s4901_s1 + $0x1f0] sm:$0xff]   ;;  %v3822_v6 = vld [vmem:[%s4901_s1 + $0x178] sm:$0xff]  }
  0x17   :  { %3293 = vmatpush3.bf16.msra.mxu0 %v3773_v21  ;;  %v3821_v5 = vld [vmem:[%s4901_s1 + $0x1b0] sm:$0xff]   ;;  %v3823_v7 = vld [vmem:[%s4901_s1 + $0x138] sm:$0xff]   ;;  %v3829_v12 = vld [vmem:[%s4901_s1 + $0x240] sm:$0xff]  }
  0x18   :  { %3294 = vmatprep.subr.bf16.mxu0 %v3776_v24  ;;  %v3824_v8 = vld [vmem:[%s4901_s1 + $0x1f8] sm:$0xff]   ;;  %v3825_v9 = vld [vmem:[%s4902_s0 + $0x10] ss:$100 sps:$4 sm:$0xff]   ;;  %v3833_v15 = vld [vmem:[%s4901_s1 + $0x200] sm:$0xff]  }
  0x19   :  { %3321 = vmatpush3.bf16.msra.mxu1 %v3775_v23  ;;  %v3827_v10 = vld [vmem:[%s4902_s0 + $0x14] ss:$100 sps:$4 sm:$0xff]   ;;  %v3832_v14 = vld [vmem:[%s4902_s0 + $0x1c] ss:$100 sps:$4 sm:$0xff]   ;;  %v3836_v18 = vld [vmem:[%s4901_s1 + $0x248] sm:$0xff]  }
  0x1a   :  { %3322 = vmatprep.subr.bf16.mxu1 %v3778_v26  ;;  %v3828_v11 = vld [vmem:[%s4901_s1 + $0x1b8] sm:$0xff]   ;;  %v3834_v16 = vld [vmem:[%s4901_s1 + $0x2c0] sm:$0xff]   ;;  %v3837_v19 = vld [vmem:[%s4901_s1 + $0x208] sm:$0xff]  }
  0x1b   :  { %3295 = vmatpush3.bf16.msra.mxu0 %v3777_v25  ;;  %v3830_v13 = vld [vmem:[%s4902_s0 + $0x18] ss:$100 sps:$4 sm:$0xff]   ;;  %v3835_v17 = vld [vmem:[%s4901_s1 + $0x280] sm:$0xff]   ;;  %v3838_v20 = vld [vmem:[%s4901_s1 + $0x2c8] sm:$0xff]  }
  0x1c   :  { %3296 = vmatprep.subr.bf16.mxu0 %v3780_v28  ;;  %v64_v21 = vld [vmem:[%s4902_s0 + $0xd8] sm:$0x77]  ;;  %v3840_v23 = vld [vmem:[%s4901_s1 + $0x288] sm:$0xff]   ;;  %v3842_v25 = vld [vmem:[%s4901_s1 + $0x250] sm:$0xff]  }
  0x1d   :  { %3323 = vmatpush3.bf16.msra.mxu1 %v3779_v27  ;;  %v3030_v22 = vcombine.high %v64_v21, %v64_v21  ;;  %v3029_v24 = vcombine.low %v64_v21, %v64_v21  ;;  %v65_v26 = vld [vmem:[%s4902_s0 + $0xe0] sm:$0x77]  ;;  %v3844_v28 = vld [vmem:[%s4901_s1 + $0x210] sm:$0xff]   ;;  %v3848_v32 = vld [vmem:[%s4901_s1 + $0x258] sm:$0xff]  }
  0x1e   :  { %3324 = vmatprep.subr.bf16.mxu1 %v3782_v30  ;;  %v3032_v27 = vcombine.high %v65_v26, %v65_v26  ;;  %v3846_v30 = vld [vmem:[%s4901_s1 + $0x2d0] sm:$0xff]   ;;  %v3852_v36 = vld [vmem:[%s4901_s1 + $0x260] sm:$0xff]   ;;  %v3901_v21 = vld [vmem:[%s4901_s1 + $0x3a8] sm:$0xff]  }
  0x1f   :  { %3297 = vmatpush3.bf16.msra.mxu0 %v3781_v29  ;;  %v3031_v29 = vcombine.low %v65_v26, %v65_v26  ;;  %v3875_v57 = vld [vmem:[%s4901_s1 + $0x300] sm:$0xff]   ;;  %v3906_v26 = vld [vmem:[%s4901_s1 + $0x378] sm:$0xff]  }
  0x20   :  { %3338 = vmatprep.subr.bf16.mxu0 %v3787_v34  ;;  %v3850_v34 = vld [vmem:[%s4901_s1 + $0x2d8] sm:$0xff]  }
  0x21   :  { %3325 = vmatpush3.bf16.msra.mxu1 %v3786_v33  ;;  %v3849_v33 = vld [vmem:[%s4901_s1 + $0x218] sm:$0xff]  }
  0x22   :  { %1902 = vmatmul.mubr.bf16.vlgmr.msra.gmra.mrb[0].mxu0 %v3783_v31  ;;  %3366 = vmatprep.subr.bf16.mxu1 %v3792_v38  ;;  %v3847_v31 = vld [vmem:[%s4901_s1 + $0x290] sm:$0xff]   ;;  %v3854_v38 = vld [vmem:[%s4901_s1 + $0x2e0] sm:$0xff]  }
  0x23   :  { %3339 = vmatpush3.bf16.msra.mxu0 %v3791_v37  ;;  %1909 = vmatprep.mubr.bf16.mxu0 %v3026_v58  ;;  %v3853_v37 = vld [vmem:[%s4901_s1 + $0x220] sm:$0xff]  }
  0x24   :  { %1950 = vmatmul.mubr.bf16.vlgmr.msra.gmra.mrb[0].mxu1 %v3788_v35  ;;  %3340 = vmatprep.subr.bf16.mxu0 %v3794_v40  ;;  %v3851_v35 = vld [vmem:[%s4901_s1 + $0x298] sm:$0xff]   ;;  %v3856_v40 = vld [vmem:[%s4901_s1 + $0x268] sm:$0xff]   ;;  %v3876_v58 = vld [vmem:[%s4901_s1 + $0x3c0] sm:$0xff]  }
  0x25   :  { %3367 = vmatpush3.bf16.msra.mxu1 %v3793_v39  ;;  %1957 = vmatprep.mubr.bf16.mxu1 %v3028_v1  ;;  %v3855_v39 = vld [vmem:[%s4901_s1 + $0x2a0] sm:$0xff]   ;;  %v3882_v1 = vld [vmem:[%s4901_s1 + $0x388] sm:$0xff]  }
  0x26   :  { %3368 = vmatprep.subr.bf16.mxu1 %v3796_v42  ;;  %v3858_v42 = vld [vmem:[%s4901_s1 + $0x2e8] sm:$0xff]  }
  0x27   :  { %3341 = vmatpush3.bf16.msra.mxu0 %v3795_v41  ;;  %v3857_v41 = vld [vmem:[%s4901_s1 + $0x228] sm:$0xff]  }
  0x28   :  { %3342 = vmatprep.subr.bf16.mxu0 %v3798_v44  ;;  %v3860_v44 = vld [vmem:[%s4901_s1 + $0x270] sm:$0xff]  }
  0x29   :  { %3369 = vmatpush3.bf16.msra.mxu1 %v3797_v43  ;;  %v3859_v43 = vld [vmem:[%s4901_s1 + $0x2a8] sm:$0xff]  }
  0x2a   :  { %3370 = vmatprep.subr.bf16.mxu1 %v3800_v46  ;;  %1910 = vmatmul.mubr.bf16.gmra.mrb[4].mxu0 %v3025_v60  ;;  %v3862_v46 = vld [vmem:[%s4901_s1 + $0x2f0] sm:$0xff]   ;;  %v3878_v60 = vld [vmem:[%s4901_s1 + $0x348] sm:$0xff]  }
  0x2b   :  { %3343 = vmatpush3.bf16.msra.mxu0 %v3799_v45  ;;  %1997 = vmatprep.mubr.bf16.mxu0 %v3827_v10  ;;  %v3861_v45 = vld [vmem:[%s4901_s1 + $0x230] sm:$0xff]   ;;  %v3890_v10 = vld [vmem:[%s4901_s1 + $0x358] sm:$0xff]  }
  0x2c   :  { %3344 = vmatprep.subr.bf16.mxu0 %v3802_v48  ;;  %1958 = vmatmul.mubr.bf16.gmra.mrb[4].mxu1 %v3027_v3  ;;  %v3864_v48 = vld [vmem:[%s4901_s1 + $0x278] sm:$0xff]   ;;  %v3884_v3 = vld [vmem:[%s4901_s1 + $0x350] sm:$0xff]  }
  0x2d   :  { %3371 = vmatpush3.bf16.msra.mxu1 %v3801_v47  ;;  %2045 = vmatprep.mubr.bf16.mxu1 %v3832_v14  ;;  %v3863_v47 = vld [vmem:[%s4901_s1 + $0x2b0] sm:$0xff]   ;;  %v3894_v14 = vld [vmem:[%s4901_s1 + $0x360] sm:$0xff]  }
  0x2e   :  { %3372 = vmatprep.subr.bf16.mxu1 %v3804_v50  ;;  %v3866_v50 = vld [vmem:[%s4901_s1 + $0x2f8] sm:$0xff]  }
  0x2f   :  { %3345 = vmatpush3.bf16.msra.mxu0 %v3803_v49  ;;  %v3865_v49 = vld [vmem:[%s4901_s1 + $0x238] sm:$0xff]  }
  0x30   :  { %3346 = vmatprep.subr.bf16.mxu0 %v3806_v52  ;;  %v3869_v52 = vld [vmem:[%s4902_s0 + $0x24] ss:$100 sps:$4 sm:$0xff]  }
  0x31   :  { %3373 = vmatpush3.bf16.msra.mxu1 %v3805_v51  ;;  %v3867_v51 = vld [vmem:[%s4902_s0 + $0x20] ss:$100 sps:$4 sm:$0xff]  }
  0x32   :  { %3374 = vmatprep.subr.bf16.mxu1 %v3808_v54  ;;  %v3871_v54 = vld [vmem:[%s4901_s1 + $0x340] sm:$0xff]  }
  0x33   :  { %3347 = vmatpush3.bf16.msra.mxu0 %v3807_v53  ;;  %v3870_v53 = vld [vmem:[%s4901_s1 + $0x2b8] sm:$0xff]  }
  0x34   :  { %3348 = vmatprep.subr.bf16.mxu0 %v3810_v56  ;;  %v3874_v56 = vld [vmem:[%s4902_s0 + $0x2c] ss:$100 sps:$4 sm:$0xff]  }
  0x35   :  { %3375 = vmatpush3.bf16.msra.mxu1 %v3809_v55  ;;  %v3872_v55 = vld [vmem:[%s4902_s0 + $0x28] ss:$100 sps:$4 sm:$0xff]  }
  0x36   :  { %3376 = vmatprep.subr.bf16.mxu1 %v3814_v61  ;;  %v3879_v61 = vld [vmem:[%s4901_s1 + $0x308] sm:$0xff]  }
  0x37   :  { %3349 = vmatpush3.bf16.msra.mxu0 %v3812_v59  ;;  %v3877_v59 = vld [vmem:[%s4901_s1 + $0x380] sm:$0xff]  }
  0x38   :  { %3350 = vmatprep.subr.bf16.mxu0 %v3816_v63  ;;  %v66_v63 = vld [vmem:[%s4902_s0 + $0xe8] sm:$0x77] }
  0x39   :  { %3377 = vmatpush3.bf16.msra.mxu1 %v3815_v62  ;;  %v3880_v62 = vld [vmem:[%s4901_s1 + $0x3c8] sm:$0xff]   ;;  %v3034_v0 = vcombine.high %v66_v63, %v66_v63 }
  0x3a   :  { %3378 = vmatprep.subr.bf16.mxu1 %v3820_v4  ;;  %v67_v4 = vld [vmem:[%s4902_s0 + $0xf0] sm:$0x77] }
  0x3b   :  { %3351 = vmatpush3.bf16.msra.mxu0 %v3818_v2  ;;  %v3033_v2 = vcombine.low %v66_v63, %v66_v63  ;;  %v3943_v63 = vld [vmem:[%s4901_s1 + $0x4a8] sm:$0xff]  }
  0x3c   :  { %3352 = vmatprep.subr.bf16.mxu0 %v3822_v6  ;;  %v3886_v6 = vld [vmem:[%s4901_s1 + $0x310] sm:$0xff]  }
  0x3d   :  { %3379 = vmatpush3.bf16.msra.mxu1 %v3821_v5  ;;  %v3036_v5 = vcombine.high %v67_v4, %v67_v4 }
  0x3e   :  { %3380 = vmatprep.subr.bf16.mxu1 %v3824_v8  ;;  %v3888_v8 = vld [vmem:[%s4901_s1 + $0x3d0] sm:$0xff]  }
  0x3f   :  { %3353 = vmatpush3.bf16.msra.mxu0 %v3823_v7  ;;  %v3035_v7 = vcombine.low %v67_v4, %v67_v4  ;;  %v3948_v4 = vld [vmem:[%s4901_s1 + $0x478] sm:$0xff]  }
  0x40   :  { %3394 = vmatprep.subr.bf16.mxu0 %v3829_v12  ;;  %v3892_v12 = vld [vmem:[%s4901_s1 + $0x3d8] sm:$0xff]  }
  0x41   :  { %3381 = vmatpush3.bf16.msra.mxu1 %v3828_v11  ;;  %v3891_v11 = vld [vmem:[%s4901_s1 + $0x318] sm:$0xff]  }
  0x42   :  { %1998 = vmatmul.mubr.bf16.vlgmr.msra.gmra.mrb[8].mxu0 %v3825_v9  ;;  %3422 = vmatprep.subr.bf16.mxu1 %v3834_v16  ;;  %v3889_v9 = vld [vmem:[%s4901_s1 + $0x390] sm:$0xff]   ;;  %v3896_v16 = vld [vmem:[%s4901_s1 + $0x3e0] sm:$0xff]  }
  0x43   :  { %3395 = vmatpush3.bf16.msra.mxu0 %v3833_v15  ;;  %2005 = vmatprep.mubr.bf16.mxu0 %v3030_v22  ;;  %v3895_v15 = vld [vmem:[%s4901_s1 + $0x320] sm:$0xff]   ;;  %v3902_v22 = vld [vmem:[%s4901_s1 + $0x370] sm:$0xff]  }
  0x44   :  { %2046 = vmatmul.mubr.bf16.vlgmr.msra.gmra.mrb[8].mxu1 %v3830_v13  ;;  %3396 = vmatprep.subr.bf16.mxu0 %v3836_v18  ;;  %v3893_v13 = vld [vmem:[%s4901_s1 + $0x398] sm:$0xff]   ;;  %v3898_v18 = vld [vmem:[%s4901_s1 + $0x368] sm:$0xff]  }
  0x45   :  { %3423 = vmatpush3.bf16.msra.mxu1 %v3835_v17  ;;  %2053 = vmatprep.mubr.bf16.mxu1 %v3032_v27  ;;  %v3897_v17 = vld [vmem:[%s4901_s1 + $0x3a0] sm:$0xff]   ;;  %v3907_v27 = vld [vmem:[%s4901_s1 + $0x338] sm:$0xff]  }
  0x46   :  { %3424 = vmatprep.subr.bf16.mxu1 %v3838_v20  ;;  %v3900_v20 = vld [vmem:[%s4901_s1 + $0x3e8] sm:$0xff]  }
  0x47   :  { %3397 = vmatpush3.bf16.msra.mxu0 %v3837_v19  ;;  %v3899_v19 = vld [vmem:[%s4901_s1 + $0x328] sm:$0xff]  }
  0x48   :  { %3398 = vmatprep.subr.bf16.mxu0 %v3842_v25  ;;  %v3905_v25 = vld [vmem:[%s4901_s1 + $0x3b0] sm:$0xff]  }
  0x49   :  { %3425 = vmatpush3.bf16.msra.mxu1 %v3840_v23  ;;  %v3903_v23 = vld [vmem:[%s4901_s1 + $0x330] sm:$0xff]  }
  0x4a   :  { %2006 = vmatmul.mubr.bf16.gmra.mrb[12].mxu0 %v3029_v24  ;;  %3426 = vmatprep.subr.bf16.mxu1 %v3846_v30  ;;  %v3904_v24 = vld [vmem:[%s4901_s1 + $0x3f0] sm:$0xff]  }
  0x4b   :  { %3399 = vmatpush3.bf16.msra.mxu0 %v3844_v28  ;;  %2093 = vmatprep.mubr.bf16.mxu0 %v3869_v52  ;;  %v3908_v28 = vld [vmem:[%s4901_s1 + $0x3f8] sm:$0xff]  }
  0x4c   :  { %2054 = vmatmul.mubr.bf16.gmra.mrb[12].mxu1 %v3031_v29  ;;  %3400 = vmatprep.subr.bf16.mxu0 %v3848_v32  ;;  %v3909_v29 = vld [vmem:[%s4902_s0 + $0x30] ss:$100 sps:$4 sm:$0xff]   ;;  %v3913_v32 = vld [vmem:[%s4901_s1 + $0x440] sm:$0xff]   ;;  %v3932_v52 = vld [vmem:[%s4901_s1 + $0x458] sm:$0xff]  }
  0x4d   :  { %3427 = vmatpush3.bf16.msra.mxu1 %v3847_v31  ;;  %2141 = vmatprep.mubr.bf16.mxu1 %v3874_v56  ;;  %v3911_v30 = vld [vmem:[%s4902_s0 + $0x34] ss:$100 sps:$4 sm:$0xff]   ;;  %v3936_v56 = vld [vmem:[%s4901_s1 + $0x460] sm:$0xff]  }
  0x4e   :  { %3428 = vmatprep.subr.bf16.mxu1 %v3850_v34  ;;  %v3912_v31 = vld [vmem:[%s4901_s1 + $0x3b8] sm:$0xff]  }
  0x4f   :  { %3401 = vmatpush3.bf16.msra.mxu0 %v3849_v33  ;;  %v3914_v33 = vld [vmem:[%s4902_s0 + $0x38] ss:$100 sps:$4 sm:$0xff]  }
  0x50   :  { %3402 = vmatprep.subr.bf16.mxu0 %v3852_v36  ;;  %v3916_v34 = vld [vmem:[%s4902_s0 + $0x3c] ss:$100 sps:$4 sm:$0xff]  }
  0x51   :  { %3429 = vmatpush3.bf16.msra.mxu1 %v3851_v35  ;;  %v3917_v35 = vld [vmem:[%s4901_s1 + $0x400] sm:$0xff]  }
  0x52   :  { %3430 = vmatprep.subr.bf16.mxu1 %v3854_v38  ;;  %v3918_v36 = vld [vmem:[%s4901_s1 + $0x4c0] sm:$0xff]   ;;  %v3920_v38 = vld [vmem:[%s4901_s1 + $0x448] sm:$0xff]  }
  0x53   :  { %3403 = vmatpush3.bf16.msra.mxu0 %v3853_v37  ;;  %v3919_v37 = vld [vmem:[%s4901_s1 + $0x480] sm:$0xff]  }
  0x54   :  { %3404 = vmatprep.subr.bf16.mxu0 %v3856_v40  ;;  %v3922_v40 = vld [vmem:[%s4901_s1 + $0x4c8] sm:$0xff]  }
  0x55   :  { %3431 = vmatpush3.bf16.msra.mxu1 %v3855_v39  ;;  %v3921_v39 = vld [vmem:[%s4901_s1 + $0x408] sm:$0xff]  }
  0x56   :  { %3432 = vmatprep.subr.bf16.mxu1 %v3858_v42 }
  0x57   :  { %3405 = vmatpush3.bf16.msra.mxu0 %v3857_v41  ;;  %v68_v41 = vld [vmem:[%s4902_s0 + $0xf8] sm:$0x77] }
  0x58   :  { %3406 = vmatprep.subr.bf16.mxu0 %v3860_v44  ;;  %v3038_v42 = vcombine.high %v68_v41, %v68_v41  ;;  %v3037_v44 = vcombine.low %v68_v41, %v68_v41  ;;  %v3985_v41 = vld [vmem:[%s4901_s1 + $0x5a8] sm:$0xff]  }
  0x59   :  { %3433 = vmatpush3.bf16.msra.mxu1 %v3859_v43  ;;  %v3924_v43 = vld [vmem:[%s4901_s1 + $0x488] sm:$0xff]  }
  0x5a   :  { %3434 = vmatprep.subr.bf16.mxu1 %v3862_v46  ;;  %v69_v46 = vld [vmem:[%s4902_s0 + $0x100] sm:$0x77] }
  0x5b   :  { %3407 = vmatpush3.bf16.msra.mxu0 %v3861_v45  ;;  %v3926_v45 = vld [vmem:[%s4901_s1 + $0x450] sm:$0xff]  }
  0x5c   :  { %3408 = vmatprep.subr.bf16.mxu0 %v3864_v48  ;;  %v3928_v48 = vld [vmem:[%s4901_s1 + $0x410] sm:$0xff]  }
  0x5d   :  { %3435 = vmatpush3.bf16.msra.mxu1 %v3863_v47  ;;  %v3040_v47 = vcombine.high %v69_v46, %v69_v46 }
  0x5e   :  { %3436 = vmatprep.subr.bf16.mxu1 %v3866_v50  ;;  %v3930_v50 = vld [vmem:[%s4901_s1 + $0x4d0] sm:$0xff]  }
  0x5f   :  { %3409 = vmatpush3.bf16.msra.mxu0 %v3865_v49  ;;  %v3039_v49 = vcombine.low %v69_v46, %v69_v46  ;;  %v3990_v46 = vld [vmem:[%s4901_s1 + $0x578] sm:$0xff]  }
  0x60   :  { %3450 = vmatprep.subr.bf16.mxu0 %v3871_v54  ;;  %v3934_v54 = vld [vmem:[%s4901_s1 + $0x4d8] sm:$0xff]  }
  0x61   :  { %3437 = vmatpush3.bf16.msra.mxu1 %v3870_v53  ;;  %v3933_v53 = vld [vmem:[%s4901_s1 + $0x418] sm:$0xff]  }
  0x62   :  { %2094 = vmatmul.mubr.bf16.vlgmr.msra.gmra.mrb[16].mxu0 %v3867_v51  ;;  %3478 = vmatprep.subr.bf16.mxu1 %v3876_v58  ;;  %v3931_v51 = vld [vmem:[%s4901_s1 + $0x490] sm:$0xff]   ;;  %v3938_v58 = vld [vmem:[%s4901_s1 + $0x4e0] sm:$0xff]  }
  0x63   :  { %3451 = vmatpush3.bf16.msra.mxu0 %v3875_v57  ;;  %2101 = vmatprep.mubr.bf16.mxu0 %v3034_v0  ;;  %v3937_v57 = vld [vmem:[%s4901_s1 + $0x420] sm:$0xff]   ;;  %v3944_v0 = vld [vmem:[%s4901_s1 + $0x470] sm:$0xff]  }
  0x64   :  { %2142 = vmatmul.mubr.bf16.vlgmr.msra.gmra.mrb[16].mxu1 %v3872_v55  ;;  %3452 = vmatprep.subr.bf16.mxu0 %v3878_v60  ;;  %v3935_v55 = vld [vmem:[%s4901_s1 + $0x498] sm:$0xff]   ;;  %v3940_v60 = vld [vmem:[%s4901_s1 + $0x468] sm:$0xff]  }
  0x65   :  { %3479 = vmatpush3.bf16.msra.mxu1 %v3877_v59  ;;  %2149 = vmatprep.mubr.bf16.mxu1 %v3036_v5  ;;  %v3939_v59 = vld [vmem:[%s4901_s1 + $0x4a0] sm:$0xff]   ;;  %v3949_v5 = vld [vmem:[%s4901_s1 + $0x438] sm:$0xff]  }
  0x66   :  { %3480 = vmatprep.subr.bf16.mxu1 %v3880_v62  ;;  %v3942_v62 = vld [vmem:[%s4901_s1 + $0x4e8] sm:$0xff]  }
  0x67   :  { %3453 = vmatpush3.bf16.msra.mxu0 %v3879_v61  ;;  %v3941_v61 = vld [vmem:[%s4901_s1 + $0x428] sm:$0xff]  }
  0x68   :  { %3454 = vmatprep.subr.bf16.mxu0 %v3884_v3  ;;  %v3947_v3 = vld [vmem:[%s4901_s1 + $0x4b0] sm:$0xff]  }
  0x69   :  { %3481 = vmatpush3.bf16.msra.mxu1 %v3882_v1  ;;  %v3945_v1 = vld [vmem:[%s4901_s1 + $0x430] sm:$0xff]  }
  0x6a   :  { %2102 = vmatmul.mubr.bf16.gmra.mrb[20].mxu0 %v3033_v2  ;;  %3482 = vmatprep.subr.bf16.mxu1 %v3888_v8  ;;  %v3946_v2 = vld [vmem:[%s4901_s1 + $0x4f0] sm:$0xff]   ;;  %v3953_v8 = vld [vmem:[%s4902_s0 + $0x44] ss:$100 sps:$4 sm:$0xff]  }
  0x6b   :  { %3455 = vmatpush3.bf16.msra.mxu0 %v3886_v6  ;;  %2189 = vmatprep.mubr.bf16.mxu0 %v3911_v30  ;;  %v3950_v6 = vld [vmem:[%s4901_s1 + $0x4f8] sm:$0xff]  }
  0x6c   :  { %2150 = vmatmul.mubr.bf16.gmra.mrb[20].mxu1 %v3035_v7  ;;  %3456 = vmatprep.subr.bf16.mxu0 %v3890_v10  ;;  %v3951_v7 = vld [vmem:[%s4902_s0 + $0x40] ss:$100 sps:$4 sm:$0xff]   ;;  %v3974_v30 = vld [vmem:[%s4901_s1 + $0x558] sm:$0xff]  }
  0x6d   :  { %3483 = vmatpush3.bf16.msra.mxu1 %v3889_v9  ;;  %2237 = vmatprep.mubr.bf16.mxu1 %v3916_v34  ;;  %v3954_v9 = vld [vmem:[%s4901_s1 + $0x4b8] sm:$0xff]   ;;  %v3955_v10 = vld [vmem:[%s4901_s1 + $0x540] sm:$0xff]  }
  0x6e   :  { %3484 = vmatprep.subr.bf16.mxu1 %v3892_v12  ;;  %v3958_v12 = vld [vmem:[%s4902_s0 + $0x4c] ss:$100 sps:$4 sm:$0xff]   ;;  %v3978_v34 = vld [vmem:[%s4901_s1 + $0x560] sm:$0xff]  }
  0x6f   :  { %3457 = vmatpush3.bf16.msra.mxu0 %v3891_v11  ;;  %v3956_v11 = vld [vmem:[%s4902_s0 + $0x48] ss:$100 sps:$4 sm:$0xff]  }
  0x70   :  { %3458 = vmatprep.subr.bf16.mxu0 %v3894_v14  ;;  %v3960_v14 = vld [vmem:[%s4901_s1 + $0x5c0] sm:$0xff]  }
  0x71   :  { %3485 = vmatpush3.bf16.msra.mxu1 %v3893_v13  ;;  %v3959_v13 = vld [vmem:[%s4901_s1 + $0x500] sm:$0xff]  }
  0x72   :  { %3486 = vmatprep.subr.bf16.mxu1 %v3896_v16  ;;  %v3962_v16 = vld [vmem:[%s4901_s1 + $0x548] sm:$0xff]  }
  0x73   :  { %3459 = vmatpush3.bf16.msra.mxu0 %v3895_v15  ;;  %v3961_v15 = vld [vmem:[%s4901_s1 + $0x580] sm:$0xff]  }
  0x74   :  { %3460 = vmatprep.subr.bf16.mxu0 %v3898_v18  ;;  %v3964_v18 = vld [vmem:[%s4901_s1 + $0x5c8] sm:$0xff]  }
  0x75   :  { %3487 = vmatpush3.bf16.msra.mxu1 %v3897_v17  ;;  %v3963_v17 = vld [vmem:[%s4901_s1 + $0x508] sm:$0xff]  }
  0x76   :  { %3488 = vmatprep.subr.bf16.mxu1 %v3900_v20 }
  0x77   :  { %3461 = vmatpush3.bf16.msra.mxu0 %v3899_v19  ;;  %v70_v19 = vld [vmem:[%s4902_s0 + $0x108] sm:$0x77] }
  0x78   :  { %3462 = vmatprep.subr.bf16.mxu0 %v3902_v22  ;;  %v3042_v20 = vcombine.high %v70_v19, %v70_v19  ;;  %v3041_v22 = vcombine.low %v70_v19, %v70_v19 }
  0x79   :  { %3489 = vmatpush3.bf16.msra.mxu1 %v3901_v21  ;;  %v3966_v21 = vld [vmem:[%s4901_s1 + $0x588] sm:$0xff]  }
  0x7a   :  { %3490 = vmatprep.subr.bf16.mxu1 %v3904_v24  ;;  %v71_v24 = vld [vmem:[%s4902_s0 + $0x110] sm:$0x77] }
  0x7b   :  { %3463 = vmatpush3.bf16.msra.mxu0 %v3903_v23  ;;  %v3968_v23 = vld [vmem:[%s4901_s1 + $0x550] sm:$0xff]  }
  0x7c   :  { %3464 = vmatprep.subr.bf16.mxu0 %v3906_v26  ;;  %v3970_v26 = vld [vmem:[%s4901_s1 + $0x510] sm:$0xff]  }
  0x7d   :  { %3491 = vmatpush3.bf16.msra.mxu1 %v3905_v25  ;;  %v3044_v25 = vcombine.high %v71_v24, %v71_v24 }
  0x7e   :  { %3492 = vmatprep.subr.bf16.mxu1 %v3908_v28  ;;  %v3972_v28 = vld [vmem:[%s4901_s1 + $0x5d0] sm:$0xff]  }
  0x7f   :  { %3465 = vmatpush3.bf16.msra.mxu0 %v3907_v27  ;;  %v3043_v27 = vcombine.low %v71_v24, %v71_v24 }
  0x80   :  { %3506 = vmatprep.subr.bf16.mxu0 %v3913_v32  ;;  %v3976_v32 = vld [vmem:[%s4901_s1 + $0x5d8] sm:$0xff]  }
  0x81   :  { %3493 = vmatpush3.bf16.msra.mxu1 %v3912_v31  ;;  %v3975_v31 = vld [vmem:[%s4901_s1 + $0x518] sm:$0xff]  }
  0x82   :  { %2190 = vmatmul.mubr.bf16.vlgmr.msra.gmra.mrb[24].mxu0 %v3909_v29  ;;  %3534 = vmatprep.subr.bf16.mxu1 %v3918_v36  ;;  %v3973_v29 = vld [vmem:[%s4901_s1 + $0x590] sm:$0xff]   ;;  %v3980_v36 = vld [vmem:[%s4901_s1 + $0x5e0] sm:$0xff]  }
  0x83   :  { %3507 = vmatpush3.bf16.msra.mxu0 %v3917_v35  ;;  %2197 = vmatprep.mubr.bf16.mxu0 %v3038_v42  ;;  %v3979_v35 = vld [vmem:[%s4901_s1 + $0x520] sm:$0xff]   ;;  %v3986_v42 = vld [vmem:[%s4901_s1 + $0x570] sm:$0xff]  }
  0x84   :  { %2238 = vmatmul.mubr.bf16.vlgmr.msra.gmra.mrb[24].mxu1 %v3914_v33  ;;  %3508 = vmatprep.subr.bf16.mxu0 %v3920_v38  ;;  %v3977_v33 = vld [vmem:[%s4901_s1 + $0x598] sm:$0xff]   ;;  %v3982_v38 = vld [vmem:[%s4901_s1 + $0x568] sm:$0xff]  }
  0x85   :  { %3535 = vmatpush3.bf16.msra.mxu1 %v3919_v37  ;;  %2245 = vmatprep.mubr.bf16.mxu1 %v3040_v47  ;;  %v3981_v37 = vld [vmem:[%s4901_s1 + $0x5a0] sm:$0xff]   ;;  %v3991_v47 = vld [vmem:[%s4901_s1 + $0x538] sm:$0xff]  }
  0x86   :  { %3536 = vmatprep.subr.bf16.mxu1 %v3922_v40  ;;  %v3984_v40 = vld [vmem:[%s4901_s1 + $0x5e8] sm:$0xff]  }
  0x87   :  { %3509 = vmatpush3.bf16.msra.mxu0 %v3921_v39  ;;  %v3983_v39 = vld [vmem:[%s4901_s1 + $0x528] sm:$0xff]  }
  0x88   :  { %3510 = vmatprep.subr.bf16.mxu0 %v3926_v45  ;;  %v3989_v45 = vld [vmem:[%s4901_s1 + $0x5b0] sm:$0xff]  }
  0x89   :  { %3537 = vmatpush3.bf16.msra.mxu1 %v3924_v43  ;;  %v3987_v43 = vld [vmem:[%s4901_s1 + $0x530] sm:$0xff]  }
  0x8a   :  { %2198 = vmatmul.mubr.bf16.gmra.mrb[28].mxu0 %v3037_v44  ;;  %3538 = vmatprep.subr.bf16.mxu1 %v3930_v50  ;;  %v3988_v44 = vld [vmem:[%s4901_s1 + $0x5f0] sm:$0xff]  }
  0x8b   :  { %3511 = vmatpush3.bf16.msra.mxu0 %v3928_v48  ;;  %2285 = vmatprep.mubr.bf16.mxu0 %v3953_v8  ;;  %v3992_v48 = vld [vmem:[%s4901_s1 + $0x5f8] sm:$0xff]  }
  0x8c   :  { %2246 = vmatmul.mubr.bf16.gmra.mrb[28].mxu1 %v3039_v49  ;;  %3512 = vmatprep.subr.bf16.mxu0 %v3932_v52  ;;  %v3993_v49 = vld [vmem:[%s4902_s0 + $0x50] ss:$100 sps:$4 sm:$0xff]   ;;  %v3997_v52 = vld [vmem:[%s4901_s1 + $0x600] sm:$0xff]  }
  0x8d   :  { %3539 = vmatpush3.bf16.msra.mxu1 %v3931_v51  ;;  %2333 = vmatprep.mubr.bf16.mxu1 %v3958_v12  ;;  %v3995_v50 = vld [vmem:[%s4902_s0 + $0x54] ss:$100 sps:$4 sm:$0xff]  }
  0x8e   :  { %3540 = vmatprep.subr.bf16.mxu1 %v3934_v54  ;;  %v3996_v51 = vld [vmem:[%s4901_s1 + $0x5b8] sm:$0xff]  }
  0x8f   :  { %3513 = vmatpush3.bf16.msra.mxu0 %v3933_v53  ;;  %v3998_v53 = vld [vmem:[%s4902_s0 + $0x58] ss:$100 sps:$4 sm:$0xff]  }
  0x90   :  { %3514 = vmatprep.subr.bf16.mxu0 %v3936_v56  ;;  %v4000_v54 = vld [vmem:[%s4902_s0 + $0x5c] ss:$100 sps:$4 sm:$0xff]  }
  0x91   :  { %3541 = vmatpush3.bf16.msra.mxu1 %v3935_v55  ;;  %v4001_v55 = vld [vmem:[%s4901_s1 + $0x608] sm:$0xff]   ;;  %v72_v56 = vld [vmem:[%s4902_s0 + $0x118] sm:$0x77] }
  0x92   :  { %3542 = vmatprep.subr.bf16.mxu1 %v3938_v58  ;;  %v4004_v58 = vld [vmem:[%s4901_s1 + $0x610] sm:$0xff]  }
  0x93   :  { %3515 = vmatpush3.bf16.msra.mxu0 %v3937_v57  ;;  %v3046_v57 = vcombine.high %v72_v56, %v72_v56 }
  0x94   :  { %3516 = vmatprep.subr.bf16.mxu0 %v3940_v60  ;;  %v3045_v60 = vcombine.low %v72_v56, %v72_v56 }
  0x95   :  { %3543 = vmatpush3.bf16.msra.mxu1 %v3939_v59  ;;  %v73_v59 = vld [vmem:[%s4902_s0 + $0x120] sm:$0x77] }
  0x96   :  { %3544 = vmatprep.subr.bf16.mxu1 %v3942_v62  ;;  %v4008_v62 = vld [vmem:[%s4902_s0 + $0x60] ss:$100 sps:$4 sm:$0xff]  }
  0x97   :  { %3517 = vmatpush3.bf16.msra.mxu0 %v3941_v61  ;;  %v3048_v61 = vcombine.high %v73_v59, %v73_v59 }
  0x98   :  { %3518 = vmatprep.subr.bf16.mxu0 %v3944_v0  ;;  %v3047_v0 = vcombine.low %v73_v59, %v73_v59 }
  0x99   :  { %3545 = vmatpush3.bf16.msra.mxu1 %v3943_v63  ;;  %v4007_v63 = vld [vmem:[%s4901_s1 + $0x618] sm:$0xff]  }
  0x9a   :  { %3546 = vmatprep.subr.bf16.mxu1 %v3946_v2 }
  0x9b   :  { %3519 = vmatpush3.bf16.msra.mxu0 %v3945_v1  ;;  %v4009_v1 = vld [vmem:[%s4902_s0 + $0x128] ss:$0 sps:$4 sm:$0x77]  }
  0x9c   :  { %3520 = vmatprep.subr.bf16.mxu0 %v3948_v4 }
  0x9d   :  { %3547 = vmatpush3.bf16.msra.mxu1 %v3947_v3  ;;  %v2999_v3 = vld [vmem:[%s4903_s2] ss:$0 sm:$0xff] }
  0x9e   :  { %3548 = vmatprep.subr.bf16.mxu1 %v3950_v6 }
  0x9f   :  { %3521 = vmatpush3.bf16.msra.mxu0 %v3949_v5 }
  0xa0   :  { %3562 = vmatprep.subr.bf16.mxu0 %v3955_v10 }
  0xa1   :  { %3549 = vmatpush3.bf16.msra.mxu1 %v3954_v9 }
  0xa2   :  { %2286 = vmatmul.mubr.bf16.vlgmr.msra.gmra.mrb[32].mxu0 %v3951_v7  ;;  %3590 = vmatprep.subr.bf16.mxu1 %v3960_v14 }
  0xa3   :  { %3563 = vmatpush3.bf16.msra.mxu0 %v3959_v13  ;;  %2293 = vmatprep.mubr.bf16.mxu0 %v3042_v20 }
  0xa4   :  { %2334 = vmatmul.mubr.bf16.vlgmr.msra.gmra.mrb[32].mxu1 %v3956_v11  ;;  %3564 = vmatprep.subr.bf16.mxu0 %v3962_v16 }
  0xa5   :  { %3591 = vmatpush3.bf16.msra.mxu1 %v3961_v15  ;;  %2341 = vmatprep.mubr.bf16.mxu1 %v3044_v25 }
  0xa6   :  { %3592 = vmatprep.subr.bf16.mxu1 %v3964_v18 }
  0xa7   :  { %3565 = vmatpush3.bf16.msra.mxu0 %v3963_v17 }
  0xa8   :  { %3566 = vmatprep.subr.bf16.mxu0 %v3968_v23 }
  0xa9   :  { %3593 = vmatpush3.bf16.msra.mxu1 %v3966_v21 }
  0xaa   :  { %2294 = vmatmul.mubr.bf16.gmra.mrb[36].mxu0 %v3041_v22  ;;  %3594 = vmatprep.subr.bf16.mxu1 %v3972_v28 }
  0xab   :  { %3567 = vmatpush3.bf16.msra.mxu0 %v3970_v26  ;;  %2381 = vmatprep.mubr.bf16.mxu0 %v3995_v50 }
  0xac   :  { %2342 = vmatmul.mubr.bf16.gmra.mrb[36].mxu1 %v3043_v27  ;;  %3568 = vmatprep.subr.bf16.mxu0 %v3974_v30 }
  0xad   :  { %3595 = vmatpush3.bf16.msra.mxu1 %v3973_v29  ;;  %2429 = vmatprep.mubr.bf16.mxu1 %v4000_v54 }
  0xae   :  { %3596 = vmatprep.subr.bf16.mxu1 %v3976_v32 }
  0xaf   :  { %3569 = vmatpush3.bf16.msra.mxu0 %v3975_v31 }
  0xb0   :  { %3570 = vmatprep.subr.bf16.mxu0 %v3978_v34 }
  0xb1   :  { %3597 = vmatpush3.bf16.msra.mxu1 %v3977_v33 }
  0xb2   :  { %3598 = vmatprep.subr.bf16.mxu1 %v3980_v36 }
  0xb3   :  { %3571 = vmatpush3.bf16.msra.mxu0 %v3979_v35 }
  0xb4   :  { %3572 = vmatprep.subr.bf16.mxu0 %v3982_v38 }
  0xb5   :  { %3599 = vmatpush3.bf16.msra.mxu1 %v3981_v37 }
  0xb6   :  { %3600 = vmatprep.subr.bf16.mxu1 %v3984_v40 }
  0xb7   :  { %3573 = vmatpush3.bf16.msra.mxu0 %v3983_v39 }
  0xb8   :  { %3574 = vmatprep.subr.bf16.mxu0 %v3986_v42 }
  0xb9   :  { %3601 = vmatpush3.bf16.msra.mxu1 %v3985_v41 }
  0xba   :  { %3602 = vmatprep.subr.bf16.mxu1 %v3988_v44 }
  0xbb   :  { %3575 = vmatpush3.bf16.msra.mxu0 %v3987_v43 }
  0xbc   :  { %3576 = vmatprep.subr.bf16.mxu0 %v3990_v46 }
  0xbd   :  { %3603 = vmatpush3.bf16.msra.mxu1 %v3989_v45 }
  0xbe   :  { %3604 = vmatprep.subr.bf16.mxu1 %v3992_v48 }
  0xbf   :  { %3577 = vmatpush3.bf16.msra.mxu0 %v3991_v47 }
  0xc0   :  { %3662 = vmatprep.subr.bf16.mxu0 %v3997_v52 }
  0xc1   :  { %3605 = vmatpush3.bf16.msra.mxu1 %v3996_v51 }
  0xc2   :  { %2382 = vmatmul.mubr.bf16.vlgmr.msra.gmra.mrb[40].mxu0 %v3993_v49 }
  0xc3   :  { %3663 = vmatpush3.bf16.msra.mxu0 %v3997_v52  ;;  %2389 = vmatprep.mubr.bf16.mxu0 %v3046_v57 }
  0xc4   :  { %2430 = vmatmul.mubr.bf16.vlgmr.msra.gmra.mrb[40].mxu1 %v3998_v53  ;;  %3664 = vmatprep.subr.bf16.mxu0 %v4001_v55 }
  0xc5   :  { %2437 = vmatprep.mubr.bf16.mxu1 %v3048_v61 }
  0xc7   :  { %3665 = vmatpush3.bf16.msra.mxu0 %v4001_v55 }
  0xc8   :  { %3666 = vmatprep.subr.bf16.mxu0 %v4004_v58 }
  0xca   :  { %2390 = vmatmul.mubr.bf16.gmra.mrb[44].mxu0 %v3045_v60 }
  0xcb   :  { %3670 = vmatprep.mubr.msk.bf16.mxu0 %vm1862_vm0, %v4008_v62  ;;  %3667 = vmatpush3.bf16.msra.mxu0 %v4004_v58 }
  0xcc   :  { %3668 = vmatprep.subr.bf16.mxu0 %v4007_v63  ;;  %2438 = vmatmul.mubr.bf16.gmra.mrb[44].mxu1 %v3047_v0 }
  0xcf   :  { %3669 = vmatpush3.bf16.msra.mxu0 %v4007_v63 }
  0xd2   :  { %3671 = vmatmul.mubr.msk.bf16.vlgmr.msra.gmra.mrb[48].mxu0 %vm1862_vm0, %v4009_v1 }
  0xf5   :  { %v3298_v2 = vpop.f32.mrb[0].mxu0 }
  0xf6   :  { %v3299_v4 = vpop.f32.mrb[1].mxu0 }
  0xf7   :  { %v3300_v5 = vadd.f32 %v3299_v4, %v3298_v2  ;;  %v3301_v6 = vpop.f32.mrb[2].mxu0  ;;  %v3326_v7 = vpop.f32.mrb[0].mxu1 }
  0xf8   :  { %v3302_v8 = vpop.f32.mrb[3].mxu0  ;;  %v3327_v11 = vpop.f32.mrb[1].mxu1 }
  0xf9   :  { %v1904_v9 = vadd.f32 %v3300_v5, %v2999_v3  ;;  %v3303_v10 = vadd.f32 %v3302_v8, %v3301_v6  ;;  %v3328_v12 = vadd.f32 %v3327_v11, %v3326_v7  ;;  %v3329_v13 = vpop.f32.mrb[2].mxu1 }
  0xfa   :  { %v3330_v15 = vpop.f32.mrb[3].mxu1 }
  0xfb   :  { %v1907_v14 = vadd.f32 %v3303_v10, %v2999_v3  ;;  %v1952_v16 = vadd.f32 %v3328_v12, %v1904_v9  ;;  %v3331_v17 = vadd.f32 %v3330_v15, %v3329_v13  ;;  %v4010_v10 = vld [vmem:[%s4904_s3] sm:$0xff]  }
  0xfc   :  { %3678 = vmatprep.mubr.msk.bf16.mxu0 %vm2506_vm1, %v4010_v10 }
  0xfd   :  { %v1955_v18 = vadd.f32 %v3331_v17, %v1907_v14  ;;  %v3304_v19 = vpop.f32.mrb[4].mxu0 }
  0xfe   :  { %v3305_v20 = vpop.f32.mrb[5].mxu0 }
  0xff   :  { %v3306_v21 = vadd.f32 %v3305_v20, %v3304_v19  ;;  %v3307_v22 = vpop.f32.mrb[6].mxu0  ;;  %v3332_v25 = vpop.f32.mrb[4].mxu1 }
 0x100   :  { %v3308_v23 = vpop.f32.mrb[7].mxu0  ;;  %v3333_v26 = vpop.f32.mrb[5].mxu1 }
 0x101   :  { %v1912_v24 = vadd.f32 %v3306_v21, %v2999_v3  ;;  %v3334_v27 = vadd.f32 %v3333_v26, %v3332_v25  ;;  %v3335_v28 = vpop.f32.mrb[6].mxu1  ;;  %v4018_v25 = vld [vmem:[%s4907_s6 + $0x8] sm:$0xff]   ;;  %v4020_v26 = vld [vmem:[%s4907_s6 + $0x10] sm:$0xff]  }
 0x102   :  { %v3336_v29 = vpop.f32.mrb[7].mxu1  ;;  %v4022_v28 = vld [vmem:[%s4907_s6 + $0x18] sm:$0xff]  }
 0x103   :  { %v1960_v30 = vadd.f32 %v3334_v27, %v1912_v24  ;;  %v4016_v24 = vld [vmem:[%s4907_s6] sm:$0xff]  }
 0x104   :  { %3690 = vmatprep.subr.bf16.mxu1 %v4016_v24 }
 0x105   :  { %3691 = vmatpush3.bf16.msra.mxu1 %v4016_v24 }
 0x106   :  { %3692 = vmatprep.subr.bf16.mxu1 %v4018_v25 }
 0x109   :  { %3693 = vmatpush3.bf16.msra.mxu1 %v4018_v25 }
 0x10a   :  { %3694 = vmatprep.subr.bf16.mxu1 %v4020_v26 }
 0x10d   :  { %3695 = vmatpush3.bf16.msra.mxu1 %v4020_v26 }
 0x10e   :  { %3696 = vmatprep.subr.bf16.mxu1 %v4022_v28 }
 0x111   :  { %3697 = vmatpush3.bf16.msra.mxu1 %v4022_v28 }
 0x115   :  { %v3354_v31 = vpop.f32.mrb[8].mxu0 }
 0x116   :  { %v3355_v32 = vpop.f32.mrb[9].mxu0 }
 0x117   :  { %v3356_v33 = vadd.f32 %v3355_v32, %v3354_v31  ;;  %v3357_v34 = vpop.f32.mrb[10].mxu0  ;;  %v3382_v35 = vpop.f32.mrb[8].mxu1 }
 0x118   :  { %v3358_v36 = vpop.f32.mrb[11].mxu0  ;;  %v3383_v39 = vpop.f32.mrb[9].mxu1 }
 0x119   :  { %v2000_v37 = vadd.f32 %v3356_v33, %v1952_v16  ;;  %v3359_v38 = vadd.f32 %v3358_v36, %v3357_v34  ;;  %v3384_v40 = vadd.f32 %v3383_v39, %v3382_v35  ;;  %v3385_v41 = vpop.f32.mrb[10].mxu1 }
 0x11a   :  { %v3386_v43 = vpop.f32.mrb[11].mxu1 }
 0x11b   :  { %v2003_v42 = vadd.f32 %v3359_v38, %v1955_v18  ;;  %v2048_v44 = vadd.f32 %v3384_v40, %v2000_v37  ;;  %v3387_v45 = vadd.f32 %v3386_v43, %v3385_v41  ;;  %v4024_v37 = vld [vmem:[%s4907_s6 + $0x20] sm:$0xff]  }
 0x11c   :  { %3698 = vmatprep.subr.bf16.mxu1 %v4024_v37 }
 0x11d   :  { %v2051_v46 = vadd.f32 %v3387_v45, %v2003_v42  ;;  %v3360_v47 = vpop.f32.mrb[12].mxu0  ;;  %3699 = vmatpush3.bf16.msra.mxu1 %v4024_v37 }
 0x11e   :  { %v3361_v48 = vpop.f32.mrb[13].mxu0 }
 0x11f   :  { %v3362_v49 = vadd.f32 %v3361_v48, %v3360_v47  ;;  %v3388_v50 = vpop.f32.mrb[12].mxu1  ;;  %v3363_v51 = vpop.f32.mrb[14].mxu0 }
 0x120   :  { %v3389_v52 = vpop.f32.mrb[13].mxu1  ;;  %v3364_v53 = vpop.f32.mrb[15].mxu0 }
 0x121   :  { %v2008_v54 = vadd.f32 %v3362_v49, %v1960_v30  ;;  %v3390_v55 = vadd.f32 %v3389_v52, %v3388_v50  ;;  %v3391_v56 = vpop.f32.mrb[14].mxu1 }
 0x122   :  { %v3392_v57 = vpop.f32.mrb[15].mxu1 }
 0x123   :  { %v2056_v58 = vadd.f32 %v3390_v55, %v2008_v54 }
 0x135   :  { %v3410_v59 = vpop.f32.mrb[16].mxu0 }
 0x136   :  { %v3411_v60 = vpop.f32.mrb[17].mxu0 }
 0x137   :  { %v3412_v61 = vadd.f32 %v3411_v60, %v3410_v59  ;;  %v3413_v62 = vpop.f32.mrb[18].mxu0  ;;  %v3438_v1 = vpop.f32.mrb[16].mxu1 }
 0x138   :  { %v3414_v63 = vpop.f32.mrb[19].mxu0  ;;  %v3439_v3 = vpop.f32.mrb[17].mxu1 }
 0x139   :  { %v2096_v0 = vadd.f32 %v3412_v61, %v2048_v44  ;;  %v3415_v2 = vadd.f32 %v3414_v63, %v3413_v62  ;;  %v3440_v5 = vadd.f32 %v3439_v3, %v3438_v1  ;;  %v3441_v6 = vpop.f32.mrb[18].mxu1 }
 0x13a   :  { %v3442_v7 = vpop.f32.mrb[19].mxu1 }
 0x13b   :  { %v2099_v4 = vadd.f32 %v3415_v2, %v2051_v46  ;;  %v2144_v8 = vadd.f32 %v3440_v5, %v2096_v0  ;;  %v3443_v9 = vadd.f32 %v3442_v7, %v3441_v6 }
 0x13d   :  { %v2147_v11 = vadd.f32 %v3443_v9, %v2099_v4  ;;  %v3416_v12 = vpop.f32.mrb[20].mxu0 }
 0x13e   :  { %v3417_v13 = vpop.f32.mrb[21].mxu0 }
 0x13f   :  { %v3418_v14 = vadd.f32 %v3417_v13, %v3416_v12  ;;  %v3444_v15 = vpop.f32.mrb[20].mxu1  ;;  %v3419_v16 = vpop.f32.mrb[22].mxu0 }
 0x140   :  { %v3445_v17 = vpop.f32.mrb[21].mxu1  ;;  %v3420_v18 = vpop.f32.mrb[23].mxu0 }
 0x141   :  { %v2104_v19 = vadd.f32 %v3418_v14, %v2056_v58  ;;  %v3446_v20 = vadd.f32 %v3445_v17, %v3444_v15  ;;  %v3447_v21 = vpop.f32.mrb[22].mxu1 }
 0x142   :  { %v3448_v22 = vpop.f32.mrb[23].mxu1 }
 0x143   :  { %v2152_v23 = vadd.f32 %v3446_v20, %v2104_v19 }
 0x155   :  { %v3466_v27 = vpop.f32.mrb[24].mxu0 }
 0x156   :  { %v3467_v29 = vpop.f32.mrb[25].mxu0 }
 0x157   :  { %v3468_v30 = vadd.f32 %v3467_v29, %v3466_v27  ;;  %v3469_v31 = vpop.f32.mrb[26].mxu0  ;;  %v3494_v32 = vpop.f32.mrb[24].mxu1 }
 0x158   :  { %v3470_v33 = vpop.f32.mrb[27].mxu0  ;;  %v3495_v36 = vpop.f32.mrb[25].mxu1 }
 0x159   :  { %v2192_v34 = vadd.f32 %v3468_v30, %v2144_v8  ;;  %v3471_v35 = vadd.f32 %v3470_v33, %v3469_v31  ;;  %v3496_v38 = vadd.f32 %v3495_v36, %v3494_v32  ;;  %v3497_v39 = vpop.f32.mrb[26].mxu1 }
 0x15a   :  { %v3498_v41 = vpop.f32.mrb[27].mxu1 }
 0x15b   :  { %v2195_v40 = vadd.f32 %v3471_v35, %v2147_v11  ;;  %v2240_v42 = vadd.f32 %v3496_v38, %v2192_v34  ;;  %v3499_v43 = vadd.f32 %v3498_v41, %v3497_v39 }
 0x15d   :  { %v2243_v44 = vadd.f32 %v3499_v43, %v2195_v40  ;;  %v3472_v45 = vpop.f32.mrb[28].mxu0 }
 0x15e   :  { %v3473_v46 = vpop.f32.mrb[29].mxu0 }
 0x15f   :  { %v3474_v47 = vadd.f32 %v3473_v46, %v3472_v45  ;;  %v3475_v48 = vpop.f32.mrb[30].mxu0  ;;  %v3500_v49 = vpop.f32.mrb[28].mxu1 }
 0x160   :  { %v3476_v50 = vpop.f32.mrb[31].mxu0  ;;  %v3501_v52 = vpop.f32.mrb[29].mxu1 }
 0x161   :  { %v2200_v51 = vadd.f32 %v3474_v47, %v2152_v23  ;;  %v3502_v53 = vadd.f32 %v3501_v52, %v3500_v49  ;;  %v3503_v54 = vpop.f32.mrb[30].mxu1 }
 0x162   :  { %v3504_v55 = vpop.f32.mrb[31].mxu1 }
 0x163   :  { %v2248_v56 = vadd.f32 %v3502_v53, %v2200_v51 }
 0x175   :  { %v3522_v57 = vpop.f32.mrb[32].mxu0 }
 0x176   :  { %v3523_v58 = vpop.f32.mrb[33].mxu0 }
 0x177   :  { %v3524_v59 = vadd.f32 %v3523_v58, %v3522_v57  ;;  %v3525_v60 = vpop.f32.mrb[34].mxu0  ;;  %v3550_v61 = vpop.f32.mrb[32].mxu1 }
 0x178   :  { %v3526_v62 = vpop.f32.mrb[35].mxu0  ;;  %v3551_v1 = vpop.f32.mrb[33].mxu1 }
 0x179   :  { %v2288_v63 = vadd.f32 %v3524_v59, %v2240_v42  ;;  %v3527_v0 = vadd.f32 %v3526_v62, %v3525_v60  ;;  %v3552_v2 = vadd.f32 %v3551_v1, %v3550_v61  ;;  %v3553_v3 = vpop.f32.mrb[34].mxu1  ;;  %v4011_v59 = vld [vmem:[%s4904_s3 + $0x8] ss:$0 sps:$4 sm:$0x33]   ;;  %v4012_v60 = vld [vmem:[%s4905_s4] sm:$0xff]   ;;  %v4019_v1 = vld [vmem:[%s4906_s5 + $0x18] sm:$0xff]  }
 0x17a   :  { %v3554_v5 = vpop.f32.mrb[35].mxu1  ;;  %v4014_v61 = vld [vmem:[%s4906_s5] sm:$0xff]   ;;  %v4013_v62 = vld [vmem:[%s4905_s4 + $0x8] ss:$0 sps:$4 sm:$0x33]  }
 0x17b   :  { %v2291_v4 = vadd.f32 %v3527_v0, %v2243_v44  ;;  %v2336_v6 = vadd.f32 %v3552_v2, %v2288_v63  ;;  %v3555_v7 = vadd.f32 %v3554_v5, %v3553_v3  ;;  %v4015_v63 = vld [vmem:[%s4906_s5 + $0x8] sm:$0xff]   ;;  %v4017_v0 = vld [vmem:[%s4906_s5 + $0x10] sm:$0xff]   ;;  %v4021_v2 = vld [vmem:[%s4906_s5 + $0x20] sm:$0xff]  }
 0x17c   :  { %v4023_v3 = vld [vmem:[%s4906_s5 + $0x28] sm:$0xff]  }
 0x17d   :  { %v2339_v8 = vadd.f32 %v3555_v7, %v2291_v4  ;;  %v3528_v9 = vpop.f32.mrb[36].mxu0  ;;  %v4025_v4 = vld [vmem:[%s4906_s5 + $0x30] sm:$0xff]   ;;  %v4026_v5 = vld [vmem:[%s4907_s6 + $0x28] sm:$0xff]  }
 0x17e   :  { %v3529_v10 = vpop.f32.mrb[37].mxu0  ;;  %3700 = vmatprep.subr.bf16.mxu1 %v4026_v5  ;;  %v4028_v7 = vld [vmem:[%s4907_s6 + $0x30] sm:$0xff]  }
 0x17f   :  { %v3530_v11 = vadd.f32 %v3529_v10, %v3528_v9  ;;  %v3556_v12 = vpop.f32.mrb[36].mxu1  ;;  %v3531_v13 = vpop.f32.mrb[38].mxu0  ;;  %3701 = vmatpush3.bf16.msra.mxu1 %v4026_v5  ;;  %v4030_v9 = vld [vmem:[%s4908_s8] sm:$0xff]  }
 0x180   :  { %v3557_v14 = vpop.f32.mrb[37].mxu1  ;;  %v3532_v15 = vpop.f32.mrb[39].mxu0  ;;  %3702 = vmatprep.subr.bf16.mxu1 %v4028_v7 }
 0x181   :  { %v2296_v16 = vadd.f32 %v3530_v11, %v2248_v56  ;;  %v3558_v17 = vadd.f32 %v3557_v14, %v3556_v12  ;;  %v3559_v18 = vpop.f32.mrb[38].mxu1 }
 0x182   :  { %v3560_v19 = vpop.f32.mrb[39].mxu1 }
 0x183   :  { %v2344_v20 = vadd.f32 %v3558_v17, %v2296_v16  ;;  %3703 = vmatpush3.bf16.msra.mxu1 %v4028_v7 }
 0x195   :  { %v3578_v21 = vpop.f32.mrb[40].mxu0 }
 0x196   :  { %v3579_v22 = vpop.f32.mrb[41].mxu0 }
 0x197   :  { %v3580_v23 = vadd.f32 %v3579_v22, %v3578_v21  ;;  %v3581_v24 = vpop.f32.mrb[42].mxu0  ;;  %v3606_v27 = vpop.f32.mrb[40].mxu1  ;;  %v4031_v22 = vld [vmem:[%s4908_s8 + $0x8] sm:$0xff]  }
 0x198   :  { %v3582_v25 = vpop.f32.mrb[43].mxu0  ;;  %v3607_v29 = vpop.f32.mrb[41].mxu1 }
 0x199   :  { %v2384_v26 = vadd.f32 %v3580_v23, %v2336_v6  ;;  %v3583_v28 = vadd.f32 %v3582_v25, %v3581_v24  ;;  %v3608_v31 = vadd.f32 %v3607_v29, %v3606_v27  ;;  %v3609_v32 = vpop.f32.mrb[42].mxu1  ;;  %v4027_v6 = vld [vmem:[%s4906_s5 + $0x38] sm:$0xff]   ;;  %v4032_v23 = vld [vmem:[%s4908_s8 + $0x10] sm:$0xff]   ;;  %v4034_v25 = vld [vmem:[%s4908_s8 + $0x20] sm:$0xff]  }
 0x19a   :  { %v3610_v33 = vpop.f32.mrb[43].mxu1  ;;  %v4033_v24 = vld [vmem:[%s4908_s8 + $0x18] sm:$0xff]   ;;  %v4036_v27 = vld [vmem:[%s4908_s8 + $0x30] sm:$0xff]  }
 0x19b   :  { %v2387_v30 = vadd.f32 %v3583_v28, %v2339_v8  ;;  %v3611_v34 = vadd.f32 %v3610_v33, %v3609_v32  ;;  %v2432_v36 = vadd.f32 %v3608_v31, %v2384_v26  ;;  %v4029_v8 = vld [vmem:[%s4907_s6 + $0x38] sm:$0xff]   ;;  %v4035_v26 = vld [vmem:[%s4908_s8 + $0x28] sm:$0xff]  }
 0x19c   :  { %3704 = vmatprep.subr.bf16.mxu1 %v4029_v8  ;;  %v4037_v28 = vld [vmem:[%s4908_s8 + $0x38] sm:$0xff]  }
 0x19d   :  { %v3584_v35 = vpop.f32.mrb[44].mxu0  ;;  %v2435_v40 = vadd.f32 %v3611_v34, %v2387_v30  ;;  %3705 = vmatpush3.bf16.msra.mxu1 %v4029_v8  ;;  %v3272_v34 = vld [vmem:[%s4909_s7] ss:$0 sm:$0xff] }
 0x19e   :  { %v3585_v37 = vpop.f32.mrb[45].mxu0  ;;  %3730 = vmatprep.subr.bf16.mxu1 %v4030_v9 }
 0x19f   :  { %v3586_v38 = vadd.f32 %v3585_v37, %v3584_v35  ;;  %v3587_v39 = vpop.f32.mrb[46].mxu0  ;;  %v3612_v43 = vpop.f32.mrb[44].mxu1 }
 0x1a0   :  { %v3588_v41 = vpop.f32.mrb[47].mxu0  ;;  %v3613_v44 = vpop.f32.mrb[45].mxu1 }
 0x1a1   :  { %v2392_v42 = vadd.f32 %v3586_v38, %v2344_v20  ;;  %v3614_v45 = vadd.f32 %v3613_v44, %v3612_v43  ;;  %v3615_v46 = vpop.f32.mrb[46].mxu1 }
 0x1a2   :  { %v3616_v47 = vpop.f32.mrb[47].mxu1 }
 0x1a3   :  { %v2440_v48 = vadd.f32 %v3614_v45, %v2392_v42 }
 0x1a5   :  { %v3672_v49 = vpop.f32.mrb[48].mxu0 }
 0x1a6   :  { %v2488_v50 = vadd.f32 %v3672_v49, %v2440_v48  ;;  %v2479_v51 = vpop.f32.mrb[49].mxu0  ;;  %v3273_v49 = vld [vmem:[%s4910_s9] ss:$0 sm:$0xff] }
 0x1a7   :  { %v2480_v52 = vadd.f32 %v2479_v51, %v2432_v36  ;;  %v3673_v53 = vpop.f32.mrb[50].mxu0 }
 0x1a8   :  { %v2482_v54 = vpop.f32.mrb[51].mxu0  ;;  %v2494_v57 = vpack.c.bf16 %v2488_v50, %v2488_v50 }
 0x1a9   :  { %v2483_v55 = vadd.f32 %v2482_v54, %v2435_v40 }
 0x1aa   :  { %v2515_v58 = vsel %vm2513_vm2, %v2494_v57, 0 }
 0x1ab   :  { %v2493_v56 = vpack.c.bf16 %v2483_v55, %v2480_v52 }
 0x1ad   :  { %3674 = vmatprep.subr.bf16.mxu0 %v2493_v56 }
 0x1ae   :  { %3675 = vmatpush3.bf16.msra.mxu0 %v2493_v56 }
 0x1af   :  { %3750 = vmatprep.subr.msk.bf16.mxu0 %vm2513_vm2, %v2494_v57 }
 0x1b2   :  { %3677 = vmatpush3.bf16.msra.mxu0 %v2515_v58 }
 0x1b3   :  { %3682 = vmatprep.subr.bf16.mxu0 %v2493_v56 }
 0x1b5   :  { %3679 = vmatmul.mubr.msk.bf16.vlgmr.msra.gmra.mrb[52].mxu0 %vm2506_vm1, %v4011_v59 }
 0x1b6   :  { %3683 = vmatpush3.bf16.msra.mxu0 %v2493_v56  ;;  %3686 = vmatprep.mubr.msk.bf16.mxu0 %vm2506_vm1, %v4012_v60 }
 0x1b7   :  { %3751 = vmatprep.subr.msk.bf16.mxu0 %vm2513_vm2, %v2494_v57 }
 0x1ba   :  { %3685 = vmatpush3.bf16.msra.mxu0 %v2515_v58 }
 0x1bb   :  { %3710 = vmatprep.subr.bf16.mxu0 %v4014_v61 }
 0x1bd   :  { %3687 = vmatmul.mubr.msk.bf16.vlgmr.msra.gmra.mrb[56].mxu0 %vm2506_vm1, %v4013_v62 }
 0x1be   :  { %3711 = vmatpush3.bf16.msra.mxu0 %v4014_v61 }
 0x1bf   :  { %3712 = vmatprep.subr.bf16.mxu0 %v4015_v63 }
 0x1c2   :  { %3713 = vmatpush3.bf16.msra.mxu0 %v4015_v63 }
 0x1c3   :  { %3714 = vmatprep.subr.bf16.mxu0 %v4017_v0 }
 0x1c6   :  { %3715 = vmatpush3.bf16.msra.mxu0 %v4017_v0 }
 0x1c7   :  { %3716 = vmatprep.subr.bf16.mxu0 %v4019_v1 }
 0x1ca   :  { %3717 = vmatpush3.bf16.msra.mxu0 %v4019_v1 }
 0x1cb   :  { %3718 = vmatprep.subr.bf16.mxu0 %v4021_v2 }
 0x1ce   :  { %3719 = vmatpush3.bf16.msra.mxu0 %v4021_v2 }
 0x1cf   :  { %3720 = vmatprep.subr.bf16.mxu0 %v4023_v3 }
 0x1d2   :  { %3721 = vmatpush3.bf16.msra.mxu0 %v4023_v3 }
 0x1d3   :  { %3722 = vmatprep.subr.bf16.mxu0 %v4025_v4 }
 0x1d6   :  { %3723 = vmatpush3.bf16.msra.mxu0 %v4025_v4 }
 0x1d7   :  { %3724 = vmatprep.subr.bf16.mxu0 %v4027_v6 }
 0x1da   :  { %3725 = vmatpush3.bf16.msra.mxu0 %v4027_v6 }
 0x288   :  { %v3680_v10 = vpop.f32.mrb[52].mxu0 }
 0x289   :  { %v2551_v11 = vpop.f32.mrb[53].mxu0  ;;  %v2631_v15 = vpack.c.bf16 %v3680_v10, %v3680_v10 }
 0x28a   :  { %v3681_v12 = vpop.f32.mrb[54].mxu0 }
 0x28b   :  { %v2554_v13 = vpop.f32.mrb[55].mxu0 }
 0x28c   :  { %v2630_v14 = vpack.c.bf16 %v2554_v13, %v2551_v11 }
 0x28e   :  { %3726 = vmatprep.mubr.bf16.mxu0 %v2630_v14 }
 0x28f   :  { %3727 = vmatmul.mubr.bf16.vlgmr.msra.gmra.mrb[60].mxu0 %v2631_v15 }
 0x290   :  { %v3688_v16 = vpop.f32.mrb[56].mxu0 }
 0x291   :  { %v2616_v17 = vpop.f32.mrb[57].mxu0  ;;  %v2649_v21 = vpack.c.bf16 %v3688_v16, %v3688_v16 }
 0x292   :  { %v3689_v18 = vpop.f32.mrb[58].mxu0 }
 0x293   :  { %v2619_v19 = vpop.f32.mrb[59].mxu0 }
 0x294   :  { %v2648_v20 = vpack.c.bf16 %v2619_v19, %v2616_v17 }
 0x296   :  { %3706 = vmatprep.mubr.bf16.mxu1 %v2648_v20 }
 0x297   :  { %3707 = vmatmul.mubr.bf16.vlgmr.msra.gmra.mrb[48].mxu1 %v2649_v21 }
 0x298   :  { %3731 = vmatpush3.bf16.msra.mxu1 %v4030_v9 }
 0x299   :  { %3732 = vmatprep.subr.bf16.mxu1 %v4031_v22 }
 0x29c   :  { %3733 = vmatpush3.bf16.msra.mxu1 %v4031_v22 }
 0x29d   :  { %3734 = vmatprep.subr.bf16.mxu1 %v4032_v23 }
 0x2a0   :  { %3735 = vmatpush3.bf16.msra.mxu1 %v4032_v23 }
 0x2a1   :  { %3736 = vmatprep.subr.bf16.mxu1 %v4033_v24 }
 0x2a4   :  { %3737 = vmatpush3.bf16.msra.mxu1 %v4033_v24 }
 0x2a5   :  { %3738 = vmatprep.subr.bf16.mxu1 %v4034_v25 }
 0x2a8   :  { %3739 = vmatpush3.bf16.msra.mxu1 %v4034_v25 }
 0x2a9   :  { %3740 = vmatprep.subr.bf16.mxu1 %v4035_v26 }
 0x2ac   :  { %3741 = vmatpush3.bf16.msra.mxu1 %v4035_v26 }
 0x2ad   :  { %3742 = vmatprep.subr.bf16.mxu1 %v4036_v27 }
 0x2b0   :  { %3743 = vmatpush3.bf16.msra.mxu1 %v4036_v27 }
 0x2b1   :  { %3744 = vmatprep.subr.bf16.mxu1 %v4037_v28 }
 0x2b4   :  { %3745 = vmatpush3.bf16.msra.mxu1 %v4037_v28 }
 0x362   :  { %v3728_v29 = vpop.f32.mrb[60].mxu0 }
 0x363   :  { %v2844_v30 = vpop.f32.mrb[61].mxu0 }
 0x364   :  { %v3729_v31 = vpop.f32.mrb[62].mxu0 }
 0x365   :  { %v2847_v32 = vpop.f32.mrb[63].mxu0 }
 0x36a   :  { %v3708_v33 = vpop.f32.mrb[48].mxu1 }
 0x36b   :  { %v2853_v35 = vadd.f32 %v3728_v29, %v3708_v33  ;;  %v2748_v36 = vpop.f32.mrb[49].mxu1 }
 0x36c   :  { %v2845_v37 = vadd.f32 %v2844_v30, %v2748_v36  ;;  %v3709_v38 = vpop.f32.mrb[50].mxu1 }
 0x36d   :  { %v2867_v39 = vadd.f32 %v3272_v34, %v2853_v35  ;;  %v2751_v40 = vpop.f32.mrb[51].mxu1 }
 0x36e   :  { %v2865_v41 = vadd.f32 %v3272_v34, %v2845_v37  ;;  %v2848_v42 = vadd.f32 %v2847_v32, %v2751_v40 }
 0x36f   :  { %v2870_v44 = vmax.f32 %v2867_v39, 0.0 }
 0x370   :  { %v2866_v43 = vadd.f32 %v3272_v34, %v2848_v42  ;;  %v2868_v45 = vmax.f32 %v2865_v41, 0.0 }
 0x371   :  { %v2872_v48 = vpack.c.bf16 %v2870_v44, %v2870_v44 }
 0x372   :  { %v2869_v46 = vmax.f32 %v2866_v43, 0.0 }
 0x374   :  { %v2871_v47 = vpack.c.bf16 %v2869_v46, %v2868_v45 }
 0x376   :  { %3746 = vmatprep.mubr.bf16.mxu1 %v2871_v47 }
 0x377   :  { %3747 = vmatmul.mubr.bf16.vlgmr.msra.gmra.mrb[52].mxu1 %v2872_v48 }
 0x44a   :  { %v3748_v50 = vpop.f32.mrb[52].mxu1 }
 0x44b   :  { %v2987_v51 = vadd.f32 %v3748_v50, %v3273_v49  ;;  %v2978_v52 = vpop.f32.mrb[53].mxu1 }
 0x44c   :  { %v2979_v53 = vadd.f32 %v3273_v49, %v2978_v52  ;;  %v3749_v54 = vpop.f32.mrb[54].mxu1 }
 0x44d   :  { %2994 = vst [vmem:[%s4911_s10 + $0x10] sm:$0xf] %v2987_v51  ;;  %v2981_v55 = vpop.f32.mrb[55].mxu1 }
 0x44e   :  { %2992 = vst [vmem:[%s4911_s10] sm:$0xff] %v2979_v53  ;;  %v2982_v56 = vadd.f32 %v3273_v49, %v2981_v55 }
 0x450   :  { %2993 = vst [vmem:[%s4911_s10 + $0x8] sm:$0xff] %v2982_v56 }

</bundles_post_ra>
